<compile_context>
chip_gen: v7x
topology: tpu7x:2x2x1
jax: 0.10.0
libtpu: 0.0.40
codegen_flags: <defaults>
</compile_context>

<pallas_src>
import functools
import math

import jax
import jax.numpy as jnp
from jax import lax
from jax.experimental import pallas as pl
from jax.experimental.pallas import tpu as pltpu


# ----------------------------------------------------------------------------
# Pallas kernel: phase-decomposed transposed conv, one folded matmul per phase.
# One grid step = TB (batch*time) slabs.  Phases / taps are static Python.
# ----------------------------------------------------------------------------
def _deconv_phase_kernel(x_ref, *refs, phases, TB, Cin, Cout, Ho_m, Wo_t):
    # x_ref    : (TB, Hp, Wp, Cin)            bf16, spatially padded input slab
    # refs[:-1]: per-phase packed weights     bf16, (Cin*ntaps_p, Cout) each
    # refs[-1] : (TB, NPH*Ho_m, Wo_t, Cout)   bf16, phase-major output
    o_ref = refs[-1]
    w_refs = refs[:-1]
    M = TB * Ho_m * Wo_t
    for p, offs in enumerate(phases):                 # static unroll (sh*sw)
        if len(offs) == 0:                            # phase with no taps -> 0
            o_ref[:, p * Ho_m:(p + 1) * Ho_m, :, :] = jnp.zeros(
                (TB, Ho_m, Wo_t, Cout), o_ref.dtype)
            continue
        # gather every tap of this phase once and fold them into the matmul K
        # dimension (all windows have identical shape -> cheap minor concat).
        windows = [x_ref[:, ho:ho + Ho_m, wo:wo + Wo_t, :] for (ho, wo) in offs]
        xs = windows[0] if len(windows) == 1 else jnp.concatenate(windows,
                                                                  axis=-1)
        acc = jnp.dot(xs.reshape(M, Cin * len(offs)), w_refs[p][...],
                      preferred_element_type=jnp.float32)     # (M, Cout) f32
        o_ref[:, p * Ho_m:(p + 1) * Ho_m, :, :] = acc.reshape(
            TB, Ho_m, Wo_t, Cout).astype(o_ref.dtype)


# ----------------------------------------------------------------------------
# Per-generation tiling
# ----------------------------------------------------------------------------
def _tpu_config():
    """(physical VMEM bytes, >1 TensorCore per chip?) with safe fallbacks."""
    vmem_cap = None
    try:
        vmem_cap = int(pltpu.get_tpu_info().vmem_capacity_bytes)
    except Exception:
        vmem_cap = None
    kind = ""
    try:
        kind = jax.devices()[0].device_kind.lower()
    except Exception:
        pass
    multi_core = "v7" in kind                       # v7x: 2 TensorCores / chip
    if vmem_cap is None:
        vmem_cap = (64 << 20) if multi_core else (128 << 20)
    return vmem_cap, multi_core


def _choose_tb(B, Hp, Wp, Cin, n_phase, Ho_m, Wo_t, Cout, k_max):
    """Pick the batch*time slab tile TB and grid-step count per generation."""
    vmem_cap, multi_core = _tpu_config()
    # scoped VMEM ceiling: ~3/4 of physical (96 MiB v5e/v6e, 48 MiB v7x)
    vmem_limit = min((vmem_cap * 3) // 4, 96 << 20)

    def up(v, m):
        return -(-v // m) * m

    # per-slab VMEM footprint including (8,128) tiling padding of the last dims
    in_u = Hp * up(Wp, 8) * up(Cin, 128) * 2                     # bf16 input
    out_u = n_phase * Ho_m * up(Wo_t, 8) * up(Cout, 128) * 2     # bf16 output
    tmp_u = Ho_m * Wo_t * (3 * up(k_max, 128) * 2 + up(Cout, 128) * 4)
    per_unit = 2 * (in_u + out_u) + tmp_u                        # dbl-buffered
    budget = vmem_limit // 2                                     # Mosaic headroom
    tb = max(1, min(B, budget // max(per_unit, 1)))
    steps = pl.cdiv(B, tb)
    if multi_core:
        # both TensorCores share the "parallel" axis -> keep an even step count
        if steps < 2 and B > 1:
            tb = pl.cdiv(B, 2)
            steps = pl.cdiv(B, tb)
        if steps % 2:
            steps += 1
    return int(tb), int(steps), int(vmem_limit)


# ----------------------------------------------------------------------------
# Forward wrapper
# ----------------------------------------------------------------------------
def conv_transpose_forward(x_nchwt, weight, stride, padding, dilation, groups,
                           compute_dtype=jnp.bfloat16):
    """Semantics of F.conv_transpose3d with trivial time kernel, bias=None.

    x_nchwt : (N, Cin, H, W, T)
    weight  : (Cin, Cout//groups, KH, KW, 1)   (PyTorch ConvTranspose layout)
    returns : (N, Cout, Ho, Wo, T) float32
    """
    N, Cin, H, W, T = x_nchwt.shape
    sh, sw = stride
    ph, pw = padding
    dh, dw = dilation
    KH, KW = weight.shape[2], weight.shape[3]
    cin_g = Cin // groups
    cout_g = weight.shape[1]
    Cout = cout_g * groups

    Ho = (H - 1) * sh - 2 * ph + dh * (KH - 1) + 1
    Wo = (W - 1) * sw - 2 * pw + dw * (KW - 1) + 1
    Ho_m = pl.cdiv(Ho, sh)                      # per-phase output rows
    Wo_m = pl.cdiv(Wo, sw)                      # per-phase output cols (logical)
    Wo_t = -(-Wo_m // 8) * 8                    # sublane-aligned, cropped later
    n_phase = sh * sw

    # ---- static phase decomposition (pure Python ints) ----------------------
    # Output (oh, ow) with oh = oh'*sh + r uses tap kh iff (r+ph-kh*dh)%sh==0,
    # reading input row ih = oh' + qh with qh = (r+ph-kh*dh)//sh (same for w).
    qh = {(r, kh): (r + ph - kh * dh) // sh
          for r in range(sh) for kh in range(KH)
          if (r + ph - kh * dh) % sh == 0}
    qw = {(c, kw): (c + pw - kw * dw) // sw
          for c in range(sw) for kw in range(KW)
          if (c + pw - kw * dw) % sw == 0}

    PT = max(0, -min(qh.values()))
    PB = max(0, max(qh.values()) + Ho_m - 1 - (H - 1))
    PL = max(0, -min(qw.values()))
    PR = max(0, max(qw.values()) + Wo_t - 1 - (W - 1))
    Hp, Wp = H + PT + PB, W + PL + PR

    # ---- weights: fold groups into a block-diagonal (Cin, Cout) matrix ------
    w = weight[..., 0].astype(jnp.float32)            # (Cin, cout_g, KH, KW)
    if groups == 1:
        w_full = w
    else:
        w_full = jnp.zeros((Cin, Cout, KH, KW), w.dtype)
        for g in range(groups):
            w_full = w_full.at[g * cin_g:(g + 1) * cin_g,
                               g * cout_g:(g + 1) * cout_g].set(
                w[g * cin_g:(g + 1) * cin_g])
    w_k = jnp.transpose(w_full, (2, 3, 0, 1))          # (KH, KW, Cin, Cout)

    # per-phase tap offsets + per-phase packed (Cin*ntaps, Cout) weights
    phases = []
    phase_weights = []
    k_max = Cin
    for r in range(sh):
        for c in range(sw):
            kk = [(kh, kw) for kh in range(KH) if (r, kh) in qh
                  for kw in range(KW) if (c, kw) in qw]
            offs = tuple((qh[(r, kh)] + PT, qw[(c, kw)] + PL) for (kh, kw) in kk)
            phases.append(offs)
            if kk:
                wp = jnp.concatenate([w_k[kh, kw] for (kh, kw) in kk], axis=0)
            else:
                wp = jnp.zeros((Cin, Cout), jnp.float32)   # unused dummy
            k_max = max(k_max, int(wp.shape[0]))
            phase_weights.append(wp.astype(compute_dtype))
    phases = tuple(phases)

    # ---- input slab ----------------------------------------------------------
    B = N * T
    x = jnp.transpose(x_nchwt, (0, 4, 2, 3, 1)).reshape(B, H, W, Cin)
    x = x.astype(compute_dtype)

    TB, steps, vmem_limit = _choose_tb(B, Hp, Wp, Cin, n_phase, Ho_m, Wo_t,
                                       Cout, k_max)
    B_pad = TB * steps
    x = lax.pad(x, jnp.zeros((), compute_dtype),
                ((0, B_pad - B, 0), (PT, PB, 0), (PL, PR, 0), (0, 0, 0)))

    kernel = functools.partial(_deconv_phase_kernel, phases=phases, TB=TB,
                               Cin=Cin, Cout=Cout, Ho_m=Ho_m, Wo_t=Wo_t)
    in_specs = [pl.BlockSpec((TB, Hp, Wp, Cin), lambda b: (b, 0, 0, 0))]
    in_specs += [pl.BlockSpec(tuple(wp.shape), lambda b: (0, 0))
                 for wp in phase_weights]
    out = pl.pallas_call(
        kernel,
        out_shape=jax.ShapeDtypeStruct((B_pad, n_phase * Ho_m, Wo_t, Cout),
                                       compute_dtype),
        grid=(steps,),
        in_specs=in_specs,
        out_specs=pl.BlockSpec((TB, n_phase * Ho_m, Wo_t, Cout),
                               lambda b: (b, 0, 0, 0)),
        compiler_params=pltpu.CompilerParams(
            dimension_semantics=("parallel",),
            vmem_limit_bytes=vmem_limit),
    )(x, *phase_weights)

    # ---- re-interleave output phases (bf16 glue, upcast only at the end) ----
    out = out[:B].reshape(B, sh, sw, Ho_m, Wo_t, Cout)[:, :, :, :, :Wo_m, :]
    out = jnp.transpose(out, (0, 3, 1, 4, 2, 5)).reshape(
        B, Ho_m * sh, Wo_m * sw, Cout)[:, :Ho, :Wo, :]
    out = out.reshape(N, T, Ho, Wo, Cout)
    out = jnp.transpose(out, (0, 4, 2, 3, 1))          # (N, Cout, Ho, Wo, T)
    return out.astype(jnp.float32)


# ----------------------------------------------------------------------------
# Module-like wrapper mirroring slayer.synapse.ConvTranspose
# ----------------------------------------------------------------------------
class ConvTransposePallas:
    def __init__(self, in_features, out_features, kernel_size, stride=1,
                 padding=0, dilation=1, groups=1, weight_scale=1,
                 pre_hook_fx=None, key=None):
        def _pair(v):
            return (v, v) if isinstance(v, int) else (v[0], v[1])
        self.kernel_size = _pair(kernel_size)
        self.stride = _pair(stride)
        self.padding = _pair(padding)
        self.dilation = _pair(dilation)
        self.groups = groups
        self.in_channels = in_features
        self.out_channels = out_features
        self._pre_hook_fx = pre_hook_fx
        # TODO(synk): weight_norm reparameterization (enable_weight_norm) not implemented
        self.weight_norm_enabled = False
        self.complex = False

        kh, kw = self.kernel_size
        cout_g = out_features // groups
        # deterministic init mimicking torch's kaiming-uniform bound (a=sqrt(5))
        fan_in = cout_g * kh * kw
        bound = 1.0 / math.sqrt(fan_in)
        if key is None:
            key = jax.random.PRNGKey(0)
        w = jax.random.uniform(key, (in_features, cout_g, kh, kw, 1),
                               minval=-bound, maxval=bound, dtype=jnp.float32)
        self.weight = weight_scale * w

    @property
    def shape(self):
        return self.weight.shape

    @property
    def pre_hook_fx(self):
        return self._pre_hook_fx

    @pre_hook_fx.setter
    def pre_hook_fx(self, fx):
        self._pre_hook_fx = fx

    def forward(self, x):
        w = self.weight if self._pre_hook_fx is None else self._pre_hook_fx(self.weight)
        return conv_transpose_forward(x, w, self.stride, self.padding,
                                      self.dilation, self.groups)

    __call__ = forward


# ----------------------------------------------------------------------------
# Pure-JAX reference (lax.conv_general_dilated with lhs dilation == transposed
# conv) used only for correctness checking.
# ----------------------------------------------------------------------------
def conv_transpose_reference(x_nchwt, weight, stride, padding, dilation, groups):
    N, Cin, H, W, T = x_nchwt.shape
    sh, sw = stride
    ph, pw = padding
    dh, dw = dilation
    KH, KW = weight.shape[2], weight.shape[3]
    cout_g = weight.shape[1]
    Cout = cout_g * groups

    x2 = jnp.transpose(x_nchwt, (0, 4, 1, 2, 3)).reshape(N * T, Cin, H, W)
    w = weight[..., 0]                                  # (Cin, Cout/g, KH, KW)
    w = w.reshape(groups, Cin // groups, cout_g, KH, KW)
    w = jnp.transpose(w, (0, 2, 1, 3, 4)).reshape(Cout, Cin // groups, KH, KW)
    w = w[:, :, ::-1, ::-1]
    y = lax.conv_general_dilated(
        x2, w, window_strides=(1, 1),
        padding=[(dh * (KH - 1) - ph,) * 2, (dw * (KW - 1) - pw,) * 2],
        lhs_dilation=(sh, sw), rhs_dilation=(dh, dw),
        dimension_numbers=('NCHW', 'OIHW', 'NCHW'),
        feature_group_count=groups,
        precision=lax.Precision.HIGHEST)
    Ho, Wo = y.shape[2], y.shape[3]
    y = y.reshape(N, T, Cout, Ho, Wo)
    return jnp.transpose(y, (0, 2, 3, 4, 1))


if __name__ == "__main__":
    key = jax.random.PRNGKey(0)
    kx, kw1, kw2 = jax.random.split(key, 3)

    N, Cin, Cout, H, W, T = 2, 4, 8, 8, 8, 4
    x = jax.random.normal(kx, (N, Cin, H, W, T), dtype=jnp.float32)
    # the kernel computes on bf16 operands; compare against a reference fed the
    # identically rounded values (accumulation is f32 in both paths)
    x_bf = x.astype(jnp.bfloat16).astype(jnp.float32)

    ok = True

    # config A: classic upsampling deconv (stride 2, padding 1, groups 1)
    layer_a = ConvTransposePallas(Cin, Cout, kernel_size=3, stride=2, padding=1,
                                  dilation=1, groups=1, weight_scale=1, key=kw1)
    y_a = jax.block_until_ready(layer_a(x))
    w_a = layer_a.weight.astype(jnp.bfloat16).astype(jnp.float32)
    r_a = conv_transpose_reference(x_bf, w_a, layer_a.stride, layer_a.padding,
                                   layer_a.dilation, layer_a.groups)
    ok &= bool(jnp.allclose(y_a, r_a, atol=2e-2, rtol=2e-2))

    # config B: dilated, grouped, weight_scale != 1, with a pre_hook_fx
    layer_b = ConvTransposePallas(Cin, Cout, kernel_size=(3, 3), stride=1,
                                  padding=0, dilation=2, groups=2, weight_scale=2,
                                  pre_hook_fx=lambda w: 0.5 * w, key=kw2)
    y_b = jax.block_until_ready(layer_b(x))
    w_b = (0.5 * layer_b.weight).astype(jnp.bfloat16).astype(jnp.float32)
    r_b = conv_transpose_reference(x_bf, w_b, layer_b.stride, layer_b.padding,
                                   layer_b.dilation, layer_b.groups)
    ok &= bool(jnp.allclose(y_b, r_b, atol=2e-2, rtol=2e-2))

    if not ok:
        raise SystemExit("mismatch vs reference")
    print("KERNEL_OK")
</pallas_src>

<mosaic_0001>
module attributes {stable_mosaic.version = 11 : i64} {
  func.func @_deconv_phase_kernel(%arg0: i32, %arg1: memref<8x9x9x4xbf16, #tpu.memory_space<vmem>>, %arg2: memref<4x8xbf16, #tpu.memory_space<vmem>>, %arg3: memref<8x8xbf16, #tpu.memory_space<vmem>>, %arg4: memref<8x8xbf16, #tpu.memory_space<vmem>>, %arg5: memref<16x8xbf16, #tpu.memory_space<vmem>>, %arg6: memref<8x32x8x8xbf16, #tpu.memory_space<vmem>>) attributes {dimension_semantics = [#tpu.dimension_semantics<parallel>], iteration_bounds = array<i64: 1>, scalar_prefetch = 0 : i64, scratch_operands = 0 : i64, tpu.core_type = #tpu.core_type<tc>, window_params = [{transform_indices = @transform_0, window_bounds = array<i64: 8, 9, 9, 4>}, {pipeline_mode = #tpu.pipeline_mode<synchronous>, transform_indices = @transform_1, window_bounds = array<i64: 4, 8>}, {pipeline_mode = #tpu.pipeline_mode<synchronous>, transform_indices = @transform_2, window_bounds = array<i64: 8, 8>}, {pipeline_mode = #tpu.pipeline_mode<synchronous>, transform_indices = @transform_3, window_bounds = array<i64: 8, 8>}, {pipeline_mode = #tpu.pipeline_mode<synchronous>, transform_indices = @transform_4, window_bounds = array<i64: 16, 8>}, {transform_indices = @transform_5, window_bounds = array<i64: 8, 32, 8, 8>}]} {
    %c0 = arith.constant 0 : index
    %c0_0 = arith.constant 0 : index
    %c0_1 = arith.constant 0 : index
    %c0_2 = arith.constant 0 : index
    %0 = vector.load %arg1[%c0, %c0_0, %c0_1, %c0_2] : memref<8x9x9x4xbf16, #tpu.memory_space<vmem>>, vector<8x8x8x4xbf16>
    %1 = vector.shape_cast %0 : vector<8x8x8x4xbf16> to vector<512x4xbf16>
    %c0_3 = arith.constant 0 : index
    %c0_4 = arith.constant 0 : index
    %2 = vector.load %arg2[%c0_3, %c0_4] : memref<4x8xbf16, #tpu.memory_space<vmem>>, vector<4x8xbf16>
    %cst = arith.constant dense<0.000000e+00> : vector<512x8xf32>
    %3 = tpu.matmul %1, %2, %cst {dimension_numbers = #tpu.dot_dimension_numbers<[1], [0], [0], [1], [0, 0, 1, 1], [], []>} : vector<512x4xbf16>, vector<4x8xbf16>, vector<512x8xf32> -> vector<512x8xf32>
    %4 = vector.shape_cast %3 : vector<512x8xf32> to vector<8x8x8x8xf32>
    %5 = arith.truncf %4 : vector<8x8x8x8xf32> to vector<8x8x8x8xbf16>
    %c0_5 = arith.constant 0 : index
    %c0_6 = arith.constant 0 : index
    %c0_7 = arith.constant 0 : index
    %c0_8 = arith.constant 0 : index
    %6 = vector.load %arg6[%c0_5, %c0_6, %c0_7, %c0_8] : memref<8x32x8x8xbf16, #tpu.memory_space<vmem>>, vector<8x8x8x8xbf16>
    tpu.vector_store %arg6[%c0_5, %c0_6, %c0_7, %c0_8], %5 {strides = array<i32>} : memref<8x32x8x8xbf16, #tpu.memory_space<vmem>>, vector<8x8x8x8xbf16>,
    %c0_9 = arith.constant 0 : index
    %c0_10 = arith.constant 0 : index
    %c1 = arith.constant 1 : index
    %c0_11 = arith.constant 0 : index
    %7 = vector.load %arg1[%c0_9, %c0_10, %c1, %c0_11] : memref<8x9x9x4xbf16, #tpu.memory_space<vmem>>, vector<8x8x8x4xbf16>
    %c0_12 = arith.constant 0 : index
    %c0_13 = arith.constant 0 : index
    %c0_14 = arith.constant 0 : index
    %c0_15 = arith.constant 0 : index
    %8 = vector.load %arg1[%c0_12, %c0_13, %c0_14, %c0_15] : memref<8x9x9x4xbf16, #tpu.memory_space<vmem>>, vector<8x8x8x4xbf16>
    %9 = tpu.concatenate %7, %8 in 3 : vector<8x8x8x4xbf16>, vector<8x8x8x4xbf16> -> vector<8x8x8x8xbf16>
    %10 = vector.shape_cast %9 : vector<8x8x8x8xbf16> to vector<512x8xbf16>
    %c0_16 = arith.constant 0 : index
    %c0_17 = arith.constant 0 : index
    %11 = vector.load %arg3[%c0_16, %c0_17] : memref<8x8xbf16, #tpu.memory_space<vmem>>, vector<8x8xbf16>
    %cst_18 = arith.constant dense<0.000000e+00> : vector<512x8xf32>
    %12 = tpu.matmul %10, %11, %cst_18 {dimension_numbers = #tpu.dot_dimension_numbers<[1], [0], [0], [1], [0, 0, 1, 1], [], []>} : vector<512x8xbf16>, vector<8x8xbf16>, vector<512x8xf32> -> vector<512x8xf32>
    %13 = vector.shape_cast %12 : vector<512x8xf32> to vector<8x8x8x8xf32>
    %14 = arith.truncf %13 : vector<8x8x8x8xf32> to vector<8x8x8x8xbf16>
    %c0_19 = arith.constant 0 : index
    %c8 = arith.constant 8 : index
    %c0_20 = arith.constant 0 : index
    %c0_21 = arith.constant 0 : index
    %15 = vector.load %arg6[%c0_19, %c8, %c0_20, %c0_21] : memref<8x32x8x8xbf16, #tpu.memory_space<vmem>>, vector<8x8x8x8xbf16>
    tpu.vector_store %arg6[%c0_19, %c8, %c0_20, %c0_21], %14 {strides = array<i32>} : memref<8x32x8x8xbf16, #tpu.memory_space<vmem>>, vector<8x8x8x8xbf16>,
    %c0_22 = arith.constant 0 : index
    %c1_23 = arith.constant 1 : index
    %c0_24 = arith.constant 0 : index
    %c0_25 = arith.constant 0 : index
    %16 = vector.load %arg1[%c0_22, %c1_23, %c0_24, %c0_25] : memref<8x9x9x4xbf16, #tpu.memory_space<vmem>>, vector<8x8x8x4xbf16>
    %c0_26 = arith.constant 0 : index
    %c0_27 = arith.constant 0 : index
    %c0_28 = arith.constant 0 : index
    %c0_29 = arith.constant 0 : index
    %17 = vector.load %arg1[%c0_26, %c0_27, %c0_28, %c0_29] : memref<8x9x9x4xbf16, #tpu.memory_space<vmem>>, vector<8x8x8x4xbf16>
    %18 = tpu.concatenate %16, %17 in 3 : vector<8x8x8x4xbf16>, vector<8x8x8x4xbf16> -> vector<8x8x8x8xbf16>
    %19 = vector.shape_cast %18 : vector<8x8x8x8xbf16> to vector<512x8xbf16>
    %c0_30 = arith.constant 0 : index
    %c0_31 = arith.constant 0 : index
    %20 = vector.load %arg4[%c0_30, %c0_31] : memref<8x8xbf16, #tpu.memory_space<vmem>>, vector<8x8xbf16>
    %cst_32 = arith.constant dense<0.000000e+00> : vector<512x8xf32>
    %21 = tpu.matmul %19, %20, %cst_32 {dimension_numbers = #tpu.dot_dimension_numbers<[1], [0], [0], [1], [0, 0, 1, 1], [], []>} : vector<512x8xbf16>, vector<8x8xbf16>, vector<512x8xf32> -> vector<512x8xf32>
    %22 = vector.shape_cast %21 : vector<512x8xf32> to vector<8x8x8x8xf32>
    %23 = arith.truncf %22 : vector<8x8x8x8xf32> to vector<8x8x8x8xbf16>
    %c0_33 = arith.constant 0 : index
    %c16 = arith.constant 16 : index
    %c0_34 = arith.constant 0 : index
    %c0_35 = arith.constant 0 : index
    %24 = vector.load %arg6[%c0_33, %c16, %c0_34, %c0_35] : memref<8x32x8x8xbf16, #tpu.memory_space<vmem>>, vector<8x8x8x8xbf16>
    tpu.vector_store %arg6[%c0_33, %c16, %c0_34, %c0_35], %23 {strides = array<i32>} : memref<8x32x8x8xbf16, #tpu.memory_space<vmem>>, vector<8x8x8x8xbf16>,
    %c0_36 = arith.constant 0 : index
    %c1_37 = arith.constant 1 : index
    %c1_38 = arith.constant 1 : index
    %c0_39 = arith.constant 0 : index
    %25 = vector.load %arg1[%c0_36, %c1_37, %c1_38, %c0_39] : memref<8x9x9x4xbf16, #tpu.memory_space<vmem>>, vector<8x8x8x4xbf16>
    %c0_40 = arith.constant 0 : index
    %c1_41 = arith.constant 1 : index
    %c0_42 = arith.constant 0 : index
    %c0_43 = arith.constant 0 : index
    %26 = vector.load %arg1[%c0_40, %c1_41, %c0_42, %c0_43] : memref<8x9x9x4xbf16, #tpu.memory_space<vmem>>, vector<8x8x8x4xbf16>
    %c0_44 = arith.constant 0 : index
    %c0_45 = arith.constant 0 : index
    %c1_46 = arith.constant 1 : index
    %c0_47 = arith.constant 0 : index
    %27 = vector.load %arg1[%c0_44, %c0_45, %c1_46, %c0_47] : memref<8x9x9x4xbf16, #tpu.memory_space<vmem>>, vector<8x8x8x4xbf16>
    %c0_48 = arith.constant 0 : index
    %c0_49 = arith.constant 0 : index
    %c0_50 = arith.constant 0 : index
    %c0_51 = arith.constant 0 : index
    %28 = vector.load %arg1[%c0_48, %c0_49, %c0_50, %c0_51] : memref<8x9x9x4xbf16, #tpu.memory_space<vmem>>, vector<8x8x8x4xbf16>
    %29 = tpu.concatenate %25, %26, %27, %28 in 3 : vector<8x8x8x4xbf16>, vector<8x8x8x4xbf16>, vector<8x8x8x4xbf16>, vector<8x8x8x4xbf16> -> vector<8x8x8x16xbf16>
    %30 = vector.shape_cast %29 : vector<8x8x8x16xbf16> to vector<512x16xbf16>
    %c0_52 = arith.constant 0 : index
    %c0_53 = arith.constant 0 : index
    %31 = vector.load %arg5[%c0_52, %c0_53] : memref<16x8xbf16, #tpu.memory_space<vmem>>, vector<16x8xbf16>
    %cst_54 = arith.constant dense<0.000000e+00> : vector<512x8xf32>
    %32 = tpu.matmul %30, %31, %cst_54 {dimension_numbers = #tpu.dot_dimension_numbers<[1], [0], [0], [1], [0, 0, 1, 1], [], []>} : vector<512x16xbf16>, vector<16x8xbf16>, vector<512x8xf32> -> vector<512x8xf32>
    %33 = vector.shape_cast %32 : vector<512x8xf32> to vector<8x8x8x8xf32>
    %34 = arith.truncf %33 : vector<8x8x8x8xf32> to vector<8x8x8x8xbf16>
    %c0_55 = arith.constant 0 : index
    %c24 = arith.constant 24 : index
    %c0_56 = arith.constant 0 : index
    %c0_57 = arith.constant 0 : index
    %35 = vector.load %arg6[%c0_55, %c24, %c0_56, %c0_57] : memref<8x32x8x8xbf16, #tpu.memory_space<vmem>>, vector<8x8x8x8xbf16>
    tpu.vector_store %arg6[%c0_55, %c24, %c0_56, %c0_57], %34 {strides = array<i32>} : memref<8x32x8x8xbf16, #tpu.memory_space<vmem>>, vector<8x8x8x8xbf16>,
    return
  }
  func.func @transform_0(%arg0: i32) -> (i32, i32, i32, i32) {
    %c0_i32 = arith.constant 0 : i32
    %c0_i32_0 = arith.constant 0 : i32
    %c0_i32_1 = arith.constant 0 : i32
    %c0_i32_2 = arith.constant 0 : i32
    return %arg0, %c0_i32, %c0_i32_0, %c0_i32_1 : i32, i32, i32, i32
  }
  func.func @transform_1(%arg0: i32) -> (i32, i32) {
    %c0_i32 = arith.constant 0 : i32
    %c0_i32_0 = arith.constant 0 : i32
    %c0_i32_1 = arith.constant 0 : i32
    return %c0_i32, %c0_i32_0 : i32, i32
  }
  func.func @transform_2(%arg0: i32) -> (i32, i32) {
    %c0_i32 = arith.constant 0 : i32
    %c0_i32_0 = arith.constant 0 : i32
    %c0_i32_1 = arith.constant 0 : i32
    return %c0_i32, %c0_i32_0 : i32, i32
  }
  func.func @transform_3(%arg0: i32) -> (i32, i32) {
    %c0_i32 = arith.constant 0 : i32
    %c0_i32_0 = arith.constant 0 : i32
    %c0_i32_1 = arith.constant 0 : i32
    return %c0_i32, %c0_i32_0 : i32, i32
  }
  func.func @transform_4(%arg0: i32) -> (i32, i32) {
    %c0_i32 = arith.constant 0 : i32
    %c0_i32_0 = arith.constant 0 : i32
    %c0_i32_1 = arith.constant 0 : i32
    return %c0_i32, %c0_i32_0 : i32, i32
  }
  func.func @transform_5(%arg0: i32) -> (i32, i32, i32, i32) {
    %c0_i32 = arith.constant 0 : i32
    %c0_i32_0 = arith.constant 0 : i32
    %c0_i32_1 = arith.constant 0 : i32
    %c0_i32_2 = arith.constant 0 : i32
    return %arg0, %c0_i32, %c0_i32_0, %c0_i32_1 : i32, i32, i32, i32
  }
}

</mosaic_0001>

<bundles_post_ra>
// kernel: tpu_custom_call.1
= control target key start
LH: loop header
LB: loop body
LE: loop exit
PB: predicated region body
PF: predicated region fallthrough
CT: control target
= control target key end

     0   :  { %10 = vsyncpa [#allocation3], 0  ;;  %s16395_s0 = inlined_call_operand.hbm [shape: bf16[8,9,9,4], index: 0, kind: input, shape index: {}]   ;;  %s16396_s1 = inlined_call_operand.hbm [shape: bf16[4,8], index: 1, kind: input, shape index: {}]   ;;  %s16397_s2 = inlined_call_operand.hbm [shape: bf16[8,8], index: 2, kind: input, shape index: {}]   ;;  %s16398_s3 = inlined_call_operand.hbm [shape: bf16[8,8], index: 3, kind: input, shape index: {}]   ;;  %s16399_s4 = inlined_call_operand.hbm [shape: bf16[16,8], index: 4, kind: input, shape index: {}]   ;;  %s16400_s5 = inlined_call_operand.hbm [shape: bf16[8,32,8,8], index: 5, kind: output, shape index: {}]  }
   0x1   :  { %11 = vsyncpa [#allocation6], 0 }
   0x2   :  { %12 = vsyncpa [#allocation9], 0 }
   0x3   :  { %13 = vsyncpa [#allocation4], 0  ;;  %s11904_s18 = smov [#allocation5]   ;;  %s11905_s20 = smov [#allocation8]  }
   0x4   :  { %s32_s19 = sshll.u32 %s11904_s18, 4  ;;  %s52_s21 = sshll.u32 %s11905_s20, 4  ;;  %s33_s19 = int_to_ptr.vmem [resolvable:$true] %s32_s19  ;;  %s53_s21 = int_to_ptr.vmem [resolvable:$true] %s52_s21 }
   0x5   :  { %s11764_s24 = scalar_lea.hbm %s16396_s1, 32 }
   0x6   :  { %p11765_p0 = scmp.ne.s32.totalorder %s16396_s1, %s11764_s24  ;;  %p11768_p1 = scmp.lt.u32.totalorder %s11764_s24, %s16396_s1 }
   0x8   :  { %p11770_p2 = pnand %p11768_p1, %p11765_p0 }
   0xa   :  { %11773 = shalt.err (!%p11770_p2)
}
   0xb   :  { %s11774_s29 = scalar_lea.vmem %s33_s19, 32  ;;  %p11779_p4 = scmp.lt.s32.totalorder %s33_s19, %s33_s19 }
   0xc   :  { %p11775_p3 = scmp.ne.s32.totalorder %s33_s19, %s11774_s29  ;;  %p11780_p5 = scmp.lt.s32.totalorder %s11774_s29, %s11774_s29 }
   0xe   :  { %p11781_p6 = por %p11780_p5, %p11779_p4 }
  0x10   :  { %p11782_p7 = pnand %p11781_p6, %p11775_p3 }
  0x12   :  { %11785 = shalt.err (!%p11782_p7)
}
  0x13   :  { %35 = dma.hbm_to_vmem [thread:$0]  %s16396_s1, 32, %s33_s19, [#allocation6]  }
  0x14   :  { %s11786_s9 = scalar_lea.hbm %s16398_s3, 64 }
  0x15   :  { %p11787_p8 = scmp.ne.s32.totalorder %s16398_s3, %s11786_s9  ;;  %p11790_p9 = scmp.lt.u32.totalorder %s11786_s9, %s16398_s3 }
  0x17   :  { %p11792_p10 = pnand %p11790_p9, %p11787_p8 }
  0x19   :  { %11795 = shalt.err (!%p11792_p10)
}
  0x1a   :  { %s11796_s14 = scalar_lea.vmem %s53_s21, 64  ;;  %p11801_p12 = scmp.lt.s32.totalorder %s53_s21, %s53_s21 }
  0x1b   :  { %p11797_p11 = scmp.ne.s32.totalorder %s53_s21, %s11796_s14  ;;  %p11802_p13 = scmp.lt.s32.totalorder %s11796_s14, %s11796_s14 }
  0x1d   :  { %p11803_p0 = por %p11802_p13, %p11801_p12 }
  0x1f   :  { %p11804_p1 = pnand %p11803_p0, %p11797_p11 }
  0x21   :  { %11807 = shalt.err (!%p11804_p1)
}
  0x22   :  { %55 = dma.hbm_to_vmem [thread:$0]  %s16398_s3, 64, %s53_s21, [#allocation9]  }
  0x23   :  { %s11906_s16 = smov [#allocation2]   ;;  %s11808_s20 = scalar_lea.hbm %s16395_s0, 9216 }
  0x24   :  { %s19_s17 = sshll.u32 %s11906_s16, 4  ;;  %p11809_p2 = scmp.ne.s32.totalorder %s16395_s0, %s11808_s20  ;;  %s20_s17 = int_to_ptr.vmem [resolvable:$true] %s19_s17 }
  0x25   :  { %p11812_p3 = scmp.lt.u32.totalorder %s11808_s20, %s16395_s0 }
  0x27   :  { %p11814_p4 = pnand %p11812_p3, %p11809_p2 }
  0x29   :  { %11817 = shalt.err (!%p11814_p4)
}
  0x2a   :  { %s11818_s26 = scalar_lea.vmem %s20_s17, 9216  ;;  %p11823_p6 = scmp.lt.s32.totalorder %s20_s17, %s20_s17 }
  0x2b   :  { %p11819_p5 = scmp.ne.s32.totalorder %s20_s17, %s11818_s26  ;;  %p11824_p7 = scmp.lt.s32.totalorder %s11818_s26, %s11818_s26 }
  0x2d   :  { %p11825_p8 = por %p11824_p7, %p11823_p6 }
  0x2f   :  { %p11826_p9 = pnand %p11825_p8, %p11819_p5 }
  0x31   :  { %11829 = shalt.err (!%p11826_p9)
}
  0x32   :  { %s11907_s3 = smov 64   ;;  %s11908_s21 = smov 4  }
  0x33   :  { %25 = dma.hbm_to_vmem [thread:$0]  %s16395_s0, 9216, %s20_s17, [#allocation3], %s11907_s3, %s11907_s3, %s11908_s21  }
  0x34   :  { %s11909_s29 = smov [#allocation7]   ;;  %s11910_s6 = smov [#allocation10]  }
  0x35   :  { %s42_s30 = sshll.u32 %s11909_s29, 4  ;;  %s61_s7 = sshll.u32 %s11910_s6, 4  ;;  %s43_s30 = int_to_ptr.vmem [resolvable:$true] %s42_s30  ;;  %s62_s7 = int_to_ptr.vmem [resolvable:$true] %s61_s7 }
  0x36   :  { %s11830_s10 = scalar_lea.hbm %s16397_s2, 64 }
  0x37   :  { %p11831_p10 = scmp.ne.s32.totalorder %s16397_s2, %s11830_s10  ;;  %p11834_p11 = scmp.lt.u32.totalorder %s11830_s10, %s16397_s2 }
  0x39   :  { %p11836_p12 = pnand %p11834_p11, %p11831_p10 }
  0x3b   :  { %11839 = shalt.err (!%p11836_p12)
}
  0x3c   :  { %s11840_s0 = scalar_lea.vmem %s43_s30, 64  ;;  %p11845_p0 = scmp.lt.s32.totalorder %s43_s30, %s43_s30 }
  0x3d   :  { %p11841_p13 = scmp.ne.s32.totalorder %s43_s30, %s11840_s0  ;;  %p11846_p1 = scmp.lt.s32.totalorder %s11840_s0, %s11840_s0 }
  0x3f   :  { %p11847_p2 = por %p11846_p1, %p11845_p0 }
  0x41   :  { %p11848_p3 = pnand %p11847_p2, %p11841_p13 }
  0x43   :  { %11851 = shalt.err (!%p11848_p3)
}
  0x44   :  { %45 = dma.hbm_to_vmem [thread:$0]  %s16397_s2, 64, %s43_s30, [#allocation6]  }
  0x45   :  { %s11852_s18 = scalar_lea.hbm %s16399_s4, 128 }
  0x46   :  { %p11853_p4 = scmp.ne.s32.totalorder %s16399_s4, %s11852_s18  ;;  %p11856_p5 = scmp.lt.u32.totalorder %s11852_s18, %s16399_s4 }
  0x48   :  { %p11858_p6 = pnand %p11856_p5, %p11853_p4 }
  0x4a   :  { %11861 = shalt.err (!%p11858_p6)
}
  0x4b   :  { %s11862_s24 = scalar_lea.vmem %s62_s7, 128  ;;  %p11867_p8 = scmp.lt.s32.totalorder %s62_s7, %s62_s7 }
  0x4c   :  { %p11863_p7 = scmp.ne.s32.totalorder %s62_s7, %s11862_s24  ;;  %p11868_p9 = scmp.lt.s32.totalorder %s11862_s24, %s11862_s24 }
  0x4e   :  { %p11869_p10 = por %p11868_p9, %p11867_p8 }
  0x50   :  { %p11870_p11 = pnand %p11869_p10, %p11863_p7 }
  0x52   :  { %11873 = shalt.err (!%p11870_p11)
}
  0x53   :  { %67 = dma.hbm_to_vmem [thread:$0]  %s16399_s4, 128, %s62_s7, [#allocation9], %s11907_s3, %s11907_s3, %s11908_s21  }
  0x54   :  { %11896 = dma.done.wait [#allocation3], 9216  }
  0x55   :  { %11897 = vsyncadd [#allocation3], 4294958080 }
  0x56   :  { %11898 = dma.done.wait [#allocation6], 96  }
  0x57   :  { %11899 = vsyncadd [#allocation6], 4294967200 }
  0x58   :  { %11900 = dma.done.wait [#allocation9], 192  }
  0x59   :  { %11901 = vsyncadd [#allocation9], 4294967104  ;;  %v832_v0 = vld [vmem:[#allocation2 + $0x10] sm:$0xf]  ;;  %v828_v1 = vld [vmem:[#allocation2] sm:$0xf] }
  0x5a   :  { %v9999_v2 = vcombine.low %v832_v0, %v832_v0  ;;  %v9997_v3 = vcombine.low %v828_v1, %v828_v1  ;;  %v834_v4 = vld [vmem:[#allocation2 + $0x18] sm:$0xf]  ;;  %v830_v5 = vld [vmem:[#allocation2 + $0x8] sm:$0xf]  ;;  %v836_v9 = vld [vmem:[#allocation2 + $0x20] sm:$0xf] }
  0x5b   :  { %v10000_v6 = vcombine.low %v834_v4, %v834_v4  ;;  %v9998_v7 = vcombine.low %v830_v5, %v830_v5  ;;  %v838_v8 = vld [vmem:[#allocation2 + $0x28] sm:$0xf]  ;;  %v842_v10 = vld [vmem:[#allocation2 + $0x38] sm:$0xf]  ;;  %v840_v15 = vld [vmem:[#allocation2 + $0x30] sm:$0xf]  ;;  %v10001_v23 = vcombine.low %v836_v9, %v836_v9 }
  0x5c   :  { %v1355_v11 = vshrl.u32 %v9999_v2, 16  ;;  %v1358_v12 = vshll.u32 %v9999_v2, 16  ;;  %v1341_v13 = vshrl.u32 %v9997_v3, 16  ;;  %v1344_v14 = vshll.u32 %v9997_v3, 16  ;;  %v846_v31 = vld [vmem:[#allocation2 + $0x50] sm:$0xf] }
  0x5d   :  { %v1362_v16 = vshrl.u32 %v10000_v6, 16  ;;  %v1365_v17 = vshll.u32 %v10000_v6, 16  ;;  %v1348_v18 = vshrl.u32 %v9998_v7, 16  ;;  %v1351_v19 = vshll.u32 %v9998_v7, 16  ;;  %v844_v32 = vld [vmem:[#allocation2 + $0x48] sm:$0xf] }
  0x5e   :  { %v1357_v20 = vrot.slane %v1355_v11, 7  ;;  %v1343_v21 = vrot.slane %v1341_v13, 7  ;;  %v10002_v22 = vcombine.low %v838_v8, %v838_v8  ;;  %v10004_v26 = vcombine.low %v842_v10, %v842_v10  ;;  %v850_v37 = vld [vmem:[#allocation2 + $0x60] sm:$0xf]  ;;  %v848_v46 = vld [vmem:[#allocation2 + $0x58] sm:$0xf] }
  0x5f   :  { %v1364_v24 = vrot.slane %v1362_v16, 7  ;;  %v1350_v25 = vrot.slane %v1348_v18, 7  ;;  %v10003_v27 = vcombine.low %v840_v15, %v840_v15  ;;  %v1369_v36 = vshrl.u32 %v10001_v23, 16  ;;  %v854_v55 = vld [vmem:[#allocation2 + $0x70] sm:$0xf]  ;;  %s11911_s4 = smov 8  }
  0x60   :  { %v1360_v28 = vor.u32 %v1358_v12, %v1357_v20  ;;  %v1346_v29 = vor.u32 %v1344_v14, %v1343_v21  ;;  %v1376_v30 = vshrl.u32 %v10002_v22, 16  ;;  %v1379_v35 = vshll.u32 %v10002_v22, 16  ;;  %v852_v57 = vld [vmem:[#allocation2 + $0x68] sm:$0xf]  ;;  %v858_v4 = vld [vmem:[#allocation2 + $0x80] sm:$0xf] }
  0x61   :  { %v1367_v33 = vor.u32 %v1365_v17, %v1364_v24  ;;  %v1353_v34 = vor.u32 %v1351_v19, %v1350_v25  ;;  %v1372_v39 = vshll.u32 %v10001_v23, 16  ;;  %v1390_v40 = vshrl.u32 %v10004_v26, 16  ;;  %v856_v5 = vld [vmem:[#allocation2 + $0x78] sm:$0xf]  ;;  %v860_v17 = vld [vmem:[#allocation2 + $0x90] sm:$0xf] }
  0x62   :  { %1792 = vrot.lane.b32.xlu1 %v1360_v28, %s11908_s21  ;;  %1788 = vrot.lane.b32.xlu0 %v1346_v29, %s11908_s21  ;;  %v1378_v38 = vrot.slane %v1376_v30, 7  ;;  %v1383_v41 = vshrl.u32 %v10003_v27, 16  ;;  %v1371_v42 = vrot.slane %v1369_v36, 7  ;;  %v10006_v43 = vcombine.low %v846_v31, %v846_v31  ;;  %v862_v12 = vld [vmem:[#allocation2 + $0x98] sm:$0xf]  ;;  %s11912_s26 = smov 12  }
  0x63   :  { %v10005_v44 = vcombine.low %v844_v32, %v844_v32  ;;  %v10008_v45 = vcombine.low %v850_v37, %v850_v37  ;;  %v1393_v47 = vshll.u32 %v10004_v26, 16  ;;  %v1386_v48 = vshll.u32 %v10003_v27, 16  ;;  %v866_v24 = vld [vmem:[#allocation2 + $0xa8] sm:$0xf]  ;;  %v864_v29 = vld [vmem:[#allocation2 + $0xa0] sm:$0xf] }
  0x64   :  { %v1404_v49 = vshrl.u32 %v10006_v43, 16  ;;  %v1381_v51 = vor.u32 %v1379_v35, %v1378_v38  ;;  %v1374_v52 = vor.u32 %v1372_v39, %v1371_v42  ;;  %v1392_v53 = vrot.slane %v1390_v40, 7  ;;  %v12022_v40 = vld [vmem:[#allocation2 + $0xb8] sm:$0xf]  ;;  %s11913_s27 = smov [#allocation11]  }
  0x65   :  { %v1397_v50 = vshrl.u32 %v10005_v44, 16  ;;  %v1385_v54 = vrot.slane %v1383_v41, 7  ;;  %v10007_v56 = vcombine.low %v848_v46, %v848_v46  ;;  %v1407_v58 = vshll.u32 %v10006_v43, 16  ;;  %v12024_v41 = vld [vmem:[#allocation2 + $0xb0] sm:$0xf]  ;;  %s9855_s28 = sshll.u32 %s11913_s27, 4  ;;  %s9856_s28 = int_to_ptr.vmem [resolvable:$true] %s9855_s28 }
  0x66   :  { %1794 = vrot.lane.b32.xlu1 %v1367_v33, %s11908_s21  ;;  %1790 = vrot.lane.b32.xlu0 %v1353_v34, %s11908_s21  ;;  %v1418_v59 = vshrl.u32 %v10008_v45, 16  ;;  %v1406_v60 = vrot.slane %v1404_v49, 7  ;;  %v1400_v62 = vshll.u32 %v10005_v44, 16  ;;  %v10010_v63 = vcombine.low %v854_v55, %v854_v55  ;;  %s11874_s29 = scalar_lea.vmem %s9856_s28, 16384  ;;  %p11879_p13 = scmp.lt.s32.totalorder %s9856_s28, %s9856_s28 }
  0x67   :  { %v1399_v61 = vrot.slane %v1397_v50, 7  ;;  %v1395_v0 = vor.u32 %v1393_v47, %v1392_v53  ;;  %v1388_v1 = vor.u32 %v1386_v48, %v1385_v54  ;;  %v1411_v2 = vshrl.u32 %v10007_v56, 16  ;;  %v12034_v53 = vld [vmem:[#allocation2 + $0xc0] sm:$0xf]  ;;  %p11875_p12 = scmp.ne.s32.totalorder %s9856_s28, %s11874_s29  ;;  %p11880_p0 = scmp.lt.s32.totalorder %s11874_s29, %s11874_s29 }
  0x68   :  { %v10009_v3 = vcombine.low %v852_v57, %v852_v57  ;;  %v1420_v6 = vrot.slane %v1418_v59, 7  ;;  %v1421_v7 = vshll.u32 %v10008_v45, 16  ;;  %v1409_v8 = vor.u32 %v1407_v58, %v1406_v60  ;;  %v12038_v60 = vld [vmem:[#allocation2 + $0xe0] sm:$0xf] }
  0x69   :  { %v1402_v9 = vor.u32 %v1400_v62, %v1399_v61  ;;  %v1432_v10 = vshrl.u32 %v10010_v63, 16  ;;  %v10012_v11 = vcombine.low %v858_v4, %v858_v4  ;;  %v1413_v13 = vrot.slane %v1411_v2, 7  ;;  %v12046_v4 = vld [vmem:[#allocation2 + $0xf0] sm:$0xf]  ;;  %p11881_p1 = por %p11880_p0, %p11879_p13 }
  0x6a   :  { %1798 = vrot.lane.b32.xlu1 %v1381_v51, %s11908_s21  ;;  %1796 = vrot.lane.b32.xlu0 %v1374_v52, %s11908_s21  ;;  %v1414_v14 = vshll.u32 %v10007_v56, 16  ;;  %v1425_v15 = vshrl.u32 %v10009_v3, 16  ;;  %v10011_v16 = vcombine.low %v856_v5, %v856_v5  ;;  %v1423_v18 = vor.u32 %v1421_v7, %v1420_v6  ;;  %v12032_v52 = vld [vmem:[#allocation2 + $0xc8] sm:$0xf] }
  0x6b   :  { %v1435_v19 = vshll.u32 %v10010_v63, 16  ;;  %v1434_v20 = vrot.slane %v1432_v10, 7  ;;  %v1446_v21 = vshrl.u32 %v10012_v11, 16  ;;  %v10014_v22 = vcombine.low %v862_v12, %v862_v12  ;;  %p11882_p2 = pnand %p11881_p1, %p11875_p12 }
  0x6c   :  { %v10013_v23 = vcombine.low %v860_v17, %v860_v17  ;;  %v1416_v25 = vor.u32 %v1414_v14, %v1413_v13  ;;  %v1427_v26 = vrot.slane %v1425_v15, 7  ;;  %v1428_v27 = vshll.u32 %v10009_v3, 16  ;;  %v12054_v14 = vld [vmem:[#allocation2 + $0xe8] sm:$0xf] }
  0x6d   :  { %v1439_v28 = vshrl.u32 %v10011_v16, 16  ;;  %v1449_v30 = vshll.u32 %v10012_v11, 16  ;;  %v10016_v31 = vcombine.low %v866_v24, %v866_v24  ;;  %v1437_v32 = vor.u32 %v1435_v19, %v1434_v20 }
  0x6e   :  { %1802 = vrot.lane.b32.xlu1 %v1395_v0, %s11908_s21  ;;  %1800 = vrot.lane.b32.xlu0 %v1388_v1, %s11908_s21  ;;  %v1448_v33 = vrot.slane %v1446_v21, 7  ;;  %v1460_v34 = vshrl.u32 %v10014_v22, 16  ;;  %v1453_v35 = vshrl.u32 %v10013_v23, 16  ;;  %v1430_v36 = vor.u32 %v1428_v27, %v1427_v26  ;;  %v12044_v1 = vld [vmem:[#allocation2 + $0xd8] sm:$0xf] }
  0x6f   :  { %v1441_v37 = vrot.slane %v1439_v28, 7  ;;  %v1442_v38 = vshll.u32 %v10011_v16, 16  ;;  %v10015_v39 = vcombine.low %v864_v29, %v864_v29  ;;  %v1463_v42 = vshll.u32 %v10014_v22, 16  ;;  %v12065_v26 = vld [vmem:[#allocation2 + $0xf8] sm:$0xf] }
  0x70   :  { %v1474_v43 = vshrl.u32 %v10016_v31, 16  ;;  %v1462_v44 = vrot.slane %v1460_v34, 7  ;;  %v1455_v45 = vrot.slane %v1453_v35, 7  ;;  %v1456_v46 = vshll.u32 %v10013_v23, 16  ;;  %16502 = vst [vmem:[#allocation16_spill] sm:$0xff] %v12065_v26 }
  0x71   :  { %v10018_v47 = vcombine.low %v12022_v40, %v12022_v40  ;;  %v1451_v48 = vor.u32 %v1449_v30, %v1448_v33  ;;  %v1444_v49 = vor.u32 %v1442_v38, %v1441_v37  ;;  %v1467_v50 = vshrl.u32 %v10015_v39, 16  ;;  %v12067_v29 = vld [vmem:[#allocation2 + $0x110] sm:$0xf]  ;;  %v12075_v38 = vld [vmem:[#allocation2 + $0x108] sm:$0xf] }
  0x72   :  { %1806 = vrot.lane.b32.xlu1 %v1409_v8, %s11908_s21  ;;  %1804 = vrot.lane.b32.xlu0 %v1402_v9, %s11908_s21  ;;  %v10017_v51 = vcombine.low %v12024_v41, %v12024_v41  ;;  %v1476_v54 = vrot.slane %v1474_v43, 7  ;;  %v1477_v55 = vshll.u32 %v10016_v31, 16  ;;  %v1465_v56 = vor.u32 %v1463_v42, %v1462_v44  ;;  %v11305_v9 = vld [vmem:[#allocation2] ss:$8 sps:$4 sm:$0xff]   ;;  %16503 = vst [vmem:[#allocation17_spill] sm:$0xff] %v12067_v29 }
  0x73   :  { %v1458_v57 = vor.u32 %v1456_v46, %v1455_v45  ;;  %v1488_v58 = vshrl.u32 %v10018_v47, 16  ;;  %v10020_v59 = vcombine.low %v12032_v52, %v12032_v52  ;;  %v1469_v61 = vrot.slane %v1467_v50, 7  ;;  %16504 = vst [vmem:[#allocation18_spill] sm:$0xff] %v12075_v38 }
  0x74   :  { %v1470_v62 = vshll.u32 %v10015_v39, 16  ;;  %v1481_v63 = vshrl.u32 %v10017_v51, 16  ;;  %v10019_v0 = vcombine.low %v12034_v53, %v12034_v53  ;;  %v1479_v2 = vor.u32 %v1477_v55, %v1476_v54  ;;  %v12085_v54 = vld [vmem:[#allocation2 + $0x120] sm:$0xf] }
  0x75   :  { %v1491_v3 = vshll.u32 %v10018_v47, 16  ;;  %vm309_vm0 = vcmask 31744   ;;  %v1490_v5 = vrot.slane %v1488_v58, 7  ;;  %v1502_v6 = vshrl.u32 %v10020_v59, 16  ;;  %v12079_v47 = vld [vmem:[#allocation2 + $0x128] sm:$0xf] }
  0x76   :  { %1810 = vrot.lane.b32.xlu1 %v1423_v18, %s11908_s21  ;;  %1808 = vrot.lane.b32.xlu0 %v1416_v25, %s11908_s21  ;;  %v10022_v7 = vcombine.low %v12038_v60, %v12038_v60  ;;  %v10021_v8 = vcombine.low %v12044_v1, %v12044_v1  ;;  %v1472_v10 = vor.u32 %v1470_v62, %v1469_v61  ;;  %v1483_v11 = vrot.slane %v1481_v63, 7  ;;  %v12063_v25 = vld [vmem:[#allocation2 + $0x100] sm:$0xf] }
  0x77   :  { %v1484_v12 = vshll.u32 %v10017_v51, 16  ;;  %v1495_v13 = vshrl.u32 %v10019_v0, 16  ;;  %10964 = vmatprep.mubr.msk.bf16.mxu0 %vm309_vm0, %v11305_v9  ;;  %v1505_v15 = vshll.u32 %v10020_v59, 16  ;;  %v10024_v16 = vcombine.low %v12046_v4, %v12046_v4  ;;  %16505 = vst [vmem:[#allocation19_spill] sm:$0xff] %v12079_v47  ;;  %16506 = vst [vmem:[#allocation20_spill] sm:$0xff] %v12085_v54 }
  0x78   :  { %v1493_v17 = vor.u32 %v1491_v3, %v1490_v5  ;;  %v1504_v18 = vrot.slane %v1502_v6, 7  ;;  %v1516_v19 = vshrl.u32 %v10022_v7, 16  ;;  %v1509_v20 = vshrl.u32 %v10021_v8, 16  ;;  %v12093_v3 = vld [vmem:[#allocation2 + $0x138] sm:$0xf] }
  0x79   :  { %v1486_v21 = vor.u32 %v1484_v12, %v1483_v11  ;;  %v1497_v22 = vrot.slane %v1495_v13, 7  ;;  %v1498_v23 = vshll.u32 %v10019_v0, 16  ;;  %v10023_v24 = vcombine.low %v12054_v14, %v12054_v14  ;;  %16507 = vst [vmem:[#allocation21_spill] sm:$0xff] %v12093_v3  ;;  %v12095_v5 = vld [vmem:[#allocation2 + $0x130] sm:$0xf] }
  0x7a   :  { %1814 = vrot.lane.b32.xlu1 %v1437_v32, %s11908_s21  ;;  %1812 = vrot.lane.b32.xlu0 %v1430_v36, %s11908_s21  ;;  %v1519_v27 = vshll.u32 %v10022_v7, 16  ;;  %v1530_v28 = vshrl.u32 %v10024_v16, 16  ;;  %v1518_v30 = vrot.slane %v1516_v19, 7  ;;  %v1511_v31 = vrot.slane %v1509_v20, 7  ;;  %16508 = vst [vmem:[#allocation22_spill] sm:$0xff] %v12095_v5 }
  0x7b   :  { %v1512_v32 = vshll.u32 %v10021_v8, 16  ;;  %v10026_v33 = vcombine.low %v12063_v25, %v12063_v25  ;;  %v1507_v34 = vor.u32 %v1505_v15, %v1504_v18  ;;  %v1500_v35 = vor.u32 %v1498_v23, %v1497_v22  ;;  %v12097_v8 = vld [vmem:[#allocation2 + $0x148] sm:$0xf]  ;;  %v12101_v13 = vld [vmem:[#allocation2 + $0x140] sm:$0xf] }
  0x7c   :  { %v1523_v36 = vshrl.u32 %v10023_v24, 16  ;;  %v10025_v37 = vcombine.low %v12065_v26, %v12065_v26  ;;  %v1532_v39 = vrot.slane %v1530_v28, 7  ;;  %v1533_v42 = vshll.u32 %v10024_v16, 16  ;;  %16509 = vst [vmem:[#allocation23_spill] sm:$0xff] %v12097_v8  ;;  %16510 = vst [vmem:[#allocation24_spill] sm:$0xff] %v12101_v13 }
  0x7d   :  { %v10028_v43 = vcombine.low %v12067_v29, %v12067_v29  ;;  %v1521_v44 = vor.u32 %v1519_v27, %v1518_v30  ;;  %v1514_v45 = vor.u32 %v1512_v32, %v1511_v31  ;;  %v1544_v46 = vshrl.u32 %v10026_v33, 16  ;;  %v12111_v27 = vld [vmem:[#allocation2 + $0x158] sm:$0xf] }
  0x7e   :  { %1818 = vrot.lane.b32.xlu1 %v1451_v48, %s11908_s21  ;;  %1816 = vrot.lane.b32.xlu0 %v1444_v49, %s11908_s21  ;;  %v1525_v48 = vrot.slane %v1523_v36, 7  ;;  %v1526_v49 = vshll.u32 %v10023_v24, 16  ;;  %v1537_v50 = vshrl.u32 %v10025_v37, 16  ;;  %v10027_v51 = vcombine.low %v12075_v38, %v12075_v38  ;;  %16511 = vst [vmem:[#allocation25_spill] sm:$0xff] %v12111_v27 }
  0x7f   :  { %v1535_v55 = vor.u32 %v1533_v42, %v1532_v39  ;;  %v1547_v58 = vshll.u32 %v10026_v33, 16  ;;  %v1540_v59 = vshll.u32 %v10025_v37, 16  ;;  %v10030_v61 = vcombine.low %v12079_v47, %v12079_v47  ;;  %v12115_v33 = vld [vmem:[#allocation2 + $0x150] sm:$0xf] }
  0x80   :  { %v1528_v62 = vor.u32 %v1526_v49, %v1525_v48  ;;  %v1539_v63 = vrot.slane %v1537_v50, 7  ;;  %v1551_v0 = vshrl.u32 %v10027_v51, 16  ;;  %v1561_v7 = vshll.u32 %v10028_v43, 16  ;;  %16512 = vst [vmem:[#allocation26_spill] sm:$0xff] %v12115_v33  ;;  %v12123_v48 = vld [vmem:[#allocation2 + $0x170] sm:$0xf] }
  0x81   :  { %v1572_v11 = vshrl.u32 %v10030_v61, 16  ;;  %v10032_v12 = vcombine.low %v12093_v3, %v12093_v3  ;;  %v10031_v18 = vcombine.low %v12095_v5, %v12095_v5  ;;  %v1575_v20 = vshll.u32 %v10030_v61, 16  ;;  %16513 = vst [vmem:[#allocation27_spill] sm:$0xff] %v12123_v48  ;;  %v12125_v49 = vld [vmem:[#allocation2 + $0x168] sm:$0xf] }
  0x82   :  { %1822 = vrot.lane.b32.xlu1 %v1465_v56, %s11908_s21  ;;  %1820 = vrot.lane.b32.xlu0 %v1458_v57, %s11908_s21  ;;  %v1558_v56 = vshrl.u32 %v10028_v43, 16  ;;  %v1546_v57 = vrot.slane %v1544_v46, 7  ;;  %v1542_v15 = vor.u32 %v1540_v59, %v1539_v63  ;;  %v1553_v16 = vrot.slane %v1551_v0, 7  ;;  %16514 = vst [vmem:[#allocation28_spill] sm:$0xff] %v12125_v49 }
  0x83   :  { %v1586_v22 = vshrl.u32 %v10032_v12, 16  ;;  %v10034_v23 = vcombine.low %v12097_v8, %v12097_v8  ;;  %v10033_v24 = vcombine.low %v12101_v13, %v12101_v13  ;;  %v1579_v32 = vshrl.u32 %v10031_v18, 16 }
  0x84   :  { %v1560_v6 = vrot.slane %v1558_v56, 7  ;;  %v1549_v9 = vor.u32 %v1547_v58, %v1546_v57  ;;  %v10035_v46 = vcombine.low %v12115_v33, %v12115_v33  ;;  %v12131_v59 = vcombine.low %v12123_v48, %v12123_v48 }
  0x85   :  { %v1588_v37 = vrot.slane %v1586_v22, 7  ;;  %v1600_v39 = vshrl.u32 %v10034_v23, 16  ;;  %v1593_v42 = vshrl.u32 %v10033_v24, 16  ;;  %v1603_v50 = vshll.u32 %v10034_v23, 16  ;;  %v922_v23 = vld [vmem:[#allocation2 + $0x1a0] sm:$0xf] }
  0x86   :  { %1826 = vrot.lane.b32.xlu1 %v1479_v2, %s11908_s21  ;;  %1824 = vrot.lane.b32.xlu0 %v1472_v10, %s11908_s21  ;;  %v10029_v2 = vcombine.low %v12085_v54, %v12085_v54  ;;  %v1554_v10 = vshll.u32 %v10027_v51, 16  ;;  %v1563_v19 = vor.u32 %v1561_v7, %v1560_v6  ;;  %v1596_v58 = vshll.u32 %v10033_v24, 16  ;;  %v912_v6 = vld [vmem:[#allocation2 + $0x178] sm:$0xf] }
  0x87   :  { %v1602_v56 = vrot.slane %v1600_v39, 7  ;;  %v1595_v57 = vrot.slane %v1593_v42, 7  ;;  %v1607_v63 = vshrl.u32 %v10035_v46, 16  ;;  %v10037_v0 = vcombine.low %v12125_v49, %v12125_v49  ;;  %v11308_v24 = vld [vmem:[#allocation2 + $0x10] ss:$8 sps:$4 sm:$0xff]  }
  0x88   :  { %v1556_v28 = vor.u32 %v1554_v10, %v1553_v16  ;;  %v1568_v31 = vshll.u32 %v10029_v2, 16  ;;  %vm406_vm1 = vcmask 1041408   ;;  %v1610_v16 = vshll.u32 %v10035_v46, 16  ;;  %v3327_v39 = vld [vmem:[#allocation7] sm:$0xf] }
  0x89   :  { %v920_v46 = vld [vmem:[#allocation2 + $0x198] sm:$0xf]  ;;  %vm3521_vm2 = vcmask 1043456   ;;  %vm2428_vm3 = vsmask.f32 3328  ;;  %vm3424_vm6 = vcmask 64512  }
  0x8a   :  { %1830 = vrot.lane.b32.xlu1 %v1493_v17, %s11908_s21  ;;  %1828 = vrot.lane.b32.xlu0 %v1486_v21, %s11908_s21  ;;  %v1565_v17 = vshrl.u32 %v10029_v2, 16  ;;  %v1574_v21 = vrot.slane %v1572_v11, 7  ;;  %v148_v2 = vld [vmem:[#allocation5] sm:$0x3]  ;;  %v918_v11 = vld [vmem:[#allocation2 + $0x190] sm:$0xf] }
  0x8b   :  { %11226 = vmatprep.subr.msk.bf16.mxu0 %vm406_vm1, %v148_v2  ;;  %v408_v22 = vsel %vm406_vm1, %v148_v2, 0  ;;  %11227 = vmatprep.subr.msk.bf16.mxu1 %vm3521_vm2, %v3327_v39  ;;  %vm2429_vm4 = vsmask.f32 7440  ;;  %vm763_vm7 = vcmask 60416   ;;  %vm7886_vm8 = vcmask 97280  }
  0x8c   :  { %v1567_v30 = vrot.slane %v1565_v17, 7  ;;  %v1577_v36 = vor.u32 %v1575_v20, %v1574_v21  ;;  %v1628_v17 = vshrl.u32 %v12131_v59, 16  ;;  %v1621_v20 = vshrl.u32 %v10037_v0, 16  ;;  %10963 = vmatpush3.bf16.msra.mxu0 %v408_v22  ;;  %vm12524_vm5 = vmor %vm2428_vm3, %vm2429_vm4 }
  0x8d   :  { %v10039_v21 = vcombine.low %v912_v6, %v912_v6  ;;  %vm9335_vm9 = vcmask 130048  }
  0x8e   :  { %1834 = vrot.lane.b32.xlu1 %v1507_v34, %s11908_s21  ;;  %1832 = vrot.lane.b32.xlu0 %v1500_v35, %s11908_s21  ;;  %v1589_v34 = vshll.u32 %v10032_v12, 16  ;;  %v10036_v35 = vcombine.low %v12111_v27, %v12111_v27  ;;  %v1570_v43 = vor.u32 %v1568_v31, %v1567_v30  ;;  %v1605_v12 = vor.u32 %v1603_v50, %v1602_v56 }
  0x8f   :  { %v1631_v30 = vshll.u32 %v12131_v59, 16  ;;  %10965 = vmatmul.mubr.msk.bf16.vlgmr.msra.gmra.mrb[0].mxu0 %vm309_vm0, %v11308_v24  ;;  %v1638_v59 = vshll.u32 %v10039_v21, 16 }
  0x90   :  { %v1614_v51 = vshrl.u32 %v10036_v35, 16  ;;  %v1591_v61 = vor.u32 %v1589_v34, %v1588_v37  ;;  %v1630_v34 = vrot.slane %v1628_v17, 7 }
  0x92   :  { %1838 = vrot.lane.b32.xlu1 %v1521_v44, %s11908_s21  ;;  %1836 = vrot.lane.b32.xlu0 %v1514_v45, %s11908_s21  ;;  %v1581_v44 = vrot.slane %v1579_v32, 7  ;;  %v1582_v45 = vshll.u32 %v10031_v18, 16  ;;  %v1616_v7 = vrot.slane %v1614_v51, 7  ;;  %v916_v18 = vld [vmem:[#allocation2 + $0x188] sm:$0xf]  ;;  %v1633_v2 = vor.u32 %v1631_v30, %v1630_v34 }
  0x93   :  { %v11315_v32 = vld [vmem:[#allocation2 + $0x20] ss:$8 sps:$4 sm:$0xff]   ;;  %v12145_v37 = vcombine.low %v916_v18, %v916_v18  ;;  %v926_v51 = vld [vmem:[#allocation2 + $0x1b8] sm:$0xf] }
  0x94   :  { %10968 = vmatprep.mubr.msk.bf16.mxu0 %vm309_vm0, %v11315_v32 }
  0x95   :  { %v1652_v18 = vshll.u32 %v12145_v37, 16 }
  0x96   :  { %1842 = vrot.lane.b32.xlu1 %v1535_v55, %s11908_s21  ;;  %1840 = vrot.lane.b32.xlu0 %v1528_v62, %s11908_s21  ;;  %v12127_v55 = vld [vmem:[#allocation2 + $0x180] sm:$0xf]  ;;  %v1584_v62 = vor.u32 %v1582_v45, %v1581_v44  ;;  %v1635_v44 = vshrl.u32 %v10039_v21, 16  ;;  %v12149_v45 = vcombine.low %v922_v23, %v922_v23  ;;  %v11325_v21 = vld [vmem:[#allocation2 + $0x48] ss:$8 sps:$4 sm:$0xff]  }
  0x97   :  { %16515 = vst [vmem:[#allocation29_spill] sm:$0xff] %v12127_v55  ;;  %v10040_v10 = vcombine.low %v12127_v55, %v12127_v55  ;;  %v12279_v55 = vld [vmem:[#allocation2 + $0x64] sm:$0x1] }
  0x98   :  { %v1673_v23 = vshll.u32 %v12149_v45, 16  ;;  %16523 = vst [vmem:[#allocation37_spill] sm:$0xff] %v12279_v55  ;;  %v11365_v55 = vld [vmem:[#allocation2 + $0xd8] ss:$8 sps:$4 sm:$0xff]  }
  0x99   :  { %v1642_v31 = vshrl.u32 %v10040_v10, 16  ;;  %v1645_v50 = vshll.u32 %v10040_v10, 16  ;;  %v928_v10 = vld [vmem:[#allocation2 + $0x1c0] sm:$0xf] }
  0x9a   :  { %1846 = vrot.lane.b32.xlu1 %v1549_v9, %s11908_s21  ;;  %1844 = vrot.lane.b32.xlu0 %v1542_v15, %s11908_s21  ;;  %v1617_v9 = vshll.u32 %v10036_v35, 16  ;;  %v1598_v15 = vor.u32 %v1596_v58, %v1595_v57  ;;  %v1624_v35 = vshll.u32 %v10037_v0, 16  ;;  %v924_v57 = vld [vmem:[#allocation2 + $0x1b0] sm:$0xf]  ;;  %v3523_v58 = vsel %vm3521_vm2, %v3327_v39, 0 }
  0x9b   :  { %v1644_v56 = vrot.slane %v1642_v31, 7  ;;  %v930_v0 = vld [vmem:[#allocation2 + $0x1c8] sm:$0xf]  ;;  %11029 = vmatpush3.bf16.msra.mxu1 %v3523_v58  ;;  %v946_v58 = vld [vmem:[#allocation2 + $0x210] sm:$0xf] }
  0x9c   :  { %v12172_v34 = vcombine.low %v930_v0, %v930_v0  ;;  %v11328_v0 = vld [vmem:[#allocation2 + $0x58] ss:$8 sps:$4 sm:$0xff]  }
  0x9e   :  { %1850 = vrot.lane.b32.xlu1 %v1563_v19, %s11908_s21  ;;  %1848 = vrot.lane.b32.xlu0 %v1556_v28, %s11908_s21  ;;  %v1609_v19 = vrot.slane %v1607_v63, 7  ;;  %v1619_v28 = vor.u32 %v1617_v9, %v1616_v7  ;;  %v12157_v63 = vcombine.low %v920_v46, %v920_v46  ;;  %v1637_v7 = vrot.slane %v1635_v44, 7 }
  0x9f   :  { %v1670_v9 = vshrl.u32 %v12149_v45, 16  ;;  %v942_v45 = vld [vmem:[#allocation2 + $0x200] sm:$0xf] }
  0xa0   :  { %v1612_v42 = vor.u32 %v1610_v16, %v1609_v19  ;;  %v1647_v16 = vor.u32 %v1645_v50, %v1644_v56  ;;  %v12164_v19 = vcombine.low %v926_v51, %v926_v51  ;;  %v1663_v24 = vshrl.u32 %v12157_v63, 16 }
  0xa1   :  { %v1640_v30 = vor.u32 %v1638_v59, %v1637_v7  ;;  %v1672_v32 = vrot.slane %v1670_v9, 7 }
  0xa2   :  { %1854 = vrot.lane.b32.xlu1 %v1577_v36, %s11908_s21  ;;  %1852 = vrot.lane.b32.xlu0 %v1570_v43, %s11908_s21  ;;  %v12143_v36 = vcombine.low %v918_v11, %v918_v11  ;;  %v1623_v43 = vrot.slane %v1621_v20, 7  ;;  %v934_v11 = vld [vmem:[#allocation2 + $0x1d8] sm:$0xf]  ;;  %v938_v20 = vld [vmem:[#allocation2 + $0x1e8] sm:$0xf]  ;;  %v1687_v44 = vshll.u32 %v12164_v19, 16 }
  0xa3   :  { %v1665_v46 = vrot.slane %v1663_v24, 7  ;;  %v12187_v56 = vcombine.low %v938_v20, %v938_v20  ;;  %v950_v24 = vld [vmem:[#allocation2 + $0x220] sm:$0xf] }
  0xa4   :  { %v1626_v6 = vor.u32 %v1624_v35, %v1623_v43  ;;  %v1659_v17 = vshll.u32 %v12143_v36, 16  ;;  %v1666_v35 = vshll.u32 %v12157_v63, 16  ;;  %v1684_v43 = vshrl.u32 %v12164_v19, 16 }
  0xa5   :  { %v1701_v63 = vshll.u32 %v12172_v34, 16 }
  0xa6   :  { %1858 = vrot.lane.b32.xlu1 %v1591_v61, %s11908_s21  ;;  %1856 = vrot.lane.b32.xlu0 %v1584_v62, %s11908_s21  ;;  %v1656_v61 = vshrl.u32 %v12143_v36, 16  ;;  %v1649_v62 = vshrl.u32 %v12145_v37, 16  ;;  %v12175_v36 = vcombine.low %v928_v10, %v928_v10  ;;  %v12177_v37 = vcombine.low %v934_v11, %v934_v11  ;;  %v944_v11 = vld [vmem:[#allocation2 + $0x208] sm:$0xf] }
  0xa7   :  { %v1675_v10 = vor.u32 %v1673_v23, %v1672_v32  ;;  %v1668_v19 = vor.u32 %v1666_v35, %v1665_v46  ;;  %v948_v23 = vld [vmem:[#allocation2 + $0x218] sm:$0xf]  ;;  %v952_v46 = vld [vmem:[#allocation2 + $0x228] sm:$0xf] }
  0xa8   :  { %v1658_v22 = vrot.slane %v1656_v61, 7  ;;  %v1651_v31 = vrot.slane %v1649_v62, 7  ;;  %v1698_v62 = vshrl.u32 %v12172_v34, 16 }
  0xaa   :  { %1862 = vrot.lane.b32.xlu1 %v1605_v12, %s11908_s21  ;;  %1860 = vrot.lane.b32.xlu0 %v1598_v15, %s11908_s21  ;;  %v932_v12 = vld [vmem:[#allocation2 + $0x1d0] sm:$0xf]  ;;  %v1661_v59 = vor.u32 %v1659_v17, %v1658_v22  ;;  %v1654_v61 = vor.u32 %v1652_v18, %v1651_v31  ;;  %v1726_v17 = vshrl.u32 %v12187_v56, 16  ;;  %v12199_v18 = vcombine.low %v942_v45, %v942_v45 }
  0xab   :  { %v11318_v15 = vld [vmem:[#allocation2 + $0x30] ss:$8 sps:$4 sm:$0xff]   ;;  %v12179_v39 = vcombine.low %v932_v12, %v932_v12  ;;  %v1700_v20 = vrot.slane %v1698_v62, 7  ;;  %v12205_v22 = vcombine.low %v946_v58, %v946_v58  ;;  %v1715_v31 = vshll.u32 %v12177_v37, 16 }
  0xac   :  { %10969 = vmatmul.mubr.msk.bf16.gmra.mrb[4].mxu0 %vm309_vm0, %v11318_v15  ;;  %v11335_v12 = vld [vmem:[#allocation2 + $0x68] ss:$8 sps:$4 sm:$0xff]   ;;  %v1686_v15 = vrot.slane %v1684_v43, 7  ;;  %v1729_v43 = vshll.u32 %v12187_v56, 16  ;;  %v1743_v62 = vshll.u32 %v12199_v18, 16 }
  0xad   :  { %10972 = vmatprep.mubr.msk.bf16.mxu0 %vm309_vm0, %v11325_v21  ;;  %v1705_v7 = vshrl.u32 %v12179_v39, 16  ;;  %v1708_v35 = vshll.u32 %v12179_v39, 16  ;;  %v954_v45 = vld [vmem:[#allocation2 + $0x230] sm:$0xf]  ;;  %v1754_v56 = vshrl.u32 %v12205_v22, 16 }
  0xae   :  { %1866 = vrot.lane.b32.xlu1 %v1619_v28, %s11908_s21  ;;  %1864 = vrot.lane.b32.xlu0 %v1612_v42, %s11908_s21  ;;  %v12168_v28 = vcombine.low %v924_v57, %v924_v57  ;;  %v936_v42 = vld [vmem:[#allocation2 + $0x1e0] sm:$0xf]  ;;  %v940_v57 = vld [vmem:[#allocation2 + $0x1f8] sm:$0xf]  ;;  %v1689_v58 = vor.u32 %v1687_v44, %v1686_v15  ;;  %v12233_v15 = vld [vmem:[#allocation2 + $0x14] sm:$0x1] }
  0xaf   :  { %v12196_v9 = vcombine.low %v936_v42, %v936_v42  ;;  %v12203_v21 = vcombine.low %v940_v57, %v940_v57  ;;  %v1707_v42 = vrot.slane %v1705_v7, 7  ;;  %v1703_v7 = vor.u32 %v1701_v63, %v1700_v20  ;;  %v12240_v20 = vld [vmem:[#allocation2 + $0x1c] sm:$0x1] }
  0xb0   :  { %v1677_v50 = vshrl.u32 %v12168_v28, 16  ;;  %v1680_v51 = vshll.u32 %v12168_v28, 16  ;;  %v1757_v63 = vshll.u32 %v12205_v22, 16 }
  0xb1   :  { %v1719_v32 = vshrl.u32 %v12196_v9, 16  ;;  %v1722_v57 = vshll.u32 %v12196_v9, 16  ;;  %v1733_v39 = vshrl.u32 %v12203_v21, 16 }
  0xb2   :  { %1870 = vrot.lane.b32.xlu1 %v1633_v2, %s11908_s21  ;;  %1868 = vrot.lane.b32.xlu0 %v1626_v6, %s11908_s21  ;;  %v1691_v2 = vshrl.u32 %v12175_v36, 16  ;;  %v1712_v6 = vshrl.u32 %v12177_v37, 16  ;;  %v12216_v37 = vcombine.low %v944_v11, %v944_v11  ;;  %v11345_v11 = vld [vmem:[#allocation2 + $0x90] ss:$8 sps:$4 sm:$0xff]  }
  0xb4   :  { %v1693_v28 = vrot.slane %v1691_v2, 7  ;;  %10973 = vmatmul.mubr.msk.bf16.gmra.mrb[8].mxu0 %vm309_vm0, %v11328_v0  ;;  %v1714_v34 = vrot.slane %v1712_v6, 7  ;;  %v12223_v0 = vcombine.low %v950_v24, %v950_v24  ;;  %v12225_v2 = vcombine.low %v948_v23, %v948_v23  ;;  %v11338_v6 = vld [vmem:[#allocation2 + $0x78] ss:$8 sps:$4 sm:$0xff]  }
  0xb5   :  { %10976 = vmatprep.mubr.msk.bf16.mxu0 %vm309_vm0, %v11335_v12  ;;  %v1747_v44 = vshrl.u32 %v12216_v37, 16  ;;  %v12231_v12 = vcombine.low %v952_v46, %v952_v46  ;;  %v1710_v46 = vor.u32 %v1708_v35, %v1707_v42  ;;  %v12267_v42 = vld [vmem:[#allocation2] sm:$0xf]  ;;  %v12283_v35 = vld [vmem:[#allocation2 + $0x5c] sm:$0x1] }
  0xb6   :  { %1874 = vrot.lane.b32.xlu1 %v1647_v16, %s11908_s21  ;;  %1872 = vrot.lane.b32.xlu0 %v1640_v30, %s11908_s21  ;;  %v1679_v16 = vrot.slane %v1677_v50, 7  ;;  %v1694_v30 = vshll.u32 %v12175_v36, 16  ;;  %v1728_v50 = vrot.slane %v1726_v17, 7  ;;  %v1740_v36 = vshrl.u32 %v12199_v18, 16  ;;  %16524 = vst [vmem:[#allocation38_spill] sm:$0xff] %v12283_v35 }
  0xb7   :  { %v1735_v17 = vrot.slane %v1733_v39, 7  ;;  %v1756_v18 = vrot.slane %v1754_v56, 7  ;;  %v1761_v24 = vshrl.u32 %v12225_v2, 16  ;;  %v1749_v23 = vrot.slane %v1747_v44, 7  ;;  %v12257_v39 = vld [vmem:[#allocation2 + $0x24] sm:$0x1] }
  0xb8   :  { %v1696_v9 = vor.u32 %v1694_v30, %v1693_v28  ;;  %v1750_v28 = vshll.u32 %v12216_v37, 16  ;;  %v12247_v30 = vld [vmem:[#allocation2 + $0xc] sm:$0x1]  ;;  %v1775_v22 = vshrl.u32 %v12231_v12, 16  ;;  %16518 = vst [vmem:[#allocation32_spill] sm:$0xff] %v12257_v39  ;;  %v1778_v27 = vshll.u32 %v12231_v12, 16 }
  0xb9   :  { %16516 = vst [vmem:[#allocation30_spill] sm:$0xff] %v12247_v30  ;;  %v12259_v37 = vld [vmem:[#allocation2 + $0x10] sm:$0xf]  ;;  %v12271_v44 = vld [vmem:[#allocation2 + $0x18] sm:$0xf] }
  0xba   :  { %1878 = vrot.lane.b32.xlu1 %v1661_v59, %s11908_s21  ;;  %1876 = vrot.lane.b32.xlu0 %v1654_v61, %s11908_s21  ;;  %v1682_v59 = vor.u32 %v1680_v51, %v1679_v16  ;;  %v1721_v61 = vrot.slane %v1719_v32, 7  ;;  %v12229_v51 = vcombine.low %v954_v45, %v954_v45  ;;  %v1742_v16 = vrot.slane %v1740_v36, 7  ;;  %v12299_v12 = vld [vmem:[#allocation2 + $0x84] sm:$0x1]  ;;  %v12303_v56 = vld [vmem:[#allocation2 + $0x9c] sm:$0x1] }
  0xbb   :  { %v1717_v45 = vor.u32 %v1715_v31, %v1714_v34  ;;  %v1771_v36 = vshll.u32 %v12223_v0, 16  ;;  %v11348_v31 = vld [vmem:[#allocation2 + $0xa0] ss:$8 sps:$4 sm:$0xff]   ;;  %v11355_v34 = vld [vmem:[#allocation2 + $0xb0] ss:$8 sps:$4 sm:$0xff]   ;;  %v1777_v33 = vrot.slane %v1775_v22, 7 }
  0xbc   :  { %10977 = vmatmul.mubr.msk.bf16.gmra.mrb[12].mxu0 %vm309_vm0, %v11338_v6  ;;  %v1782_v32 = vshrl.u32 %v12229_v51, 16  ;;  %v1785_v48 = vshll.u32 %v12229_v51, 16  ;;  %16528 = vst [vmem:[#allocation42_spill] sm:$0xff] %v12299_v12  ;;  %v12301_v22 = vld [vmem:[#allocation2 + $0x7c] sm:$0x1]  ;;  %16530 = vst [vmem:[#allocation44_spill] sm:$0xff] %v12303_v56 }
  0xbd   :  { %10980 = vmatprep.mubr.msk.bf16.mxu0 %vm309_vm0, %v11345_v11  ;;  %v1763_v11 = vrot.slane %v1761_v24, 7  ;;  %v12277_v24 = vld [vmem:[#allocation2 + $0x4c] sm:$0x1]  ;;  %16529 = vst [vmem:[#allocation43_spill] sm:$0xff] %v12301_v22  ;;  %v12317_v51 = vld [vmem:[#allocation2 + $0x94] sm:$0x1] }
  0xbe   :  { %1882 = vrot.lane.b32.xlu1 %v1675_v10, %s11908_s21  ;;  %1880 = vrot.lane.b32.xlu0 %v1668_v19, %s11908_s21  ;;  %v1736_v10 = vshll.u32 %v12203_v21, 16  ;;  %v12238_v19 = vld [vmem:[#allocation2 + $0x4] sm:$0x1]  ;;  %v1768_v21 = vshrl.u32 %v12223_v0, 16  ;;  %v1731_v0 = vor.u32 %v1729_v43, %v1728_v50  ;;  %16522 = vst [vmem:[#allocation36_spill] sm:$0xff] %v12277_v24  ;;  %v1784_v49 = vrot.slane %v1782_v32, 7 }
  0xbf   :  { %v12285_v43 = vld [vmem:[#allocation2 + $0x74] sm:$0x1]  ;;  %v12289_v50 = vor.u32 %v1743_v62, %v1742_v16  ;;  %v12297_v32 = vld [vmem:[#allocation2 + $0x6c] sm:$0x1]  ;;  %v12309_v62 = vld [vmem:[#allocation2 + $0x28] sm:$0xf] }
  0xc0   :  { %v1770_v6 = vrot.slane %v1768_v21, 7  ;;  %v12275_v21 = vld [vmem:[#allocation2 + $0x54] sm:$0x1]  ;;  %16525 = vst [vmem:[#allocation39_spill] sm:$0xff] %v12285_v43  ;;  %16527 = vst [vmem:[#allocation41_spill] sm:$0xff] %v12297_v32 }
  0xc1   :  { %16521 = vst [vmem:[#allocation35_spill] sm:$0xff] %v12275_v21  ;;  %16531 = vst [vmem:[#allocation45_spill] sm:$0xff] %v12309_v62  ;;  %v12313_v16 = vld [vmem:[#allocation2 + $0x20] sm:$0xf]  ;;  %v12319_v30 = vld [vmem:[#allocation2 + $0xac] sm:$0x1] }
  0xc2   :  { %1886 = vrot.lane.b32.xlu1 %v1689_v58, %s11908_s21  ;;  %1884 = vrot.lane.b32.xlu0 %v1682_v59, %s11908_s21  ;;  %v1764_v58 = vshll.u32 %v12225_v2, 16  ;;  %v12255_v59 = vld [vmem:[#allocation2 + $0x2c] sm:$0x1]  ;;  %v1724_v2 = vor.u32 %v1722_v57, %v1721_v61  ;;  %v12291_v57 = vor.u32 %v1736_v10, %v1735_v17  ;;  %v12293_v61 = vld [vmem:[#allocation2 + $0x8] sm:$0xf]  ;;  %16532 = vst [vmem:[#allocation46_spill] sm:$0xff] %v12313_v16 }
  0xc3   :  { %16517 = vst [vmem:[#allocation31_spill] sm:$0xff] %v12255_v59  ;;  %16526 = vst [vmem:[#allocation40_spill] sm:$0xff] %v12293_v61  ;;  %v12321_v61 = vld [vmem:[#allocation2 + $0xa4] sm:$0x1]  ;;  %v12334_v17 = vld [vmem:[#allocation2 + $0x30] sm:$0xf] }
  0xc4   :  { %16533 = vst [vmem:[#allocation47_spill] sm:$0xff] %v12319_v30  ;;  %10981 = vmatmul.mubr.msk.bf16.gmra.mrb[16].mxu0 %vm309_vm0, %v11348_v31  ;;  %16534 = vst [vmem:[#allocation48_spill] sm:$0xff] %v12334_v17  ;;  %v12338_v16 = vld [vmem:[#allocation2 + $0xb4] sm:$0x1]  ;;  %v12340_v59 = vld [vmem:[#allocation2 + $0xcc] sm:$0x1] }
  0xc5   :  { %v12342_v62 = vld [vmem:[#allocation2 + $0xc4] sm:$0x1]  ;;  %10984 = vmatprep.mubr.msk.bf16.mxu0 %vm309_vm0, %v11355_v34  ;;  %v12353_v31 = vld [vmem:[#allocation2 + $0x48] sm:$0xf]  ;;  %v12357_v10 = vld [vmem:[#allocation2 + $0x60] sm:$0xf] }
  0xc6   :  { %1890 = vrot.lane.b32.xlu1 %v1703_v7, %s11908_s21  ;;  %1888 = vrot.lane.b32.xlu0 %v1696_v9, %s11908_s21  ;;  %v12263_v7 = vld [vmem:[#allocation2 + $0x3c] sm:$0x1]  ;;  %v12265_v9 = vld [vmem:[#allocation2 + $0x34] sm:$0x1]  ;;  %16536 = vst [vmem:[#allocation50_spill] sm:$0xff] %v12353_v31  ;;  %16537 = vst [vmem:[#allocation51_spill] sm:$0xff] %v12357_v10 }
  0xc7   :  { %16519 = vst [vmem:[#allocation33_spill] sm:$0xff] %v12263_v7  ;;  %16520 = vst [vmem:[#allocation34_spill] sm:$0xff] %v12265_v9  ;;  %v12361_v34 = vld [vmem:[#allocation2 + $0xdc] sm:$0x1]  ;;  %v11358_v17 = vld [vmem:[#allocation2 + $0xc0] ss:$8 sps:$4 sm:$0xff]  }
  0xc8   :  { %v12371_v21 = vld [vmem:[#allocation2 + $0x58] sm:$0xf]  ;;  %v12375_v24 = vld [vmem:[#allocation2 + $0x70] sm:$0xf]  ;;  %v12379_v10 = vld [vmem:[#allocation2 + $0x104] sm:$0x1] }
  0xc9   :  { %16539 = vst [vmem:[#allocation53_spill] sm:$0xff] %v12371_v21  ;;  %16540 = vst [vmem:[#allocation54_spill] sm:$0xff] %v12375_v24  ;;  %v12381_v31 = vld [vmem:[#allocation2 + $0xfc] sm:$0x1]  ;;  %v12391_v39 = vld [vmem:[#allocation2 + $0x80] sm:$0xf] }
  0xca   :  { %1894 = vrot.lane.b32.xlu1 %v1717_v45, %s11908_s21  ;;  %1892 = vrot.lane.b32.xlu0 %v1710_v46, %s11908_s21  ;;  %v12305_v45 = vor.u32 %v1757_v63, %v1756_v18  ;;  %v12307_v46 = vor.u32 %v1750_v28, %v1749_v23  ;;  %v12323_v18 = vld [vmem:[#allocation2 + $0xbc] sm:$0x1]  ;;  %v12326_v63 = vor.u32 %v1771_v36, %v1770_v6  ;;  %v12330_v28 = vld [vmem:[#allocation2 + $0x38] sm:$0xf]  ;;  %v12345_v36 = vld [vmem:[#allocation2 + $0xe4] sm:$0x1] }
  0xcb   :  { %v12328_v23 = vor.u32 %v1764_v58, %v1763_v11  ;;  %v12347_v58 = vor.u32 %v1785_v48, %v1784_v49  ;;  %v12349_v6 = vld [vmem:[#allocation2 + $0x50] sm:$0xf]  ;;  %v12363_v48 = vld [vmem:[#allocation2 + $0xf4] sm:$0x1]  ;;  %v12365_v49 = vld [vmem:[#allocation2 + $0xec] sm:$0x1]  ;;  %v12369_v11 = vor.u32 %v1778_v27, %v1777_v33 }
  0xcc   :  { %16535 = vst [vmem:[#allocation49_spill] sm:$0xff] %v12349_v6  ;;  %16538 = vst [vmem:[#allocation52_spill] sm:$0xff] %v12365_v49  ;;  %v12387_v27 = vld [vmem:[#allocation2 + $0x68] sm:$0xf]  ;;  %v12395_v9 = vld [vmem:[#allocation2 + $0x78] sm:$0xf]  ;;  %10985 = vmatmul.mubr.msk.bf16.gmra.mrb[20].mxu0 %vm309_vm0, %v11358_v17 }
  0xcd   :  { %16541 = vst [vmem:[#allocation55_spill] sm:$0xff] %v12379_v10  ;;  %16542 = vst [vmem:[#allocation56_spill] sm:$0xff] %v12381_v31  ;;  %v12399_v24 = vld [vmem:[#allocation2 + $0x98] sm:$0xf]  ;;  %v12403_v6 = vld [vmem:[#allocation2 + $0x12c] sm:$0x1]  ;;  %10988 = vmatprep.mubr.msk.bf16.mxu0 %vm309_vm0, %v11365_v55  ;;  %v16560_v55 = vcombine.low %v12267_v42, %v12238_v19 }
  0xce   :  { %1898 = vrot.lane.b32.xlu1 %v1731_v0, %s11908_s21  ;;  %1896 = vrot.lane.b32.xlu0 %v1724_v2, %s11908_s21  ;;  %v12383_v0 = vld [vmem:[#allocation2 + $0x114] sm:$0x1]  ;;  %v12385_v2 = vld [vmem:[#allocation2 + $0x10c] sm:$0x1]  ;;  %16545 = vst [vmem:[#allocation59_spill] sm:$0xff] %v12387_v27  ;;  %16546 = vst [vmem:[#allocation60_spill] sm:$0xff] %v12395_v9 }
  0xcf   :  { %16543 = vst [vmem:[#allocation57_spill] sm:$0xff] %v12383_v0  ;;  %16544 = vst [vmem:[#allocation58_spill] sm:$0xff] %v12385_v2  ;;  %v12405_v7 = vld [vmem:[#allocation2 + $0x124] sm:$0x1]  ;;  %v12407_v33 = vld [vmem:[#allocation2 + $0x13c] sm:$0x1]  ;;  %v16559_v2 = vcombine.low %v12259_v37, %v12233_v15 }
  0xd0   :  { %16547 = vst [vmem:[#allocation61_spill] sm:$0xff] %v12399_v24  ;;  %16548 = vst [vmem:[#allocation62_spill] sm:$0xff] %v12403_v6  ;;  %v12409_v32 = vld [vmem:[#allocation2 + $0x134] sm:$0x1]  ;;  %v12411_v27 = vld [vmem:[#allocation2 + $0x90] sm:$0xf] }
  0xd1   :  { %16549 = vst [vmem:[#allocation63_spill] sm:$0xff] %v12405_v7  ;;  %16550 = vst [vmem:[#allocation64_spill] sm:$0xff] %v12407_v33  ;;  %v12415_v12 = vld [vmem:[#allocation2 + $0xa8] sm:$0xf]  ;;  %v12419_v22 = vld [vmem:[#allocation2 + $0xa0] sm:$0xf] }
  0xd2   :  { %16551 = vst [vmem:[#allocation65_spill] sm:$0xff] %v12409_v32  ;;  %16552 = vst [vmem:[#allocation66_spill] sm:$0xff] %v12415_v12  ;;  %v12433_v30 = vld [vmem:[#allocation2 + $0x14c] sm:$0x1]  ;;  %v12435_v12 = vld [vmem:[#allocation2 + $0x144] sm:$0x1]  ;;  %1902 = vrot.lane.b32.xlu1 %v12289_v50, %s11908_s21  ;;  %1900 = vrot.lane.b32.xlu0 %v12291_v57, %s11908_s21 }
  0xd3   :  { %16553 = vst [vmem:[#allocation67_spill] sm:$0xff] %v12433_v30  ;;  %16554 = vst [vmem:[#allocation68_spill] sm:$0xff] %v12435_v12  ;;  %v12447_v24 = vld [vmem:[#allocation2 + $0x15c] sm:$0x1]  ;;  %v12458_v35 = vld [vmem:[#allocation2 + $0x154] sm:$0x1] }
  0xd4   :  { %16555 = vst [vmem:[#allocation69_spill] sm:$0xff] %v12447_v24  ;;  %16556 = vst [vmem:[#allocation70_spill] sm:$0xff] %v12458_v35  ;;  %v12460_v21 = vld [vmem:[#allocation2 + $0x174] sm:$0x1]  ;;  %v12462_v43 = vld [vmem:[#allocation2 + $0x16c] sm:$0x1]  ;;  %v1793_v49 = vpop.permute.xlu1 %1792  ;;  %v1789_v17 = vpop.permute.xlu0 %1788 }
  0xd5   :  { %16557 = vst [vmem:[#allocation71_spill] sm:$0xff] %v12460_v21  ;;  %16558 = vst [vmem:[#allocation72_spill] sm:$0xff] %v12462_v43  ;;  %v1924_v38 = vsel %vm309_vm0, %v16559_v2, %v1793_v49  ;;  %v1918_v0 = vsel %vm309_vm0, %v16560_v55, %v1789_v17  ;;  %v11368_v50 = vld [vmem:[#allocation2 + $0xe8] ss:$8 sps:$4 sm:$0xff]   ;;  %v11375_v15 = vld [vmem:[#allocation2 + $0xf8] ss:$8 sps:$4 sm:$0xff]   ;;  %v16566_v49 = vcombine.low %v12271_v44, %v12240_v20 }
  0xd6   :  { %v10065_v33 = vcombine.low %v1924_v38, %v1924_v38  ;;  %v10066_v3 = vcombine.high %v1924_v38, %v1924_v38  ;;  %v10061_v9 = vcombine.low %v1918_v0, %v1918_v0  ;;  %v10062_v32 = vcombine.high %v1918_v0, %v1918_v0  ;;  %1906 = vrot.lane.b32.xlu1 %v12305_v45, %s11908_s21  ;;  %v12497_v0 = vld [vmem:[#allocation2 + $0x184] sm:$0x1]  ;;  %v16567_v17 = vld [vmem:[#allocation40_spill] sm:$0xff] }
  0xd7   :  { %1904 = vrot.lane.b32.xlu0 %v12307_v46, %s11908_s21  ;;  %16565 = vst [vmem:[#allocation73_spill] sm:$0xff] %v12497_v0  ;;  %v16568_v21 = vld [vmem:[#allocation30_spill] sm:$0xff]  ;;  %10989 = vmatmul.mubr.msk.bf16.gmra.mrb[24].mxu0 %vm309_vm0, %v11368_v50  ;;  %v16574_v0 = vld [vmem:[#allocation45_spill] sm:$0xff]  ;;  %v16582_v47 = vld [vmem:[#allocation48_spill] sm:$0xff] }
  0xd8   :  { %v2460_v56 = vshrl.u32 %v10065_v33, 16  ;;  %v2463_v45 = vshll.u32 %v10065_v33, 16  ;;  %v2469_v57 = vshll.u32 %v10066_v3, 16  ;;  %v2432_v12 = vshrl.u32 %v10061_v9, 16  ;;  %v1795_v46 = vpop.permute.xlu1 %1794  ;;  %v1791_v13 = vpop.permute.xlu0 %1790  ;;  %10992 = vmatprep.mubr.msk.bf16.mxu0 %vm309_vm0, %v11375_v15 }
  0xd9   :  { %v2435_v30 = vshll.u32 %v10061_v9, 16  ;;  %v12499_v8 = vshll.u32 %v10062_v32, 16  ;;  %v1927_v37 = vsel %vm309_vm0, %v16566_v49, %v1795_v46  ;;  %v16569_v2 = vcombine.low %v16567_v17, %v16568_v21 }
  0xda   :  { %v2462_v43 = vrot.slane %v2460_v56, 4  ;;  %v2465_v38 = vrot.slane %v2463_v45, 5  ;;  %v2471_v33 = vrot.slane %v2469_v57, 5  ;;  %v12509_v3 = vrot.slane %v2432_v12, 4  ;;  %1910 = vrot.lane.b32.xlu1 %v12326_v63, %s11908_s21  ;;  %v11314_v45 = vld [vmem:[#allocation2] ss:$0 sps:$4 sm:$0xff]  }
  0xdb   :  { %v1921_v55 = vsel %vm309_vm0, %v16569_v2, %v1791_v13  ;;  %v12513_v9 = vrot.slane %v2435_v30, 5  ;;  %v10067_v20 = vcombine.low %v1927_v37, %v1927_v37  ;;  %v10068_v44 = vcombine.high %v1927_v37, %v1927_v37  ;;  %1908 = vrot.lane.b32.xlu0 %v12328_v23, %s11908_s21  ;;  %v11313_v2 = vld [vmem:[#allocation2 + $0x8] ss:$0 sps:$4 sm:$0xff]   ;;  %v16575_v63 = vld [vmem:[#allocation31_spill] sm:$0xff] }
  0xdc   :  { %v2466_v13 = vor.u32 %v2465_v38, %v2462_v43  ;;  %v10063_v56 = vcombine.low %v1921_v55, %v1921_v55  ;;  %v10064_v21 = vcombine.high %v1921_v55, %v1921_v55  ;;  %v1799_v57 = vpop.permute.xlu1 %1798  ;;  %v1797_v12 = vpop.permute.xlu0 %1796  ;;  %v16571_v49 = vmov 0 }
  0xdd   :  { %v16572_v49 = vsel %vm12524_vm5, 4294967295, %v16571_v49  ;;  %v2474_v50 = vshrl.u32 %v10067_v20, 16  ;;  %v2477_v43 = vshll.u32 %v10067_v20, 16  ;;  %v2483_v37 = vshll.u32 %v10068_v44, 16  ;;  %v11378_v20 = vld [vmem:[#allocation2 + $0x108] ss:$8 sps:$4 sm:$0xff]  }
  0xde   :  { %16573 = vst [vmem:[#allocation40_spill] sm:$0xff] %v16572_v49  ;;  %v2467_v17 = vrot.slane %v2466_v13, 4  ;;  %v2446_v38 = vshrl.u32 %v10063_v56, 16  ;;  %v2449_v55 = vshll.u32 %v10063_v56, 16  ;;  %v12530_v15 = vshll.u32 %v10064_v21, 16  ;;  %1914 = vrot.lane.b32.xlu1 %v12347_v58, %s11908_s21 }
  0xdf   :  { %v2476_v46 = vrot.slane %v2474_v50, 4  ;;  %v2479_v30 = vrot.slane %v2477_v43, 5  ;;  %v2485_v32 = vrot.slane %v2483_v37, 5  ;;  %v16576_v35 = vcombine.low %v16574_v0, %v16575_v63  ;;  %1912 = vrot.lane.b32.xlu0 %v12369_v11, %s11908_s21  ;;  %v11385_v43 = vld [vmem:[#allocation2 + $0x120] ss:$8 sps:$4 sm:$0xff]   ;;  %v16578_v37 = vld [vmem:[#allocation32_spill] sm:$0xff]  ;;  %10993 = vmatmul.mubr.msk.bf16.gmra.mrb[28].mxu0 %vm309_vm0, %v11378_v20 }
  0xe0   :  { %v12542_v44 = vsel %vm12524_vm5, %v2467_v17, %v2471_v33  ;;  %v12544_v13 = vrot.slane %v2446_v38, 4  ;;  %v12546_v58 = vrot.slane %v2449_v55, 5  ;;  %v1803_v21 = vpop.permute.xlu1 %1802  ;;  %v1801_v50 = vpop.permute.xlu0 %1800  ;;  %v16580_v55 = vld [vmem:[#allocation33_spill] sm:$0xff]  ;;  %10996 = vmatprep.mubr.msk.bf16.mxu0 %vm309_vm0, %v11385_v43  ;;  %v16583_v43 = vld [vmem:[#allocation34_spill] sm:$0xff]  ;;  %v3974_v49 = vld [vmem:[#allocation2 + $0x110] sm:$0xf] }
  0xe1   :  { %v1933_v23 = vsel %vm309_vm0, %v16576_v35, %v1799_v57  ;;  %v2480_v0 = vor.u32 %v2479_v30, %v2476_v46  ;;  %v16577_v57 = vld [vmem:[#allocation46_spill] sm:$0xff]  ;;  %v16581_v24 = vcombine.low %v12330_v28, %v16580_v55  ;;  %v11319_v30 = vld [vmem:[#allocation2 + $0x18] ss:$0 sps:$4 sm:$0xff]   ;;  %v11320_v46 = vld [vmem:[#allocation2 + $0x10] ss:$0 sps:$4 sm:$0xff]   ;;  %v16584_v29 = vcombine.low %v16582_v47, %v16583_v43 }
  0xe2   :  { %v10071_v63 = vcombine.low %v1933_v23, %v1933_v23  ;;  %v10072_v35 = vcombine.high %v1933_v23, %v1933_v23  ;;  %v16579_v11 = vcombine.low %v16577_v57, %v16578_v37  ;;  %4266 = vrot.lane.b32.xlu1 %v11313_v2, %s11908_s21  ;;  %v11323_v55 = vld [vmem:[#allocation2 + $0x28] ss:$0 sps:$4 sm:$0xff]  }
  0xe3   :  { %v1939_v56 = vsel %vm309_vm0, %v16581_v24, %v1803_v21  ;;  %v2481_v23 = vrot.slane %v2480_v0, 4  ;;  %4264 = vrot.lane.b32.xlu0 %v11314_v45, %s11908_s21  ;;  %v11388_v45 = vld [vmem:[#allocation2 + $0x130] ss:$8 sps:$4 sm:$0xff]  }
  0xe4   :  { %v1930_v42 = vsel %vm309_vm0, %v16579_v11, %v1797_v12  ;;  %v2502_v19 = vshrl.u32 %v10071_v63, 16  ;;  %v2505_v5 = vshll.u32 %v10071_v63, 16  ;;  %v2511_v57 = vshll.u32 %v10072_v35, 16  ;;  %v1807_v33 = vpop.permute.xlu1 %1806  ;;  %v1805_v28 = vpop.permute.xlu0 %1804  ;;  %v11324_v63 = vld [vmem:[#allocation2 + $0x20] ss:$0 sps:$4 sm:$0xff]  }
  0xe5   :  { %v10069_v17 = vcombine.low %v1930_v42, %v1930_v42  ;;  %v10070_v38 = vcombine.high %v1930_v42, %v1930_v42  ;;  %v10075_v11 = vcombine.low %v1939_v56, %v1939_v56  ;;  %v12565_v24 = vsel %vm12524_vm5, %v2481_v23, %v2485_v32 }
  0xe6   :  { %v2504_v2 = vrot.slane %v2502_v19, 4  ;;  %v2507_v21 = vrot.slane %v2505_v5, 5  ;;  %v2513_v0 = vrot.slane %v2511_v57, 5  ;;  %4270 = vrot.lane.b32.xlu1 %v11319_v30, %s11908_s21  ;;  %v1936_v32 = vsel %vm309_vm0, %v16584_v29, %v1801_v50 }
  0xe7   :  { %v2488_v12 = vshrl.u32 %v10069_v17, 16  ;;  %v2491_v37 = vshll.u32 %v10069_v17, 16  ;;  %v2497_v42 = vshll.u32 %v10070_v38, 16  ;;  %v10076_v17 = vcombine.high %v1939_v56, %v1939_v56  ;;  %4268 = vrot.lane.b32.xlu0 %v11320_v46, %s11908_s21  ;;  %v11329_v46 = vld [vmem:[#allocation2 + $0x38] ss:$0 sps:$4 sm:$0xff]   ;;  %10997 = vmatmul.mubr.msk.bf16.gmra.mrb[32].mxu0 %vm309_vm0, %v11388_v45 }
  0xe8   :  { %v2508_v38 = vor.u32 %v2507_v21, %v2504_v2  ;;  %v2530_v54 = vshrl.u32 %v10075_v11, 16  ;;  %v2533_v6 = vshll.u32 %v10075_v11, 16  ;;  %v10073_v23 = vcombine.low %v1936_v32, %v1936_v32  ;;  %v16585_v2 = vld [vmem:[#allocation49_spill] sm:$0xff]  ;;  %v16586_v21 = vld [vmem:[#allocation35_spill] sm:$0xff] }
  0xe9   :  { %v2490_v35 = vrot.slane %v2488_v12, 4  ;;  %v2493_v20 = vrot.slane %v2491_v37, 5  ;;  %v2499_v7 = vrot.slane %v2497_v42, 5  ;;  %v2539_v19 = vshll.u32 %v10076_v17, 16  ;;  %v1811_v12 = vpop.permute.xlu1 %1810  ;;  %v1809_v37 = vpop.permute.xlu0 %1808  ;;  %v11395_v42 = vld [vmem:[#allocation2 + $0x140] ss:$8 sps:$4 sm:$0xff]  }
  0xea   :  { %v10074_v57 = vcombine.high %v1936_v32, %v1936_v32  ;;  %v2509_v56 = vrot.slane %v2508_v38, 4  ;;  %v2532_v31 = vrot.slane %v2530_v54, 4  ;;  %v2535_v30 = vrot.slane %v2533_v6, 5  ;;  %4274 = vrot.lane.b32.xlu1 %v11323_v55, %s11908_s21  ;;  %v11330_v6 = vld [vmem:[#allocation2 + $0x30] ss:$0 sps:$4 sm:$0xff]   ;;  %11000 = vmatprep.mubr.msk.bf16.mxu0 %vm309_vm0, %v11395_v42 }
  0xeb   :  { %v2494_v5 = vor.u32 %v2493_v20, %v2490_v35  ;;  %v16587_v11 = vcombine.low %v16585_v2, %v16586_v21  ;;  %v2541_v43 = vrot.slane %v2539_v19, 5  ;;  %v2516_v29 = vshrl.u32 %v10073_v23, 16  ;;  %4272 = vrot.lane.b32.xlu0 %v11324_v63, %s11908_s21  ;;  %v16589_v2 = vld [vmem:[#allocation36_spill] sm:$0xff] }
  0xec   :  { %v2519_v50 = vshll.u32 %v10073_v23, 16  ;;  %v12580_v35 = vsel %vm12524_vm5, %v2509_v56, %v2513_v0  ;;  %v2536_v20 = vor.u32 %v2535_v30, %v2532_v31  ;;  %v2525_v17 = vshll.u32 %v10074_v57, 16  ;;  %v11333_v57 = vld [vmem:[#allocation2 + $0x50] ss:$0 sps:$4 sm:$0xff]   ;;  %v16588_v30 = vld [vmem:[#allocation50_spill] sm:$0xff] }
  0xed   :  { %v1945_v26 = vsel %vm309_vm0, %v16587_v11, %v1807_v33  ;;  %v2495_v47 = vrot.slane %v2494_v5, 4  ;;  %v2518_v38 = vrot.slane %v2516_v29, 4  ;;  %v12588_v5 = vpop.permute.xlu1 %1814  ;;  %v12590_v0 = vpop.permute.xlu0 %1812 }
  0xee   :  { %v10079_v54 = vcombine.low %v1945_v26, %v1945_v26  ;;  %v2521_v55 = vrot.slane %v2519_v50, 5  ;;  %v10080_v32 = vcombine.high %v1945_v26, %v1945_v26  ;;  %v2537_v31 = vrot.slane %v2536_v20, 4  ;;  %4278 = vrot.lane.b32.xlu1 %v11329_v46, %s11908_s21 }
  0xef   :  { %v12586_v33 = vsel %vm12524_vm5, %v2495_v47, %v2499_v7  ;;  %v2527_v19 = vrot.slane %v2525_v17, 5  ;;  %v16590_v7 = vcombine.low %v16588_v30, %v16589_v2  ;;  %v16591_v26 = vor.u32 %v12513_v9, %v12509_v3  ;;  %v11334_v47 = vld [vmem:[#allocation2 + $0x48] ss:$0 sps:$4 sm:$0xff]   ;;  %4276 = vrot.lane.b32.xlu0 %v11330_v6, %s11908_s21  ;;  %v11398_v17 = vld [vmem:[#allocation2 + $0x150] ss:$8 sps:$4 sm:$0xff]  }
  0xf0   :  { %v2558_v23 = vshrl.u32 %v10079_v54, 16  ;;  %v2561_v63 = vshll.u32 %v10079_v54, 16  ;;  %v2522_v56 = vor.u32 %v2521_v55, %v2518_v38  ;;  %v2567_v45 = vshll.u32 %v10080_v32, 16  ;;  %v11405_v54 = vld [vmem:[#allocation2 + $0x168] ss:$8 sps:$4 sm:$0xff]   ;;  %11001 = vmatmul.mubr.msk.bf16.gmra.mrb[36].mxu0 %vm309_vm0, %v11398_v17 }
  0xf1   :  { %v1942_v21 = vsel %vm309_vm0, %v16590_v7, %v1805_v28  ;;  %v2439_v11 = vrot.slane %v16591_v26, 4  ;;  %v12603_v42 = vsel %vm12524_vm5, %v2537_v31, %v2541_v43  ;;  %v16592_v3 = vrot.slane %v12499_v8, 5  ;;  %v1819_v46 = vpop.permute.xlu1 %1818  ;;  %v12610_v32 = vpop.permute.xlu0 %1816  ;;  %v11339_v43 = vld [vmem:[#allocation2 + $0x60] ss:$0 sps:$4 sm:$0xff]   ;;  %v11340_v2 = vld [vmem:[#allocation2 + $0x58] ss:$0 sps:$4 sm:$0xff]   ;;  %11004 = vmatprep.mubr.msk.bf16.mxu0 %vm309_vm0, %v11405_v54 }
  0xf2   :  { %v2560_v29 = vrot.slane %v2558_v23, 4  ;;  %v2563_v50 = vrot.slane %v2561_v63, 5  ;;  %v10077_v20 = vcombine.low %v1942_v21, %v1942_v21  ;;  %v2523_v38 = vrot.slane %v2522_v56, 4  ;;  %v16595_v7 = vld [vmem:[#allocation37_spill] sm:$0xff]  ;;  %4282 = vrot.lane.b32.xlu1 %v11333_v57, %s11908_s21 }
  0xf3   :  { %v2569_v28 = vrot.slane %v2567_v45, 5  ;;  %v10078_v55 = vcombine.high %v1942_v21, %v1942_v21  ;;  %v2444_v9 = vsel %vm12524_vm5, %v2439_v11, %v16592_v3  ;;  %v16593_v6 = vor.u32 %v12546_v58, %v12544_v13  ;;  %v16594_v45 = vld [vmem:[#allocation51_spill] sm:$0xff]  ;;  %v16597_v11 = vld [vmem:[#allocation53_spill] sm:$0xff]  ;;  %v16598_v3 = vld [vmem:[#allocation38_spill] sm:$0xff]  ;;  %4280 = vrot.lane.b32.xlu0 %v11334_v47, %s11908_s21 }
  0xf4   :  { %v2564_v31 = vor.u32 %v2563_v50, %v2560_v29  ;;  %v2544_v23 = vshrl.u32 %v10077_v20, 16  ;;  %v2547_v63 = vshll.u32 %v10077_v20, 16  ;;  %v12617_v56 = vsel %vm12524_vm5, %v2523_v38, %v2527_v19 }
  0xf5   :  { %v2453_v30 = vrot.slane %v16593_v6, 4  ;;  %v2553_v8 = vshll.u32 %v10078_v55, 16  ;;  %v16596_v21 = vcombine.low %v16594_v45, %v16595_v7  ;;  %v16599_v29 = vcombine.low %v16597_v11, %v16598_v3  ;;  %v12634_v7 = vpop.permute.xlu1 %1822 }
  0xf6   :  { %v2565_v13 = vrot.slane %v2564_v31, 4  ;;  %v2546_v58 = vrot.slane %v2544_v23, 4  ;;  %v2549_v20 = vrot.slane %v2547_v63, 5  ;;  %v16600_v6 = vrot.slane %v12530_v15, 5  ;;  %4286 = vrot.lane.b32.xlu1 %v11339_v43, %s11908_s21 }
  0xf7   :  { %v1951_v26 = vsel %vm309_vm0, %v16596_v21, %v1811_v12  ;;  %v1948_v50 = vsel %vm309_vm0, %v16599_v29, %v1809_v37  ;;  %v2555_v12 = vrot.slane %v2553_v8, 5  ;;  %v12636_v37 = vpop.permute.xlu0 %1820  ;;  %v10190_v63 = vcombine.low %v12542_v44, %v12565_v24  ;;  %4284 = vrot.lane.b32.xlu0 %v11340_v2, %s11908_s21  ;;  %v11408_v24 = vld [vmem:[#allocation2 + $0x178] ss:$8 sps:$4 sm:$0xff]  }
  0xf8   :  { %v2458_v19 = vsel %vm12524_vm5, %v2453_v30, %v16600_v6  ;;  %v10083_v55 = vcombine.low %v1951_v26, %v1951_v26  ;;  %v10084_v45 = vcombine.high %v1951_v26, %v1951_v26  ;;  %v12641_v15 = vsel %vm12524_vm5, %v2565_v13, %v2569_v28  ;;  %v11343_v30 = vld [vmem:[#allocation2 + $0x70] ss:$0 sps:$4 sm:$0xff]   ;;  %v11344_v28 = vld [vmem:[#allocation2 + $0x68] ss:$0 sps:$4 sm:$0xff]   ;;  %11005 = vmatmul.mubr.msk.bf16.gmra.mrb[40].mxu0 %vm309_vm0, %v11408_v24 }
  0xf9   :  { %v10189_v38 = vcombine.low %v2444_v9, %v2458_v19  ;;  %v2550_v57 = vor.u32 %v2549_v20, %v2546_v58  ;;  %v10081_v31 = vcombine.low %v1948_v50, %v1948_v50  ;;  %v10082_v23 = vcombine.high %v1948_v50, %v1948_v50  ;;  %v12651_v13 = vpop.permute.xlu1 %1826  ;;  %v11415_v6 = vld [vmem:[#allocation2 + $0x188] ss:$8 sps:$4 sm:$0xff]  }
  0xfa   :  { %v2586_v47 = vshrl.u32 %v10083_v55, 16  ;;  %v2589_v17 = vshll.u32 %v10083_v55, 16  ;;  %v2595_v9 = vshll.u32 %v10084_v45, 16  ;;  %v10191_v50 = vcombine.low %v12586_v33, %v12580_v35  ;;  %v16602_v55 = vld [vmem:[#allocation39_spill] sm:$0xff]  ;;  %4290 = vrot.lane.b32.xlu1 %v11343_v30, %s11908_s21  ;;  %11008 = vmatprep.mubr.msk.bf16.mxu0 %vm309_vm0, %v11415_v6 }
  0xfb   :  { %11030 = vmatprep.mubr.msk.bf16.mxu1 %vm3424_vm6, %v10189_v38  ;;  %v2551_v8 = vrot.slane %v2550_v57, 4  ;;  %v2572_v54 = vshrl.u32 %v10081_v31, 16  ;;  %v2575_v21 = vshll.u32 %v10081_v31, 16  ;;  %v2581_v26 = vshll.u32 %v10082_v23, 16  ;;  %v12653_v44 = vpop.permute.xlu0 %1824  ;;  %v16601_v38 = vld [vmem:[#allocation54_spill] sm:$0xff]  ;;  %v16604_v45 = vld [vmem:[#allocation59_spill] sm:$0xff]  ;;  %4288 = vrot.lane.b32.xlu0 %v11344_v28, %s11908_s21 }
  0xfc   :  { %v2588_v11 = vrot.slane %v2586_v47, 4  ;;  %v2591_v3 = vrot.slane %v2589_v17, 5  ;;  %v2597_v29 = vrot.slane %v2595_v9, 5  ;;  %11031 = vmatmul.mubr.msk.bf16.vlgmr.msra.gmra.mrb[0].mxu1 %vm3424_vm6, %v10190_v63  ;;  %v16603_v35 = vcombine.low %v16601_v38, %v16602_v55  ;;  %v16605_v57 = vld [vmem:[#allocation41_spill] sm:$0xff]  ;;  %v16607_v23 = vld [vmem:[#allocation42_spill] sm:$0xff] }
  0xfd   :  { %v12657_v43 = vsel %vm12524_vm5, %v2551_v8, %v2555_v12  ;;  %v2574_v58 = vrot.slane %v2572_v54, 4  ;;  %v2577_v2 = vrot.slane %v2575_v21, 5  ;;  %v2583_v20 = vrot.slane %v2581_v26, 5  ;;  %11034 = vmatprep.mubr.msk.bf16.mxu1 %vm3424_vm6, %v10191_v50  ;;  %v11349_v21 = vld [vmem:[#allocation2 + $0x80] ss:$0 sps:$4 sm:$0xff]   ;;  %v12676_v50 = vpop.permute.xlu1 %1830 }
  0xfe   :  { %v2592_v19 = vor.u32 %v2591_v3, %v2588_v11  ;;  %v1957_v33 = vsel %vm309_vm0, %v16603_v35, %v12588_v5  ;;  %v16606_v31 = vcombine.low %v16604_v45, %v16605_v57  ;;  %v16608_v47 = vcombine.low %v12391_v39, %v16607_v23  ;;  %v11350_v39 = vld [vmem:[#allocation2 + $0x78] ss:$0 sps:$4 sm:$0xff]   ;;  %4294 = vrot.lane.b32.xlu1 %v11349_v21, %s11908_s21 }
  0xff   :  { %v2578_v9 = vor.u32 %v2577_v2, %v2574_v58  ;;  %v10087_v63 = vcombine.low %v1957_v33, %v1957_v33  ;;  %v10088_v8 = vcombine.high %v1957_v33, %v1957_v33  ;;  %v11353_v35 = vld [vmem:[#allocation2 + $0x98] ss:$0 sps:$4 sm:$0xff]   ;;  %4292 = vrot.lane.b32.xlu0 %v11350_v39, %s11908_s21  ;;  %v10192_v10 = vcombine.low %v12617_v56, %v12603_v42 }
 0x100   :  { %v1954_v12 = vsel %vm309_vm0, %v16606_v31, %v12590_v0  ;;  %v1963_v17 = vsel %vm309_vm0, %v16608_v47, %v1819_v46  ;;  %v2593_v26 = vrot.slane %v2592_v19, 4  ;;  %v12678_v0 = vpop.permute.xlu0 %1828  ;;  %v11354_v31 = vld [vmem:[#allocation2 + $0x90] ss:$0 sps:$4 sm:$0xff]   ;;  %v10193_v56 = vcombine.low %v12657_v43, %v12641_v15 }
 0x101   :  { %v10085_v54 = vcombine.low %v1954_v12, %v1954_v12  ;;  %v10086_v5 = vcombine.high %v1954_v12, %v1954_v12  ;;  %v10091_v11 = vcombine.low %v1963_v17, %v1963_v17  ;;  %v10092_v3 = vcombine.high %v1963_v17, %v1963_v17 }
 0x102   :  { %v2579_v46 = vrot.slane %v2578_v9, 4  ;;  %v2614_v58 = vshrl.u32 %v10087_v63, 16  ;;  %v2617_v2 = vshll.u32 %v10087_v63, 16  ;;  %v2623_v38 = vshll.u32 %v10088_v8, 16  ;;  %v11418_v9 = vld [vmem:[#allocation2 + $0x198] ss:$8 sps:$4 sm:$0xff]   ;;  %4298 = vrot.lane.b32.xlu1 %v11353_v35, %s11908_s21 }
 0x103   :  { %v12684_v30 = vsel %vm12524_vm5, %v2593_v26, %v2597_v29  ;;  %v2600_v19 = vshrl.u32 %v10085_v54, 16  ;;  %v2603_v55 = vshll.u32 %v10085_v54, 16  ;;  %v2609_v28 = vshll.u32 %v10086_v5, 16  ;;  %v12692_v29 = vpop.permute.xlu1 %1834  ;;  %v16609_v54 = vld [vmem:[#allocation60_spill] sm:$0xff]  ;;  %v16610_v26 = vld [vmem:[#allocation43_spill] sm:$0xff]  ;;  %4296 = vrot.lane.b32.xlu0 %v11354_v31, %s11908_s21  ;;  %11009 = vmatmul.mubr.msk.bf16.gmra.mrb[44].mxu0 %vm309_vm0, %v11418_v9  ;;  %v16612_v35 = vld [vmem:[#allocation61_spill] sm:$0xff] }
 0x104   :  { %v12688_v33 = vsel %vm12524_vm5, %v2579_v46, %v2583_v20  ;;  %v2616_v45 = vrot.slane %v2614_v58, 4  ;;  %v2619_v24 = vrot.slane %v2617_v2, 5  ;;  %v2625_v57 = vrot.slane %v2623_v38, 5  ;;  %v12694_v17 = vpop.permute.xlu0 %1832  ;;  %11035 = vmatmul.mubr.msk.bf16.gmra.mrb[4].mxu1 %vm3424_vm6, %v10192_v10  ;;  %v16613_v31 = vld [vmem:[#allocation44_spill] sm:$0xff] }
 0x105   :  { %v2602_v12 = vrot.slane %v2600_v19, 4  ;;  %v2605_v6 = vrot.slane %v2603_v55, 5  ;;  %v2611_v23 = vrot.slane %v2609_v28, 5  ;;  %v2642_v47 = vshrl.u32 %v10091_v11, 16  ;;  %v11425_v19 = vld [vmem:[#allocation2 + $0x1b0] ss:$8 sps:$4 sm:$0xff]   ;;  %11038 = vmatprep.mubr.msk.bf16.mxu1 %vm3424_vm6, %v10193_v56 }
 0x106   :  { %v2620_v63 = vor.u32 %v2619_v24, %v2616_v45  ;;  %v2645_v20 = vshll.u32 %v10091_v11, 16  ;;  %v2651_v8 = vshll.u32 %v10092_v3, 16  ;;  %v16611_v5 = vcombine.low %v16609_v54, %v16610_v26  ;;  %v11359_v11 = vld [vmem:[#allocation2 + $0xa8] ss:$0 sps:$4 sm:$0xff]   ;;  %11012 = vmatprep.mubr.msk.bf16.mxu0 %vm309_vm0, %v11425_v19 }
 0x107   :  { %v2606_v46 = vor.u32 %v2605_v6, %v2602_v12  ;;  %v2644_v58 = vrot.slane %v2642_v47, 4  ;;  %v11360_v6 = vld [vmem:[#allocation2 + $0xa0] ss:$0 sps:$4 sm:$0xff]   ;;  %v16615_v43 = vcombine.low %v12411_v27, %v12317_v51  ;;  %4302 = vrot.lane.b32.xlu1 %v11359_v11, %s11908_s21  ;;  %v11364_v51 = vld [vmem:[#allocation2 + $0xb0] ss:$0 sps:$4 sm:$0xff]  }
 0x108   :  { %v1960_v21 = vsel %vm309_vm0, %v16611_v5, %v12610_v32  ;;  %v2621_v39 = vrot.slane %v2620_v63, 4  ;;  %v2647_v55 = vrot.slane %v2645_v20, 5  ;;  %v2653_v28 = vrot.slane %v2651_v8, 5  ;;  %v12705_v32 = vpop.permute.xlu1 %1838  ;;  %v12707_v12 = vpop.permute.xlu0 %1836  ;;  %4300 = vrot.lane.b32.xlu0 %v11360_v6, %s11908_s21  ;;  %v11428_v27 = vld [vmem:[#allocation2 + $0x1c0] ss:$8 sps:$4 sm:$0xff]  }
 0x109   :  { %v10089_v2 = vcombine.low %v1960_v21, %v1960_v21  ;;  %v10090_v38 = vcombine.high %v1960_v21, %v1960_v21  ;;  %v2607_v3 = vrot.slane %v2606_v46, 4  ;;  %v16614_v63 = vcombine.low %v16612_v35, %v16613_v31 }
 0x10a   :  { %v12712_v47 = vsel %vm12524_vm5, %v2621_v39, %v2625_v57  ;;  %v2648_v42 = vor.u32 %v2647_v55, %v2644_v58 }
 0x10b   :  { %v2628_v45 = vshrl.u32 %v10089_v2, 16  ;;  %v2631_v24 = vshll.u32 %v10089_v2, 16  ;;  %v2637_v54 = vshll.u32 %v10090_v38, 16  ;;  %v1969_v20 = vsel %vm309_vm0, %v16614_v63, %v12634_v7  ;;  %v16616_v2 = vld [vmem:[#allocation66_spill] sm:$0xff]  ;;  %v16617_v38 = vld [vmem:[#allocation47_spill] sm:$0xff]  ;;  %11013 = vmatmul.mubr.msk.bf16.gmra.mrb[48].mxu0 %vm309_vm0, %v11428_v27 }
 0x10c   :  { %v12724_v8 = vsel %vm12524_vm5, %v2607_v3, %v2611_v23  ;;  %v2649_v5 = vrot.slane %v2648_v42, 4  ;;  %v10095_v10 = vcombine.low %v1969_v20, %v1969_v20  ;;  %v10096_v15 = vcombine.high %v1969_v20, %v1969_v20  ;;  %v11363_v23 = vld [vmem:[#allocation2 + $0xb8] ss:$0 sps:$4 sm:$0xff]   ;;  %v12740_v55 = vpop.permute.xlu1 %1842  ;;  %v12742_v3 = vpop.permute.xlu0 %1840  ;;  %4304 = vrot.lane.b32.xlu0 %v11364_v51, %s11908_s21 }
 0x10d   :  { %v2630_v9 = vrot.slane %v2628_v45, 4  ;;  %v2633_v26 = vrot.slane %v2631_v24, 5  ;;  %v2639_v57 = vrot.slane %v2637_v54, 5  ;;  %v1966_v7 = vsel %vm309_vm0, %v16615_v43, %v12636_v37  ;;  %v11435_v54 = vld [vmem:[#allocation2 + $0x1d0] ss:$8 sps:$4 sm:$0xff]   ;;  %4306 = vrot.lane.b32.xlu1 %v11363_v23, %s11908_s21 }
 0x10e   :  { %v10093_v46 = vcombine.low %v1966_v7, %v1966_v7  ;;  %v10094_v58 = vcombine.high %v1966_v7, %v1966_v7  ;;  %v16618_v19 = vcombine.low %v16616_v2, %v16617_v38  ;;  %v12746_v37 = vsel %vm12524_vm5, %v2649_v5, %v2653_v28  ;;  %v11370_v7 = vld [vmem:[#allocation2 + $0xc0] ss:$0 sps:$4 sm:$0xff]   ;;  %11016 = vmatprep.mubr.msk.bf16.mxu0 %vm309_vm0, %v11435_v54 }
 0x10f   :  { %v2634_v21 = vor.u32 %v2633_v26, %v2630_v9  ;;  %v2670_v11 = vshrl.u32 %v10095_v10, 16  ;;  %v2673_v45 = vshll.u32 %v10095_v10, 16  ;;  %v2679_v24 = vshll.u32 %v10096_v15, 16  ;;  %v11369_v9 = vld [vmem:[#allocation2 + $0xc8] ss:$0 sps:$4 sm:$0xff]  }
 0x110   :  { %v1975_v39 = vsel %vm309_vm0, %v16618_v19, %v12651_v13  ;;  %v2656_v56 = vshrl.u32 %v10093_v46, 16  ;;  %v2659_v35 = vshll.u32 %v10093_v46, 16  ;;  %v2665_v13 = vshll.u32 %v10094_v58, 16  ;;  %v12754_v15 = vpop.permute.xlu1 %1846  ;;  %v12756_v43 = vpop.permute.xlu0 %1844  ;;  %4308 = vrot.lane.b32.xlu0 %v11370_v7, %s11908_s21 }
 0x111   :  { %v2635_v42 = vrot.slane %v2634_v21, 4  ;;  %v2672_v31 = vrot.slane %v2670_v11, 4  ;;  %v2675_v6 = vrot.slane %v2673_v45, 5  ;;  %v2681_v63 = vrot.slane %v2679_v24, 5  ;;  %4310 = vrot.lane.b32.xlu1 %v11369_v9, %s11908_s21  ;;  %v11373_v24 = vld [vmem:[#allocation2 + $0xe0] ss:$0 sps:$4 sm:$0xff]  }
 0x112   :  { %v10099_v20 = vcombine.low %v1975_v39, %v1975_v39  ;;  %v2658_v28 = vrot.slane %v2656_v56, 4  ;;  %v2661_v5 = vrot.slane %v2659_v35, 5  ;;  %v2667_v10 = vrot.slane %v2665_v13, 5 }
 0x113   :  { %v12751_v26 = vsel %vm12524_vm5, %v2635_v42, %v2639_v57  ;;  %v2676_v21 = vor.u32 %v2675_v6, %v2672_v31  ;;  %v10100_v46 = vcombine.high %v1975_v39, %v1975_v39  ;;  %v16619_v2 = vcombine.low %v12419_v22, %v12321_v61 }
 0x114   :  { %v2698_v23 = vshrl.u32 %v10099_v20, 16  ;;  %v2701_v58 = vshll.u32 %v10099_v20, 16  ;;  %v2662_v57 = vor.u32 %v2661_v5, %v2658_v28  ;;  %v10194_v19 = vcombine.low %v12688_v33, %v12684_v30  ;;  %v12779_v30 = vpop.permute.xlu0 %1848  ;;  %v11374_v33 = vld [vmem:[#allocation2 + $0xd8] ss:$0 sps:$4 sm:$0xff]  }
 0x115   :  { %v1972_v38 = vsel %vm309_vm0, %v16619_v2, %v12653_v44  ;;  %v10195_v51 = vcombine.low %v12724_v8, %v12712_v47  ;;  %v2677_v27 = vrot.slane %v2676_v21, 4  ;;  %v2707_v45 = vshll.u32 %v10100_v46, 16  ;;  %v12777_v44 = vpop.permute.xlu1 %1850  ;;  %v11438_v47 = vld [vmem:[#allocation2 + $0x1e0] ss:$8 sps:$4 sm:$0xff]   ;;  %4314 = vrot.lane.b32.xlu1 %v11373_v24, %s11908_s21  ;;  %4312 = vrot.lane.b32.xlu0 %v11374_v33, %s11908_s21 }
 0x116   :  { %v2700_v11 = vrot.slane %v2698_v23, 4  ;;  %v2703_v39 = vrot.slane %v2701_v58, 5  ;;  %v2663_v54 = vrot.slane %v2662_v57, 4  ;;  %v10097_v42 = vcombine.low %v1972_v38, %v1972_v38  ;;  %11039 = vmatmul.mubr.msk.bf16.gmra.mrb[8].mxu1 %vm3424_vm6, %v10194_v19  ;;  %v11380_v2 = vld [vmem:[#allocation2 + $0xe8] ss:$0 sps:$4 sm:$0xff]   ;;  %11017 = vmatmul.mubr.msk.bf16.gmra.mrb[52].mxu0 %vm309_vm0, %v11438_v47 }
 0x117   :  { %v10098_v56 = vcombine.high %v1972_v38, %v1972_v38  ;;  %v16620_v61 = vcombine.low %v12022_v40, %v12323_v18  ;;  %v12783_v8 = vsel %vm12524_vm5, %v2677_v27, %v2681_v63  ;;  %v2709_v13 = vrot.slane %v2707_v45, 5  ;;  %11042 = vmatprep.mubr.msk.bf16.mxu1 %vm3424_vm6, %v10195_v51  ;;  %v11379_v63 = vld [vmem:[#allocation2 + $0xf0] ss:$0 sps:$4 sm:$0xff]  }
 0x118   :  { %v2704_v35 = vor.u32 %v2703_v39, %v2700_v11  ;;  %v12788_v40 = vsel %vm12524_vm5, %v2663_v54, %v2667_v10  ;;  %v2684_v18 = vshrl.u32 %v10097_v42, 16  ;;  %v16621_v23 = vcombine.low %v12024_v41, %v12338_v16  ;;  %v12799_v57 = vpop.permute.xlu0 %1852 }
 0x119   :  { %v1981_v22 = vsel %vm309_vm0, %v16620_v61, %v12676_v50  ;;  %v2687_v50 = vshll.u32 %v10097_v42, 16  ;;  %v2693_v6 = vshll.u32 %v10098_v56, 16  ;;  %v12797_v58 = vpop.permute.xlu1 %1854  ;;  %4318 = vrot.lane.b32.xlu1 %v11379_v63, %s11908_s21  ;;  %v11383_v56 = vld [vmem:[#allocation2 + $0x100] ss:$0 sps:$4 sm:$0xff]   ;;  %4316 = vrot.lane.b32.xlu0 %v11380_v2, %s11908_s21  ;;  %v10196_v2 = vcombine.low %v12751_v26, %v12746_v37 }
 0x11a   :  { %v10103_v31 = vcombine.low %v1981_v22, %v1981_v22  ;;  %v2705_v20 = vrot.slane %v2704_v35, 4  ;;  %v10104_v9 = vcombine.high %v1981_v22, %v1981_v22  ;;  %v2686_v7 = vrot.slane %v2684_v18, 4 }
 0x11b   :  { %v2689_v21 = vrot.slane %v2687_v50, 5  ;;  %v2695_v46 = vrot.slane %v2693_v6, 5  ;;  %v1978_v10 = vsel %vm309_vm0, %v16621_v23, %v12678_v0  ;;  %v16622_v0 = vcombine.low %v12032_v52, %v12340_v59  ;;  %v11384_v52 = vld [vmem:[#allocation2 + $0xf8] ss:$0 sps:$4 sm:$0xff]  }
 0x11c   :  { %v2726_v28 = vshrl.u32 %v10103_v31, 16  ;;  %v2729_v5 = vshll.u32 %v10103_v31, 16  ;;  %v12804_v38 = vsel %vm12524_vm5, %v2705_v20, %v2709_v13  ;;  %v2735_v27 = vshll.u32 %v10104_v9, 16  ;;  %v12815_v13 = vpop.permute.xlu0 %1856 }
 0x11d   :  { %v2690_v11 = vor.u32 %v2689_v21, %v2686_v7  ;;  %v10101_v41 = vcombine.low %v1978_v10, %v1978_v10  ;;  %v10102_v16 = vcombine.high %v1978_v10, %v1978_v10  ;;  %v1987_v39 = vsel %vm309_vm0, %v16622_v0, %v12692_v29  ;;  %v12813_v35 = vpop.permute.xlu1 %1858  ;;  %4322 = vrot.lane.b32.xlu1 %v11383_v56, %s11908_s21  ;;  %v11389_v21 = vld [vmem:[#allocation2 + $0x110] ss:$0 sps:$4 sm:$0xff]  }
 0x11e   :  { %v2728_v19 = vrot.slane %v2726_v28, 4  ;;  %v2731_v51 = vrot.slane %v2729_v5, 5  ;;  %v2737_v24 = vrot.slane %v2735_v27, 5  ;;  %v10107_v54 = vcombine.low %v1987_v39, %v1987_v39  ;;  %4320 = vrot.lane.b32.xlu0 %v11384_v52, %s11908_s21  ;;  %11043 = vmatmul.mubr.msk.bf16.gmra.mrb[12].mxu1 %vm3424_vm6, %v10196_v2 }
 0x11f   :  { %v10108_v42 = vcombine.high %v1987_v39, %v1987_v39  ;;  %v2691_v61 = vrot.slane %v2690_v11, 4  ;;  %v2712_v22 = vshrl.u32 %v10101_v41, 16  ;;  %v2715_v33 = vshll.u32 %v10101_v41, 16  ;;  %v11390_v11 = vld [vmem:[#allocation2 + $0x108] ss:$0 sps:$4 sm:$0xff]  }
 0x120   :  { %v2732_v45 = vor.u32 %v2731_v51, %v2728_v19  ;;  %v2721_v47 = vshll.u32 %v10102_v16, 16  ;;  %v2754_v29 = vshrl.u32 %v10107_v54, 16  ;;  %v2757_v31 = vshll.u32 %v10107_v54, 16  ;;  %v12838_v27 = vpop.permute.xlu0 %1860 }
 0x121   :  { %v2763_v18 = vshll.u32 %v10108_v42, 16  ;;  %v12819_v50 = vsel %vm12524_vm5, %v2691_v61, %v2695_v46  ;;  %v2714_v6 = vrot.slane %v2712_v22, 4  ;;  %v2717_v20 = vrot.slane %v2715_v33, 5  ;;  %v12836_v51 = vpop.permute.xlu1 %1862  ;;  %4326 = vrot.lane.b32.xlu1 %v11389_v21, %s11908_s21 }
 0x122   :  { %v2733_v59 = vrot.slane %v2732_v45, 4  ;;  %v2723_v9 = vrot.slane %v2721_v47, 5  ;;  %v2756_v5 = vrot.slane %v2754_v29, 4  ;;  %v2759_v63 = vrot.slane %v2757_v31, 5  ;;  %v11393_v45 = vld [vmem:[#allocation2 + $0x128] ss:$0 sps:$4 sm:$0xff]   ;;  %4324 = vrot.lane.b32.xlu0 %v11390_v11, %s11908_s21 }
 0x123   :  { %v2765_v7 = vrot.slane %v2763_v18, 5  ;;  %v2718_v23 = vor.u32 %v2717_v20, %v2714_v6  ;;  %v16623_v10 = vcombine.low %v12034_v53, %v12342_v62  ;;  %v10197_v19 = vcombine.low %v12788_v40, %v12783_v8 }
 0x124   :  { %v12823_v28 = vsel %vm12524_vm5, %v2733_v59, %v2737_v24  ;;  %v2760_v41 = vor.u32 %v2759_v63, %v2756_v5  ;;  %v16624_v53 = vcombine.low %v12038_v60, %v12345_v36  ;;  %v16625_v40 = vcombine.low %v12044_v1, %v12361_v34  ;;  %v11448_v60 = vld [vmem:[#allocation2 + $0x208] ss:$8 sps:$4 sm:$0xff]   ;;  %v12860_v34 = vpop.permute.xlu0 %1864 }
 0x125   :  { %v1984_v46 = vsel %vm309_vm0, %v16623_v10, %v12694_v17  ;;  %v11445_v17 = vld [vmem:[#allocation2 + $0x1f8] ss:$8 sps:$4 sm:$0xff]   ;;  %v2719_v37 = vrot.slane %v2718_v23, 4  ;;  %11046 = vmatprep.mubr.msk.bf16.mxu1 %vm3424_vm6, %v10197_v19  ;;  %v12858_v1 = vpop.permute.xlu1 %1866  ;;  %v16626_v5 = vcombine.low %v12046_v4, %v12363_v48  ;;  %4330 = vrot.lane.b32.xlu1 %v11393_v45, %s11908_s21  ;;  %v11400_v48 = vld [vmem:[#allocation2 + $0x130] ss:$0 sps:$4 sm:$0xff]  }
 0x126   :  { %v10105_v16 = vcombine.low %v1984_v46, %v1984_v46  ;;  %v10106_v0 = vcombine.high %v1984_v46, %v1984_v46  ;;  %v1993_v62 = vsel %vm309_vm0, %v16624_v53, %v12705_v32  ;;  %v1990_v39 = vsel %vm309_vm0, %v16625_v40, %v12707_v12  ;;  %v11394_v12 = vld [vmem:[#allocation2 + $0x120] ss:$0 sps:$4 sm:$0xff]   ;;  %11020 = vmatprep.mubr.msk.bf16.mxu0 %vm309_vm0, %v11445_v17  ;;  %v11399_v10 = vld [vmem:[#allocation2 + $0x138] ss:$0 sps:$4 sm:$0xff]   ;;  %v11403_v53 = vld [vmem:[#allocation2 + $0x148] ss:$0 sps:$4 sm:$0xff]  }
 0x127   :  { %v10111_v26 = vcombine.low %v1993_v62, %v1993_v62  ;;  %v10112_v8 = vcombine.high %v1993_v62, %v1993_v62  ;;  %v2761_v24 = vrot.slane %v2760_v41, 4  ;;  %v12855_v36 = vsel %vm12524_vm5, %v2719_v37, %v2723_v9  ;;  %11021 = vmatmul.mubr.msk.bf16.gmra.mrb[56].mxu0 %vm309_vm0, %v11448_v60  ;;  %4328 = vrot.lane.b32.xlu0 %v11394_v12, %s11908_s21 }
 0x128   :  { %v2740_v54 = vshrl.u32 %v10105_v16, 16  ;;  %v2743_v42 = vshll.u32 %v10105_v16, 16  ;;  %v2749_v56 = vshll.u32 %v10106_v0, 16  ;;  %v10109_v6 = vcombine.low %v1990_v39, %v1990_v39  ;;  %v12882_v4 = vpop.permute.xlu0 %1868 }
 0x129   :  { %v2782_v32 = vshrl.u32 %v10111_v26, 16  ;;  %v2785_v61 = vshll.u32 %v10111_v26, 16  ;;  %v2791_v22 = vshll.u32 %v10112_v8, 16  ;;  %v12865_v33 = vsel %vm12524_vm5, %v2761_v24, %v2765_v7  ;;  %v16627_v7 = vld [vmem:[#allocation52_spill] sm:$0xff]  ;;  %v12880_v41 = vpop.permute.xlu1 %1870  ;;  %4334 = vrot.lane.b32.xlu1 %v11399_v10, %s11908_s21 }
 0x12a   :  { %v2742_v47 = vrot.slane %v2740_v54, 4  ;;  %v2745_v52 = vrot.slane %v2743_v42, 5  ;;  %v2751_v59 = vrot.slane %v2749_v56, 5  ;;  %v10110_v9 = vcombine.high %v1990_v39, %v1990_v39  ;;  %v11459_v26 = vld [vmem:[#allocation2 + $0x218] ss:$8 sps:$4 sm:$0xff]  }
 0x12b   :  { %v2784_v29 = vrot.slane %v2782_v32, 4  ;;  %v2787_v31 = vrot.slane %v2785_v61, 5  ;;  %v2793_v18 = vrot.slane %v2791_v22, 5  ;;  %v1999_v63 = vsel %vm309_vm0, %v16626_v5, %v12740_v55  ;;  %v11460_v24 = vld [vmem:[#allocation2 + $0x228] ss:$8 sps:$4 sm:$0xff]   ;;  %4332 = vrot.lane.b32.xlu0 %v11400_v48, %s11908_s21  ;;  %11024 = vmatprep.mubr.msk.bf16.mxu0 %vm309_vm0, %v11459_v26 }
 0x12c   :  { %v2746_v20 = vor.u32 %v2745_v52, %v2742_v47  ;;  %v16628_v21 = vcombine.low %v12054_v14, %v16627_v7  ;;  %v2768_v2 = vshrl.u32 %v10109_v6, 16  ;;  %v2771_v19 = vshll.u32 %v10109_v6, 16  ;;  %v12896_v61 = vpop.permute.xlu0 %1872  ;;  %v11404_v22 = vld [vmem:[#allocation2 + $0x140] ss:$0 sps:$4 sm:$0xff]  }
 0x12d   :  { %v2788_v46 = vor.u32 %v2787_v31, %v2784_v29  ;;  %v10115_v11 = vcombine.low %v1999_v63, %v1999_v63  ;;  %v2777_v16 = vshll.u32 %v10110_v9, 16  ;;  %v10116_v0 = vcombine.high %v1999_v63, %v1999_v63  ;;  %v12894_v32 = vpop.permute.xlu1 %1874  ;;  %v16629_v63 = vld [vmem:[#allocation55_spill] sm:$0xff]  ;;  %4338 = vrot.lane.b32.xlu1 %v11403_v53, %s11908_s21 }
 0x12e   :  { %v1996_v23 = vsel %vm309_vm0, %v16628_v21, %v12742_v3  ;;  %v2747_v55 = vrot.slane %v2746_v20, 4  ;;  %v2770_v62 = vrot.slane %v2768_v2, 4  ;;  %v2773_v17 = vrot.slane %v2771_v19, 5  ;;  %v16631_v19 = vld [vmem:[#allocation16_spill] sm:$0xff] }
 0x12f   :  { %v10113_v14 = vcombine.low %v1996_v23, %v1996_v23  ;;  %v2789_v3 = vrot.slane %v2788_v46, 4  ;;  %v2810_v37 = vshrl.u32 %v10115_v11, 16  ;;  %v2779_v40 = vrot.slane %v2777_v16, 5  ;;  %11025 = vmatmul.mubr.msk.bf16.gmra.mrb[60].mxu0 %vm309_vm0, %v11460_v24  ;;  %4336 = vrot.lane.b32.xlu0 %v11404_v22, %s11908_s21  ;;  %v16634_v16 = vld [vmem:[#allocation17_spill] sm:$0xff] }
 0x130   :  { %v12886_v8 = vsel %vm12524_vm5, %v2747_v55, %v2751_v59  ;;  %v2813_v39 = vshll.u32 %v10115_v11, 16  ;;  %v2819_v45 = vshll.u32 %v10116_v0, 16  ;;  %v2774_v42 = vor.u32 %v2773_v17, %v2770_v62  ;;  %v12918_v46 = vpop.permute.xlu0 %1876  ;;  %v16632_v11 = vld [vmem:[#allocation56_spill] sm:$0xff]  ;;  %v16635_v0 = vld [vmem:[#allocation57_spill] sm:$0xff] }
 0x131   :  { %v12891_v54 = vsel %vm12524_vm5, %v2789_v3, %v2793_v18  ;;  %v2812_v56 = vrot.slane %v2810_v37, 4  ;;  %v10114_v60 = vcombine.high %v1996_v23, %v1996_v23  ;;  %v2796_v52 = vshrl.u32 %v10113_v14, 16  ;;  %v11409_v23 = vld [vmem:[#allocation2 + $0x158] ss:$0 sps:$4 sm:$0xff]  }
 0x132   :  { %v2815_v12 = vrot.slane %v2813_v39, 5  ;;  %v2821_v47 = vrot.slane %v2819_v45, 5  ;;  %v2799_v59 = vshll.u32 %v10113_v14, 16  ;;  %v2775_v29 = vrot.slane %v2774_v42, 4  ;;  %4342 = vrot.lane.b32.xlu1 %v11409_v23, %s11908_s21  ;;  %v16638_v23 = vld [vmem:[#allocation58_spill] sm:$0xff] }
 0x133   :  { %v2805_v31 = vshll.u32 %v10114_v60, 16  ;;  %v10198_v18 = vcombine.low %v12819_v50, %v12804_v38  ;;  %v10199_v6 = vcombine.low %v12855_v36, %v12823_v28  ;;  %v2798_v9 = vrot.slane %v2796_v52, 4  ;;  %v12916_v36 = vpop.permute.xlu1 %1878 }
 0x134   :  { %v2816_v20 = vor.u32 %v2815_v12, %v2812_v56  ;;  %v2801_v5 = vrot.slane %v2799_v59, 5  ;;  %v16630_v7 = vcombine.low %v12063_v25, %v16629_v63  ;;  %v12912_v10 = vsel %vm12524_vm5, %v2775_v29, %v2779_v40  ;;  %v11410_v25 = vld [vmem:[#allocation2 + $0x150] ss:$0 sps:$4 sm:$0xff]   ;;  %v12939_v22 = vpop.permute.xlu0 %1880  ;;  %v11414_v12 = vld [vmem:[#allocation2 + $0x168] ss:$0 sps:$4 sm:$0xff]  }
 0x135   :  { %v2807_v38 = vrot.slane %v2805_v31, 5  ;;  %11047 = vmatmul.mubr.msk.bf16.gmra.mrb[16].mxu1 %vm3424_vm6, %v10198_v18  ;;  %v16633_v48 = vcombine.low %v16631_v19, %v16632_v11  ;;  %v16636_v14 = vcombine.low %v16634_v16, %v16635_v0  ;;  %4340 = vrot.lane.b32.xlu0 %v11410_v25, %s11908_s21  ;;  %v4584_v31 = vld [vmem:[#allocation8] sm:$0xf] }
 0x136   :  { %v2005_v21 = vsel %vm309_vm0, %v16630_v7, %v12754_v15  ;;  %v2817_v15 = vrot.slane %v2816_v20, 4  ;;  %v2802_v2 = vor.u32 %v2801_v5, %v2798_v9  ;;  %11050 = vmatprep.mubr.msk.bf16.mxu1 %vm3424_vm6, %v10199_v6  ;;  %11228 = vmatprep.subr.msk.bf16.mxu0 %vm3521_vm2, %v4584_v31  ;;  %v16643_v31 = vld [vmem:[#allocation20_spill] sm:$0xff] }
 0x137   :  { %v10119_v50 = vcombine.low %v2005_v21, %v2005_v21  ;;  %v10120_v28 = vcombine.high %v2005_v21, %v2005_v21  ;;  %v2002_v55 = vsel %vm309_vm0, %v16633_v48, %v12756_v43  ;;  %v2011_v53 = vsel %vm309_vm0, %v16636_v14, %v12777_v44  ;;  %v11413_v43 = vld [vmem:[#allocation2 + $0x170] ss:$0 sps:$4 sm:$0xff]   ;;  %v12937_v44 = vpop.permute.xlu1 %1882  ;;  %v16637_v21 = vld [vmem:[#allocation18_spill] sm:$0xff] }
 0x138   :  { %v10117_v37 = vcombine.low %v2002_v55, %v2002_v55  ;;  %v12933_v26 = vsel %vm12524_vm5, %v2817_v15, %v2821_v47  ;;  %v2803_v40 = vrot.slane %v2802_v2, 4  ;;  %v10118_v39 = vcombine.high %v2002_v55, %v2002_v55  ;;  %4346 = vrot.lane.b32.xlu1 %v11413_v43, %s11908_s21  ;;  %v12955_v48 = vpop.permute.xlu0 %1884  ;;  %v11420_v55 = vld [vmem:[#allocation2 + $0x178] ss:$0 sps:$4 sm:$0xff]   ;;  %v16641_v43 = vld [vmem:[#allocation62_spill] sm:$0xff] }
 0x139   :  { %v2838_v3 = vshrl.u32 %v10119_v50, 16  ;;  %v2841_v62 = vshll.u32 %v10119_v50, 16  ;;  %v2847_v17 = vshll.u32 %v10120_v28, 16  ;;  %v10123_v45 = vcombine.low %v2011_v53, %v2011_v53  ;;  %v11419_v28 = vld [vmem:[#allocation2 + $0x180] ss:$0 sps:$4 sm:$0xff]   ;;  %4344 = vrot.lane.b32.xlu0 %v11414_v12, %s11908_s21 }
 0x13a   :  { %v2824_v60 = vshrl.u32 %v10117_v37, 16  ;;  %v12943_v47 = vsel %vm12524_vm5, %v2803_v40, %v2807_v38  ;;  %v2827_v52 = vshll.u32 %v10117_v37, 16  ;;  %v2833_v59 = vshll.u32 %v10118_v39, 16 }
 0x13b   :  { %v2840_v24 = vrot.slane %v2838_v3, 4  ;;  %v2843_v42 = vrot.slane %v2841_v62, 5  ;;  %v2849_v56 = vrot.slane %v2847_v17, 5  ;;  %v10124_v29 = vcombine.high %v2011_v53, %v2011_v53  ;;  %v12953_v11 = vpop.permute.xlu1 %1886 }
 0x13c   :  { %v2826_v6 = vrot.slane %v2824_v60, 4  ;;  %v2866_v20 = vshrl.u32 %v10123_v45, 16  ;;  %v2869_v9 = vshll.u32 %v10123_v45, 16  ;;  %v2829_v5 = vrot.slane %v2827_v52, 5  ;;  %v16640_v45 = vld [vmem:[#allocation19_spill] sm:$0xff]  ;;  %4350 = vrot.lane.b32.xlu1 %v11419_v28, %s11908_s21  ;;  %v16647_v28 = vld [vmem:[#allocation64_spill] sm:$0xff] }
 0x13d   :  { %v2844_v18 = vor.u32 %v2843_v42, %v2840_v24  ;;  %v2835_v63 = vrot.slane %v2833_v59, 5  ;;  %v2875_v7 = vshll.u32 %v10124_v29, 16  ;;  %v16639_v50 = vcombine.low %v16637_v21, %v16638_v23  ;;  %4348 = vrot.lane.b32.xlu0 %v11420_v55, %s11908_s21  ;;  %v12975_v59 = vpop.permute.xlu0 %1888 }
 0x13e   :  { %v2868_v15 = vrot.slane %v2866_v20, 4  ;;  %v2871_v2 = vrot.slane %v2869_v9, 5  ;;  %v2830_v16 = vor.u32 %v2829_v5, %v2826_v6  ;;  %v10201_v39 = vcombine.low %v12912_v10, %v12891_v54  ;;  %v11424_v54 = vld [vmem:[#allocation2 + $0x188] ss:$0 sps:$4 sm:$0xff]  }
 0x13f   :  { %v2008_v38 = vsel %vm309_vm0, %v16639_v50, %v12779_v30  ;;  %v2845_v25 = vrot.slane %v2844_v18, 4  ;;  %v2877_v0 = vrot.slane %v2875_v7, 5  ;;  %v10200_v30 = vcombine.low %v12886_v8, %v12865_v33  ;;  %v11423_v8 = vld [vmem:[#allocation2 + $0x190] ss:$0 sps:$4 sm:$0xff]   ;;  %v12973_v52 = vpop.permute.xlu1 %1890 }
 0x140   :  { %v10121_v19 = vcombine.low %v2008_v38, %v2008_v38  ;;  %v10122_v14 = vcombine.high %v2008_v38, %v2008_v38  ;;  %v2872_v3 = vor.u32 %v2871_v2, %v2868_v15  ;;  %v2831_v37 = vrot.slane %v2830_v16, 4  ;;  %v16644_v18 = vld [vmem:[#allocation63_spill] sm:$0xff]  ;;  %v16646_v38 = vld [vmem:[#allocation21_spill] sm:$0xff]  ;;  %4354 = vrot.lane.b32.xlu1 %v11423_v8, %s11908_s21 }
 0x141   :  { %v12961_v53 = vsel %vm12524_vm5, %v2845_v25, %v2849_v56  ;;  %11051 = vmatmul.mubr.msk.bf16.gmra.mrb[20].mxu1 %vm3424_vm6, %v10200_v30  ;;  %v16642_v24 = vcombine.low %v16640_v45, %v16641_v43  ;;  %v16645_v6 = vcombine.low %v16643_v31, %v16644_v18  ;;  %v16648_v25 = vcombine.low %v16646_v38, %v16647_v28  ;;  %v11429_v2 = vld [vmem:[#allocation2 + $0x1a0] ss:$0 sps:$4 sm:$0xff]   ;;  %v11430_v30 = vld [vmem:[#allocation2 + $0x198] ss:$0 sps:$4 sm:$0xff]  }
 0x142   :  { %v2852_v62 = vshrl.u32 %v10121_v19, 16  ;;  %v2855_v17 = vshll.u32 %v10121_v19, 16  ;;  %v2861_v40 = vshll.u32 %v10122_v14, 16  ;;  %v2873_v42 = vrot.slane %v2872_v3, 4  ;;  %11054 = vmatprep.mubr.msk.bf16.mxu1 %vm3424_vm6, %v10201_v39  ;;  %4352 = vrot.lane.b32.xlu0 %v11424_v54, %s11908_s21  ;;  %v13000_v14 = vpop.permute.xlu0 %1892  ;;  %v16649_v54 = vld [vmem:[#allocation22_spill] sm:$0xff] }
 0x143   :  { %v2017_v33 = vsel %vm309_vm0, %v16642_v24, %v12797_v58  ;;  %v12979_v10 = vsel %vm12524_vm5, %v2831_v37, %v2835_v63  ;;  %v2014_v20 = vsel %vm309_vm0, %v16645_v6, %v12799_v57  ;;  %v2023_v15 = vsel %vm309_vm0, %v16648_v25, %v12813_v35 }
 0x144   :  { %v2854_v56 = vrot.slane %v2852_v62, 4  ;;  %v2857_v60 = vrot.slane %v2855_v17, 5  ;;  %v10127_v12 = vcombine.low %v2017_v33, %v2017_v33  ;;  %v2863_v29 = vrot.slane %v2861_v40, 5  ;;  %4358 = vrot.lane.b32.xlu1 %v11429_v2, %s11908_s21 }
 0x145   :  { %v10128_v58 = vcombine.high %v2017_v33, %v2017_v33  ;;  %v12989_v9 = vsel %vm12524_vm5, %v2873_v42, %v2877_v0  ;;  %v10125_v63 = vcombine.low %v2014_v20, %v2014_v20  ;;  %v10126_v50 = vcombine.high %v2014_v20, %v2014_v20  ;;  %v12998_v0 = vpop.permute.xlu1 %1894  ;;  %v11433_v42 = vld [vmem:[#allocation2 + $0x1b8] ss:$0 sps:$4 sm:$0xff]   ;;  %v11434_v20 = vld [vmem:[#allocation2 + $0x1b0] ss:$0 sps:$4 sm:$0xff]  }
 0x146   :  { %v2858_v5 = vor.u32 %v2857_v60, %v2854_v56  ;;  %v2894_v7 = vshrl.u32 %v10127_v12, 16  ;;  %v2897_v21 = vshll.u32 %v10127_v12, 16  ;;  %v10131_v16 = vcombine.low %v2023_v15, %v2023_v15  ;;  %4356 = vrot.lane.b32.xlu0 %v11430_v30, %s11908_s21  ;;  %v13015_v6 = vpop.permute.xlu0 %1896 }
 0x147   :  { %v2903_v23 = vshll.u32 %v10128_v58, 16  ;;  %v2880_v62 = vshrl.u32 %v10125_v63, 16  ;;  %v2883_v17 = vshll.u32 %v10125_v63, 16  ;;  %v2889_v37 = vshll.u32 %v10126_v50, 16  ;;  %v16650_v58 = vld [vmem:[#allocation65_spill] sm:$0xff] }
 0x148   :  { %v2859_v57 = vrot.slane %v2858_v5, 4  ;;  %v2896_v19 = vrot.slane %v2894_v7, 4  ;;  %v2899_v55 = vrot.slane %v2897_v21, 5  ;;  %v10132_v39 = vcombine.high %v2023_v15, %v2023_v15  ;;  %4362 = vrot.lane.b32.xlu1 %v11433_v42, %s11908_s21 }
 0x149   :  { %v2905_v3 = vrot.slane %v2903_v23, 5  ;;  %v2922_v45 = vshrl.u32 %v10131_v16, 16  ;;  %v2882_v43 = vrot.slane %v2880_v62, 4  ;;  %v2885_v24 = vrot.slane %v2883_v17, 5  ;;  %v13013_v18 = vpop.permute.xlu1 %1898  ;;  %v16659_v62 = vld [vmem:[#allocation69_spill] sm:$0xff] }
 0x14a   :  { %v13004_v35 = vsel %vm12524_vm5, %v2859_v57, %v2863_v29  ;;  %v2900_v40 = vor.u32 %v2899_v55, %v2896_v19  ;;  %v2891_v33 = vrot.slane %v2889_v37, 5  ;;  %v2925_v8 = vshll.u32 %v10131_v16, 16  ;;  %v16652_v19 = vld [vmem:[#allocation23_spill] sm:$0xff]  ;;  %4360 = vrot.lane.b32.xlu0 %v11434_v20, %s11908_s21 }
 0x14b   :  { %v2924_v60 = vrot.slane %v2922_v45, 4  ;;  %v2931_v12 = vshll.u32 %v10132_v39, 16  ;;  %v16651_v31 = vcombine.low %v16649_v54, %v16650_v58  ;;  %v2886_v5 = vor.u32 %v2885_v24, %v2882_v43  ;;  %v16653_v55 = vld [vmem:[#allocation67_spill] sm:$0xff]  ;;  %v13045_v39 = vpop.permute.xlu0 %1900 }
 0x14c   :  { %v2901_v56 = vrot.slane %v2900_v40, 4  ;;  %v2927_v7 = vrot.slane %v2925_v8, 5  ;;  %v10202_v38 = vcombine.low %v12943_v47, %v12933_v26  ;;  %v16654_v16 = vcombine.low %v16652_v19, %v16653_v55  ;;  %v16655_v26 = vld [vmem:[#allocation24_spill] sm:$0xff] }
 0x14d   :  { %v2020_v29 = vsel %vm309_vm0, %v16651_v31, %v12815_v13  ;;  %v2933_v50 = vrot.slane %v2931_v12, 5  ;;  %v10203_v13 = vcombine.low %v12979_v10, %v12961_v53  ;;  %v2887_v28 = vrot.slane %v2886_v5, 4  ;;  %v16656_v47 = vld [vmem:[#allocation68_spill] sm:$0xff]  ;;  %v16658_v10 = vld [vmem:[#allocation25_spill] sm:$0xff]  ;;  %v13043_v40 = vpop.permute.xlu1 %1902 }
 0x14e   :  { %v10129_v21 = vcombine.low %v2020_v29, %v2020_v29  ;;  %v10130_v23 = vcombine.high %v2020_v29, %v2020_v29  ;;  %v13019_v63 = vsel %vm12524_vm5, %v2901_v56, %v2905_v3  ;;  %v2928_v25 = vor.u32 %v2927_v7, %v2924_v60  ;;  %11055 = vmatmul.mubr.msk.bf16.gmra.mrb[24].mxu1 %vm3424_vm6, %v10202_v38 }
 0x14f   :  { %v2029_v30 = vsel %vm309_vm0, %v16654_v16, %v12836_v51  ;;  %v16657_v3 = vcombine.low %v16655_v26, %v16656_v47  ;;  %v16660_v17 = vcombine.low %v16658_v10, %v16659_v62  ;;  %v2892_v51 = vsel %vm12524_vm5, %v2887_v28, %v2891_v33  ;;  %11058 = vmatprep.mubr.msk.bf16.mxu1 %vm3424_vm6, %v10203_v13  ;;  %v13056_v38 = vpop.permute.xlu0 %1904  ;;  %v16661_v26 = vld [vmem:[#allocation26_spill] sm:$0xff] }
 0x150   :  { %v2908_v15 = vshrl.u32 %v10129_v21, 16  ;;  %v2911_v2 = vshll.u32 %v10129_v21, 16  ;;  %v2917_v57 = vshll.u32 %v10130_v23, 16  ;;  %v2929_v45 = vrot.slane %v2928_v25, 4  ;;  %v16662_v47 = vld [vmem:[#allocation70_spill] sm:$0xff] }
 0x151   :  { %v2026_v53 = vsel %vm309_vm0, %v16657_v3, %v12838_v27  ;;  %v2035_v37 = vsel %vm309_vm0, %v16660_v17, %v12858_v1  ;;  %v10135_v8 = vcombine.low %v2029_v30, %v2029_v30  ;;  %v10136_v42 = vcombine.high %v2029_v30, %v2029_v30  ;;  %v13054_v20 = vpop.permute.xlu1 %1906 }
 0x152   :  { %v2910_v43 = vrot.slane %v2908_v15, 4  ;;  %v2913_v24 = vrot.slane %v2911_v2, 5  ;;  %v2919_v27 = vrot.slane %v2917_v57, 5  ;;  %v10133_v56 = vcombine.low %v2026_v53, %v2026_v53 }
 0x153   :  { %v13052_v1 = vsel %vm12524_vm5, %v2929_v45, %v2933_v50  ;;  %v10134_v12 = vcombine.high %v2026_v53, %v2026_v53  ;;  %v10139_v54 = vcombine.low %v2035_v37, %v2035_v37  ;;  %v2950_v58 = vshrl.u32 %v10135_v8, 16 }
 0x154   :  { %v2914_v60 = vor.u32 %v2913_v24, %v2910_v43  ;;  %v2953_v31 = vshll.u32 %v10135_v8, 16  ;;  %v2959_v29 = vshll.u32 %v10136_v42, 16  ;;  %v2936_v33 = vshrl.u32 %v10133_v56, 16  ;;  %v13069_v43 = vpop.permute.xlu0 %1908 }
 0x155   :  { %v2939_v7 = vshll.u32 %v10133_v56, 16  ;;  %v2945_v21 = vshll.u32 %v10134_v12, 16  ;;  %v10140_v23 = vcombine.high %v2035_v37, %v2035_v37  ;;  %v2952_v13 = vrot.slane %v2950_v58, 4  ;;  %v13067_v10 = vpop.permute.xlu1 %1910 }
 0x156   :  { %v2915_v5 = vrot.slane %v2914_v60, 4  ;;  %v2955_v28 = vrot.slane %v2953_v31, 5  ;;  %v2961_v25 = vrot.slane %v2959_v29, 5  ;;  %v2938_v50 = vrot.slane %v2936_v33, 4  ;;  %v16664_v29 = vld [vmem:[#allocation27_spill] sm:$0xff] }
 0x157   :  { %v2941_v2 = vrot.slane %v2939_v7, 5  ;;  %v2947_v57 = vrot.slane %v2945_v21, 5  ;;  %v2978_v19 = vshrl.u32 %v10139_v54, 16  ;;  %v2981_v16 = vshll.u32 %v10139_v54, 16  ;;  %v16665_v33 = vld [vmem:[#allocation71_spill] sm:$0xff] }
 0x158   :  { %v13060_v15 = vsel %vm12524_vm5, %v2915_v5, %v2919_v27  ;;  %v2956_v55 = vor.u32 %v2955_v28, %v2952_v13  ;;  %v2987_v30 = vshll.u32 %v10140_v23, 16  ;;  %v16663_v3 = vcombine.low %v16661_v26, %v16662_v47  ;;  %v13088_v28 = vpop.permute.xlu0 %1912  ;;  %v16671_v26 = vld [vmem:[#allocation73_spill] sm:$0xff] }
 0x159   :  { %v2942_v62 = vor.u32 %v2941_v2, %v2938_v50  ;;  %v2980_v17 = vrot.slane %v2978_v19, 4  ;;  %v2983_v27 = vrot.slane %v2981_v16, 5  ;;  %v10204_v42 = vcombine.low %v13004_v35, %v12989_v9  ;;  %v13084_v9 = vpop.permute.xlu1 %1914  ;;  %v16667_v50 = vld [vmem:[#allocation28_spill] sm:$0xff] }
 0x15a   :  { %v2032_v53 = vsel %vm309_vm0, %v16663_v3, %v12860_v34  ;;  %v2957_v24 = vrot.slane %v2956_v55, 4  ;;  %v2989_v8 = vrot.slane %v2987_v30, 5  ;;  %v10205_v31 = vcombine.low %v2892_v51, %v13019_v63  ;;  %v16668_v2 = vld [vmem:[#allocation72_spill] sm:$0xff] }
 0x15b   :  { %v10137_v37 = vcombine.low %v2032_v53, %v2032_v53  ;;  %v10138_v45 = vcombine.high %v2032_v53, %v2032_v53  ;;  %v2943_v56 = vrot.slane %v2942_v62, 4  ;;  %v2984_v58 = vor.u32 %v2983_v27, %v2980_v17  ;;  %11059 = vmatmul.mubr.msk.bf16.gmra.mrb[28].mxu1 %vm3424_vm6, %v10204_v42 }
 0x15c   :  { %v13075_v34 = vsel %vm12524_vm5, %v2957_v24, %v2961_v25  ;;  %v16666_v5 = vcombine.low %v16664_v29, %v16665_v33  ;;  %11062 = vmatprep.mubr.msk.bf16.mxu1 %vm3424_vm6, %v10205_v31  ;;  %v16669_v19 = vcombine.low %v16667_v50, %v16668_v2  ;;  %v11678_v2 = vld [vmem:[#allocation2 + $0x178] sm:$0xf] }
 0x15d   :  { %v2964_v60 = vshrl.u32 %v10137_v37, 16  ;;  %v2967_v12 = vshll.u32 %v10137_v37, 16  ;;  %v2973_v54 = vshll.u32 %v10138_v45, 16  ;;  %v2948_v35 = vsel %vm12524_vm5, %v2943_v56, %v2947_v57  ;;  %v16670_v57 = vld [vmem:[#allocation29_spill] sm:$0xff]  ;;  %v13105_v45 = vpop.permute.xlu1 %4266  ;;  %v13107_v56 = vpop.permute.xlu0 %4264 }
 0x15e   :  { %v2041_v7 = vsel %vm309_vm0, %v16666_v5, %v12880_v41  ;;  %v2985_v25 = vrot.slane %v2984_v58, 4  ;;  %v2038_v41 = vsel %vm309_vm0, %v16669_v19, %v12882_v4  ;;  %v16672_v47 = vcombine.low %v16670_v57, %v16671_v26 }
 0x15f   :  { %v2966_v21 = vrot.slane %v2964_v60, 4  ;;  %v2969_v23 = vrot.slane %v2967_v12, 5  ;;  %v2975_v13 = vrot.slane %v2973_v54, 5  ;;  %v10143_v63 = vcombine.low %v2041_v7, %v2041_v7 }
 0x160   :  { %v10144_v51 = vcombine.high %v2041_v7, %v2041_v7  ;;  %v10141_v16 = vcombine.low %v2038_v41, %v2038_v41  ;;  %v10142_v30 = vcombine.high %v2038_v41, %v2038_v41  ;;  %v2047_v3 = vsel %vm309_vm0, %v16672_v47, %v12894_v32  ;;  %v913_v32 = vld [vmem:[#allocation2 + $0x17c] sm:$0x1] }
 0x161   :  { %v2970_v55 = vor.u32 %v2969_v23, %v2966_v21  ;;  %v13103_v53 = vsel %vm12524_vm5, %v2985_v25, %v2989_v8  ;;  %v3006_v62 = vshrl.u32 %v10143_v63, 16  ;;  %v3009_v17 = vshll.u32 %v10143_v63, 16  ;;  %v919_v25 = vld [vmem:[#allocation2 + $0x194] sm:$0x1]  ;;  %v917_v63 = vld [vmem:[#allocation2 + $0x18c] sm:$0x1] }
 0x162   :  { %v3015_v37 = vshll.u32 %v10144_v51, 16  ;;  %v2992_v4 = vshrl.u32 %v10141_v16, 16  ;;  %v2995_v27 = vshll.u32 %v10141_v16, 16  ;;  %v3001_v42 = vshll.u32 %v10142_v30, 16  ;;  %v13113_v51 = vpop.permute.xlu1 %4270 }
 0x163   :  { %v2971_v24 = vrot.slane %v2970_v55, 4  ;;  %v3008_v60 = vrot.slane %v3006_v62, 4  ;;  %v3011_v12 = vrot.slane %v3009_v17, 5  ;;  %v10147_v58 = vcombine.low %v2047_v3, %v2047_v3  ;;  %v13118_v55 = vpop.permute.xlu0 %4268  ;;  %v11679_v62 = vld [vmem:[#allocation2 + $0x190] sm:$0xf] }
 0x164   :  { %v3017_v54 = vrot.slane %v3015_v37, 5  ;;  %v2994_v31 = vrot.slane %v2992_v4, 4  ;;  %v2997_v29 = vrot.slane %v2995_v27, 5  ;;  %v3003_v33 = vrot.slane %v3001_v42, 5  ;;  %v11680_v37 = vld [vmem:[#allocation2 + $0x188] sm:$0xf] }
 0x165   :  { %v13111_v8 = vsel %vm12524_vm5, %v2971_v24, %v2975_v13  ;;  %v3012_v5 = vor.u32 %v3011_v12, %v3008_v60  ;;  %v10148_v7 = vcombine.high %v2047_v3, %v2047_v3  ;;  %v3034_v21 = vshrl.u32 %v10147_v58, 16 }
 0x166   :  { %v3037_v23 = vshll.u32 %v10147_v58, 16  ;;  %v2998_v50 = vor.u32 %v2997_v29, %v2994_v31  ;;  %v9975_v19 = vcombine.low %v11678_v2, %v913_v32  ;;  %v10206_v41 = vcombine.low %v13060_v15, %v13052_v1  ;;  %v13134_v32 = vpop.permute.xlu1 %4274 }
 0x167   :  { %v10207_v13 = vcombine.low %v2948_v35, %v13075_v34  ;;  %v3013_v16 = vrot.slane %v3012_v5, 4  ;;  %v3036_v30 = vrot.slane %v3034_v21, 4  ;;  %v3043_v26 = vshll.u32 %v10148_v7, 16  ;;  %v13136_v21 = vpop.permute.xlu0 %4272 }
 0x168   :  { %v3039_v57 = vrot.slane %v3037_v23, 5  ;;  %v2999_v47 = vrot.slane %v2998_v50, 4  ;;  %v2044_v3 = vsel %vm309_vm0, %v9975_v19, %v12896_v61  ;;  %11063 = vmatmul.mubr.msk.bf16.gmra.mrb[32].mxu1 %vm3424_vm6, %v10206_v41  ;;  %v9978_v17 = vcombine.low %v11679_v62, %v919_v25  ;;  %v921_v41 = vld [vmem:[#allocation2 + $0x19c] sm:$0x1]  ;;  %v11681_v62 = vld [vmem:[#allocation2 + $0x1a0] sm:$0xf] }
 0x169   :  { %v9977_v24 = vcombine.low %v11680_v37, %v917_v63  ;;  %v13125_v1 = vsel %vm12524_vm5, %v3013_v16, %v3017_v54  ;;  %v3045_v34 = vrot.slane %v3043_v26, 5  ;;  %v10145_v35 = vcombine.low %v2044_v3, %v2044_v3  ;;  %11066 = vmatprep.mubr.msk.bf16.mxu1 %vm3424_vm6, %v10207_v13  ;;  %v927_v37 = vld [vmem:[#allocation2 + $0x1bc] sm:$0x1] }
 0x16a   :  { %v3040_v15 = vor.u32 %v3039_v57, %v3036_v30  ;;  %v3004_v4 = vsel %vm12524_vm5, %v2999_v47, %v3003_v33  ;;  %v10146_v27 = vcombine.high %v2044_v3, %v2044_v3  ;;  %v2053_v61 = vsel %vm309_vm0, %v9978_v17, %v12916_v36 }
 0x16b   :  { %v2050_v42 = vsel %vm309_vm0, %v9977_v24, %v12918_v46  ;;  %v3020_v12 = vshrl.u32 %v10145_v35, 16  ;;  %v3023_v58 = vshll.u32 %v10145_v35, 16  ;;  %v10151_v54 = vcombine.low %v2053_v61, %v2053_v61  ;;  %v923_v46 = vld [vmem:[#allocation2 + $0x1a4] sm:$0x1]  ;;  %v11682_v35 = vld [vmem:[#allocation2 + $0x198] sm:$0xf] }
 0x16c   :  { %v3041_v60 = vrot.slane %v3040_v15, 4  ;;  %v3029_v31 = vshll.u32 %v10146_v27, 16  ;;  %v10152_v29 = vcombine.high %v2053_v61, %v2053_v61  ;;  %v10149_v5 = vcombine.low %v2050_v42, %v2050_v42  ;;  %v925_v61 = vld [vmem:[#allocation2 + $0x1b4] sm:$0x1] }
 0x16d   :  { %v10150_v7 = vcombine.high %v2050_v42, %v2050_v42  ;;  %v3022_v36 = vrot.slane %v3020_v12, 4  ;;  %v3025_v23 = vrot.slane %v3023_v58, 5  ;;  %v3062_v25 = vshrl.u32 %v10151_v54, 16  ;;  %v13142_v42 = vpop.permute.xlu1 %4278 }
 0x16e   :  { %v13140_v33 = vsel %vm12524_vm5, %v3041_v60, %v3045_v34  ;;  %v3031_v63 = vrot.slane %v3029_v31, 5  ;;  %v3065_v50 = vshll.u32 %v10151_v54, 16  ;;  %v3071_v2 = vshll.u32 %v10152_v29, 16  ;;  %v13149_v31 = vpop.permute.xlu0 %4276 }
 0x16f   :  { %v3048_v19 = vshrl.u32 %v10149_v5, 16  ;;  %v3026_v13 = vor.u32 %v3025_v23, %v3022_v36  ;;  %v3064_v16 = vrot.slane %v3062_v25, 4  ;;  %v3051_v30 = vshll.u32 %v10149_v5, 16 }
 0x170   :  { %v3057_v57 = vshll.u32 %v10150_v7, 16  ;;  %v3067_v26 = vrot.slane %v3065_v50, 5  ;;  %v3073_v47 = vrot.slane %v3071_v2, 5  ;;  %v9980_v17 = vcombine.low %v11681_v62, %v923_v46 }
 0x171   :  { %v3050_v3 = vrot.slane %v3048_v19, 4  ;;  %v3027_v24 = vrot.slane %v3026_v13, 4  ;;  %v3053_v15 = vrot.slane %v3051_v30, 5  ;;  %v9979_v27 = vcombine.low %v11682_v35, %v921_v41  ;;  %v931_v13 = vld [vmem:[#allocation2 + $0x1cc] sm:$0x1] }
 0x172   :  { %v3059_v34 = vrot.slane %v3057_v57, 5  ;;  %v3068_v60 = vor.u32 %v3067_v26, %v3064_v16  ;;  %v2059_v12 = vsel %vm309_vm0, %v9980_v17, %v12937_v44  ;;  %v10208_v58 = vcombine.low %v13111_v8, %v13103_v53  ;;  %v11683_v44 = vld [vmem:[#allocation2 + $0x1b8] sm:$0xf]  ;;  %v11684_v53 = vld [vmem:[#allocation2 + $0x1b0] sm:$0xf] }
 0x173   :  { %v10209_v54 = vcombine.low %v3004_v4, %v13125_v1  ;;  %v13153_v29 = vsel %vm12524_vm5, %v3027_v24, %v3031_v63  ;;  %v3054_v5 = vor.u32 %v3053_v15, %v3050_v3  ;;  %v10155_v7 = vcombine.low %v2059_v12, %v2059_v12  ;;  %v13169_v3 = vpop.permute.xlu1 %4282  ;;  %v13171_v24 = vpop.permute.xlu0 %4280 }
 0x174   :  { %v10156_v36 = vcombine.high %v2059_v12, %v2059_v12  ;;  %v3069_v23 = vrot.slane %v3068_v60, 4  ;;  %v2056_v25 = vsel %vm309_vm0, %v9979_v27, %v12939_v22  ;;  %11067 = vmatmul.mubr.msk.bf16.gmra.mrb[36].mxu1 %vm3424_vm6, %v10208_v58  ;;  %v9982_v46 = vcombine.low %v11683_v44, %v927_v37  ;;  %v11685_v27 = vld [vmem:[#allocation2 + $0x1c8] sm:$0xf] }
 0x175   :  { %v9981_v8 = vcombine.low %v11684_v53, %v925_v61  ;;  %v3055_v1 = vrot.slane %v3054_v5, 4  ;;  %v3090_v4 = vshrl.u32 %v10155_v7, 16  ;;  %v3093_v50 = vshll.u32 %v10155_v7, 16  ;;  %11070 = vmatprep.mubr.msk.bf16.mxu1 %vm3424_vm6, %v10209_v54  ;;  %v929_v53 = vld [vmem:[#allocation2 + $0x1c4] sm:$0x1] }
 0x176   :  { %v3099_v2 = vshll.u32 %v10156_v36, 16  ;;  %v13161_v63 = vsel %vm12524_vm5, %v3069_v23, %v3073_v47  ;;  %v10153_v19 = vcombine.low %v2056_v25, %v2056_v25  ;;  %v10154_v41 = vcombine.high %v2056_v25, %v2056_v25 }
 0x177   :  { %v2065_v22 = vsel %vm309_vm0, %v9982_v46, %v12953_v11  ;;  %v13167_v16 = vsel %vm12524_vm5, %v3055_v1, %v3059_v34  ;;  %v3092_v30 = vrot.slane %v3090_v4, 4  ;;  %v3095_v57 = vrot.slane %v3093_v50, 5  ;;  %v13181_v50 = vpop.permute.xlu1 %4286 }
 0x178   :  { %v3101_v26 = vrot.slane %v3099_v2, 5  ;;  %v3076_v62 = vshrl.u32 %v10153_v19, 16  ;;  %v3079_v17 = vshll.u32 %v10153_v19, 16  ;;  %v3085_v37 = vshll.u32 %v10154_v41, 16 }
 0x179   :  { %v10159_v47 = vcombine.low %v2065_v22, %v2065_v22  ;;  %v3096_v15 = vor.u32 %v3095_v57, %v3092_v30  ;;  %v10160_v35 = vcombine.high %v2065_v22, %v2065_v22  ;;  %v2062_v11 = vsel %vm309_vm0, %v9981_v8, %v12955_v48 }
 0x17a   :  { %v9984_v61 = vcombine.low %v11685_v27, %v931_v13  ;;  %v3078_v34 = vrot.slane %v3076_v62, 4  ;;  %v3081_v60 = vrot.slane %v3079_v17, 5  ;;  %v3087_v12 = vrot.slane %v3085_v37, 5  ;;  %v13183_v13 = vpop.permute.xlu0 %4284 }
 0x17b   :  { %v3118_v58 = vshrl.u32 %v10159_v47, 16  ;;  %v3097_v54 = vrot.slane %v3096_v15, 4  ;;  %v3121_v5 = vshll.u32 %v10159_v47, 16  ;;  %v3127_v7 = vshll.u32 %v10160_v35, 16 }
 0x17c   :  { %v10157_v36 = vcombine.low %v2062_v11, %v2062_v11  ;;  %v3082_v23 = vor.u32 %v3081_v60, %v3078_v34  ;;  %v10158_v44 = vcombine.high %v2062_v11, %v2062_v11  ;;  %v2071_v46 = vsel %vm309_vm0, %v9984_v61, %v12973_v52  ;;  %v11686_v52 = vld [vmem:[#allocation2 + $0x1c0] sm:$0xf] }
 0x17d   :  { %v3120_v25 = vrot.slane %v3118_v58, 4  ;;  %v13179_v48 = vsel %vm12524_vm5, %v3097_v54, %v3101_v26  ;;  %v3123_v8 = vrot.slane %v3121_v5, 5  ;;  %v3129_v1 = vrot.slane %v3127_v7, 5  ;;  %v935_v5 = vld [vmem:[#allocation2 + $0x1dc] sm:$0x1] }
 0x17e   :  { %v3104_v4 = vshrl.u32 %v10157_v36, 16  ;;  %v3083_v2 = vrot.slane %v3082_v23, 4  ;;  %v3107_v19 = vshll.u32 %v10157_v36, 16  ;;  %v3113_v41 = vshll.u32 %v10158_v44, 16  ;;  %v933_v7 = vld [vmem:[#allocation2 + $0x1d4] sm:$0x1]  ;;  %v13197_v44 = vpop.permute.xlu1 %4290 }
 0x17f   :  { %v10163_v22 = vcombine.low %v2071_v46, %v2071_v46  ;;  %v3124_v30 = vor.u32 %v3123_v8, %v3120_v25  ;;  %v10164_v62 = vcombine.high %v2071_v46, %v2071_v46  ;;  %v9983_v17 = vcombine.low %v11686_v52, %v929_v53 }
 0x180   :  { %v3106_v57 = vrot.slane %v3104_v4, 4  ;;  %v13187_v26 = vsel %vm12524_vm5, %v3083_v2, %v3087_v12  ;;  %v3109_v37 = vrot.slane %v3107_v19, 5  ;;  %v3115_v47 = vrot.slane %v3113_v41, 5  ;;  %v939_v4 = vld [vmem:[#allocation2 + $0x1ec] sm:$0x1]  ;;  %v13199_v2 = vpop.permute.xlu0 %4288 }
 0x181   :  { %v3146_v15 = vshrl.u32 %v10163_v22, 16  ;;  %v3125_v35 = vrot.slane %v3124_v30, 4  ;;  %v3149_v11 = vshll.u32 %v10163_v22, 16  ;;  %v3155_v27 = vshll.u32 %v10164_v62, 16  ;;  %v11687_v41 = vld [vmem:[#allocation2 + $0x1d8] sm:$0xf] }
 0x182   :  { %v2068_v61 = vsel %vm309_vm0, %v9983_v17, %v12975_v59  ;;  %v3110_v34 = vor.u32 %v3109_v37, %v3106_v57  ;;  %v10210_v25 = vcombine.low %v13153_v29, %v13140_v33  ;;  %v9986_v22 = vcombine.low %v11687_v41, %v935_v5  ;;  %v11688_v30 = vld [vmem:[#allocation2 + $0x1d0] sm:$0xf]  ;;  %v937_v17 = vld [vmem:[#allocation2 + $0x1e4] sm:$0x1] }
 0x183   :  { %v3148_v60 = vrot.slane %v3146_v15, 4  ;;  %v10161_v58 = vcombine.low %v2068_v61, %v2068_v61  ;;  %v10162_v54 = vcombine.high %v2068_v61, %v2068_v61  ;;  %v13193_v36 = vsel %vm12524_vm5, %v3125_v35, %v3129_v1 }
 0x184   :  { %v3151_v12 = vrot.slane %v3149_v11, 5  ;;  %v3157_v23 = vrot.slane %v3155_v27, 5  ;;  %v3111_v46 = vrot.slane %v3110_v34, 4  ;;  %11071 = vmatmul.mubr.msk.bf16.gmra.mrb[40].mxu1 %vm3424_vm6, %v10210_v25  ;;  %v10211_v1 = vcombine.low %v13167_v16, %v13161_v63  ;;  %v11689_v16 = vld [vmem:[#allocation2 + $0x1e8] sm:$0xf] }
 0x185   :  { %v3132_v53 = vshrl.u32 %v10161_v58, 16  ;;  %v3135_v59 = vshll.u32 %v10161_v58, 16  ;;  %v3141_v8 = vshll.u32 %v10162_v54, 16  ;;  %v9985_v57 = vcombine.low %v11688_v30, %v933_v7  ;;  %v11690_v54 = vld [vmem:[#allocation2 + $0x1e0] sm:$0xf] }
 0x186   :  { %v3152_v19 = vor.u32 %v3151_v12, %v3148_v60  ;;  %v13206_v33 = vsel %vm12524_vm5, %v3111_v46, %v3115_v47  ;;  %11074 = vmatprep.mubr.msk.bf16.mxu1 %vm3424_vm6, %v10211_v1  ;;  %v2077_v15 = vsel %vm309_vm0, %v9986_v22, %v12998_v0  ;;  %v9988_v35 = vcombine.low %v11689_v16, %v939_v4  ;;  %v13219_v0 = vpop.permute.xlu1 %4294  ;;  %v13221_v46 = vpop.permute.xlu0 %4292 }
 0x187   :  { %v3134_v29 = vrot.slane %v3132_v53, 4  ;;  %v3137_v62 = vrot.slane %v3135_v59, 5  ;;  %v3143_v52 = vrot.slane %v3141_v8, 5  ;;  %v2074_v63 = vsel %vm309_vm0, %v9985_v57, %v13000_v14 }
 0x188   :  { %v3153_v37 = vrot.slane %v3152_v19, 4  ;;  %v10167_v27 = vcombine.low %v2077_v15, %v2077_v15  ;;  %v10168_v61 = vcombine.high %v2077_v15, %v2077_v15  ;;  %v10165_v47 = vcombine.low %v2074_v63, %v2074_v63 }
 0x189   :  { %v3138_v11 = vor.u32 %v3137_v62, %v3134_v29  ;;  %v10166_v60 = vcombine.high %v2074_v63, %v2074_v63  ;;  %v2083_v58 = vsel %vm309_vm0, %v9988_v35, %v13013_v18  ;;  %v9987_v5 = vcombine.low %v11690_v54, %v937_v17 }
 0x18a   :  { %v13215_v34 = vsel %vm12524_vm5, %v3153_v37, %v3157_v23  ;;  %v3174_v14 = vshrl.u32 %v10167_v27, 16  ;;  %v3177_v12 = vshll.u32 %v10167_v27, 16  ;;  %v3183_v25 = vshll.u32 %v10168_v61, 16  ;;  %v13233_v54 = vpop.permute.xlu0 %4296 }
 0x18b   :  { %v3139_v7 = vrot.slane %v3138_v11, 4  ;;  %v3160_v53 = vshrl.u32 %v10165_v47, 16  ;;  %v3163_v59 = vshll.u32 %v10165_v47, 16  ;;  %v3169_v8 = vshll.u32 %v10166_v60, 16  ;;  %v5264_v11 = vld [vmem:[#allocation2 + $0x10] sm:$0xf] }
 0x18c   :  { %v10171_v4 = vcombine.low %v2083_v58, %v2083_v58  ;;  %v3176_v19 = vrot.slane %v3174_v14, 4  ;;  %v3179_v18 = vrot.slane %v3177_v12, 5  ;;  %v3185_v1 = vrot.slane %v3183_v25, 5 }
 0x18d   :  { %v13225_v23 = vsel %vm12524_vm5, %v3139_v7, %v3143_v52  ;;  %v3162_v41 = vrot.slane %v3160_v53, 4  ;;  %v3165_v22 = vrot.slane %v3163_v59, 5  ;;  %v3171_v30 = vrot.slane %v3169_v8, 5  ;;  %v13229_v52 = vpop.permute.xlu1 %4298 }
 0x18e   :  { %v10172_v57 = vcombine.high %v2083_v58, %v2083_v58  ;;  %v3180_v29 = vor.u32 %v3179_v18, %v3176_v19  ;;  %v3202_v62 = vshrl.u32 %v10171_v4, 16  ;;  %v3205_v17 = vshll.u32 %v10171_v4, 16  ;;  %v943_v58 = vld [vmem:[#allocation2 + $0x204] sm:$0x1] }
 0x18f   :  { %v2080_v37 = vsel %vm309_vm0, %v9987_v5, %v13015_v6  ;;  %v3166_v15 = vor.u32 %v3165_v22, %v3162_v41  ;;  %v10212_v60 = vcombine.low %v13187_v26, %v13179_v48  ;;  %v941_v5 = vld [vmem:[#allocation2 + $0x1fc] sm:$0x1]  ;;  %v10213_v8 = vcombine.low %v13206_v33, %v13193_v36  ;;  %v5262_v48 = vld [vmem:[#allocation2 + $0x8] sm:$0xf]  ;;  %v947_v26 = vld [vmem:[#allocation2 + $0x214] sm:$0x1] }
 0x190   :  { %v3211_v63 = vshll.u32 %v10172_v57, 16  ;;  %v10169_v16 = vcombine.low %v2080_v37, %v2080_v37  ;;  %v10170_v35 = vcombine.high %v2080_v37, %v2080_v37  ;;  %v3181_v27 = vrot.slane %v3180_v29, 4  ;;  %v11691_v41 = vld [vmem:[#allocation2 + $0x200] sm:$0xf]  ;;  %v11692_v29 = vld [vmem:[#allocation2 + $0x1f8] sm:$0xf] }
 0x191   :  { %v3204_v61 = vrot.slane %v3202_v62, 4  ;;  %v3207_v47 = vrot.slane %v3205_v17, 5  ;;  %v3167_v7 = vrot.slane %v3166_v15, 4  ;;  %11075 = vmatmul.mubr.msk.bf16.gmra.mrb[44].mxu1 %vm3424_vm6, %v10212_v60  ;;  %v9990_v22 = vcombine.low %v11691_v41, %v943_v58  ;;  %v11693_v15 = vld [vmem:[#allocation2 + $0x210] sm:$0xf] }
 0x192   :  { %v3213_v14 = vrot.slane %v3211_v63, 5  ;;  %v3188_v12 = vshrl.u32 %v10169_v16, 16  ;;  %v3191_v6 = vshll.u32 %v10169_v16, 16  ;;  %v13237_v25 = vsel %vm12524_vm5, %v3181_v27, %v3185_v1  ;;  %11078 = vmatprep.mubr.msk.bf16.mxu1 %vm3424_vm6, %v10213_v8 }
 0x193   :  { %v3208_v53 = vor.u32 %v3207_v47, %v3204_v61  ;;  %v3197_v59 = vshll.u32 %v10170_v35, 16  ;;  %v13244_v4 = vsel %vm12524_vm5, %v3167_v7, %v3171_v30  ;;  %v9989_v62 = vcombine.low %v11692_v29, %v941_v5  ;;  %v13249_v30 = vpop.permute.xlu1 %4302  ;;  %v13257_v47 = vpop.permute.xlu0 %4300 }
 0x194   :  { %v3190_v19 = vrot.slane %v3188_v12, 4  ;;  %v3193_v18 = vrot.slane %v3191_v6, 5  ;;  %v10446_v17 = vcombine.low %v5264_v11, %v5264_v11  ;;  %v2089_v36 = vsel %vm309_vm0, %v9990_v22, %v13043_v40 }
 0x195   :  { %v3209_v57 = vrot.slane %v3208_v53, 4  ;;  %v3199_v1 = vrot.slane %v3197_v59, 5  ;;  %v10445_v33 = vcombine.low %v5262_v48, %v5262_v48  ;;  %v9992_v63 = vcombine.low %v11693_v15, %v947_v26 }
 0x196   :  { %v3194_v37 = vor.u32 %v3193_v18, %v3190_v19  ;;  %v10175_v35 = vcombine.low %v2089_v36, %v2089_v36  ;;  %v10176_v27 = vcombine.high %v2089_v36, %v2089_v36  ;;  %v2086_v61 = vsel %vm309_vm0, %v9989_v62, %v13045_v39  ;;  %v5268_v18 = vld [vmem:[#allocation2 + $0x20] sm:$0xf]  ;;  %v945_v62 = vld [vmem:[#allocation2 + $0x20c] sm:$0x1] }
 0x197   :  { %v13253_v16 = vsel %vm12524_vm5, %v3209_v57, %v3213_v14  ;;  %v10173_v60 = vcombine.low %v2086_v61, %v2086_v61  ;;  %v10174_v58 = vcombine.high %v2086_v61, %v2086_v61  ;;  %v5910_v40 = vshrl.u32 %v10446_v17, 16 }
 0x198   :  { %v3195_v11 = vrot.slane %v3194_v37, 4  ;;  %v3230_v7 = vshrl.u32 %v10175_v35, 16  ;;  %v3233_v12 = vshll.u32 %v10175_v35, 16  ;;  %v3239_v6 = vshll.u32 %v10176_v27, 16  ;;  %v13263_v37 = vpop.permute.xlu1 %4306  ;;  %v13267_v35 = vpop.permute.xlu0 %4304 }
 0x199   :  { %v5913_v5 = vshll.u32 %v10446_v17, 16  ;;  %v3216_v14 = vshrl.u32 %v10173_v60, 16  ;;  %v3219_v59 = vshll.u32 %v10173_v60, 16  ;;  %v3225_v8 = vshll.u32 %v10174_v58, 16 }
 0x19a   :  { %v13261_v53 = vsel %vm12524_vm5, %v3195_v11, %v3199_v1  ;;  %v3232_v48 = vrot.slane %v3230_v7, 4  ;;  %v3235_v26 = vrot.slane %v3233_v12, 5  ;;  %v3241_v39 = vrot.slane %v3239_v6, 5 }
 0x19b   :  { %v5912_v19 = vrot.slane %v5910_v40, 7  ;;  %v3218_v41 = vrot.slane %v3216_v14, 4  ;;  %v3221_v22 = vrot.slane %v3219_v59, 5  ;;  %v3227_v57 = vrot.slane %v3225_v8, 5  ;;  %v11694_v40 = vld [vmem:[#allocation2 + $0x208] sm:$0xf] }
 0x19c   :  { %v5903_v29 = vshrl.u32 %v10445_v33, 16  ;;  %v3236_v17 = vor.u32 %v3235_v26, %v3232_v48  ;;  %v5906_v15 = vshll.u32 %v10445_v33, 16  ;;  %v2095_v1 = vsel %vm309_vm0, %v9992_v63, %v13054_v20  ;;  %v5266_v26 = vld [vmem:[#allocation2 + $0x18] sm:$0xf] }
 0x19d   :  { %v5915_v36 = vor.u32 %v5913_v5, %v5912_v19  ;;  %v3222_v27 = vor.u32 %v3221_v22, %v3218_v41  ;;  %v10179_v11 = vcombine.low %v2095_v1, %v2095_v1  ;;  %v10180_v60 = vcombine.high %v2095_v1, %v2095_v1  ;;  %v951_v41 = vld [vmem:[#allocation2 + $0x224] sm:$0x1] }
 0x19e   :  { %v5905_v61 = vrot.slane %v5903_v29, 7  ;;  %v3237_v58 = vrot.slane %v3236_v17, 4  ;;  %v9991_v7 = vcombine.low %v11694_v40, %v945_v62  ;;  %v10214_v12 = vcombine.low %v13225_v23, %v13215_v34  ;;  %v13286_v17 = vpop.permute.xlu0 %4308 }
 0x19f   :  { %6352 = vrot.lane.b32.xlu1 %v5915_v36, %s11908_s21  ;;  %v10448_v6 = vcombine.low %v5268_v18, %v5268_v18  ;;  %v3223_v5 = vrot.slane %v3222_v27, 4  ;;  %v3258_v14 = vshrl.u32 %v10179_v11, 16  ;;  %v3261_v59 = vshll.u32 %v10179_v11, 16 }
 0x1a0   :  { %v5908_v33 = vor.u32 %v5906_v15, %v5905_v61  ;;  %v13274_v20 = vsel %vm12524_vm5, %v3237_v58, %v3241_v39  ;;  %v3267_v63 = vshll.u32 %v10180_v60, 16  ;;  %v2092_v8 = vsel %vm309_vm0, %v9991_v7, %v13056_v38  ;;  %11079 = vmatmul.mubr.msk.bf16.gmra.mrb[48].mxu1 %vm3424_vm6, %v10214_v12  ;;  %v13284_v39 = vpop.permute.xlu1 %4310  ;;  %v11695_v58 = vld [vmem:[#allocation2 + $0x220] sm:$0xf]  ;;  %v5392_v7 = vld [vmem:[#allocation2 + $0x8] sm:$0xf] }
 0x1a1   :  { %v5924_v48 = vshrl.u32 %v10448_v6, 16  ;;  %v13281_v34 = vsel %vm12524_vm5, %v3223_v5, %v3227_v57  ;;  %v3260_v23 = vrot.slane %v3258_v14, 4  ;;  %v3263_v19 = vrot.slane %v3261_v59, 5  ;;  %v949_v57 = vld [vmem:[#allocation2 + $0x21c] sm:$0x1] }
 0x1a2   :  { %6350 = vrot.lane.b32.xlu0 %v5908_v33, %s11908_s21  ;;  %v10177_v18 = vcombine.low %v2092_v8, %v2092_v8  ;;  %v3269_v22 = vrot.slane %v3267_v63, 5  ;;  %v10178_v29 = vcombine.high %v2092_v8, %v2092_v8  ;;  %v5927_v38 = vshll.u32 %v10448_v6, 16  ;;  %v5393_v6 = vld [vmem:[#allocation2 + $0xc] sm:$0x1] }
 0x1a3   :  { %v5926_v62 = vrot.slane %v5924_v48, 7  ;;  %v3264_v36 = vor.u32 %v3263_v19, %v3260_v23  ;;  %v10447_v27 = vcombine.low %v5266_v26, %v5266_v26  ;;  %v10215_v60 = vcombine.low %v13244_v4, %v13237_v25  ;;  %v11696_v48 = vld [vmem:[#allocation2 + $0x218] sm:$0xf] }
 0x1a4   :  { %v3244_v15 = vshrl.u32 %v10177_v18, 16  ;;  %v3247_v1 = vshll.u32 %v10177_v18, 16  ;;  %v3253_v61 = vshll.u32 %v10178_v29, 16  ;;  %v9994_v40 = vcombine.low %v11695_v58, %v951_v41  ;;  %v5390_v18 = vld [vmem:[#allocation2] sm:$0xf]  ;;  %v13298_v29 = vpop.permute.xlu1 %4314 }
 0x1a5   :  { %v5929_v11 = vor.u32 %v5927_v38, %v5926_v62  ;;  %v3265_v12 = vrot.slane %v3264_v36, 4  ;;  %v5917_v14 = vshrl.u32 %v10447_v27, 16  ;;  %v5920_v63 = vshll.u32 %v10447_v27, 16  ;;  %11082 = vmatprep.mubr.msk.bf16.mxu1 %vm3424_vm6, %v10215_v60  ;;  %v5391_v41 = vld [vmem:[#allocation2 + $0x4] sm:$0x1] }
 0x1a6   :  { %v3246_v5 = vrot.slane %v3244_v15, 4  ;;  %v3249_v33 = vrot.slane %v3247_v1, 5  ;;  %v3255_v59 = vrot.slane %v3253_v61, 5  ;;  %v2101_v8 = vsel %vm309_vm0, %v9994_v40, %v13067_v10  ;;  %v13304_v10 = vpop.permute.xlu0 %4312  ;;  %v955_v40 = vld [vmem:[#allocation2 + $0x234] sm:$0x1] }
 0x1a7   :  { %6356 = vrot.lane.b32.xlu1 %v5929_v11, %s11908_s21  ;;  %v9993_v26 = vcombine.low %v11696_v48, %v949_v57  ;;  %v13296_v25 = vsel %vm12524_vm5, %v3265_v12, %v3269_v22  ;;  %v5919_v23 = vrot.slane %v5917_v14, 7  ;;  %v10183_v19 = vcombine.low %v2101_v8, %v2101_v8  ;;  %v953_v12 = vld [vmem:[#allocation2 + $0x22c] sm:$0x1]  ;;  %v5396_v14 = vld [vmem:[#allocation2 + $0x18] sm:$0xf] }
 0x1a8   :  { %v3250_v4 = vor.u32 %v3249_v33, %v3246_v5  ;;  %v10184_v62 = vcombine.high %v2101_v8, %v2101_v8  ;;  %v10510_v36 = vcombine.low %v5392_v7, %v5393_v6  ;;  %v13302_v15 = vcombine.low %v5392_v7, %v5392_v7  ;;  %v5397_v6 = vld [vmem:[#allocation2 + $0x1c] sm:$0x1] }
 0x1a9   :  { %v2098_v38 = vsel %vm309_vm0, %v9993_v26, %v13069_v43  ;;  %v5922_v27 = vor.u32 %v5920_v63, %v5919_v23  ;;  %v3286_v22 = vshrl.u32 %v10183_v19, 16  ;;  %v3289_v57 = vshll.u32 %v10183_v19, 16  ;;  %v11697_v23 = vld [vmem:[#allocation2 + $0x230] sm:$0xf] }
 0x1aa   :  { %v3251_v1 = vrot.slane %v3250_v4, 4  ;;  %v3295_v61 = vshll.u32 %v10184_v62, 16  ;;  %v10181_v11 = vcombine.low %v2098_v38, %v2098_v38  ;;  %v10182_v60 = vcombine.high %v2098_v38, %v2098_v38  ;;  %v5394_v38 = vld [vmem:[#allocation2 + $0x10] sm:$0xf] }
 0x1ab   :  { %6800 = vrot.lane.b32.xlu1 %v10510_v36, %s11911_s4  ;;  %v10509_v58 = vcombine.low %v5390_v18, %v5391_v41  ;;  %6354 = vrot.lane.b32.xlu0 %v5922_v27, %s11908_s21  ;;  %v3288_v7 = vrot.slane %v3286_v22, 4  ;;  %v3291_v5 = vrot.slane %v3289_v57, 5  ;;  %v13312_v33 = vcombine.low %v5390_v18, %v5390_v18  ;;  %v11698_v41 = vld [vmem:[#allocation2 + $0x228] sm:$0xf]  ;;  %v13316_v36 = vpop.permute.xlu1 %4318  ;;  %v5395_v57 = vld [vmem:[#allocation2 + $0x14] sm:$0x1] }
 0x1ac   :  { %v13309_v43 = vsel %vm12524_vm5, %v3251_v1, %v3255_v59  ;;  %v3297_v63 = vrot.slane %v3295_v61, 5  ;;  %v3272_v8 = vshrl.u32 %v10181_v11, 16  ;;  %v3275_v48 = vshll.u32 %v10181_v11, 16  ;;  %v13318_v61 = vpop.permute.xlu0 %4316 }
 0x1ad   :  { %v3281_v26 = vshll.u32 %v10182_v60, 16  ;;  %v3292_v4 = vor.u32 %v3291_v5, %v3288_v7  ;;  %v9996_v19 = vcombine.low %v11697_v23, %v955_v40  ;;  %v9995_v62 = vcombine.low %v11698_v41, %v953_v12 }
 0x1ae   :  { %v10216_v59 = vcombine.low %v13261_v53, %v13253_v16  ;;  %v3274_v1 = vrot.slane %v3272_v8, 4  ;;  %v3277_v18 = vrot.slane %v3275_v48, 5  ;;  %v10512_v22 = vcombine.low %v5396_v14, %v5397_v6 }
 0x1af   :  { %v3283_v27 = vrot.slane %v3281_v26, 5  ;;  %v3293_v11 = vrot.slane %v3292_v4, 4  ;;  %6798 = vrot.lane.b32.xlu0 %v10509_v58, %s11911_s4  ;;  %v2107_v60 = vsel %vm309_vm0, %v9996_v19, %v13084_v9  ;;  %v2104_v40 = vsel %vm309_vm0, %v9995_v62, %v13088_v28 }
 0x1b0   :  { %11083 = vmatmul.mubr.msk.bf16.gmra.mrb[52].mxu1 %vm3424_vm6, %v10216_v59  ;;  %v13326_v16 = vcombine.low %v5396_v14, %v5396_v14  ;;  %v3278_v53 = vor.u32 %v3277_v18, %v3274_v1  ;;  %v10187_v12 = vcombine.low %v2107_v60, %v2107_v60  ;;  %v10188_v7 = vcombine.high %v2107_v60, %v2107_v60  ;;  %v3945_v14 = vld [vmem:[#allocation2 + $0x10] sm:$0xf]  ;;  %v3944_v59 = vld [vmem:[#allocation2 + $0x8] sm:$0xf] }
 0x1b1   :  { %v10185_v5 = vcombine.low %v2104_v40, %v2104_v40  ;;  %6804 = vrot.lane.b32.xlu1 %v10512_v22, %s11911_s4  ;;  %v13331_v6 = vsel %vm12524_vm5, %v3293_v11, %v3297_v63  ;;  %v10186_v58 = vcombine.high %v2104_v40, %v2104_v40  ;;  %v10511_v8 = vcombine.low %v5394_v38, %v5395_v57  ;;  %v13338_v63 = vpop.permute.xlu1 %4322  ;;  %v3947_v57 = vld [vmem:[#allocation2 + $0x20] sm:$0xf]  ;;  %v13342_v11 = vpop.permute.xlu0 %4320 }
 0x1b2   :  { %v13333_v9 = vcombine.low %v5394_v38, %v5394_v38  ;;  %v3279_v48 = vrot.slane %v3278_v53, 4  ;;  %v3314_v28 = vshrl.u32 %v10187_v12, 16  ;;  %v3317_v26 = vshll.u32 %v10187_v12, 16 }
 0x1b3   :  { %v3323_v4 = vshll.u32 %v10188_v7, 16  ;;  %v3300_v23 = vshrl.u32 %v10185_v5, 16  ;;  %v3303_v19 = vshll.u32 %v10185_v5, 16  ;;  %v3309_v41 = vshll.u32 %v10186_v58, 16  ;;  %6802 = vrot.lane.b32.xlu0 %v10511_v8, %s11911_s4 }
 0x1b4   :  { %v10217_v62 = vcombine.low %v13281_v34, %v13274_v20  ;;  %v3284_v38 = vsel %vm12524_vm5, %v3279_v48, %v3283_v27  ;;  %v3316_v1 = vrot.slane %v3314_v28, 4  ;;  %v3319_v18 = vrot.slane %v3317_v26, 5  ;;  %v3946_v34 = vld [vmem:[#allocation2 + $0x18] sm:$0xf] }
 0x1b5   :  { %v3325_v22 = vrot.slane %v3323_v4, 5  ;;  %v3302_v60 = vrot.slane %v3300_v23, 4  ;;  %v3305_v40 = vrot.slane %v3303_v19, 5  ;;  %v3311_v53 = vrot.slane %v3309_v41, 5  ;;  %v3949_v41 = vld [vmem:[#allocation2 + $0x30] sm:$0xf] }
 0x1b6   :  { %11086 = vmatprep.mubr.msk.bf16.mxu1 %vm3424_vm6, %v10217_v62  ;;  %v4397_v20 = vsel %vm309_vm0, %v3945_v14, %v13105_v45  ;;  %v3320_v12 = vor.u32 %v3319_v18, %v3316_v1  ;;  %v4394_v7 = vsel %vm309_vm0, %v3944_v59, %v13107_v56  ;;  %v6998_v27 = vshrl.u32 %v13302_v15, 16  ;;  %v5272_v62 = vld [vmem:[#allocation2 + $0x30] sm:$0xf]  ;;  %v13360_v59 = vpop.permute.xlu1 %4326  ;;  %v11699_v1 = vld [vmem:[#allocation8] sm:$0xf] }
 0x1b7   :  { %v7001_v5 = vshll.u32 %v13302_v15, 16  ;;  %v3306_v58 = vor.u32 %v3305_v40, %v3302_v60  ;;  %v10317_v8 = vcombine.low %v4394_v7, %v4397_v20  ;;  %v6991_v48 = vshrl.u32 %v13312_v33, 16  ;;  %v5270_v60 = vld [vmem:[#allocation2 + $0x28] sm:$0xf]  ;;  %v13368_v40 = vpop.permute.xlu0 %4324 }
 0x1b8   :  { %v6994_v28 = vshll.u32 %v13312_v33, 16  ;;  %v3321_v26 = vrot.slane %v3320_v12, 4  ;;  %v7000_v4 = vrot.slane %v6998_v27, 7  ;;  %v4403_v45 = vsel %vm309_vm0, %v3947_v57, %v13113_v51  ;;  %v3948_v57 = vld [vmem:[#allocation2 + $0x28] sm:$0xf] }
 0x1b9   :  { %v4400_v14 = vsel %vm309_vm0, %v3946_v34, %v13118_v55  ;;  %v3307_v23 = vrot.slane %v3306_v58, 4  ;;  %v6993_v56 = vrot.slane %v6991_v48, 7  ;;  %v10218_v15 = vcombine.low %v13309_v43, %v13296_v25  ;;  %11096 = vmatprep.mubr.msk.bf16.mxu0 %vm3424_vm6, %v10317_v8  ;;  %v3951_v34 = vld [vmem:[#allocation2 + $0x40] sm:$0xf]  ;;  %v3950_v48 = vld [vmem:[#allocation2 + $0x38] sm:$0xf] }
 0x1ba   :  { %v10318_v19 = vcombine.low %v4400_v14, %v4403_v45  ;;  %v13364_v33 = vsel %vm12524_vm5, %v3321_v26, %v3325_v22  ;;  %v7003_v51 = vor.u32 %v7001_v5, %v7000_v4  ;;  %v4842_v55 = vsel %vm3521_vm2, %v11699_v1, 0 }
 0x1bb   :  { %v7012_v18 = vshrl.u32 %v13326_v16, 16  ;;  %v3312_v25 = vsel %vm12524_vm5, %v3307_v23, %v3311_v53  ;;  %v6996_v43 = vor.u32 %v6994_v28, %v6993_v56  ;;  %11087 = vmatmul.mubr.msk.bf16.gmra.mrb[56].mxu1 %vm3424_vm6, %v10218_v15  ;;  %11095 = vmatpush3.bf16.msra.mxu0 %v4842_v55  ;;  %v7015_v22 = vshll.u32 %v13326_v16, 16  ;;  %v5276_v28 = vld [vmem:[#allocation2 + $0x40] sm:$0xf]  ;;  %v13387_v56 = vpop.permute.xlu1 %4330  ;;  %v11525_v15 = vld [vmem:[#allocation10] sm:$0xff]  }
 0x1bc   :  { %v7005_v20 = vshrl.u32 %v13333_v9, 16  ;;  %7440 = vrot.lane.b32.xlu1 %v7003_v51, %s11912_s26  ;;  %v7008_v7 = vshll.u32 %v13333_v9, 16  ;;  %v10219_v27 = vcombine.low %v3284_v38, %v13331_v6  ;;  %v4409_v53 = vsel %vm309_vm0, %v3949_v41, %v13134_v32  ;;  %v5274_v32 = vld [vmem:[#allocation2 + $0x38] sm:$0xf]  ;;  %v13394_v51 = vpop.permute.xlu0 %4328  ;;  %11160 = vmatprep.subr.bf16.mxu1 %v11525_v15 }
 0x1bd   :  { %v7014_v12 = vrot.slane %v7012_v18, 7  ;;  %7438 = vrot.lane.b32.xlu0 %v6996_v43, %s11912_s26  ;;  %v4406_v16 = vsel %vm309_vm0, %v3948_v57, %v13136_v21  ;;  %v10450_v58 = vcombine.low %v5272_v62, %v5272_v62  ;;  %v10449_v8 = vcombine.low %v5270_v60, %v5270_v60  ;;  %v3953_v9 = vld [vmem:[#allocation2 + $0x58] sm:$0xf]  ;;  %v3952_v21 = vld [vmem:[#allocation2 + $0x50] sm:$0xf]  ;;  %11161 = vmatpush3.bf16.msra.mxu1 %v11525_v15 }
 0x1be   :  { %v7007_v5 = vrot.slane %v7005_v20, 7  ;;  %11090 = vmatprep.mubr.msk.bf16.mxu1 %vm3424_vm6, %v10219_v27  ;;  %v10319_v4 = vcombine.low %v4406_v16, %v4409_v53  ;;  %11097 = vmatmul.mubr.msk.bf16.vlgmr.msra.gmra.mrb[64].mxu0 %vm3424_vm6, %v10318_v19  ;;  %v4415_v6 = vsel %vm309_vm0, %v3951_v34, %v13142_v42  ;;  %v4412_v62 = vsel %vm309_vm0, %v3950_v48, %v13149_v31  ;;  %v13397_v60 = vld [vmem:[#allocation2 + $0x28] sm:$0xf]  ;;  %v13405_v20 = vld [vmem:[#allocation2 + $0x20] sm:$0xf] }
 0x1bf   :  { %v7017_v26 = vor.u32 %v7015_v22, %v7014_v12  ;;  %v5938_v45 = vshrl.u32 %v10450_v58, 16  ;;  %v5941_v14 = vshll.u32 %v10450_v58, 16  ;;  %v5931_v23 = vshrl.u32 %v10449_v8, 16  ;;  %v3955_v53 = vld [vmem:[#allocation2 + $0x68] sm:$0xf] }
 0x1c0   :  { %v7010_v38 = vor.u32 %v7008_v7, %v7007_v5  ;;  %v5934_v41 = vshll.u32 %v10449_v8, 16  ;;  %v10220_v19 = vcombine.low %v3312_v25, %v13364_v33  ;;  %11100 = vmatprep.mubr.msk.bf16.mxu0 %vm3424_vm6, %v10319_v4  ;;  %v10452_v42 = vcombine.low %v5276_v28, %v5276_v28  ;;  %v13403_v25 = vld [vmem:[#allocation2 + $0x2c] sm:$0x1]  ;;  %v3954_v5 = vld [vmem:[#allocation2 + $0x60] sm:$0xf] }
 0x1c1   :  { %7444 = vrot.lane.b32.xlu1 %v7017_v26, %s11912_s26  ;;  %v5940_v1 = vrot.slane %v5938_v45, 7  ;;  %v5933_v55 = vrot.slane %v5931_v23, 7  ;;  %v10320_v18 = vcombine.low %v4412_v62, %v4415_v6  ;;  %v10451_v57 = vcombine.low %v5274_v32, %v5274_v32  ;;  %v5399_v8 = vld [vmem:[#allocation2 + $0x24] sm:$0x1]  ;;  %v3957_v26 = vld [vmem:[#allocation2 + $0x78] sm:$0xf]  ;;  %v13416_v6 = vpop.permute.xlu1 %4334 }
 0x1c2   :  { %7442 = vrot.lane.b32.xlu0 %v7010_v38, %s11912_s26  ;;  %v5952_v43 = vshrl.u32 %v10452_v42, 16  ;;  %v5955_v22 = vshll.u32 %v10452_v42, 16  ;;  %v4421_v31 = vsel %vm309_vm0, %v3953_v9, %v13169_v3  ;;  %v4418_v33 = vsel %vm309_vm0, %v3952_v21, %v13171_v24  ;;  %v13410_v24 = vld [vmem:[#allocation2 + $0x38] sm:$0xf]  ;;  %v3956_v4 = vld [vmem:[#allocation2 + $0x70] sm:$0xf]  ;;  %v13429_v21 = vpop.permute.xlu0 %4332 }
 0x1c3   :  { %v5943_v34 = vor.u32 %v5941_v14, %v5940_v1  ;;  %v5936_v12 = vor.u32 %v5934_v41, %v5933_v55  ;;  %11091 = vmatmul.mubr.msk.bf16.gmra.mrb[60].mxu1 %vm3424_vm6, %v10220_v19  ;;  %v5945_v7 = vshrl.u32 %v10451_v57, 16  ;;  %v5948_v27 = vshll.u32 %v10451_v57, 16  ;;  %v13427_v14 = vld [vmem:[#allocation2 + $0x30] sm:$0xf]  ;;  %v3959_v23 = vld [vmem:[#allocation2 + $0x88] sm:$0xf] }
 0x1c4   :  { %v5954_v16 = vrot.slane %v5952_v43, 7  ;;  %v10321_v58 = vcombine.low %v4418_v33, %v4421_v31  ;;  %v10578_v3 = vcombine.low %v13397_v60, %v13397_v60  ;;  %v10577_v28 = vcombine.low %v13405_v20, %v13405_v20  ;;  %v5405_v19 = vld [vmem:[#allocation2 + $0x3c] sm:$0x1]  ;;  %v5403_v57 = vld [vmem:[#allocation2 + $0x34] sm:$0x1] }
 0x1c5   :  { %6360 = vrot.lane.b32.xlu1 %v5943_v34, %s11908_s21  ;;  %v5947_v48 = vrot.slane %v5945_v7, 7  ;;  %v4427_v9 = vsel %vm309_vm0, %v3955_v53, %v13181_v50  ;;  %v4424_v38 = vsel %vm309_vm0, %v3954_v5, %v13183_v13  ;;  %v13425_v45 = vcombine.low %v13410_v24, %v13410_v24  ;;  %v3958_v13 = vld [vmem:[#allocation2 + $0x80] sm:$0xf]  ;;  %v5280_v31 = vld [vmem:[#allocation2 + $0x58] sm:$0xf]  ;;  %v13455_v5 = vpop.permute.xlu1 %4338 }
 0x1c6   :  { %6358 = vrot.lane.b32.xlu0 %v5936_v12, %s11908_s21  ;;  %v5957_v32 = vor.u32 %v5955_v22, %v5954_v16  ;;  %11101 = vmatmul.mubr.msk.bf16.gmra.mrb[68].mxu0 %vm3424_vm6, %v10320_v18  ;;  %v10514_v41 = vcombine.low %v13397_v60, %v13403_v25  ;;  %v13436_v50 = vcombine.low %v13427_v14, %v13427_v14  ;;  %v7026_v55 = vshrl.u32 %v10578_v3, 16  ;;  %v3960_v53 = vld [vmem:[#allocation2 + $0x98] sm:$0xf] }
 0x1c7   :  { %v5950_v15 = vor.u32 %v5948_v27, %v5947_v48  ;;  %11104 = vmatprep.mubr.msk.bf16.mxu0 %vm3424_vm6, %v10321_v58  ;;  %v10513_v62 = vcombine.low %v13405_v20, %v5399_v8  ;;  %v4433_v42 = vsel %vm309_vm0, %v3957_v26, %v13197_v44  ;;  %v4430_v1 = vsel %vm309_vm0, %v3956_v4, %v13199_v2  ;;  %v5278_v20 = vld [vmem:[#allocation2 + $0x50] sm:$0xf]  ;;  %v3961_v27 = vld [vmem:[#allocation2 + $0xa0] sm:$0xf]  ;;  %v3962_v8 = vld [vmem:[#allocation2 + $0xa8] sm:$0xf]  ;;  %v13462_v48 = vpop.permute.xlu0 %4336 }
 0x1c8   :  { %v10322_v18 = vcombine.low %v4424_v38, %v4427_v9  ;;  %v7029_v60 = vshll.u32 %v10578_v3, 16  ;;  %v7019_v43 = vshrl.u32 %v10577_v28, 16  ;;  %v13447_v22 = vsel %vm309_vm0, %v3959_v23, %v13219_v0  ;;  %v3963_v3 = vld [vmem:[#allocation2 + $0xb0] sm:$0xf]  ;;  %v5282_v9 = vld [vmem:[#allocation2 + $0x60] sm:$0xf] }
 0x1c9   :  { %6364 = vrot.lane.b32.xlu1 %v5957_v32, %s11908_s21  ;;  %v7028_v33 = vrot.slane %v7026_v55, 7  ;;  %v7022_v25 = vshll.u32 %v10577_v28, 16  ;;  %v13451_v44 = vsel %vm309_vm0, %v3958_v13, %v13221_v46  ;;  %v7040_v2 = vshrl.u32 %v13425_v45, 16  ;;  %v5284_v32 = vld [vmem:[#allocation2 + $0x68] sm:$0xf] }
 0x1ca   :  { %6362 = vrot.lane.b32.xlu0 %v5950_v15, %s11908_s21  ;;  %v10323_v34 = vcombine.low %v4430_v1, %v4433_v42  ;;  %v7021_v12 = vrot.slane %v7019_v43, 7  ;;  %v7033_v7 = vshrl.u32 %v13436_v50, 16  ;;  %v10516_v0 = vcombine.low %v13410_v24, %v5405_v19  ;;  %v3965_v15 = vld [vmem:[#allocation2 + $0xc0] sm:$0xf]  ;;  %v3964_v19 = vld [vmem:[#allocation2 + $0xb8] sm:$0xf]  ;;  %v13493_v43 = vpop.permute.xlu1 %4342 }
 0x1cb   :  { %v10515_v16 = vcombine.low %v13427_v14, %v5403_v57  ;;  %v10324_v58 = vcombine.low %v13451_v44, %v13447_v22  ;;  %v7043_v46 = vshll.u32 %v13425_v45, 16  ;;  %v7031_v28 = vor.u32 %v7029_v60, %v7028_v33  ;;  %v13489_v60 = vld [vmem:[#allocation2 + $0x50] sm:$0xf]  ;;  %v13545_v22 = vld [vmem:[#allocation2 + $0x64] sm:$0x1] }
 0x1cc   :  { %v7042_v26 = vrot.slane %v7040_v2, 7  ;;  %v7036_v4 = vshll.u32 %v13436_v50, 16  ;;  %v10454_v24 = vcombine.low %v5280_v31, %v5280_v31  ;;  %v7024_v38 = vor.u32 %v7022_v25, %v7021_v12 }
 0x1cd   :  { %6808 = vrot.lane.b32.xlu1 %v10514_v41, %s11911_s4  ;;  %v4445_v45 = vsel %vm309_vm0, %v3961_v27, %v13229_v52  ;;  %v4442_v14 = vsel %vm309_vm0, %v3960_v53, %v13233_v54  ;;  %v10453_v23 = vcombine.low %v5278_v20, %v5278_v20  ;;  %v7035_v41 = vrot.slane %v7033_v7, 7  ;;  %v13500_v20 = vld [vmem:[#allocation2 + $0x48] sm:$0xf]  ;;  %v13510_v53 = vld [vmem:[#allocation2 + $0x4c] sm:$0x1] }
 0x1ce   :  { %6806 = vrot.lane.b32.xlu0 %v10513_v62, %s11911_s4  ;;  %11105 = vmatmul.mubr.msk.bf16.gmra.mrb[72].mxu0 %vm3424_vm6, %v10322_v18  ;;  %v5966_v13 = vshrl.u32 %v10454_v24, 16  ;;  %v13475_v50 = vsel %vm309_vm0, %v3963_v3, %v13249_v30  ;;  %v13479_v62 = vsel %vm309_vm0, %v3962_v8, %v13257_v47  ;;  %v5969_v42 = vshll.u32 %v10454_v24, 16  ;;  %v13491_v47 = vld [vmem:[#allocation2 + $0x54] sm:$0x1]  ;;  %v3975_v7 = vld [vmem:[#allocation2 + $0x118] sm:$0xf] }
 0x1cf   :  { %11108 = vmatprep.mubr.msk.bf16.mxu0 %vm3424_vm6, %v10323_v34  ;;  %v5959_v52 = vshrl.u32 %v10453_v23, 16  ;;  %v10456_v1 = vcombine.low %v5284_v32, %v5284_v32  ;;  %v13481_v55 = vcombine.low %v5282_v9, %v5282_v9  ;;  %v10325_v54 = vcombine.low %v4442_v14, %v4445_v45  ;;  %v13502_v34 = vpop.permute.xlu0 %4340  ;;  %v13527_v45 = vld [vmem:[#allocation2 + $0x58] sm:$0xf]  ;;  %v3968_v14 = vld [vmem:[#allocation2 + $0xe0] sm:$0xf] }
 0x1d0   :  { %v5968_v18 = vrot.slane %v5966_v13, 7  ;;  %v5962_v57 = vshll.u32 %v10453_v23, 16  ;;  %v13487_v30 = vsel %vm309_vm0, %v3965_v15, %v13263_v37  ;;  %v13498_v2 = vsel %vm309_vm0, %v3964_v19, %v13267_v35  ;;  %v3971_v13 = vld [vmem:[#allocation2 + $0xf8] sm:$0xf]  ;;  %v3970_v19 = vld [vmem:[#allocation2 + $0xf0] sm:$0xf] }
 0x1d1   :  { %6812 = vrot.lane.b32.xlu1 %v10516_v0, %s11911_s4  ;;  %v5961_v31 = vrot.slane %v5959_v52, 7  ;;  %v5980_v33 = vshrl.u32 %v10456_v1, 16  ;;  %v5973_v25 = vshrl.u32 %v13481_v55, 16  ;;  %v7045_v37 = vor.u32 %v7043_v46, %v7042_v26  ;;  %v3967_v0 = vld [vmem:[#allocation2 + $0xd0] sm:$0xf]  ;;  %v13559_v52 = vpop.permute.xlu1 %4346 }
 0x1d2   :  { %6810 = vrot.lane.b32.xlu0 %v10515_v16, %s11911_s4  ;;  %v7038_v12 = vor.u32 %v7036_v4, %v7035_v41  ;;  %v13508_v27 = vcombine.low %v13489_v60, %v13489_v60  ;;  %v3966_v16 = vld [vmem:[#allocation2 + $0xc8] sm:$0xf]  ;;  %v13512_v3 = vor.u32 %v5969_v42, %v5968_v18  ;;  %v5983_v35 = vshll.u32 %v10456_v1, 16  ;;  %v13517_v26 = vld [vmem:[#allocation2 + $0x60] sm:$0xf] }
 0x1d3   :  { %v5976_v8 = vshll.u32 %v13481_v55, 16  ;;  %v3969_v4 = vld [vmem:[#allocation2 + $0xe8] sm:$0xf]  ;;  %v5982_v24 = vrot.slane %v5980_v33, 7  ;;  %v13525_v9 = vcombine.low %v13500_v20, %v13500_v20  ;;  %v13538_v41 = vsel %vm309_vm0, %v3967_v0, %v13284_v39  ;;  %v13561_v1 = vld [vmem:[#allocation2 + $0x5c] sm:$0x1] }
 0x1d4   :  { %v7054_v23 = vshrl.u32 %v13508_v27, 16  ;;  %v13543_v42 = vsel %vm309_vm0, %v3966_v16, %v13286_v17  ;;  %v13549_v44 = vcombine.low %v13517_v26, %v13517_v26  ;;  %v13557_v39 = vsel %vm309_vm0, %v3969_v4, %v13298_v29  ;;  %v13585_v16 = vpop.f32.mrb[0].mxu0 }
 0x1d5   :  { %7448 = vrot.lane.b32.xlu1 %v7031_v28, %s11912_s26  ;;  %v5964_v28 = vor.u32 %v5962_v57, %v5961_v31  ;;  %v13565_v17 = vsel %vm309_vm0, %v3968_v14, %v13304_v10  ;;  %v7047_v18 = vshrl.u32 %v13525_v9, 16  ;;  %v13569_v57 = vpop.permute.xlu0 %4344  ;;  %v13571_v31 = vpop.f32.mrb[0].mxu1  ;;  %v5985_v29 = vor.u32 %v5983_v35, %v5982_v24  ;;  %16673 = vst [vmem:[#allocation30_spill] sm:$0xff] %v13585_v16  ;;  %v3973_v35 = vld [vmem:[#allocation2 + $0x108] sm:$0xf] }
 0x1d6   :  { %7446 = vrot.lane.b32.xlu0 %v7024_v38, %s11912_s26  ;;  %11109 = vmatmul.mubr.msk.bf16.gmra.mrb[76].mxu0 %vm3424_vm6, %v10324_v58  ;;  %v5975_v38 = vrot.slane %v5973_v25, 7  ;;  %v13553_v58 = vcombine.low %v13527_v45, %v13527_v45  ;;  %v7056_v55 = vrot.slane %v7054_v23, 7  ;;  %v13577_v33 = vsel %vm309_vm0, %v3971_v13, %v13316_v36  ;;  %v5288_v25 = vld [vmem:[#allocation2 + $0x78] sm:$0xf]  ;;  %v13583_v0 = vpop.f32.mrb[1].mxu1 }
 0x1d7   :  { %11112 = vmatprep.mubr.msk.bf16.mxu0 %vm3424_vm6, %v10325_v54  ;;  %v7057_v54 = vshll.u32 %v13508_v27, 16  ;;  %v13581_v10 = vsel %vm309_vm0, %v3970_v19, %v13318_v61  ;;  %v5286_v27 = vld [vmem:[#allocation2 + $0x70] sm:$0xf]  ;;  %v7068_v36 = vshrl.u32 %v13549_v44, 16  ;;  %v13592_v24 = vpop.f32.mrb[2].mxu1  ;;  %v13594_v61 = vpop.f32.mrb[1].mxu0  ;;  %v10458_v14 = vcombine.low %v5288_v25, %v5288_v25 }
 0x1d8   :  { %v5978_v4 = vor.u32 %v5976_v8, %v5975_v38  ;;  %16674 = vst [vmem:[#allocation45_spill] sm:$0xff] %v13592_v24  ;;  %16675 = vst [vmem:[#allocation31_spill] sm:$0xff] %v13594_v61  ;;  %v7050_v8 = vshll.u32 %v13525_v9, 16  ;;  %v7061_v38 = vshrl.u32 %v13553_v58, 16  ;;  %v3972_v13 = vld [vmem:[#allocation2 + $0x100] sm:$0xf]  ;;  %v13621_v25 = vpop.permute.xlu1 %4350 }
 0x1d9   :  { %7452 = vrot.lane.b32.xlu1 %v7045_v37, %s11912_s26  ;;  %v5292_v19 = vld [vmem:[#allocation2 + $0x88] sm:$0xf]  ;;  %v13604_v37 = vpop.f32.mrb[2].mxu0  ;;  %v13606_v15 = vor.u32 %v7057_v54, %v7056_v55  ;;  %v7049_v46 = vrot.slane %v7047_v18, 7  ;;  %v7071_v9 = vshll.u32 %v13549_v44, 16  ;;  %v13619_v55 = vsel %vm309_vm0, %v3973_v35, %v13338_v63 }
 0x1da   :  { %7450 = vrot.lane.b32.xlu0 %v7038_v12, %s11912_s26  ;;  %v13602_v12 = vpop.f32.mrb[3].mxu1  ;;  %16677 = vst [vmem:[#allocation32_spill] sm:$0xff] %v13604_v37  ;;  %v13610_v23 = vpop.f32.mrb[3].mxu0  ;;  %v7064_v37 = vshll.u32 %v13553_v58, 16  ;;  %v10457_v54 = vcombine.low %v5286_v27, %v5286_v27  ;;  %v5290_v18 = vld [vmem:[#allocation2 + $0x80] sm:$0xf]  ;;  %v13631_v44 = vsel %vm309_vm0, %v3972_v13, %v13342_v11  ;;  %v13647_v11 = vsel %vm309_vm0, %v3974_v49, %v13368_v40 }
 0x1db   :  { %16676 = vst [vmem:[#allocation46_spill] sm:$0xff] %v13602_v12  ;;  %16678 = vst [vmem:[#allocation33_spill] sm:$0xff] %v13610_v23  ;;  %v13623_v32 = vpop.f32.mrb[4].mxu0  ;;  %v16680_v23 = vcombine.low %v13479_v62, %v13475_v50  ;;  %v5994_v58 = vshrl.u32 %v10458_v14, 16  ;;  %v3977_v63 = vld [vmem:[#allocation2 + $0x130] sm:$0xf]  ;;  %v13633_v27 = vpop.permute.xlu0 %4348  ;;  %v13653_v16 = vcombine.low %v5292_v19, %v5292_v19  ;;  %v13663_v49 = vor.u32 %v7050_v8, %v7049_v46 }
 0x1dc   :  { %16679 = vst [vmem:[#allocation48_spill] sm:$0xff] %v13623_v32  ;;  %v3976_v35 = vld [vmem:[#allocation2 + $0x128] sm:$0xf]  ;;  %v13635_v61 = vpop.f32.mrb[5].mxu0  ;;  %v16682_v32 = vcombine.low %v13498_v2, %v13487_v30  ;;  %v5997_v50 = vshll.u32 %v10458_v14, 16  ;;  %v5987_v62 = vshrl.u32 %v10457_v54, 16  ;;  %v13655_v30 = vcombine.low %v5290_v18, %v5290_v18 }
 0x1dd   :  { %6368 = vrot.lane.b32.xlu1 %v13512_v3, %s11908_s21  ;;  %v7070_v3 = vrot.slane %v7068_v36, 7  ;;  %16681 = vst [vmem:[#allocation34_spill] sm:$0xff] %v13635_v61  ;;  %v13643_v36 = vsel %vm309_vm0, %v3975_v7, %v13360_v59  ;;  %v5996_v13 = vrot.slane %v5994_v58, 7  ;;  %v5990_v61 = vshll.u32 %v10457_v54, 16  ;;  %v13657_v2 = vld [vmem:[#allocation2 + $0x74] sm:$0x1] }
 0x1de   :  { %6366 = vrot.lane.b32.xlu0 %v5964_v28, %s11908_s21  ;;  %11113 = vmatmul.mubr.msk.bf16.gmra.mrb[80].mxu0 %vm3424_vm6, %v16680_v23  ;;  %v7063_v28 = vrot.slane %v7061_v38, 7  ;;  %v13649_v23 = vld [vmem:[#allocation2 + $0x70] sm:$0xf]  ;;  %v13651_v38 = vpop.f32.mrb[6].mxu0  ;;  %16685 = vst [vmem:[#allocation50_spill] sm:$0xff] %v13657_v2  ;;  %v5989_v40 = vrot.slane %v5987_v62, 7 }
 0x1df   :  { %11116 = vmatprep.mubr.msk.bf16.mxu0 %vm3424_vm6, %v16682_v32  ;;  %16683 = vst [vmem:[#allocation49_spill] sm:$0xff] %v13649_v23  ;;  %16684 = vst [vmem:[#allocation35_spill] sm:$0xff] %v13651_v38  ;;  %v13659_v32 = vpop.f32.mrb[7].mxu0  ;;  %v13669_v7 = vcombine.low %v13649_v23, %v13649_v23  ;;  %v13671_v14 = vld [vmem:[#allocation2 + $0x68] sm:$0xf]  ;;  %v6008_v46 = vshrl.u32 %v13653_v16, 16  ;;  %v13703_v12 = vor.u32 %v5997_v50, %v5996_v13  ;;  %v13714_v2 = vpop.permute.xlu0 %4352 }
 0x1e0   :  { %16686 = vst [vmem:[#allocation36_spill] sm:$0xff] %v13659_v32  ;;  %v13673_v19 = vld [vmem:[#allocation2 + $0x6c] sm:$0x1]  ;;  %v3979_v54 = vld [vmem:[#allocation2 + $0x140] sm:$0xf]  ;;  %v13675_v18 = vpop.f32.mrb[8].mxu0  ;;  %v13689_v32 = vsel %vm309_vm0, %v3977_v63, %v13387_v56  ;;  %v13705_v59 = vor.u32 %v5990_v61, %v5989_v40  ;;  %v16690_v50 = vcombine.low %v13489_v60, %v13491_v47  ;;  %v16693_v60 = vcombine.low %v13543_v42, %v13538_v41 }
 0x1e1   :  { %6372 = vrot.lane.b32.xlu1 %v5985_v29, %s11908_s21  ;;  %16687 = vst [vmem:[#allocation51_spill] sm:$0xff] %v13675_v18  ;;  %v13677_v29 = vor.u32 %v7071_v9, %v7070_v3  ;;  %v6001_v8 = vshrl.u32 %v13655_v30, 16  ;;  %v3978_v58 = vld [vmem:[#allocation2 + $0x138] sm:$0xf]  ;;  %v13683_v62 = vld [vmem:[#allocation2 + $0x80] sm:$0xf]  ;;  %v13693_v9 = vsel %vm309_vm0, %v3976_v35, %v13394_v51  ;;  %v13699_v18 = vpop.permute.xlu1 %4354  ;;  %v13710_v51 = vcombine.low %v13671_v14, %v13671_v14 }
 0x1e2   :  { %6370 = vrot.lane.b32.xlu0 %v5978_v4, %s11908_s21  ;;  %v13679_v4 = vor.u32 %v7064_v37, %v7063_v28  ;;  %v13697_v3 = vld [vmem:[#allocation2 + $0x84] sm:$0x1]  ;;  %v3981_v28 = vld [vmem:[#allocation2 + $0x150] sm:$0xf]  ;;  %v13701_v38 = vpop.f32.mrb[9].mxu0  ;;  %v6011_v56 = vshll.u32 %v13653_v16, 16  ;;  %v16691_v16 = vcombine.low %v13500_v20, %v13510_v53  ;;  %v13729_v40 = vcombine.low %v13683_v62, %v13683_v62 }
 0x1e3   :  { %16688 = vst [vmem:[#allocation37_spill] sm:$0xff] %v13701_v38  ;;  %v13712_v63 = vld [vmem:[#allocation2 + $0x78] sm:$0xf]  ;;  %v3980_v35 = vld [vmem:[#allocation2 + $0x148] sm:$0xf]  ;;  %v13716_v23 = vpop.f32.mrb[10].mxu0  ;;  %v16695_v41 = vcombine.low %v13565_v17, %v13557_v39  ;;  %v13758_v42 = vsel %vm309_vm0, %v3978_v58, %v13429_v21 }
 0x1e4   :  { %v3983_v37 = vld [vmem:[#allocation2 + $0x160] sm:$0xf]  ;;  %16689 = vst [vmem:[#allocation53_spill] sm:$0xff] %v13716_v23  ;;  %v6010_v61 = vrot.slane %v6008_v46, 7  ;;  %v6004_v13 = vshll.u32 %v13655_v30, 16  ;;  %v7082_v38 = vshrl.u32 %v13669_v7, 16  ;;  %v13746_v30 = vsel %vm309_vm0, %v3979_v54, %v13416_v6 }
 0x1e5   :  { %6816 = vrot.lane.b32.xlu1 %v16690_v50, %s11911_s4  ;;  %v13732_v23 = vpop.f32.mrb[4].mxu1  ;;  %v13734_v24 = vpop.f32.mrb[11].mxu0  ;;  %v6003_v47 = vrot.slane %v6001_v8, 7  ;;  %v3982_v46 = vld [vmem:[#allocation2 + $0x158] sm:$0xf]  ;;  %v13766_v6 = vcombine.low %v13712_v63, %v13712_v63  ;;  %v13770_v54 = vsel %vm309_vm0, %v3981_v28, %v13455_v5  ;;  %v13778_v21 = vsel %vm309_vm0, %v3980_v35, %v13462_v48 }
 0x1e6   :  { %6814 = vrot.lane.b32.xlu0 %v16691_v16, %s11911_s4  ;;  %16692 = vst [vmem:[#allocation38_spill] sm:$0xff] %v13734_v24  ;;  %11117 = vmatmul.mubr.msk.bf16.gmra.mrb[84].mxu0 %vm3424_vm6, %v16693_v60  ;;  %v13748_v50 = vpop.f32.mrb[5].mxu1  ;;  %v13750_v16 = vpop.f32.mrb[12].mxu0  ;;  %v13762_v60 = vld [vmem:[#allocation2 + $0x7c] sm:$0x1]  ;;  %v7084_v58 = vrot.slane %v7082_v38, 7  ;;  %v16700_v5 = vcombine.low %v13517_v26, %v13545_v22  ;;  %v16701_v28 = vcombine.low %v13527_v45, %v13561_v1 }
 0x1e7   :  { %16694 = vst [vmem:[#allocation54_spill] sm:$0xff] %v13750_v16  ;;  %11120 = vmatprep.mubr.msk.bf16.mxu0 %vm3424_vm6, %v16695_v41  ;;  %v13772_v39 = vpop.f32.mrb[6].mxu1  ;;  %v13774_v17 = vpop.f32.mrb[13].mxu0  ;;  %v7085_v41 = vshll.u32 %v13669_v7, 16  ;;  %v7075_v8 = vshrl.u32 %v13710_v51, 16  ;;  %v13794_v48 = vor.u32 %v6011_v56, %v6010_v61  ;;  %v13798_v38 = vsel %vm309_vm0, %v3983_v37, %v13493_v43 }
 0x1e8   :  { %16696 = vst [vmem:[#allocation39_spill] sm:$0xff] %v13772_v39  ;;  %16697 = vst [vmem:[#allocation59_spill] sm:$0xff] %v13774_v17  ;;  %v13782_v53 = vpop.f32.mrb[7].mxu1  ;;  %v13784_v20 = vpop.f32.mrb[14].mxu0  ;;  %v13802_v7 = vsel %vm309_vm0, %v3982_v46, %v13502_v34  ;;  %v7096_v35 = vshrl.u32 %v13729_v40, 16  ;;  %v13809_v45 = vor.u32 %v6004_v13, %v6003_v47  ;;  %v7078_v56 = vshll.u32 %v13710_v51, 16 }
 0x1e9   :  { %16698 = vst [vmem:[#allocation41_spill] sm:$0xff] %v13782_v53  ;;  %16699 = vst [vmem:[#allocation42_spill] sm:$0xff] %v13784_v20  ;;  %6820 = vrot.lane.b32.xlu1 %v16700_v5, %s11911_s4  ;;  %v5296_v20 = vld [vmem:[#allocation2 + $0xa0] sm:$0xf]  ;;  %v5294_v26 = vld [vmem:[#allocation2 + $0x98] sm:$0xf]  ;;  %v13805_v22 = vpop.permute.xlu1 %4358  ;;  %v13824_v16 = vor.u32 %v7085_v41, %v7084_v58 }
 0x1ea   :  { %6818 = vrot.lane.b32.xlu0 %v16701_v28, %s11911_s4  ;;  %v13807_v5 = vpop.f32.mrb[15].mxu0  ;;  %v7077_v1 = vrot.slane %v7075_v8, 7  ;;  %v7089_v43 = vshrl.u32 %v13766_v6, 16  ;;  %v3985_v37 = vld [vmem:[#allocation2 + $0x178] sm:$0xf]  ;;  %v7099_v13 = vshll.u32 %v13729_v40, 16  ;;  %v10462_v34 = vcombine.low %v5296_v20, %v5296_v20 }
 0x1eb   :  { %16702 = vst [vmem:[#allocation60_spill] sm:$0xff] %v13807_v5  ;;  %v5300_v61 = vld [vmem:[#allocation2 + $0xb0] sm:$0xf]  ;;  %v13813_v28 = vpop.f32.mrb[16].mxu0  ;;  %v3987_v8 = vld [vmem:[#allocation2 + $0x188] sm:$0xf]  ;;  %v13837_v58 = vsel %vm309_vm0, %v3985_v37, %v13559_v52  ;;  %v13839_v41 = vcombine.low %v5294_v26, %v5294_v26  ;;  %v4357_v26 = vpop.permute.xlu0 %4356  ;;  %v16709_v37 = vcombine.low %v13631_v44, %v13619_v55 }
 0x1ec   :  { %16703 = vst [vmem:[#allocation43_spill] sm:$0xff] %v13813_v28  ;;  %v3984_v47 = vld [vmem:[#allocation2 + $0x170] sm:$0xf]  ;;  %v5298_v51 = vld [vmem:[#allocation2 + $0xa8] sm:$0xf]  ;;  %v13822_v17 = vpop.f32.mrb[17].mxu0  ;;  %v16707_v28 = vcombine.low %v13581_v10, %v13577_v33  ;;  %v13855_v52 = vsel %vm309_vm0, %v3987_v8, %v13621_v25 }
 0x1ed   :  { %16704 = vst [vmem:[#allocation61_spill] sm:$0xff] %v13822_v17  ;;  %v7098_v24 = vrot.slane %v7096_v35, 7  ;;  %v3986_v53 = vld [vmem:[#allocation2 + $0x180] sm:$0xf]  ;;  %v3989_v39 = vld [vmem:[#allocation2 + $0x198] sm:$0xf]  ;;  %7456 = vrot.lane.b32.xlu1 %v13606_v15, %s11912_s26  ;;  %v13847_v15 = vor.u32 %v7078_v56, %v7077_v1  ;;  %v13868_v1 = vcombine.low %v5300_v61, %v5300_v61  ;;  %v13876_v55 = vcombine.low %v5298_v51, %v5298_v51 }
 0x1ee   :  { %v13828_v46 = vpop.f32.mrb[18].mxu0  ;;  %7454 = vrot.lane.b32.xlu0 %v13663_v49, %s11912_s26  ;;  %v7091_v40 = vrot.slane %v7089_v43, 7  ;;  %v7092_v5 = vshll.u32 %v13766_v6, 16  ;;  %v3988_v20 = vld [vmem:[#allocation2 + $0x190] sm:$0xf]  ;;  %11121 = vmatmul.mubr.msk.bf16.gmra.mrb[88].mxu0 %vm3424_vm6, %v16707_v28  ;;  %v13851_v49 = vsel %vm309_vm0, %v3984_v47, %v13569_v57  ;;  %v6022_v6 = vshrl.u32 %v10462_v34, 16  ;;  %v4363_v28 = vpop.permute.xlu1 %4362 }
 0x1ef   :  { %16705 = vst [vmem:[#allocation44_spill] sm:$0xff] %v13828_v46  ;;  %v13841_v35 = vpop.f32.mrb[19].mxu0  ;;  %11124 = vmatprep.mubr.msk.bf16.mxu0 %vm3424_vm6, %v16709_v37  ;;  %v6025_v33 = vshll.u32 %v10462_v34, 16  ;;  %v6015_v10 = vshrl.u32 %v13839_v41, 16  ;;  %v13866_v57 = vsel %vm309_vm0, %v3986_v53, %v13633_v27  ;;  %v13870_v56 = vld [vmem:[#allocation2 + $0x98] sm:$0xf]  ;;  %v13880_v44 = vsel %vm309_vm0, %v3989_v39, %v13699_v18 }
 0x1f0   :  { %16706 = vst [vmem:[#allocation66_spill] sm:$0xff] %v13841_v35  ;;  %v13857_v43 = vpop.f32.mrb[20].mxu0  ;;  %16710 = vst [vmem:[#allocation52_spill] sm:$0xff] %v13870_v56  ;;  %v13872_v25 = vld [vmem:[#allocation2 + $0x9c] sm:$0x1]  ;;  %v6024_v8 = vrot.slane %v6022_v6, 7  ;;  %v13884_v27 = vsel %vm309_vm0, %v3988_v20, %v13714_v2  ;;  %v13894_v51 = vor.u32 %v7099_v13, %v7098_v24  ;;  %v13896_v6 = vor.u32 %v7092_v5, %v7091_v40 }
 0x1f1   :  { %16708 = vst [vmem:[#allocation47_spill] sm:$0xff] %v13857_v43  ;;  %16711 = vst [vmem:[#allocation55_spill] sm:$0xff] %v13872_v25  ;;  %v13874_v47 = vpop.f32.mrb[21].mxu0  ;;  %v3991_v53 = vld [vmem:[#allocation2 + $0x1a8] sm:$0xf]  ;;  %v13886_v61 = vpop.f32.mrb[8].mxu1  ;;  %7460 = vrot.lane.b32.xlu1 %v13677_v29, %s11912_s26 }
 0x1f2   :  { %16712 = vst [vmem:[#allocation16_spill] sm:$0xff] %v13874_v47  ;;  %16713 = vst [vmem:[#allocation56_spill] sm:$0xff] %v13880_v44  ;;  %v13888_v34 = vpop.f32.mrb[22].mxu0  ;;  %7458 = vrot.lane.b32.xlu0 %v13679_v4, %s11912_s26  ;;  %v6036_v2 = vshrl.u32 %v13868_v1, 16  ;;  %v13901_v39 = vld [vmem:[#allocation2 + $0x90] sm:$0xf]  ;;  %v13917_v47 = vor.u32 %v6025_v33, %v6024_v8  ;;  %v4361_v44 = vpop.permute.xlu0 %4360 }
 0x1f3   :  { %16714 = vst [vmem:[#allocation17_spill] sm:$0xff] %v13884_v27  ;;  %16715 = vst [vmem:[#allocation57_spill] sm:$0xff] %v13888_v34  ;;  %v13903_v20 = vld [vmem:[#allocation2 + $0x94] sm:$0x1]  ;;  %v3990_v37 = vld [vmem:[#allocation2 + $0x1a0] sm:$0xf]  ;;  %v13937_v8 = vcombine.low %v13901_v39, %v13901_v39 }
 0x1f4   :  { %v13905_v34 = vpop.f32.mrb[9].mxu1  ;;  %v13907_v29 = vpop.f32.mrb[23].mxu0  ;;  %v6017_v4 = vrot.slane %v6015_v10, 7  ;;  %v6018_v24 = vshll.u32 %v13839_v41, 16  ;;  %v6029_v13 = vshrl.u32 %v13876_v55, 16  ;;  %v6039_v43 = vshll.u32 %v13868_v1, 16 }
 0x1f5   :  { %16716 = vst [vmem:[#allocation18_spill] sm:$0xff] %v13907_v29  ;;  %v13913_v40 = vpop.f32.mrb[10].mxu1  ;;  %v13915_v18 = vpop.f32.mrb[24].mxu0  ;;  %v10590_v10 = vcombine.low %v13870_v56, %v13870_v56  ;;  %v13924_v41 = vld [vmem:[#allocation2 + $0xa8] sm:$0xf]  ;;  %v6032_v33 = vshll.u32 %v13876_v55, 16  ;;  %6376 = vrot.lane.b32.xlu1 %v13703_v12, %s11908_s21  ;;  %v13947_v55 = vsel %vm309_vm0, %v3991_v53, %v13805_v22  ;;  %v13950_v1 = vsel %vm309_vm0, %v3990_v37, %v4357_v26 }
 0x1f6   :  { %16717 = vst [vmem:[#allocation58_spill] sm:$0xff] %v13915_v18  ;;  %16718 = vst [vmem:[#allocation19_spill] sm:$0xff] %v13924_v41  ;;  %v13926_v29 = vld [vmem:[#allocation2 + $0xac] sm:$0x1]  ;;  %v3993_v5 = vld [vmem:[#allocation2 + $0x1c0] sm:$0xf]  ;;  %6374 = vrot.lane.b32.xlu0 %v13705_v59, %s11908_s21  ;;  %v13960_v12 = vor.u32 %v6018_v24, %v6017_v4  ;;  %v13966_v22 = vcombine.low %v13924_v41, %v13924_v41 }
 0x1f7   :  { %16719 = vst [vmem:[#allocation62_spill] sm:$0xff] %v13926_v29  ;;  %v13928_v46 = vpop.f32.mrb[11].mxu1  ;;  %v13930_v17 = vpop.f32.mrb[25].mxu0  ;;  %v6038_v18 = vrot.slane %v6036_v2, 7  ;;  %v3992_v35 = vld [vmem:[#allocation2 + $0x1b8] sm:$0xf] }
 0x1f8   :  { %16720 = vst [vmem:[#allocation20_spill] sm:$0xff] %v13930_v17  ;;  %v13939_v27 = vpop.f32.mrb[26].mxu0  ;;  %v6031_v2 = vrot.slane %v6029_v13, 7  ;;  %v13952_v17 = vld [vmem:[#allocation2 + $0xa0] sm:$0xf]  ;;  %v7110_v25 = vshrl.u32 %v10590_v10, 16 }
 0x1f9   :  { %16721 = vst [vmem:[#allocation63_spill] sm:$0xff] %v13939_v27  ;;  %16722 = vst [vmem:[#allocation21_spill] sm:$0xff] %v13952_v17  ;;  %v13954_v56 = vpop.f32.mrb[27].mxu0  ;;  %v16724_v27 = vcombine.low %v13647_v11, %v13643_v36  ;;  %v13968_v26 = vld [vmem:[#allocation2 + $0xa4] sm:$0x1]  ;;  %v13972_v53 = vcombine.low %v13952_v17, %v13952_v17  ;;  %v16727_v36 = vcombine.low %v13693_v9, %v13689_v32  ;;  %v7113_v24 = vshll.u32 %v10590_v10, 16 }
 0x1fa   :  { %16723 = vst [vmem:[#allocation64_spill] sm:$0xff] %v13954_v56  ;;  %16725 = vst [vmem:[#allocation22_spill] sm:$0xff] %v13968_v26  ;;  %v13974_v37 = vpop.f32.mrb[28].mxu0  ;;  %v13981_v11 = vsel %vm309_vm0, %v3993_v5, %v4363_v28  ;;  %v7112_v4 = vrot.slane %v7110_v25, 7  ;;  %v13986_v13 = vld [vmem:[#allocation2 + $0x14] sm:$0x1]  ;;  %v13990_v56 = vor.u32 %v6039_v43, %v6038_v18  ;;  %6380 = vrot.lane.b32.xlu1 %v13794_v48, %s11908_s21  ;;  %6378 = vrot.lane.b32.xlu0 %v13809_v45, %s11908_s21 }
 0x1fb   :  { %11125 = vmatmul.mubr.msk.bf16.gmra.mrb[92].mxu0 %vm3424_vm6, %v16724_v27  ;;  %16726 = vst [vmem:[#allocation65_spill] sm:$0xff] %v13974_v37  ;;  %16728 = vst [vmem:[#allocation23_spill] sm:$0xff] %v13981_v11  ;;  %v13984_v27 = vsel %vm309_vm0, %v3992_v35, %v4361_v44  ;;  %v13988_v59 = vpop.f32.mrb[29].mxu0  ;;  %v7103_v9 = vshrl.u32 %v13937_v8, 16  ;;  %v13997_v28 = vld [vmem:[#allocation2 + $0xc] sm:$0x1]  ;;  %v14005_v43 = vor.u32 %v6032_v33, %v6031_v2 }
 0x1fc   :  { %11128 = vmatprep.mubr.msk.bf16.mxu0 %vm3424_vm6, %v16727_v36  ;;  %16729 = vst [vmem:[#allocation67_spill] sm:$0xff] %v13988_v59  ;;  %v13999_v35 = vpop.f32.mrb[30].mxu0  ;;  %v7124_v18 = vshrl.u32 %v13966_v22, 16  ;;  %v5304_v5 = vld [vmem:[#allocation2 + $0xc0] sm:$0xf]  ;;  %v7106_v32 = vshll.u32 %v13937_v8, 16  ;;  %v3816_v2 = vpack.c.bf16 %v13571_v31, %v13571_v31  ;;  %v14026_v37 = vor.u32 %v7113_v24, %v7112_v4 }
 0x1fd   :  { %16730 = vst [vmem:[#allocation24_spill] sm:$0xff] %v13999_v35  ;;  %v5302_v10 = vld [vmem:[#allocation2 + $0xb8] sm:$0xf]  ;;  %v14012_v36 = vpop.f32.mrb[31].mxu0  ;;  %v14015_v48 = vld [vmem:[#allocation2 + $0x10] sm:$0xf]  ;;  %v3814_v45 = vpack.c.bf16 %v13583_v0, %v13583_v0  ;;  %v16740_v0 = vcombine.low %v13671_v14, %v13673_v19 }
 0x1fe   :  { %16731 = vst [vmem:[#allocation68_spill] sm:$0xff] %v14012_v36  ;;  %v7117_v33 = vshrl.u32 %v13972_v53, 16  ;;  %v14022_v25 = vld [vmem:[#allocation2 + $0x24] sm:$0x1]  ;;  %v14024_v44 = vpop.f32.mrb[32].mxu0  ;;  %16733 = vst [vmem:[#allocation69_spill] sm:$0xff] %v14026_v37  ;;  %v10466_v37 = vcombine.low %v5304_v5, %v5304_v5  ;;  %v10465_v5 = vcombine.low %v5302_v10, %v5302_v10 }
 0x1ff   :  { %16732 = vst [vmem:[#allocation25_spill] sm:$0xff] %v14024_v44  ;;  %v14028_v35 = vld [vmem:[#allocation2 + $0x8] sm:$0xf]  ;;  %v7127_v36 = vshll.u32 %v13966_v22, 16  ;;  %v14033_v59 = vld [vmem:[#allocation2 + $0x1c] sm:$0x1]  ;;  %6822 = vrot.lane.b32.xlu0 %v16740_v0, %s11911_s4 }
 0x200   :  { %v5308_v26 = vld [vmem:[#allocation2 + $0xd0] sm:$0xf]  ;;  %v14037_v31 = vpop.f32.mrb[33].mxu0  ;;  %v7105_v17 = vrot.slane %v7103_v9, 7  ;;  %v7120_v44 = vshll.u32 %v13972_v53, 16  ;;  %v16735_v4 = vld [vmem:[#allocation45_spill] sm:$0xff] }
 0x201   :  { %16734 = vst [vmem:[#allocation26_spill] sm:$0xff] %v14037_v31  ;;  %3881 = vst.msk [vmem:[#allocation11 + $0x28] sm:$0xf] %vm763_vm7, %v3816_v2  ;;  %v3817_v24 = vpack.c.bf16 %v16735_v4, %v16735_v4  ;;  %v5306_v8 = vld [vmem:[#allocation2 + $0xc8] sm:$0xf]  ;;  %v14043_v29 = vpop.f32.mrb[34].mxu0  ;;  %v14071_v10 = vcombine.low %v5308_v26, %v5308_v26 }
 0x202   :  { %16736 = vst [vmem:[#allocation70_spill] sm:$0xff] %v14043_v29  ;;  %v16737_v22 = vld [vmem:[#allocation49_spill] sm:$0xff]  ;;  %v16738_v41 = vld [vmem:[#allocation50_spill] sm:$0xff]  ;;  %v7126_v53 = vrot.slane %v7124_v18, 7  ;;  %3879 = vst.msk [vmem:[#allocation11 + $0x20] sm:$0xf] %vm763_vm7, %v3814_v45  ;;  %v14082_v0 = vcombine.low %v5306_v8, %v5306_v8 }
 0x203   :  { %v16739_v11 = vcombine.low %v16737_v22, %v16738_v41  ;;  %v14053_v9 = vld [vmem:[#allocation2 + $0x20] sm:$0xf]  ;;  %v14060_v31 = vpop.f32.mrb[35].mxu0  ;;  %v16743_v41 = vcombine.low %v13758_v42, %v13746_v30  ;;  %v7119_v14 = vrot.slane %v7117_v33, 7  ;;  %v14066_v19 = vld [vmem:[#allocation2 + $0x18] sm:$0xf]  ;;  %v16745_v30 = vcombine.low %v13778_v21, %v13770_v54 }
 0x204   :  { %v16741_v4 = vld [vmem:[#allocation46_spill] sm:$0xff]  ;;  %16742 = vst [vmem:[#allocation27_spill] sm:$0xff] %v14060_v31  ;;  %3882 = vst.msk [vmem:[#allocation11 + $0x2c] sm:$0xf] %vm763_vm7, %v3817_v24  ;;  %v6050_v18 = vshrl.u32 %v10466_v37, 16  ;;  %v14073_v45 = vpop.f32.mrb[12].mxu1  ;;  %v3820_v24 = vpack.c.bf16 %v13732_v23, %v13732_v23  ;;  %v16748_v23 = vcombine.low %v13683_v62, %v13697_v3  ;;  %v14119_v62 = vor.u32 %v7127_v36, %v7126_v53 }
 0x205   :  { %6824 = vrot.lane.b32.xlu1 %v16739_v11, %s11911_s4  ;;  %v3815_v29 = vpack.c.bf16 %v16741_v4, %v16741_v4  ;;  %11129 = vmatmul.mubr.msk.bf16.gmra.mrb[96].mxu0 %vm3424_vm6, %v16743_v41  ;;  %v14075_v22 = vpop.f32.mrb[36].mxu0  ;;  %v6053_v42 = vshll.u32 %v10466_v37, 16  ;;  %v6043_v33 = vshrl.u32 %v10465_v5, 16  ;;  %v14086_v26 = vld [vmem:[#allocation2 + $0xb8] sm:$0xf]  ;;  %v14088_v4 = vpop.f32.mrb[13].mxu1  ;;  %v14092_v11 = vor.u32 %v7106_v32, %v7105_v17 }
 0x206   :  { %16744 = vst [vmem:[#allocation71_spill] sm:$0xff] %v14075_v22  ;;  %11132 = vmatprep.mubr.msk.bf16.mxu0 %vm3424_vm6, %v16745_v30  ;;  %v14090_v41 = vpop.f32.mrb[37].mxu0  ;;  %v6052_v54 = vrot.slane %v6050_v18, 7  ;;  %v6064_v21 = vshrl.u32 %v14071_v10, 16  ;;  %v3818_v37 = vpack.c.bf16 %v13748_v50, %v13748_v50  ;;  %v14099_v8 = vpop.f32.mrb[14].mxu1  ;;  %v16749_v17 = vcombine.low %v13712_v63, %v13762_v60  ;;  %v16750_v2 = vld [vmem:[#allocation39_spill] sm:$0xff] }
 0x207   :  { %3880 = vst.msk [vmem:[#allocation11 + $0x24] sm:$0xf] %vm763_vm7, %v3815_v29  ;;  %16746 = vst [vmem:[#allocation28_spill] sm:$0xff] %v14090_v41  ;;  %v14097_v29 = vld [vmem:[#allocation2 + $0xbc] sm:$0x1]  ;;  %v14101_v30 = vpop.f32.mrb[38].mxu0  ;;  %v3821_v41 = vpack.c.bf16 %v16750_v2, %v16750_v2  ;;  %v14121_v3 = vor.u32 %v7120_v44, %v7119_v14  ;;  %v14127_v60 = vcombine.low %v14086_v26, %v14086_v26 }
 0x208   :  { %16747 = vst [vmem:[#allocation72_spill] sm:$0xff] %v14101_v30  ;;  %6826 = vrot.lane.b32.xlu0 %v16749_v17, %s11911_s4  ;;  %v6045_v32 = vrot.slane %v6043_v33, 7  ;;  %v6046_v18 = vshll.u32 %v10465_v5, 16  ;;  %v6057_v50 = vshrl.u32 %v14082_v0, 16  ;;  %3885 = vst.msk [vmem:[#allocation11 + $0x38] sm:$0xf] %vm763_vm7, %v3820_v24  ;;  %v14135_v24 = vor.u32 %v6053_v42, %v6052_v54 }
 0x209   :  { %6828 = vrot.lane.b32.xlu1 %v16748_v23, %s11911_s4  ;;  %v14115_v30 = vpop.f32.mrb[15].mxu1  ;;  %v14117_v22 = vpop.f32.mrb[39].mxu0  ;;  %v6067_v63 = vshll.u32 %v14071_v10, 16  ;;  %3883 = vst.msk [vmem:[#allocation11 + $0x30] sm:$0xf] %vm763_vm7, %v3818_v37  ;;  %v6066_v36 = vrot.slane %v6064_v21, 7 }
 0x20a   :  { %16751 = vst [vmem:[#allocation29_spill] sm:$0xff] %v14117_v22  ;;  %v14129_v5 = vld [vmem:[#allocation2 + $0xb0] sm:$0xf]  ;;  %v14131_v33 = vld [vmem:[#allocation2 + $0xb4] sm:$0x1]  ;;  %v14133_v2 = vpop.f32.mrb[40].mxu0  ;;  %v14163_v21 = vor.u32 %v6046_v18, %v6045_v32  ;;  %v3822_v32 = vpack.c.bf16 %v13905_v34, %v13905_v34  ;;  %v3825_v18 = vpack.c.bf16 %v13913_v40, %v13913_v40  ;;  %v3823_v40 = vpack.c.bf16 %v13928_v46, %v13928_v46 }
 0x20b   :  { %16752 = vst [vmem:[#allocation73_spill] sm:$0xff] %v14131_v33  ;;  %16753 = vst [vmem:[#allocation45_spill] sm:$0xff] %v14133_v2  ;;  %v6060_v44 = vshll.u32 %v14082_v0, 16  ;;  %v14141_v53 = vcombine.low %v14129_v5, %v14129_v5  ;;  %v14143_v14 = vld [vmem:[#allocation2 + $0xc8] sm:$0xf]  ;;  %v14145_v10 = vpop.f32.mrb[41].mxu0 }
 0x20c   :  { %3886 = vst.msk [vmem:[#allocation11 + $0x3c] sm:$0xf] %vm763_vm7, %v3821_v41  ;;  %16754 = vst [vmem:[#allocation49_spill] sm:$0xff] %v14145_v10  ;;  %v6059_v37 = vrot.slane %v6057_v50, 7  ;;  %v16755_v17 = vld [vmem:[#allocation41_spill] sm:$0xff]  ;;  %v14153_v0 = vcombine.low %v14143_v14, %v14143_v14  ;;  %v14157_v54 = vpop.f32.mrb[42].mxu0  ;;  %7462 = vrot.lane.b32.xlu0 %v13847_v15, %s11912_s26  ;;  %v3824_v15 = vpack.c.bf16 %v13886_v61, %v13886_v61 }
 0x20d   :  { %v3819_v42 = vpack.c.bf16 %v16755_v17, %v16755_v17  ;;  %v14155_v41 = vld [vmem:[#allocation2 + $0xc0] sm:$0xf]  ;;  %16756 = vst [vmem:[#allocation50_spill] sm:$0xff] %v14157_v54  ;;  %7464 = vrot.lane.b32.xlu1 %v13824_v16, %s11912_s26  ;;  %v14167_v17 = vld [vmem:[#allocation2 + $0xcc] sm:$0x1]  ;;  %v7138_v54 = vshrl.u32 %v14127_v60, 16  ;;  %v16758_v16 = vcombine.low %v13802_v7, %v13798_v38  ;;  %v16762_v7 = vcombine.low %v13851_v49, %v13837_v58 }
 0x20e   :  { %v14169_v23 = vld [vmem:[#allocation2 + $0xc4] sm:$0x1]  ;;  %v14173_v10 = vcombine.low %v14155_v41, %v14155_v41  ;;  %v14176_v2 = vpop.f32.mrb[43].mxu0  ;;  %v7141_v50 = vshll.u32 %v14127_v60, 16  ;;  %v14190_v22 = vld [vmem:[#allocation2 + $0x34] sm:$0x1]  ;;  %v14200_v61 = vor.u32 %v6067_v63, %v6066_v36  ;;  %v14207_v33 = vor.u32 %v6060_v44, %v6059_v37 }
 0x20f   :  { %16757 = vst [vmem:[#allocation46_spill] sm:$0xff] %v14176_v2  ;;  %11133 = vmatmul.mubr.msk.bf16.gmra.mrb[100].mxu0 %vm3424_vm6, %v16758_v16  ;;  %3884 = vst.msk [vmem:[#allocation11 + $0x34] sm:$0xf] %vm763_vm7, %v3819_v42  ;;  %v14192_v2 = vld [vmem:[#allocation2 + $0x2c] sm:$0x1]  ;;  %v14194_v38 = vpop.f32.mrb[44].mxu0 }
 0x210   :  { %16759 = vst [vmem:[#allocation39_spill] sm:$0xff] %v14190_v22  ;;  %16760 = vst [vmem:[#allocation41_spill] sm:$0xff] %v14192_v2  ;;  %11136 = vmatprep.mubr.msk.bf16.mxu0 %vm3424_vm6, %v16762_v7  ;;  %v7140_v42 = vrot.slane %v7138_v54, 7  ;;  %v7131_v34 = vshrl.u32 %v14141_v53, 16  ;;  %v5312_v60 = vld [vmem:[#allocation2 + $0xe8] sm:$0xf]  ;;  %7466 = vrot.lane.b32.xlu0 %v13896_v6, %s11912_s26 }
 0x211   :  { %16761 = vst [vmem:[#allocation74_spill] sm:$0xff] %v14194_v38  ;;  %v5310_v16 = vld [vmem:[#allocation2 + $0xe0] sm:$0xf]  ;;  %v14205_v31 = vpop.f32.mrb[45].mxu0  ;;  %3889 = vst.msk [vmem:[#allocation11 + $0xa8] sm:$0xf] %vm763_vm7, %v3824_v15  ;;  %7468 = vrot.lane.b32.xlu1 %v13894_v51, %s11912_s26  ;;  %v3828_v38 = vpack.c.bf16 %v14073_v45, %v14073_v45 }
 0x212   :  { %16763 = vst [vmem:[#allocation75_spill] sm:$0xff] %v14205_v31  ;;  %3887 = vst.msk [vmem:[#allocation11 + $0xa0] sm:$0xf] %vm763_vm7, %v3822_v32  ;;  %v7152_v46 = vshrl.u32 %v14153_v0, 16  ;;  %v5316_v49 = vld [vmem:[#allocation2 + $0xf8] sm:$0xf]  ;;  %v14238_v6 = vor.u32 %v7141_v50, %v7140_v42  ;;  %v3826_v31 = vpack.c.bf16 %v14088_v4, %v14088_v4  ;;  %v3829_v50 = vpack.c.bf16 %v14099_v8, %v14099_v8 }
 0x213   :  { %3890 = vst.msk [vmem:[#allocation11 + $0xac] sm:$0xf] %vm763_vm7, %v3825_v18  ;;  %v5314_v63 = vld [vmem:[#allocation2 + $0xf0] sm:$0xf]  ;;  %v14217_v36 = vpop.f32.mrb[46].mxu0  ;;  %v7145_v18 = vshrl.u32 %v14173_v10, 16 }
 0x214   :  { %16764 = vst [vmem:[#allocation76_spill] sm:$0xff] %v14217_v36  ;;  %3888 = vst.msk [vmem:[#allocation11 + $0xa4] sm:$0xf] %vm763_vm7, %v3823_v40  ;;  %v14225_v37 = vld [vmem:[#allocation2 + $0x30] sm:$0xf]  ;;  %v14236_v7 = vpop.f32.mrb[47].mxu0  ;;  %6382 = vrot.lane.b32.xlu0 %v13960_v12, %s11908_s21 }
 0x215   :  { %v14229_v15 = vld [vmem:[#allocation2 + $0x28] sm:$0xf]  ;;  %v14234_v51 = vld [vmem:[#allocation2 + $0x44] sm:$0x1]  ;;  %16767 = vst [vmem:[#allocation79_spill] sm:$0xff] %v14236_v7  ;;  %v7133_v58 = vrot.slane %v7131_v34, 7  ;;  %v10470_v34 = vcombine.low %v5312_v60, %v5312_v60  ;;  %6384 = vrot.lane.b32.xlu1 %v13917_v47, %s11908_s21  ;;  %v10471_v60 = vcombine.low %v5314_v63, %v5314_v63  ;;  %v16775_v47 = vcombine.low %v13866_v57, %v13855_v52 }
 0x216   :  { %16765 = vst [vmem:[#allocation77_spill] sm:$0xff] %v14229_v15  ;;  %16766 = vst [vmem:[#allocation78_spill] sm:$0xff] %v14234_v51  ;;  %v7155_v40 = vshll.u32 %v14153_v0, 16  ;;  %v14243_v54 = vld [vmem:[#allocation2 + $0x3c] sm:$0x1]  ;;  %v14245_v44 = vpop.f32.mrb[48].mxu0 }
 0x217   :  { %16768 = vst [vmem:[#allocation80_spill] sm:$0xff] %v14243_v54  ;;  %16769 = vst [vmem:[#allocation81_spill] sm:$0xff] %v14245_v44  ;;  %v7154_v36 = vrot.slane %v7152_v46, 7  ;;  %v7148_v32 = vshll.u32 %v14173_v10, 16  ;;  %v14252_v42 = vpop.f32.mrb[49].mxu0  ;;  %v10469_v44 = vcombine.low %v5310_v16, %v5310_v16  ;;  %v3827_v10 = vpack.c.bf16 %v14115_v30, %v14115_v30  ;;  %v11048_v46 = vpop.f32.mrb[16].mxu1  ;;  %11137 = vmatmul.mubr.msk.bf16.gmra.mrb[104].mxu0 %vm3424_vm6, %v16775_v47 }
 0x218   :  { %16770 = vst [vmem:[#allocation82_spill] sm:$0xff] %v14252_v42  ;;  %3893 = vst.msk [vmem:[#allocation11 + $0xb8] sm:$0xf] %vm763_vm7, %v3828_v38  ;;  %v14255_v0 = vld [vmem:[#allocation2 + $0x40] sm:$0xf]  ;;  %v14261_v7 = vpop.f32.mrb[50].mxu0  ;;  %v10472_v30 = vcombine.low %v5316_v49, %v5316_v49  ;;  %v3832_v2 = vpack.c.bf16 %v11048_v46, %v11048_v46  ;;  %6386 = vrot.lane.b32.xlu0 %v14005_v43, %s11908_s21 }
 0x219   :  { %16771 = vst [vmem:[#allocation83_spill] sm:$0xff] %v14255_v0  ;;  %16772 = vst [vmem:[#allocation84_spill] sm:$0xff] %v14261_v7  ;;  %v7147_v4 = vrot.slane %v7145_v18, 7  ;;  %v14267_v8 = vld [vmem:[#allocation2 + $0x38] sm:$0xf]  ;;  %v3623_v16 = vpop.f32.mrb[17].mxu1  ;;  %6388 = vrot.lane.b32.xlu1 %v13990_v56, %s11908_s21  ;;  %v14314_v56 = vor.u32 %v7155_v40, %v7154_v36 }
 0x21a   :  { %16773 = vst [vmem:[#allocation85_spill] sm:$0xff] %v14267_v8  ;;  %3891 = vst.msk [vmem:[#allocation11 + $0xb0] sm:$0xf] %vm763_vm7, %v3826_v31  ;;  %v14273_v45 = vpop.f32.mrb[51].mxu0  ;;  %v6078_v12 = vshrl.u32 %v10470_v34, 16  ;;  %v6081_v18 = vshll.u32 %v10470_v34, 16  ;;  %v3830_v15 = vpack.c.bf16 %v3623_v16, %v3623_v16  ;;  %v16784_v16 = vcombine.low %v14015_v48, %v13986_v13  ;;  %v6351_v48 = vpop.permute.xlu0 %6350 }
 0x21b   :  { %3894 = vst.msk [vmem:[#allocation11 + $0xbc] sm:$0xf] %vm763_vm7, %v3829_v50  ;;  %16774 = vst [vmem:[#allocation86_spill] sm:$0xff] %v14273_v45  ;;  %v6071_v7 = vshrl.u32 %v10469_v44, 16  ;;  %v6074_v42 = vshll.u32 %v10469_v44, 16  ;;  %v11049_v38 = vpop.f32.mrb[18].mxu1  ;;  %v14316_v43 = vor.u32 %v7148_v32, %v7147_v4 }
 0x21c   :  { %3892 = vst.msk [vmem:[#allocation11 + $0xb4] sm:$0xf] %vm763_vm7, %v3827_v10  ;;  %v14280_v31 = vld [vmem:[#allocation2 + $0xe0] sm:$0xf]  ;;  %v14282_v50 = vld [vmem:[#allocation2 + $0xe4] sm:$0x1]  ;;  %v6353_v10 = vpop.permute.xlu1 %6352 }
 0x21d   :  { %v14284_v49 = vpop.f32.mrb[52].mxu0  ;;  %v16777_v63 = vld [vmem:[#allocation17_spill] sm:$0xff]  ;;  %v16778_v45 = vld [vmem:[#allocation56_spill] sm:$0xff]  ;;  %v6092_v52 = vshrl.u32 %v10472_v30, 16  ;;  %v6095_v57 = vshll.u32 %v10472_v30, 16  ;;  %v6085_v47 = vshrl.u32 %v10471_v60, 16 }
 0x21e   :  { %16776 = vst [vmem:[#allocation87_spill] sm:$0xff] %v14284_v49  ;;  %v16779_v54 = vcombine.low %v16777_v63, %v16778_v45  ;;  %v6088_v34 = vshll.u32 %v10471_v60, 16  ;;  %v3626_v8 = vpop.f32.mrb[19].mxu1  ;;  %v14290_v44 = vpop.f32.mrb[53].mxu0  ;;  %v6080_v51 = vrot.slane %v6078_v12, 7  ;;  %v6073_v0 = vrot.slane %v6071_v7, 7 }
 0x21f   :  { %16780 = vst [vmem:[#allocation17_spill] sm:$0xff] %v14290_v44  ;;  %v14292_v22 = vld [vmem:[#allocation2 + $0xd8] sm:$0xf]  ;;  %v14294_v49 = vpop.f32.mrb[54].mxu0  ;;  %v6094_v30 = vrot.slane %v6092_v52, 7  ;;  %v6087_v60 = vrot.slane %v6085_v47, 7  ;;  %v3833_v12 = vpack.c.bf16 %v11049_v38, %v11049_v38  ;;  %v14312_v63 = vsel %vm309_vm0, %v16784_v16, %v6353_v10 }
 0x220   :  { %11140 = vmatprep.mubr.msk.bf16.mxu0 %vm3424_vm6, %v16779_v54  ;;  %16781 = vst [vmem:[#allocation56_spill] sm:$0xff] %v14294_v49  ;;  %v16782_v54 = vshll.u32 %v14141_v53, 16  ;;  %v14304_v7 = vld [vmem:[#allocation2 + $0xdc] sm:$0x1]  ;;  %v14306_v46 = vpop.f32.mrb[55].mxu0  ;;  %v14322_v53 = vcombine.low %v14280_v31, %v14280_v31  ;;  %v14330_v52 = vor.u32 %v6081_v18, %v6080_v51  ;;  %v14332_v36 = vor.u32 %v6074_v42, %v6073_v0 }
 0x221   :  { %16783 = vst [vmem:[#allocation88_spill] sm:$0xff] %v14306_v46  ;;  %3897 = vst.msk [vmem:[#allocation11 + $0x128] sm:$0xf] %vm763_vm7, %v3832_v2  ;;  %v14326_v38 = vld [vmem:[#allocation2 + $0xf4] sm:$0x1]  ;;  %v14328_v13 = vpop.f32.mrb[56].mxu0  ;;  %v14345_v47 = vor.u32 %v6095_v57, %v6094_v30  ;;  %v14347_v51 = vor.u32 %v6088_v34, %v6087_v60  ;;  %v3831_v42 = vpack.c.bf16 %v3626_v8, %v3626_v8 }
 0x222   :  { %v14302_v45 = vor.u32 %v16782_v54, %v7133_v58  ;;  %3895 = vst.msk [vmem:[#allocation11 + $0x120] sm:$0xf] %vm763_vm7, %v3830_v15  ;;  %v14324_v58 = vld [vmem:[#allocation2 + $0xf0] sm:$0xf]  ;;  %16785 = vst [vmem:[#allocation89_spill] sm:$0xff] %v14328_v13  ;;  %v10597_v15 = vcombine.low %v14292_v22, %v14292_v22  ;;  %v14343_v4 = vpop.f32.mrb[57].mxu0  ;;  %v16792_v57 = vcombine.low %v13901_v39, %v13903_v20 }
 0x223   :  { %3898 = vst.msk [vmem:[#allocation11 + $0x12c] sm:$0xf] %vm763_vm7, %v3833_v12  ;;  %v14339_v32 = vld [vmem:[#allocation2 + $0xe8] sm:$0xf]  ;;  %v14341_v40 = vld [vmem:[#allocation2 + $0xec] sm:$0x1]  ;;  %v14351_v0 = vcombine.low %v14324_v58, %v14324_v58  ;;  %v16793_v8 = vcombine.low %v14028_v35, %v13997_v28  ;;  %v16796_v39 = vcombine.low %v13950_v1, %v13947_v55 }
 0x224   :  { %16786 = vst [vmem:[#allocation90_spill] sm:$0xff] %v14343_v4  ;;  %v14353_v18 = vld [vmem:[#allocation2 + $0x5c] sm:$0x1]  ;;  %v14355_v10 = vpop.f32.mrb[58].mxu0  ;;  %v16789_v54 = vld [vmem:[#allocation52_spill] sm:$0xff]  ;;  %v16790_v12 = vld [vmem:[#allocation55_spill] sm:$0xff]  ;;  %6830 = vrot.lane.b32.xlu0 %v16792_v57, %s11911_s4  ;;  %v14375_v60 = vcombine.low %v14339_v32, %v14339_v32 }
 0x225   :  { %16787 = vst [vmem:[#allocation91_spill] sm:$0xff] %v14353_v18  ;;  %16788 = vst [vmem:[#allocation92_spill] sm:$0xff] %v14355_v10  ;;  %v16791_v16 = vcombine.low %v16789_v54, %v16790_v12  ;;  %v14369_v34 = vsel %vm309_vm0, %v16793_v8, %v6351_v48  ;;  %v7166_v54 = vshrl.u32 %v14322_v53, 16  ;;  %v14378_v12 = vld [vmem:[#allocation2 + $0x54] sm:$0x1]  ;;  %11141 = vmatmul.mubr.msk.bf16.gmra.mrb[108].mxu0 %vm3424_vm6, %v16796_v39  ;;  %v7169_v35 = vshll.u32 %v14322_v53, 16  ;;  %v6357_v10 = vpop.permute.xlu1 %6356 }
 0x226   :  { %16794 = vst [vmem:[#allocation52_spill] sm:$0xff] %v14378_v12  ;;  %3896 = vst.msk [vmem:[#allocation11 + $0x124] sm:$0xf] %vm763_vm7, %v3831_v42  ;;  %v7159_v48 = vshrl.u32 %v10597_v15, 16  ;;  %v14392_v57 = vld [vmem:[#allocation2 + $0x6c] sm:$0x1] }
 0x227   :  { %6832 = vrot.lane.b32.xlu1 %v16791_v16, %s11911_s4  ;;  %v14380_v16 = vpop.f32.mrb[59].mxu0  ;;  %16797 = vst [vmem:[#allocation93_spill] sm:$0xff] %v14392_v57  ;;  %v5320_v8 = vld [vmem:[#allocation2 + $0x108] sm:$0xf]  ;;  %v11052_v42 = vpop.f32.mrb[20].mxu1  ;;  %v7168_v39 = vrot.slane %v7166_v54, 7 }
 0x228   :  { %16795 = vst [vmem:[#allocation55_spill] sm:$0xff] %v14380_v16  ;;  %v14394_v30 = vpop.f32.mrb[60].mxu0  ;;  %v16799_v1 = vld [vmem:[#allocation23_spill] sm:$0xff]  ;;  %v7162_v2 = vshll.u32 %v10597_v15, 16  ;;  %v14400_v20 = vld [vmem:[#allocation2 + $0x58] sm:$0xf]  ;;  %v3836_v4 = vpack.c.bf16 %v11052_v42, %v11052_v42 }
 0x229   :  { %16798 = vst [vmem:[#allocation94_spill] sm:$0xff] %v14394_v30  ;;  %v16800_v55 = vcombine.low %v13984_v27, %v16799_v1  ;;  %16801 = vst [vmem:[#allocation23_spill] sm:$0xff] %v14400_v20  ;;  %v7180_v53 = vshrl.u32 %v14351_v0, 16  ;;  %v14405_v16 = vpop.f32.mrb[61].mxu0  ;;  %v3639_v30 = vpop.f32.mrb[21].mxu1  ;;  %v7161_v13 = vrot.slane %v7159_v48, 7 }
 0x22a   :  { %16802 = vst [vmem:[#allocation95_spill] sm:$0xff] %v14405_v16  ;;  %v14407_v46 = vld [vmem:[#allocation2 + $0x50] sm:$0xf]  ;;  %v7173_v15 = vshrl.u32 %v14375_v60, 16  ;;  %v5318_v54 = vld [vmem:[#allocation2 + $0x100] sm:$0xf]  ;;  %v3834_v42 = vpack.c.bf16 %v3639_v30, %v3639_v30 }
 0x22b   :  { %11144 = vmatprep.mubr.msk.bf16.mxu0 %vm3424_vm6, %v16800_v55  ;;  %16803 = vst [vmem:[#allocation96_spill] sm:$0xff] %v14407_v46  ;;  %v16804_v1 = vld [vmem:[#allocation19_spill] sm:$0xff]  ;;  %v16805_v55 = vld [vmem:[#allocation62_spill] sm:$0xff]  ;;  %v16807_v49 = vld [vmem:[#allocation21_spill] sm:$0xff]  ;;  %v11053_v48 = vpop.f32.mrb[22].mxu1  ;;  %v7182_v18 = vrot.slane %v7180_v53, 7  ;;  %v16811_v46 = vcombine.low %v14053_v9, %v14022_v25  ;;  %v14442_v25 = vor.u32 %v7162_v2, %v7161_v13  ;;  %v6355_v2 = vpop.permute.xlu0 %6354 }
 0x22c   :  { %v16806_v28 = vcombine.low %v16804_v1, %v16805_v55  ;;  %v16808_v16 = vld [vmem:[#allocation22_spill] sm:$0xff]  ;;  %v7183_v20 = vshll.u32 %v14351_v0, 16  ;;  %v7176_v27 = vshll.u32 %v14375_v60, 16  ;;  %v14422_v12 = vpop.f32.mrb[62].mxu0  ;;  %3901 = vst.msk [vmem:[#allocation11 + $0x138] sm:$0xf] %vm763_vm7, %v3836_v4  ;;  %v10473_v4 = vcombine.low %v5318_v54, %v5318_v54 }
 0x22d   :  { %v16809_v44 = vcombine.low %v16807_v49, %v16808_v16  ;;  %16810 = vst [vmem:[#allocation19_spill] sm:$0xff] %v14422_v12  ;;  %v14428_v1 = vsel %vm309_vm0, %v16811_v46, %v6357_v10  ;;  %v14431_v49 = vor.u32 %v7169_v35, %v7168_v39  ;;  %v14433_v30 = vld [vmem:[#allocation2 + $0x68] sm:$0xf]  ;;  %v14437_v60 = vld [vmem:[#allocation2 + $0x64] sm:$0x1]  ;;  %v14439_v16 = vpop.f32.mrb[63].mxu0  ;;  %v10474_v46 = vcombine.low %v5320_v8, %v5320_v8  ;;  %v6801_v39 = vpop.permute.xlu1 %6800 }
 0x22e   :  { %6836 = vrot.lane.b32.xlu1 %v16806_v28, %s11911_s4  ;;  %v3837_v28 = vpack.c.bf16 %v11053_v48, %v11053_v48  ;;  %16812 = vst [vmem:[#allocation62_spill] sm:$0xff] %v14437_v60  ;;  %16813 = vst [vmem:[#allocation21_spill] sm:$0xff] %v14439_v16  ;;  %v5324_v10 = vld [vmem:[#allocation2 + $0x118] sm:$0xf]  ;;  %v5322_v35 = vld [vmem:[#allocation2 + $0x110] sm:$0xf]  ;;  %v14456_v8 = vor.u32 %v7183_v20, %v7182_v18 }
 0x22f   :  { %6834 = vrot.lane.b32.xlu0 %v16809_v44, %s11911_s4  ;;  %v3642_v44 = vpop.f32.mrb[23].mxu1  ;;  %3899 = vst.msk [vmem:[#allocation11 + $0x130] sm:$0xf] %vm763_vm7, %v3834_v42  ;;  %v7175_v53 = vrot.slane %v7173_v15, 7  ;;  %v16814_v55 = vld [vmem:[#allocation30_spill] sm:$0xff]  ;;  %v16815_v0 = vld [vmem:[#allocation31_spill] sm:$0xff] }
 0x230   :  { %v3835_v9 = vpack.c.bf16 %v3642_v44, %v3642_v44  ;;  %3902 = vst.msk [vmem:[#allocation11 + $0x13c] sm:$0xf] %vm763_vm7, %v3837_v28  ;;  %v701_v48 = vpack.c.bf16 %v16814_v55, %v16814_v55  ;;  %v699_v12 = vpack.c.bf16 %v16815_v0, %v16815_v0  ;;  %v16816_v16 = vld [vmem:[#allocation32_spill] sm:$0xff]  ;;  %v16817_v13 = vld [vmem:[#allocation69_spill] sm:$0xff]  ;;  %v6106_v28 = vshrl.u32 %v10474_v46, 16 }
 0x231   :  { %v702_v42 = vpack.c.bf16 %v16816_v16, %v16816_v16  ;;  %v14458_v15 = vld [vmem:[#allocation2 + $0x60] sm:$0xf]  ;;  %v6099_v44 = vshrl.u32 %v10473_v4, 16  ;;  %v6109_v0 = vshll.u32 %v10474_v46, 16  ;;  %v6102_v16 = vshll.u32 %v10473_v4, 16  ;;  %v16819_v57 = vld [vmem:[#allocation48_spill] sm:$0xff] }
 0x232   :  { %7472 = vrot.lane.b32.xlu1 %v16817_v13, %s11912_s26  ;;  %3900 = vst.msk [vmem:[#allocation11 + $0x134] sm:$0xf] %vm763_vm7, %v3835_v9  ;;  %766 = vst.msk [vmem:[#allocation11 + $0x8] sm:$0xf] %vm763_vm7, %v701_v48  ;;  %v10475_v55 = vcombine.low %v5322_v35, %v5322_v35  ;;  %v6108_v9 = vrot.slane %v6106_v28, 7  ;;  %v16818_v20 = vld [vmem:[#allocation33_spill] sm:$0xff]  ;;  %v705_v54 = vpack.c.bf16 %v16819_v57, %v16819_v57  ;;  %v6799_v35 = vpop.permute.xlu0 %6798 }
 0x233   :  { %7470 = vrot.lane.b32.xlu0 %v14092_v11, %s11912_s26  ;;  %764 = vst.msk [vmem:[#allocation11] sm:$0xf] %vm763_vm7, %v699_v12  ;;  %767 = vst.msk [vmem:[#allocation11 + $0xc] sm:$0xf] %vm763_vm7, %v702_v42  ;;  %v10476_v11 = vcombine.low %v5324_v10, %v5324_v10  ;;  %v6101_v18 = vrot.slane %v6099_v44, 7  ;;  %v700_v13 = vpack.c.bf16 %v16818_v20, %v16818_v20 }
 0x234   :  { %v14471_v46 = vsel %vm3424_vm6, %v14312_v63, %v6801_v39  ;;  %v14473_v4 = vor.u32 %v7176_v27, %v7175_v53  ;;  %v6113_v12 = vshrl.u32 %v10475_v55, 16  ;;  %v14475_v60 = vld [vmem:[#allocation2 + $0x100] sm:$0xf]  ;;  %v14477_v10 = vld [vmem:[#allocation2 + $0x104] sm:$0x1]  ;;  %v16820_v57 = vcombine.low %v14066_v19, %v14033_v59 }
 0x235   :  { %v6120_v48 = vshrl.u32 %v10476_v11, 16  ;;  %v6123_v27 = vshll.u32 %v10476_v11, 16  ;;  %v6116_v39 = vshll.u32 %v10475_v55, 16  ;;  %765 = vst.msk [vmem:[#allocation11 + $0x4] sm:$0xf] %vm763_vm7, %v700_v13  ;;  %v16821_v53 = vld [vmem:[#allocation34_spill] sm:$0xff]  ;;  %v14495_v44 = vor.u32 %v6109_v0, %v6108_v9 }
 0x236   :  { %7476 = vrot.lane.b32.xlu1 %v14119_v62, %s11912_s26  ;;  %v7574_v63 = vsel %vm309_vm0, %v16820_v57, %v6355_v2  ;;  %770 = vst.msk [vmem:[#allocation11 + $0x18] sm:$0xf] %vm763_vm7, %v705_v54  ;;  %v703_v42 = vpack.c.bf16 %v16821_v53, %v16821_v53  ;;  %v14491_v28 = vld [vmem:[#allocation2 + $0xf8] sm:$0xf]  ;;  %v14493_v62 = vld [vmem:[#allocation2 + $0xfc] sm:$0x1]  ;;  %v14501_v55 = vsel %vm3424_vm6, %v14369_v34, %v6799_v35 }
 0x237   :  { %7474 = vrot.lane.b32.xlu0 %v14121_v3, %s11912_s26  ;;  %16822 = vst [vmem:[#allocation22_spill] sm:$0xff] %v14491_v28  ;;  %16823 = vst [vmem:[#allocation30_spill] sm:$0xff] %v14493_v62  ;;  %v6805_v3 = vpop.permute.xlu1 %6804  ;;  %v6122_v59 = vrot.slane %v6120_v48, 7  ;;  %v6115_v19 = vrot.slane %v6113_v12, 7  ;;  %v16824_v2 = vld [vmem:[#allocation35_spill] sm:$0xff]  ;;  %v14507_v20 = vor.u32 %v6102_v16, %v6101_v18  ;;  %v14512_v0 = vcombine.low %v14475_v60, %v14475_v60  ;;  %v11056_v9 = vpop.f32.mrb[24].mxu1 }
 0x238   :  { %v706_v11 = vpack.c.bf16 %v16824_v2, %v16824_v2  ;;  %v14505_v54 = vsel %vm3424_vm6, %v14428_v1, %v6805_v3  ;;  %768 = vst.msk [vmem:[#allocation11 + $0x10] sm:$0xf] %vm763_vm7, %v703_v42  ;;  %v14521_v1 = vcombine.low %v14491_v28, %v14491_v28  ;;  %v16825_v16 = vld [vmem:[#allocation36_spill] sm:$0xff]  ;;  %v6803_v48 = vpop.permute.xlu0 %6802  ;;  %v3840_v12 = vpack.c.bf16 %v11056_v9, %v11056_v9  ;;  %v3655_v57 = vpop.f32.mrb[25].mxu1  ;;  %v16826_v35 = vld [vmem:[#allocation51_spill] sm:$0xff]  ;;  %v16827_v42 = vld [vmem:[#allocation37_spill] sm:$0xff] }
 0x239   :  { %v704_v18 = vpack.c.bf16 %v16825_v16, %v16825_v16  ;;  %v709_v53 = vpack.c.bf16 %v16826_v35, %v16826_v35  ;;  %v707_v3 = vpack.c.bf16 %v16827_v42, %v16827_v42  ;;  %v7194_v2 = vshrl.u32 %v14512_v0, 16  ;;  %v11057_v13 = vpop.f32.mrb[26].mxu1  ;;  %v14541_v9 = vld [vmem:[#allocation2 + $0x110] sm:$0xf]  ;;  %v14543_v62 = vld [vmem:[#allocation2 + $0x108] sm:$0xf] }
 0x23a   :  { %771 = vst.msk [vmem:[#allocation11 + $0x1c] sm:$0xf] %vm763_vm7, %v706_v11  ;;  %6392 = vrot.lane.b32.xlu1 %v14135_v24, %s11908_s21  ;;  %v3838_v11 = vpack.c.bf16 %v3655_v57, %v3655_v57  ;;  %v14534_v16 = vor.u32 %v6123_v27, %v6122_v59  ;;  %v14536_v34 = vor.u32 %v6116_v39, %v6115_v19  ;;  %v16828_v24 = vld [vmem:[#allocation53_spill] sm:$0xff]  ;;  %3905 = vst.msk [vmem:[#allocation11 + $0x1a8] sm:$0xf] %vm763_vm7, %v3840_v12  ;;  %v3658_v42 = vpop.f32.mrb[27].mxu1 }
 0x23b   :  { %6390 = vrot.lane.b32.xlu0 %v14163_v21, %s11908_s21  ;;  %769 = vst.msk [vmem:[#allocation11 + $0x14] sm:$0xf] %vm763_vm7, %v704_v18  ;;  %v710_v21 = vpack.c.bf16 %v16828_v24, %v16828_v24  ;;  %v14546_v35 = vsel %vm3424_vm6, %v7574_v63, %v6803_v48  ;;  %v3841_v57 = vpack.c.bf16 %v11057_v13, %v11057_v13  ;;  %774 = vst.msk [vmem:[#allocation11 + $0x88] sm:$0xf] %vm763_vm7, %v709_v53  ;;  %v14551_v27 = vld [vmem:[#allocation2 + $0x114] sm:$0x1] }
 0x23c   :  { %772 = vst.msk [vmem:[#allocation11 + $0x80] sm:$0xf] %vm763_vm7, %v707_v3  ;;  %v14555_v39 = vcombine.low %v14541_v9, %v14541_v9  ;;  %v14559_v59 = vcombine.low %v14543_v62, %v14543_v62  ;;  %3903 = vst.msk [vmem:[#allocation11 + $0x1a0] sm:$0xf] %vm763_vm7, %v3838_v11  ;;  %v3839_v63 = vpack.c.bf16 %v3658_v42, %v3658_v42  ;;  %v14563_v19 = vld [vmem:[#allocation2 + $0x10c] sm:$0x1] }
 0x23d   :  { %775 = vst.msk [vmem:[#allocation11 + $0x8c] sm:$0xf] %vm763_vm7, %v710_v21  ;;  %16829 = vst [vmem:[#allocation31_spill] sm:$0xff] %v14563_v19  ;;  %v16830_v13 = vld [vmem:[#allocation38_spill] sm:$0xff]  ;;  %v16832_v53 = vld [vmem:[#allocation59_spill] sm:$0xff]  ;;  %v7196_v42 = vrot.slane %v7194_v2, 7 }
 0x23e   :  { %v708_v18 = vpack.c.bf16 %v16830_v13, %v16830_v13  ;;  %v16831_v48 = vld [vmem:[#allocation54_spill] sm:$0xff]  ;;  %v711_v3 = vpack.c.bf16 %v16832_v53, %v16832_v53  ;;  %v14571_v24 = vld [vmem:[#allocation2 + $0x7c] sm:$0x1]  ;;  %6396 = vrot.lane.b32.xlu1 %v14200_v61, %s11908_s21  ;;  %3906 = vst.msk [vmem:[#allocation11 + $0x1ac] sm:$0xf] %vm763_vm7, %v3841_v57  ;;  %v7197_v13 = vshll.u32 %v14512_v0, 16 }
 0x23f   :  { %v713_v12 = vpack.c.bf16 %v16831_v48, %v16831_v48  ;;  %16833 = vst [vmem:[#allocation32_spill] sm:$0xff] %v14571_v24  ;;  %6394 = vrot.lane.b32.xlu0 %v14207_v33, %s11908_s21  ;;  %v16834_v11 = vld [vmem:[#allocation42_spill] sm:$0xff]  ;;  %v7187_v48 = vshrl.u32 %v14521_v1, 16  ;;  %v14582_v28 = vld [vmem:[#allocation2 + $0x74] sm:$0x1]  ;;  %v7190_v33 = vshll.u32 %v14521_v1, 16 }
 0x240   :  { %v714_v21 = vpack.c.bf16 %v16834_v11, %v16834_v11  ;;  %16835 = vst [vmem:[#allocation69_spill] sm:$0xff] %v14582_v28  ;;  %3904 = vst.msk [vmem:[#allocation11 + $0x1a4] sm:$0xf] %vm763_vm7, %v3839_v63  ;;  %v16836_v2 = vld [vmem:[#allocation60_spill] sm:$0xff]  ;;  %v16837_v57 = vld [vmem:[#allocation43_spill] sm:$0xff] }
 0x241   :  { %773 = vst.msk [vmem:[#allocation11 + $0x84] sm:$0xf] %vm763_vm7, %v708_v18  ;;  %778 = vst.msk [vmem:[#allocation11 + $0x98] sm:$0xf] %vm763_vm7, %v713_v12  ;;  %v712_v0 = vpack.c.bf16 %v16836_v2, %v16836_v2  ;;  %v717_v53 = vpack.c.bf16 %v16837_v57, %v16837_v57  ;;  %v7189_v11 = vrot.slane %v7187_v48, 7  ;;  %v16839_v12 = vld [vmem:[#allocation61_spill] sm:$0xff]  ;;  %v14606_v2 = vor.u32 %v7197_v13, %v7196_v42 }
 0x242   :  { %776 = vst.msk [vmem:[#allocation11 + $0x90] sm:$0xf] %vm763_vm7, %v711_v3  ;;  %779 = vst.msk [vmem:[#allocation11 + $0x9c] sm:$0xf] %vm763_vm7, %v714_v21  ;;  %v14598_v61 = vld [vmem:[#allocation2 + $0x78] sm:$0xf]  ;;  %v715_v1 = vpack.c.bf16 %v16839_v12, %v16839_v12  ;;  %v16845_v42 = vcombine.low %v14086_v26, %v14097_v29  ;;  %v7441_v26 = vpop.permute.xlu1 %7440 }
 0x243   :  { %16838 = vst [vmem:[#allocation33_spill] sm:$0xff] %v14598_v61  ;;  %v14604_v3 = vld [vmem:[#allocation2 + $0x8c] sm:$0x1]  ;;  %16841 = vst [vmem:[#allocation34_spill] sm:$0xff] %v14606_v2  ;;  %v14610_v57 = vld [vmem:[#allocation2 + $0x70] sm:$0xf]  ;;  %v14634_v29 = vor.u32 %v7190_v33, %v7189_v11  ;;  %v16855_v33 = vcombine.low %v14143_v14, %v14167_v17 }
 0x244   :  { %16840 = vst [vmem:[#allocation48_spill] sm:$0xff] %v14604_v3  ;;  %777 = vst.msk [vmem:[#allocation11 + $0x94] sm:$0xf] %vm763_vm7, %v712_v0  ;;  %v16843_v48 = vld [vmem:[#allocation44_spill] sm:$0xff]  ;;  %v7208_v18 = vshrl.u32 %v14555_v39, 16  ;;  %6840 = vrot.lane.b32.xlu1 %v16845_v42, %s11911_s4  ;;  %v16846_v13 = vld [vmem:[#allocation73_spill] sm:$0xff] }
 0x245   :  { %782 = vst.msk [vmem:[#allocation11 + $0x108] sm:$0xf] %vm763_vm7, %v717_v53  ;;  %16842 = vst [vmem:[#allocation35_spill] sm:$0xff] %v14610_v57  ;;  %v718_v63 = vpack.c.bf16 %v16843_v48, %v16843_v48  ;;  %v14617_v24 = vld [vmem:[#allocation2 + $0x84] sm:$0x1]  ;;  %v16847_v0 = vcombine.low %v14129_v5, %v16846_v13  ;;  %v7211_v53 = vshll.u32 %v14555_v39, 16  ;;  %v7890_v13 = vsel %vm7886_vm8, %v14471_v46, %v7441_v26 }
 0x246   :  { %16844 = vst [vmem:[#allocation36_spill] sm:$0xff] %v14617_v24  ;;  %780 = vst.msk [vmem:[#allocation11 + $0x100] sm:$0xf] %vm763_vm7, %v715_v1  ;;  %v7201_v12 = vshrl.u32 %v14559_v59, 16  ;;  %v16848_v48 = vld [vmem:[#allocation66_spill] sm:$0xff]  ;;  %v16849_v28 = vld [vmem:[#allocation47_spill] sm:$0xff]  ;;  %v10639_v39 = vcombine.low %v7890_v13, %v7890_v13  ;;  %v10640_v42 = vcombine.high %v7890_v13, %v7890_v13 }
 0x247   :  { %6838 = vrot.lane.b32.xlu0 %v16847_v0, %s11911_s4  ;;  %v716_v21 = vpack.c.bf16 %v16848_v48, %v16848_v48  ;;  %v721_v57 = vpack.c.bf16 %v16849_v28, %v16849_v28  ;;  %v5328_v61 = vld [vmem:[#allocation2 + $0x130] sm:$0xf]  ;;  %16850 = vst [vmem:[#allocation51_spill] sm:$0xff] %v14634_v29  ;;  %783 = vst.msk [vmem:[#allocation11 + $0x10c] sm:$0xf] %vm763_vm7, %v718_v63  ;;  %v7210_v5 = vrot.slane %v7208_v18, 7  ;;  %v7439_v0 = vpop.permute.xlu0 %7438 }
 0x248   :  { %v14638_v1 = vld [vmem:[#allocation2 + $0x88] sm:$0xf]  ;;  %v14646_v28 = vld [vmem:[#allocation2 + $0x80] sm:$0xf]  ;;  %v16853_v63 = vld [vmem:[#allocation16_spill] sm:$0xff]  ;;  %v7888_v46 = vsel %vm7886_vm8, %v14501_v55, %v7439_v0  ;;  %v11060_v26 = vpop.f32.mrb[28].mxu1  ;;  %6844 = vrot.lane.b32.xlu1 %v16855_v33, %s11911_s4  ;;  %v7445_v0 = vpop.permute.xlu1 %7444 }
 0x249   :  { %16851 = vst [vmem:[#allocation37_spill] sm:$0xff] %v14638_v1  ;;  %781 = vst.msk [vmem:[#allocation11 + $0x104] sm:$0xf] %vm763_vm7, %v716_v21  ;;  %v719_v11 = vpack.c.bf16 %v16853_v63, %v16853_v63  ;;  %v16854_v18 = vld [vmem:[#allocation57_spill] sm:$0xff]  ;;  %v14656_v21 = vcombine.low %v5328_v61, %v5328_v61  ;;  %v10638_v3 = vcombine.high %v7888_v46, %v7888_v46  ;;  %v3671_v13 = vpop.f32.mrb[29].mxu1  ;;  %v14666_v24 = vrot.slane %v7201_v12, 7 }
 0x24a   :  { %786 = vst.msk [vmem:[#allocation11 + $0x118] sm:$0xf] %vm763_vm7, %v721_v57  ;;  %16852 = vst [vmem:[#allocation53_spill] sm:$0xff] %v14646_v28  ;;  %v722_v48 = vpack.c.bf16 %v16854_v18, %v16854_v18  ;;  %v10637_v57 = vcombine.low %v7888_v46, %v7888_v46  ;;  %v16856_v63 = vcombine.low %v14155_v41, %v14169_v23  ;;  %v8350_v55 = vshrl.u32 %v10639_v39, 16  ;;  %v14670_v28 = vpop.f32.mrb[30].mxu1 }
 0x24b   :  { %v3844_v18 = vpack.c.bf16 %v11060_v26, %v11060_v26  ;;  %784 = vst.msk [vmem:[#allocation11 + $0x110] sm:$0xf] %vm763_vm7, %v719_v11  ;;  %v8353_v61 = vshll.u32 %v10639_v39, 16  ;;  %v3842_v46 = vpack.c.bf16 %v3671_v13, %v3671_v13  ;;  %v14672_v14 = vor.u32 %v7211_v53, %v7210_v5  ;;  %v7443_v12 = vpop.permute.xlu0 %7442  ;;  %v14677_v11 = vpop.f32.mrb[31].mxu1 }
 0x24c   :  { %6842 = vrot.lane.b32.xlu0 %v16856_v63, %s11911_s4  ;;  %787 = vst.msk [vmem:[#allocation11 + $0x11c] sm:$0xf] %vm763_vm7, %v722_v48  ;;  %v8359_v17 = vshll.u32 %v10640_v42, 16  ;;  %v8336_v33 = vshrl.u32 %v10637_v57, 16  ;;  %v8339_v23 = vshll.u32 %v10637_v57, 16  ;;  %v7894_v41 = vsel %vm7886_vm8, %v14505_v54, %v7445_v0  ;;  %7480 = vrot.lane.b32.xlu1 %v14238_v6, %s11912_s26 }
 0x24d   :  { %16857 = vst [vmem:[#allocation38_spill] sm:$0xff] %v14672_v14  ;;  %3909 = vst.msk [vmem:[#allocation11 + $0x1b8] sm:$0xf] %vm763_vm7, %v3844_v18  ;;  %v8352_v48 = vrot.slane %v8350_v55, 4  ;;  %v8355_v26 = vrot.slane %v8353_v61, 5  ;;  %v10643_v39 = vcombine.low %v7894_v41, %v7894_v41  ;;  %v6134_v53 = vshrl.u32 %v14656_v21, 16 }
 0x24e   :  { %3907 = vst.msk [vmem:[#allocation11 + $0x1b0] sm:$0xf] %vm763_vm7, %v3842_v46  ;;  %v8338_v5 = vrot.slane %v8336_v33, 4  ;;  %v8341_v42 = vrot.slane %v8339_v23, 5  ;;  %v8345_v63 = vshll.u32 %v10638_v3, 16  ;;  %v10644_v57 = vcombine.high %v7894_v41, %v7894_v41  ;;  %v6361_v33 = vpop.permute.xlu1 %6360 }
 0x24f   :  { %v8356_v54 = vor.u32 %v8355_v26, %v8352_v48  ;;  %v8378_v18 = vshrl.u32 %v10643_v39, 16  ;;  %v8381_v13 = vshll.u32 %v10643_v39, 16  ;;  %v7892_v55 = vsel %vm7886_vm8, %v14546_v35, %v7443_v12  ;;  %v6359_v23 = vpop.permute.xlu0 %6358  ;;  %v16859_v26 = vld [vmem:[#allocation39_spill] sm:$0xff] }
 0x250   :  { %7478 = vrot.lane.b32.xlu0 %v14302_v45, %s11912_s26  ;;  %v8361_v61 = vrot.slane %v8359_v17, 5  ;;  %v8342_v0 = vor.u32 %v8341_v42, %v8338_v5  ;;  %v10641_v46 = vcombine.low %v7892_v55, %v7892_v55  ;;  %v10642_v1 = vcombine.high %v7892_v55, %v7892_v55  ;;  %7484 = vrot.lane.b32.xlu1 %v14314_v56, %s11912_s26  ;;  %v16861_v55 = vld [vmem:[#allocation77_spill] sm:$0xff] }
 0x251   :  { %v8357_v3 = vrot.slane %v8356_v54, 4  ;;  %v8380_v41 = vrot.slane %v8378_v18, 4  ;;  %v8383_v14 = vrot.slane %v8381_v13, 5  ;;  %v8387_v29 = vshll.u32 %v10644_v57, 16 }
 0x252   :  { %v8343_v6 = vrot.slane %v8342_v0, 4  ;;  %v8347_v2 = vrot.slane %v8345_v63, 5  ;;  %v8364_v19 = vshrl.u32 %v10641_v46, 16  ;;  %v8367_v45 = vshll.u32 %v10641_v46, 16  ;;  %v6365_v54 = vpop.permute.xlu1 %6364  ;;  %v16865_v0 = vld [vmem:[#allocation78_spill] sm:$0xff] }
 0x253   :  { %v8362_v17 = vsel %vm12524_vm5, %v8357_v3, %v8361_v61  ;;  %v8384_v12 = vor.u32 %v8383_v14, %v8380_v41  ;;  %v8373_v48 = vshll.u32 %v10642_v1, 16  ;;  %v16860_v39 = vcombine.low %v14225_v37, %v16859_v26  ;;  %v6363_v56 = vpop.permute.xlu0 %6362  ;;  %v16862_v14 = vld [vmem:[#allocation41_spill] sm:$0xff]  ;;  %v16864_v37 = vld [vmem:[#allocation83_spill] sm:$0xff] }
 0x254   :  { %7482 = vrot.lane.b32.xlu0 %v14316_v43, %s11912_s26  ;;  %v8348_v42 = vsel %vm12524_vm5, %v8343_v6, %v8347_v2  ;;  %v8366_v63 = vrot.slane %v8364_v19, 4  ;;  %v8369_v57 = vrot.slane %v8367_v45, 5  ;;  %v3845_v43 = vpack.c.bf16 %v14670_v28, %v14670_v28  ;;  %v11064_v19 = vpop.f32.mrb[32].mxu1  ;;  %v5326_v2 = vld [vmem:[#allocation2 + $0x128] sm:$0xf]  ;;  %6400 = vrot.lane.b32.xlu1 %v14330_v52, %s11908_s21  ;;  %v16867_v6 = vld [vmem:[#allocation85_spill] sm:$0xff] }
 0x255   :  { %v7583_v5 = vsel %vm309_vm0, %v16860_v39, %v6361_v33  ;;  %v8385_v18 = vrot.slane %v8384_v12, 4  ;;  %v8389_v13 = vrot.slane %v8387_v29, 5  ;;  %v16863_v1 = vcombine.low %v16861_v55, %v16862_v14  ;;  %v16868_v45 = vld [vmem:[#allocation80_spill] sm:$0xff]  ;;  %v16872_v14 = vld [vmem:[#allocation58_spill] sm:$0xff] }
 0x256   :  { %v16866_v46 = vcombine.low %v16864_v37, %v16865_v0  ;;  %v8370_v3 = vor.u32 %v8369_v57, %v8366_v63  ;;  %v8375_v41 = vrot.slane %v8373_v48, 5  ;;  %v10765_v29 = vcombine.low %v8348_v42, %v8362_v17  ;;  %3910 = vst.msk [vmem:[#allocation11 + $0x1bc] sm:$0xf] %vm763_vm7, %v3845_v43  ;;  %v6809_v17 = vpop.permute.xlu1 %6808  ;;  %v5332_v37 = vld [vmem:[#allocation2 + $0x140] sm:$0xf] }
 0x257   :  { %v7580_v61 = vsel %vm309_vm0, %v16863_v1, %v6359_v23  ;;  %v3843_v28 = vpack.c.bf16 %v14677_v11, %v14677_v11  ;;  %v3687_v23 = vpop.f32.mrb[33].mxu1  ;;  %v16869_v12 = vcombine.low %v16867_v6, %v16868_v45  ;;  %v3848_v39 = vpack.c.bf16 %v11064_v19, %v11064_v19  ;;  %v6807_v42 = vpop.permute.xlu0 %6806  ;;  %v5330_v0 = vld [vmem:[#allocation2 + $0x138] sm:$0xf] }
 0x258   :  { %v14709_v33 = vsel %vm309_vm0, %v16866_v46, %v6365_v54  ;;  %6398 = vrot.lane.b32.xlu0 %v14332_v36, %s11908_s21  ;;  %v3846_v48 = vpack.c.bf16 %v3687_v23, %v3687_v23  ;;  %v11065_v63 = vpop.f32.mrb[34].mxu1  ;;  %v6136_v57 = vrot.slane %v6134_v53, 7  ;;  %v8390_v52 = vsel %vm12524_vm5, %v8385_v18, %v8389_v13  ;;  %11162 = vmatprep.mubr.msk.bf16.mxu1 %vm9335_vm9, %v10765_v29  ;;  %v16871_v13 = vld [vmem:[#allocation18_spill] sm:$0xff]  ;;  %v16875_v45 = vld [vmem:[#allocation64_spill] sm:$0xff] }
 0x259   :  { %v7586_v26 = vsel %vm309_vm0, %v16869_v12, %v6363_v56  ;;  %v8371_v36 = vrot.slane %v8370_v3, 4  ;;  %3908 = vst.msk [vmem:[#allocation11 + $0x1b4] sm:$0xf] %vm763_vm7, %v3843_v28  ;;  %v3849_v11 = vpack.c.bf16 %v11065_v63, %v11065_v63  ;;  %v10477_v54 = vcombine.low %v5326_v2, %v5326_v2  ;;  %3913 = vst.msk [vmem:[#allocation11 + $0x228] sm:$0xf] %vm763_vm7, %v3848_v39  ;;  %v3690_v56 = vpop.f32.mrb[35].mxu1 }
 0x25a   :  { %3911 = vst.msk [vmem:[#allocation11 + $0x220] sm:$0xf] %vm763_vm7, %v3846_v48  ;;  %v16870_v53 = vshll.u32 %v14559_v59, 16  ;;  %v6137_v18 = vshll.u32 %v14656_v21, 16  ;;  %v720_v55 = vpack.c.bf16 %v16871_v13, %v16871_v13  ;;  %v725_v1 = vpack.c.bf16 %v16872_v14, %v16872_v14  ;;  %6404 = vrot.lane.b32.xlu1 %v14345_v47, %s11908_s21  ;;  %v16873_v3 = vld [vmem:[#allocation20_spill] sm:$0xff]  ;;  %v6813_v47 = vpop.permute.xlu1 %6812  ;;  %v16876_v63 = vld [vmem:[#allocation65_spill] sm:$0xff] }
 0x25b   :  { %v8376_v46 = vsel %vm12524_vm5, %v8371_v36, %v8375_v41  ;;  %v7769_v19 = vsel %vm3424_vm6, %v7583_v5, %v6809_v17  ;;  %3914 = vst.msk [vmem:[#allocation11 + $0x22c] sm:$0xf] %vm763_vm7, %v3849_v11  ;;  %v3847_v59 = vpack.c.bf16 %v3690_v56, %v3690_v56  ;;  %v6130_v2 = vshll.u32 %v10477_v54, 16  ;;  %v16874_v5 = vld [vmem:[#allocation63_spill] sm:$0xff]  ;;  %v6811_v28 = vpop.permute.xlu0 %6810 }
 0x25c   :  { %v14731_v43 = vor.u32 %v16870_v53, %v14666_v24  ;;  %6402 = vrot.lane.b32.xlu0 %v14347_v51, %s11908_s21  ;;  %v6127_v24 = vshrl.u32 %v10477_v54, 16  ;;  %v10766_v21 = vcombine.low %v8376_v46, %v8390_v52  ;;  %785 = vst.msk [vmem:[#allocation11 + $0x114] sm:$0xf] %vm763_vm7, %v720_v55  ;;  %790 = vst.msk [vmem:[#allocation11 + $0x188] sm:$0xf] %vm763_vm7, %v725_v1  ;;  %v16877_v36 = vld [vmem:[#allocation67_spill] sm:$0xff] }
 0x25d   :  { %v723_v41 = vpack.c.bf16 %v16873_v3, %v16873_v3  ;;  %v726_v29 = vpack.c.bf16 %v16874_v5, %v16874_v5  ;;  %3912 = vst.msk [vmem:[#allocation11 + $0x224] sm:$0xf] %vm763_vm7, %v3847_v59  ;;  %v14753_v23 = vcombine.low %v5332_v37, %v5332_v37  ;;  %v14755_v6 = vcombine.low %v5330_v0, %v5330_v0  ;;  %v14769_v11 = vld [vmem:[#allocation2 + $0x128] sm:$0xf]  ;;  %v14771_v54 = vld [vmem:[#allocation2 + $0x12c] sm:$0x1] }
 0x25e   :  { %v6129_v51 = vrot.slane %v6127_v24, 7  ;;  %v724_v12 = vpack.c.bf16 %v16875_v45, %v16875_v45  ;;  %v7767_v39 = vsel %vm3424_vm6, %v7580_v61, %v6807_v42  ;;  %11163 = vmatmul.mubr.msk.bf16.vlgmr.msra.gmra.mrb[64].mxu1 %vm9335_vm9, %v10766_v21  ;;  %v14761_v48 = vor.u32 %v6137_v18, %v6136_v57  ;;  %v14803_v0 = vld [vmem:[#allocation2 + $0x120] sm:$0xf]  ;;  %v14805_v46 = vld [vmem:[#allocation2 + $0x124] sm:$0x1]  ;;  %v11068_v21 = vpop.f32.mrb[36].mxu1 }
 0x25f   :  { %788 = vst.msk [vmem:[#allocation11 + $0x180] sm:$0xf] %vm763_vm7, %v723_v41  ;;  %791 = vst.msk [vmem:[#allocation11 + $0x18c] sm:$0xf] %vm763_vm7, %v726_v29  ;;  %v729_v52 = vpack.c.bf16 %v16876_v63, %v16876_v63  ;;  %v727_v17 = vpack.c.bf16 %v16877_v36, %v16877_v36  ;;  %v7773_v61 = vsel %vm3424_vm6, %v14709_v33, %v6813_v47  ;;  %v6148_v53 = vshrl.u32 %v14753_v23, 16  ;;  %v16882_v41 = vld [vmem:[#allocation25_spill] sm:$0xff] }
 0x260   :  { %v7771_v57 = vsel %vm3424_vm6, %v7586_v26, %v6811_v28  ;;  %v16878_v42 = vcombine.low %v14280_v31, %v14282_v50  ;;  %v16879_v56 = vcombine.low %v14292_v22, %v14304_v7  ;;  %v6141_v18 = vshrl.u32 %v14755_v6, 16  ;;  %789 = vst.msk [vmem:[#allocation11 + $0x184] sm:$0xf] %vm763_vm7, %v724_v12  ;;  %v16880_v31 = vld [vmem:[#allocation24_spill] sm:$0xff]  ;;  %v7449_v50 = vpop.permute.xlu1 %7448  ;;  %v7447_v7 = vpop.permute.xlu0 %7446 }
 0x261   :  { %v14787_v13 = vor.u32 %v6130_v2, %v6129_v51  ;;  %v6151_v33 = vshll.u32 %v14753_v23, 16  ;;  %v6144_v26 = vshll.u32 %v14755_v6, 16  ;;  %794 = vst.msk [vmem:[#allocation11 + $0x198] sm:$0xf] %vm763_vm7, %v729_v52  ;;  %792 = vst.msk [vmem:[#allocation11 + $0x190] sm:$0xf] %vm763_vm7, %v727_v17  ;;  %v730_v22 = vpack.c.bf16 %v16880_v31, %v16880_v31 }
 0x262   :  { %6848 = vrot.lane.b32.xlu1 %v16878_v42, %s11911_s4  ;;  %6846 = vrot.lane.b32.xlu0 %v16879_v56, %s11911_s4  ;;  %v6150_v55 = vrot.slane %v6148_v53, 7  ;;  %v14795_v14 = vrot.slane %v6141_v18, 7  ;;  %v10542_v1 = vcombine.low %v14769_v11, %v14771_v54  ;;  %v14801_v37 = vcombine.low %v14769_v11, %v14769_v11  ;;  %v16881_v2 = vld [vmem:[#allocation68_spill] sm:$0xff]  ;;  %v16935_v54 = vld [vmem:[#allocation86_spill] sm:$0xff] }
 0x263   :  { %v7898_v59 = vsel %vm7886_vm8, %v7769_v19, %v7449_v50  ;;  %v7896_v24 = vsel %vm7886_vm8, %v7767_v39, %v7447_v7  ;;  %795 = vst.msk [vmem:[#allocation11 + $0x19c] sm:$0xf] %vm763_vm7, %v730_v22  ;;  %v728_v3 = vpack.c.bf16 %v16881_v2, %v16881_v2  ;;  %v733_v5 = vpack.c.bf16 %v16882_v41, %v16882_v41  ;;  %v3703_v19 = vpop.f32.mrb[37].mxu1  ;;  %v16889_v6 = vld [vmem:[#allocation52_spill] sm:$0xff] }
 0x264   :  { %v10647_v29 = vcombine.low %v7898_v59, %v7898_v59  ;;  %v10648_v47 = vcombine.high %v7898_v59, %v7898_v59  ;;  %v10645_v28 = vcombine.low %v7896_v24, %v7896_v24  ;;  %v10646_v51 = vcombine.high %v7896_v24, %v7896_v24  ;;  %v11069_v63 = vpop.f32.mrb[38].mxu1 }
 0x265   :  { %v16883_v23 = vcombine.low %v14324_v58, %v14326_v38  ;;  %v16884_v45 = vcombine.low %v14339_v32, %v14341_v40  ;;  %v3852_v12 = vpack.c.bf16 %v11068_v21, %v11068_v21  ;;  %v3850_v39 = vpack.c.bf16 %v3703_v19, %v3703_v19  ;;  %793 = vst.msk [vmem:[#allocation11 + $0x194] sm:$0xf] %vm763_vm7, %v728_v3  ;;  %v7453_v32 = vpop.permute.xlu1 %7452  ;;  %v7451_v40 = vpop.permute.xlu0 %7450 }
 0x266   :  { %v10541_v52 = vcombine.low %v14803_v0, %v14805_v46  ;;  %v14826_v36 = vcombine.low %v14803_v0, %v14803_v0  ;;  %798 = vst.msk [vmem:[#allocation11 + $0x208] sm:$0xf] %vm763_vm7, %v733_v5  ;;  %v8406_v58 = vshrl.u32 %v10647_v29, 16  ;;  %v8409_v38 = vshll.u32 %v10647_v29, 16  ;;  %v14834_v31 = vpop.f32.mrb[39].mxu1 }
 0x267   :  { %6852 = vrot.lane.b32.xlu1 %v16883_v23, %s11911_s4  ;;  %6850 = vrot.lane.b32.xlu0 %v16884_v45, %s11911_s4  ;;  %v8415_v17 = vshll.u32 %v10648_v47, 16  ;;  %v8392_v42 = vshrl.u32 %v10645_v28, 16  ;;  %v8395_v56 = vshll.u32 %v10645_v28, 16  ;;  %v7902_v53 = vsel %vm7886_vm8, %v7773_v61, %v7453_v32  ;;  %3917 = vst.msk [vmem:[#allocation11 + $0x238] sm:$0xf] %vm763_vm7, %v3852_v12 }
 0x268   :  { %v7900_v18 = vsel %vm7886_vm8, %v7771_v57, %v7451_v40  ;;  %3915 = vst.msk [vmem:[#allocation11 + $0x230] sm:$0xf] %vm763_vm7, %v3850_v39  ;;  %v14836_v22 = vor.u32 %v6151_v33, %v6150_v55  ;;  %v8408_v50 = vrot.slane %v8406_v58, 4  ;;  %v8411_v7 = vrot.slane %v8409_v38, 5 }
 0x269   :  { %v8394_v59 = vrot.slane %v8392_v42, 4  ;;  %v8401_v24 = vshll.u32 %v10646_v51, 16  ;;  %v8417_v21 = vrot.slane %v8415_v17, 5  ;;  %v8397_v2 = vrot.slane %v8395_v56, 5  ;;  %v6369_v29 = vpop.permute.xlu1 %6368  ;;  %v6367_v33 = vpop.permute.xlu0 %6366 }
 0x26a   :  { %v10651_v61 = vcombine.low %v7902_v53, %v7902_v53  ;;  %v10652_v3 = vcombine.high %v7902_v53, %v7902_v53  ;;  %v8412_v57 = vor.u32 %v8411_v7, %v8408_v50  ;;  %v10649_v41 = vcombine.low %v7900_v18, %v7900_v18  ;;  %v14856_v7 = vld [vmem:[#allocation2 + $0x138] sm:$0xf] }
 0x26b   :  { %7488 = vrot.lane.b32.xlu1 %v14431_v49, %s11912_s26  ;;  %7486 = vrot.lane.b32.xlu0 %v14442_v25, %s11912_s26  ;;  %v10650_v5 = vcombine.high %v7900_v18, %v7900_v18  ;;  %v3853_v55 = vpack.c.bf16 %v11069_v63, %v11069_v63  ;;  %v8398_v47 = vor.u32 %v8397_v2, %v8394_v59  ;;  %v8403_v39 = vrot.slane %v8401_v24, 5  ;;  %v16885_v24 = vld [vmem:[#allocation23_spill] sm:$0xff] }
 0x26c   :  { %v8434_v28 = vshrl.u32 %v10651_v61, 16  ;;  %v8437_v23 = vshll.u32 %v10651_v61, 16  ;;  %v8443_v51 = vshll.u32 %v10652_v3, 16  ;;  %v8413_v19 = vrot.slane %v8412_v57, 4  ;;  %v16888_v3 = vld [vmem:[#allocation96_spill] sm:$0xff] }
 0x26d   :  { %v8420_v45 = vshrl.u32 %v10649_v41, 16  ;;  %v8423_v49 = vshll.u32 %v10649_v41, 16  ;;  %v8429_v12 = vshll.u32 %v10650_v5, 16  ;;  %3918 = vst.msk [vmem:[#allocation11 + $0x23c] sm:$0xf] %vm763_vm7, %v3853_v55  ;;  %v8399_v25 = vrot.slane %v8398_v47, 4  ;;  %v6373_v32 = vpop.permute.xlu1 %6372  ;;  %v6371_v40 = vpop.permute.xlu0 %6370 }
 0x26e   :  { %v8436_v58 = vrot.slane %v8434_v28, 4  ;;  %v8439_v38 = vrot.slane %v8437_v23, 5  ;;  %v8418_v63 = vsel %vm12524_vm5, %v8413_v19, %v8417_v21  ;;  %v8445_v18 = vrot.slane %v8443_v51, 5  ;;  %v16886_v21 = vld [vmem:[#allocation91_spill] sm:$0xff]  ;;  %v14872_v5 = vld [vmem:[#allocation2 + $0x134] sm:$0x1] }
 0x26f   :  { %7492 = vrot.lane.b32.xlu1 %v14456_v8, %s11912_s26  ;;  %7490 = vrot.lane.b32.xlu0 %v14473_v4, %s11912_s26  ;;  %v8422_v17 = vrot.slane %v8420_v45, 4  ;;  %v8425_v42 = vrot.slane %v8423_v49, 5  ;;  %v14852_v8 = vor.u32 %v6144_v26, %v14795_v14  ;;  %v8404_v56 = vsel %vm12524_vm5, %v8399_v25, %v8403_v39  ;;  %v14858_v4 = vld [vmem:[#allocation2 + $0x13c] sm:$0x1]  ;;  %v14870_v41 = vld [vmem:[#allocation2 + $0x130] sm:$0xf] }
 0x270   :  { %v8440_v53 = vor.u32 %v8439_v38, %v8436_v58  ;;  %v8431_v50 = vrot.slane %v8429_v12, 5  ;;  %v16887_v2 = vcombine.low %v16885_v24, %v16886_v21  ;;  %v16890_v26 = vcombine.low %v16888_v3, %v16889_v6  ;;  %v16891_v47 = vld [vmem:[#allocation26_spill] sm:$0xff] }
 0x271   :  { %v8426_v59 = vor.u32 %v8425_v42, %v8422_v17  ;;  %v10767_v57 = vcombine.low %v8404_v56, %v8418_v63  ;;  %v731_v28 = vpack.c.bf16 %v16891_v47, %v16891_v47  ;;  %v16892_v23 = vld [vmem:[#allocation70_spill] sm:$0xff]  ;;  %v6815_v25 = vpop.permute.xlu0 %6814  ;;  %v10544_v39 = vcombine.low %v14856_v7, %v14858_v4 }
 0x272   :  { %v7595_v61 = vsel %vm309_vm0, %v16887_v2, %v6369_v29  ;;  %v7592_v14 = vsel %vm309_vm0, %v16890_v26, %v6367_v33  ;;  %v8441_v55 = vrot.slane %v8440_v53, 4  ;;  %v3851_v29 = vpack.c.bf16 %v14834_v31, %v14834_v31  ;;  %v16895_v49 = vld [vmem:[#allocation62_spill] sm:$0xff]  ;;  %v6817_v31 = vpop.permute.xlu1 %6816  ;;  %v16898_v53 = vld [vmem:[#allocation71_spill] sm:$0xff]  ;;  %v16899_v2 = vld [vmem:[#allocation28_spill] sm:$0xff] }
 0x273   :  { %6408 = vrot.lane.b32.xlu1 %v14495_v44, %s11908_s21  ;;  %6406 = vrot.lane.b32.xlu0 %v14507_v20, %s11908_s21  ;;  %v734_v33 = vpack.c.bf16 %v16892_v23, %v16892_v23  ;;  %v8427_v51 = vrot.slane %v8426_v59, 4  ;;  %v16893_v44 = vld [vmem:[#allocation93_spill] sm:$0xff]  ;;  %v16896_v12 = vcombine.low %v14458_v15, %v16895_v49  ;;  %v7777_v38 = vsel %vm3424_vm6, %v7595_v61, %v6817_v31  ;;  %v16900_v61 = vld [vmem:[#allocation72_spill] sm:$0xff] }
 0x274   :  { %v16894_v19 = vcombine.low %v14433_v30, %v16893_v44  ;;  %11166 = vmatprep.mubr.msk.bf16.mxu1 %vm9335_vm9, %v10767_v57  ;;  %v8446_v58 = vsel %vm12524_vm5, %v8441_v55, %v8445_v18  ;;  %3916 = vst.msk [vmem:[#allocation11 + $0x234] sm:$0xf] %vm763_vm7, %v3851_v29  ;;  %v11072_v30 = vpop.f32.mrb[40].mxu1  ;;  %796 = vst.msk [vmem:[#allocation11 + $0x200] sm:$0xf] %vm763_vm7, %v731_v28  ;;  %v14901_v15 = vcombine.low %v14856_v7, %v14856_v7  ;;  %v16903_v31 = vld [vmem:[#allocation45_spill] sm:$0xff] }
 0x275   :  { %v7598_v20 = vsel %vm309_vm0, %v16896_v12, %v6371_v40  ;;  %799 = vst.msk [vmem:[#allocation11 + $0x20c] sm:$0xf] %vm763_vm7, %v734_v33  ;;  %v10543_v63 = vcombine.low %v14870_v41, %v14872_v5  ;;  %v8432_v17 = vsel %vm12524_vm5, %v8427_v51, %v8431_v50  ;;  %v3856_v42 = vpack.c.bf16 %v11072_v30, %v11072_v30  ;;  %v16897_v40 = vld [vmem:[#allocation27_spill] sm:$0xff]  ;;  %v6819_v6 = vpop.permute.xlu0 %6818  ;;  %v14937_v51 = vld [vmem:[#allocation2 + $0xa4] sm:$0x1] }
 0x276   :  { %v7601_v45 = vsel %vm309_vm0, %v16894_v19, %v6373_v32  ;;  %v3719_v32 = vpop.f32.mrb[41].mxu1  ;;  %v732_v56 = vpack.c.bf16 %v16897_v40, %v16897_v40  ;;  %v737_v18 = vpack.c.bf16 %v16898_v53, %v16898_v53  ;;  %v10768_v59 = vcombine.low %v8432_v17, %v8446_v58  ;;  %v6821_v3 = vpop.permute.xlu1 %6820  ;;  %v16904_v30 = vld [vmem:[#allocation22_spill] sm:$0xff] }
 0x277   :  { %6412 = vrot.lane.b32.xlu1 %v14534_v16, %s11908_s21  ;;  %6410 = vrot.lane.b32.xlu0 %v14536_v34, %s11908_s21  ;;  %v3854_v24 = vpack.c.bf16 %v3719_v32, %v3719_v32  ;;  %v11073_v21 = vpop.f32.mrb[42].mxu1  ;;  %v735_v50 = vpack.c.bf16 %v16899_v2, %v16899_v2  ;;  %v738_v16 = vpack.c.bf16 %v16900_v61, %v16900_v61  ;;  %v7222_v34 = vshrl.u32 %v14801_v37, 16  ;;  %v16905_v17 = vld [vmem:[#allocation30_spill] sm:$0xff] }
 0x278   :  { %3921 = vst.msk [vmem:[#allocation11 + $0x2a8] sm:$0xf] %vm763_vm7, %v3856_v42  ;;  %v3857_v26 = vpack.c.bf16 %v11073_v21, %v11073_v21  ;;  %797 = vst.msk [vmem:[#allocation11 + $0x204] sm:$0xf] %vm763_vm7, %v732_v56  ;;  %v7225_v57 = vshll.u32 %v14801_v37, 16  ;;  %v7215_v55 = vshrl.u32 %v14826_v36, 16  ;;  %v7775_v29 = vsel %vm3424_vm6, %v7592_v14, %v6815_v25  ;;  %11167 = vmatmul.mubr.msk.bf16.gmra.mrb[68].mxu1 %vm9335_vm9, %v10768_v59 }
 0x279   :  { %802 = vst.msk [vmem:[#allocation11 + $0x218] sm:$0xf] %vm763_vm7, %v737_v18  ;;  %3919 = vst.msk [vmem:[#allocation11 + $0x2a0] sm:$0xf] %vm763_vm7, %v3854_v24  ;;  %v3722_v47 = vpop.f32.mrb[43].mxu1  ;;  %v14930_v28 = vcombine.low %v14870_v41, %v14870_v41  ;;  %v7218_v23 = vshll.u32 %v14826_v36, 16  ;;  %v16902_v44 = vcombine.low %v14475_v60, %v14477_v10  ;;  %v741_v36 = vpack.c.bf16 %v16903_v31, %v16903_v31  ;;  %v7455_v53 = vpop.permute.xlu0 %7454 }
 0x27a   :  { %800 = vst.msk [vmem:[#allocation11 + $0x210] sm:$0xf] %vm763_vm7, %v735_v50  ;;  %803 = vst.msk [vmem:[#allocation11 + $0x21c] sm:$0xf] %vm763_vm7, %v738_v16  ;;  %v16901_v37 = vld [vmem:[#allocation29_spill] sm:$0xff]  ;;  %v3855_v19 = vpack.c.bf16 %v3722_v47, %v3722_v47  ;;  %v7224_v49 = vrot.slane %v7222_v34, 7  ;;  %v7781_v25 = vsel %vm3424_vm6, %v7601_v45, %v6821_v3  ;;  %v7779_v58 = vsel %vm3424_vm6, %v7598_v20, %v6819_v6  ;;  %v7457_v56 = vpop.permute.xlu1 %7456 }
 0x27b   :  { %v736_v33 = vpack.c.bf16 %v16901_v37, %v16901_v37  ;;  %v14939_v14 = vld [vmem:[#allocation2 + $0x9c] sm:$0x1]  ;;  %6856 = vrot.lane.b32.xlu1 %v16902_v44, %s11911_s4  ;;  %3922 = vst.msk [vmem:[#allocation11 + $0x2ac] sm:$0xf] %vm763_vm7, %v3857_v26  ;;  %v7217_v12 = vrot.slane %v7215_v55, 7  ;;  %v16906_v42 = vcombine.low %v16904_v30, %v16905_v17  ;;  %v16908_v32 = vld [vmem:[#allocation50_spill] sm:$0xff]  ;;  %v7906_v2 = vsel %vm7886_vm8, %v7777_v38, %v7457_v56 }
 0x27c   :  { %v16907_v60 = vld [vmem:[#allocation49_spill] sm:$0xff]  ;;  %v742_v40 = vpack.c.bf16 %v16908_v32, %v16908_v32  ;;  %3920 = vst.msk [vmem:[#allocation11 + $0x2a4] sm:$0xf] %vm763_vm7, %v3855_v19  ;;  %v14960_v45 = vor.u32 %v7225_v57, %v7224_v49  ;;  %806 = vst.msk [vmem:[#allocation11 + $0x288] sm:$0xf] %vm763_vm7, %v741_v36  ;;  %v7904_v50 = vsel %vm7886_vm8, %v7775_v29, %v7455_v53  ;;  %v7236_v61 = vshrl.u32 %v14901_v15, 16 }
 0x27d   :  { %6854 = vrot.lane.b32.xlu0 %v16906_v42, %s11911_s4  ;;  %801 = vst.msk [vmem:[#allocation11 + $0x214] sm:$0xf] %vm763_vm7, %v736_v33  ;;  %v739_v10 = vpack.c.bf16 %v16907_v60, %v16907_v60  ;;  %v14962_v20 = vor.u32 %v7218_v23, %v7217_v12  ;;  %v14965_v18 = vld [vmem:[#allocation2 + $0xa0] sm:$0xf]  ;;  %v14969_v24 = vld [vmem:[#allocation2 + $0x98] sm:$0xf]  ;;  %v10655_v3 = vcombine.low %v7906_v2, %v7906_v2  ;;  %v7459_v31 = vpop.permute.xlu0 %7458 }
 0x27e   :  { %v10398_v59 = vcombine.low %v14965_v18, %v14937_v51  ;;  %v10397_v21 = vcombine.low %v14969_v24, %v14939_v14  ;;  %807 = vst.msk [vmem:[#allocation11 + $0x28c] sm:$0xf] %vm763_vm7, %v742_v40  ;;  %v7239_v16 = vshll.u32 %v14901_v15, 16  ;;  %v10656_v6 = vcombine.high %v7906_v2, %v7906_v2  ;;  %v16910_v38 = vld [vmem:[#allocation31_spill] sm:$0xff]  ;;  %v16912_v23 = vld [vmem:[#allocation46_spill] sm:$0xff]  ;;  %v11076_v56 = vpop.f32.mrb[44].mxu1 }
 0x27f   :  { %804 = vst.msk [vmem:[#allocation11 + $0x280] sm:$0xf] %vm763_vm7, %v739_v10  ;;  %v10653_v26 = vcombine.low %v7904_v50, %v7904_v50  ;;  %v10654_v34 = vcombine.high %v7904_v50, %v7904_v50  ;;  %v16909_v57 = vcombine.low %v14541_v9, %v14551_v27  ;;  %v16911_v55 = vcombine.low %v14543_v62, %v16910_v38  ;;  %v16913_v33 = vld [vmem:[#allocation74_spill] sm:$0xff]  ;;  %v7461_v27 = vpop.permute.xlu1 %7460  ;;  %v16937_v18 = vld [vmem:[#allocation17_spill] sm:$0xff] }
 0x280   :  { %v7229_v29 = vshrl.u32 %v14930_v28, 16  ;;  %v7232_v47 = vshll.u32 %v14930_v28, 16  ;;  %v740_v37 = vpack.c.bf16 %v16912_v23, %v16912_v23  ;;  %v745_v44 = vpack.c.bf16 %v16913_v33, %v16913_v33  ;;  %v16914_v40 = vld [vmem:[#allocation34_spill] sm:$0xff] }
 0x281   :  { %6860 = vrot.lane.b32.xlu1 %v16909_v57, %s11911_s4  ;;  %6858 = vrot.lane.b32.xlu0 %v16911_v55, %s11911_s4  ;;  %v8462_v19 = vshrl.u32 %v10655_v3, 16  ;;  %v8465_v49 = vshll.u32 %v10655_v3, 16  ;;  %v8471_v12 = vshll.u32 %v10656_v6, 16  ;;  %v8448_v9 = vshrl.u32 %v10653_v26, 16  ;;  %v6375_v38 = vpop.permute.xlu0 %6374  ;;  %v5463_v14 = vld [vmem:[#allocation2 + $0x144] sm:$0x1] }
 0x282   :  { %v8451_v36 = vshll.u32 %v10653_v26, 16  ;;  %v7910_v62 = vsel %vm7886_vm8, %v7781_v25, %v7461_v27  ;;  %v7908_v30 = vsel %vm7886_vm8, %v7779_v58, %v7459_v31  ;;  %v14995_v17 = vrot.slane %v7236_v61, 7  ;;  %805 = vst.msk [vmem:[#allocation11 + $0x284] sm:$0xf] %vm763_vm7, %v740_v37  ;;  %810 = vst.msk [vmem:[#allocation11 + $0x298] sm:$0xf] %vm763_vm7, %v745_v44 }
 0x283   :  { %v8464_v42 = vrot.slane %v8462_v19, 4  ;;  %v8467_v60 = vrot.slane %v8465_v49, 5  ;;  %v8450_v10 = vrot.slane %v8448_v9, 4  ;;  %v8457_v32 = vshll.u32 %v10654_v34, 16  ;;  %v16915_v58 = vld [vmem:[#allocation51_spill] sm:$0xff]  ;;  %v3735_v61 = vpop.f32.mrb[45].mxu1  ;;  %v6377_v57 = vpop.permute.xlu1 %6376 }
 0x284   :  { %v8473_v53 = vrot.slane %v8471_v12, 5  ;;  %v8453_v2 = vrot.slane %v8451_v36, 5  ;;  %v10659_v50 = vcombine.low %v7910_v62, %v7910_v62  ;;  %v10660_v25 = vcombine.high %v7910_v62, %v7910_v62  ;;  %v11077_v44 = vpop.f32.mrb[46].mxu1  ;;  %v16916_v27 = vld [vmem:[#allocation38_spill] sm:$0xff] }
 0x285   :  { %7496 = vrot.lane.b32.xlu1 %v16914_v40, %s11912_s26  ;;  %7494 = vrot.lane.b32.xlu0 %v16915_v58, %s11912_s26  ;;  %v8468_v3 = vor.u32 %v8467_v60, %v8464_v42  ;;  %v10657_v6 = vcombine.low %v7908_v30, %v7908_v30  ;;  %v10658_v26 = vcombine.high %v7908_v30, %v7908_v30  ;;  %v3738_v31 = vpop.f32.mrb[47].mxu1  ;;  %v8459_v62 = vrot.slane %v8457_v32, 5 }
 0x286   :  { %v3860_v55 = vpack.c.bf16 %v11076_v56, %v11076_v56  ;;  %v8454_v23 = vor.u32 %v8453_v2, %v8450_v10  ;;  %v8490_v34 = vshrl.u32 %v10659_v50, 16  ;;  %v8493_v37 = vshll.u32 %v10659_v50, 16  ;;  %v6379_v2 = vpop.permute.xlu0 %6378 }
 0x287   :  { %v8499_v33 = vshll.u32 %v10660_v25, 16  ;;  %v8469_v19 = vrot.slane %v8468_v3, 4  ;;  %v8476_v49 = vshrl.u32 %v10657_v6, 16  ;;  %v8479_v12 = vshll.u32 %v10657_v6, 16  ;;  %v6381_v56 = vpop.permute.xlu1 %6380 }
 0x288   :  { %v8485_v9 = vshll.u32 %v10658_v26, 16  ;;  %3925 = vst.msk [vmem:[#allocation11 + $0x2b8] sm:$0xf] %vm763_vm7, %v3860_v55  ;;  %v8455_v36 = vrot.slane %v8454_v23, 4  ;;  %v8492_v30 = vrot.slane %v8490_v34, 4  ;;  %v8495_v42 = vrot.slane %v8493_v37, 5 }
 0x289   :  { %7500 = vrot.lane.b32.xlu1 %v16916_v27, %s11912_s26  ;;  %7498 = vrot.lane.b32.xlu0 %v14731_v43, %s11912_s26  ;;  %v8474_v60 = vsel %vm12524_vm5, %v8469_v19, %v8473_v53  ;;  %v8478_v10 = vrot.slane %v8476_v49, 4  ;;  %v8481_v40 = vrot.slane %v8479_v12, 5  ;;  %v7231_v50 = vrot.slane %v7229_v29, 7  ;;  %v16917_v26 = vld [vmem:[#allocation33_spill] sm:$0xff]  ;;  %v16918_v55 = vld [vmem:[#allocation32_spill] sm:$0xff]  ;;  %v16920_v34 = vld [vmem:[#allocation35_spill] sm:$0xff] }
 0x28a   :  { %v8460_v25 = vsel %vm12524_vm5, %v8455_v36, %v8459_v62  ;;  %v8496_v58 = vor.u32 %v8495_v42, %v8492_v30  ;;  %v8501_v3 = vrot.slane %v8499_v33, 5  ;;  %v8487_v6 = vrot.slane %v8485_v9, 5  ;;  %v16921_v37 = vld [vmem:[#allocation69_spill] sm:$0xff]  ;;  %v15022_v49 = vld [vmem:[#allocation2 + $0xb4] sm:$0x1] }
 0x28b   :  { %v8482_v32 = vor.u32 %v8481_v40, %v8478_v10  ;;  %v16919_v23 = vcombine.low %v16917_v26, %v16918_v55  ;;  %v16922_v53 = vcombine.low %v16920_v34, %v16921_v37  ;;  %v10769_v29 = vcombine.low %v8460_v25, %v8474_v60  ;;  %v5336_v36 = vld [vmem:[#allocation2 + $0x150] sm:$0xf]  ;;  %v16923_v62 = vld [vmem:[#allocation37_spill] sm:$0xff]  ;;  %v6825_v25 = vpop.permute.xlu1 %6824 }
 0x28c   :  { %v8497_v12 = vrot.slane %v8496_v58, 4  ;;  %v3858_v33 = vpack.c.bf16 %v3735_v61, %v3735_v61  ;;  %v3861_v9 = vpack.c.bf16 %v11077_v44, %v11077_v44  ;;  %v3859_v27 = vpack.c.bf16 %v3738_v31, %v3738_v31  ;;  %v16924_v30 = vld [vmem:[#allocation48_spill] sm:$0xff]  ;;  %v16926_v10 = vld [vmem:[#allocation53_spill] sm:$0xff]  ;;  %v6823_v58 = vpop.permute.xlu0 %6822  ;;  %v5334_v61 = vld [vmem:[#allocation2 + $0x148] sm:$0xf] }
 0x28d   :  { %v7607_v43 = vsel %vm309_vm0, %v16919_v23, %v6377_v57  ;;  %v7604_v19 = vsel %vm309_vm0, %v16922_v53, %v6375_v38  ;;  %6416 = vrot.lane.b32.xlu1 %v14761_v48, %s11908_s21  ;;  %6414 = vrot.lane.b32.xlu0 %v14787_v13, %s11908_s21  ;;  %v8483_v57 = vrot.slane %v8482_v32, 4  ;;  %v16925_v42 = vcombine.low %v16923_v62, %v16924_v30  ;;  %v16927_v40 = vld [vmem:[#allocation36_spill] sm:$0xff]  ;;  %v16931_v23 = vld [vmem:[#allocation79_spill] sm:$0xff]  ;;  %v5340_v34 = vld [vmem:[#allocation2 + $0x160] sm:$0xf] }
 0x28e   :  { %v16928_v48 = vcombine.low %v16926_v10, %v16927_v40  ;;  %11170 = vmatprep.mubr.msk.bf16.mxu1 %vm9335_vm9, %v10769_v29  ;;  %v15038_v13 = vor.u32 %v7239_v16, %v14995_v17  ;;  %v8502_v44 = vsel %vm12524_vm5, %v8497_v12, %v8501_v3  ;;  %v7785_v31 = vsel %vm3424_vm6, %v7607_v43, %v6825_v25  ;;  %v15058_v17 = vld [vmem:[#allocation2 + $0xac] sm:$0x1]  ;;  %v16930_v26 = vld [vmem:[#allocation76_spill] sm:$0xff]  ;;  %v16932_v43 = vld [vmem:[#allocation81_spill] sm:$0xff] }
 0x28f   :  { %v7613_v38 = vsel %vm309_vm0, %v16925_v42, %v6381_v56  ;;  %3923 = vst.msk [vmem:[#allocation11 + $0x2b0] sm:$0xf] %vm763_vm7, %v3858_v33  ;;  %3926 = vst.msk [vmem:[#allocation11 + $0x2bc] sm:$0xf] %vm763_vm7, %v3861_v9  ;;  %v15048_v56 = vor.u32 %v7232_v47, %v7231_v50  ;;  %v8488_v16 = vsel %vm12524_vm5, %v8483_v57, %v8487_v6  ;;  %v16929_v3 = vld [vmem:[#allocation75_spill] sm:$0xff]  ;;  %v6829_v29 = vpop.permute.xlu1 %6828  ;;  %v11080_v57 = vpop.f32.mrb[48].mxu1 }
 0x290   :  { %v7610_v60 = vsel %vm309_vm0, %v16928_v48, %v6379_v2  ;;  %3924 = vst.msk [vmem:[#allocation11 + $0x2b4] sm:$0xf] %vm763_vm7, %v3859_v27  ;;  %v15050_v2 = vld [vmem:[#allocation2 + $0xb0] sm:$0xf]  ;;  %v743_v32 = vpack.c.bf16 %v16929_v3, %v16929_v3  ;;  %v746_v28 = vpack.c.bf16 %v16930_v26, %v16930_v26  ;;  %v10482_v47 = vcombine.low %v5336_v36, %v5336_v36  ;;  %v5338_v37 = vld [vmem:[#allocation2 + $0x158] sm:$0xf]  ;;  %v6827_v12 = vpop.permute.xlu0 %6826 }
 0x291   :  { %v10400_v15 = vcombine.low %v15050_v2, %v15022_v49  ;;  %6420 = vrot.lane.b32.xlu1 %v14836_v22, %s11908_s21  ;;  %6418 = vrot.lane.b32.xlu0 %v14852_v8, %s11908_s21  ;;  %v10770_v50 = vcombine.low %v8488_v16, %v8502_v44  ;;  %v10481_v55 = vcombine.low %v5334_v61, %v5334_v61  ;;  %v16933_v8 = vld [vmem:[#allocation82_spill] sm:$0xff]  ;;  %v16934_v27 = vld [vmem:[#allocation84_spill] sm:$0xff]  ;;  %v3751_v48 = vpop.f32.mrb[49].mxu1  ;;  %v16936_v3 = vld [vmem:[#allocation87_spill] sm:$0xff] }
 0x292   :  { %v744_v6 = vpack.c.bf16 %v16931_v23, %v16931_v23  ;;  %v749_v22 = vpack.c.bf16 %v16932_v43, %v16932_v43  ;;  %v7783_v53 = vsel %vm3424_vm6, %v7604_v19, %v6823_v58  ;;  %808 = vst.msk [vmem:[#allocation11 + $0x290] sm:$0xf] %vm763_vm7, %v743_v32  ;;  %811 = vst.msk [vmem:[#allocation11 + $0x29c] sm:$0xf] %vm763_vm7, %v746_v28  ;;  %v6162_v33 = vshrl.u32 %v10482_v47, 16  ;;  %v11081_v16 = vpop.f32.mrb[50].mxu1 }
 0x293   :  { %v747_v9 = vpack.c.bf16 %v16933_v8, %v16933_v8  ;;  %v750_v36 = vpack.c.bf16 %v16934_v27, %v16934_v27  ;;  %11171 = vmatmul.mubr.msk.bf16.gmra.mrb[72].mxu1 %vm9335_vm9, %v10770_v50  ;;  %v15078_v62 = vld [vmem:[#allocation2 + $0xa8] sm:$0xf]  ;;  %v6165_v30 = vshll.u32 %v10482_v47, 16  ;;  %v6155_v42 = vshrl.u32 %v10481_v55, 16  ;;  %v7465_v47 = vpop.permute.xlu1 %7464 }
 0x294   :  { %v10399_v19 = vcombine.low %v15078_v62, %v15058_v17  ;;  %v6158_v10 = vshll.u32 %v10481_v55, 16  ;;  %809 = vst.msk [vmem:[#allocation11 + $0x294] sm:$0xf] %vm763_vm7, %v744_v6  ;;  %814 = vst.msk [vmem:[#allocation11 + $0x308] sm:$0xf] %vm763_vm7, %v749_v22  ;;  %v3864_v40 = vpack.c.bf16 %v11080_v57, %v11080_v57  ;;  %v6164_v25 = vrot.slane %v6162_v33, 7  ;;  %v7463_v50 = vpop.permute.xlu0 %7462 }
 0x295   :  { %6864 = vrot.lane.b32.xlu1 %v10542_v1, %s11911_s4  ;;  %812 = vst.msk [vmem:[#allocation11 + $0x300] sm:$0xf] %vm763_vm7, %v747_v9  ;;  %815 = vst.msk [vmem:[#allocation11 + $0x30c] sm:$0xf] %vm763_vm7, %v750_v36  ;;  %v15090_v58 = vcombine.low %v5340_v34, %v5340_v34  ;;  %v15092_v61 = vcombine.low %v5338_v37, %v5338_v37  ;;  %6862 = vrot.lane.b32.xlu0 %v10541_v52, %s11911_s4  ;;  %v6157_v11 = vrot.slane %v6155_v42, 7  ;;  %v3754_v6 = vpop.f32.mrb[51].mxu1 }
 0x296   :  { %v3862_v44 = vpack.c.bf16 %v3751_v48, %v3751_v48  ;;  %v748_v1 = vpack.c.bf16 %v16935_v54, %v16935_v54  ;;  %v753_v32 = vpack.c.bf16 %v16936_v3, %v16936_v3  ;;  %v7789_v26 = vsel %vm3424_vm6, %v7613_v38, %v6829_v29  ;;  %3929 = vst.msk [vmem:[#allocation11 + $0x328] sm:$0xf] %vm763_vm7, %v3864_v40  ;;  %v5469_v17 = vld [vmem:[#allocation2 + $0x15c] sm:$0x1]  ;;  %v5466_v62 = vld [vmem:[#allocation2 + $0x150] sm:$0xf] }
 0x297   :  { %v7787_v28 = vsel %vm3424_vm6, %v7610_v60, %v6827_v12  ;;  %v3865_v55 = vpack.c.bf16 %v11081_v16, %v11081_v16  ;;  %v6176_v0 = vshrl.u32 %v15090_v58, 16  ;;  %v7914_v46 = vsel %vm7886_vm8, %v7785_v31, %v7465_v47  ;;  %v7469_v7 = vpop.permute.xlu1 %7468 }
 0x298   :  { %v7912_v52 = vsel %vm7886_vm8, %v7783_v53, %v7463_v50  ;;  %3927 = vst.msk [vmem:[#allocation11 + $0x320] sm:$0xf] %vm763_vm7, %v3862_v44  ;;  %v15109_v23 = vor.u32 %v6165_v30, %v6164_v25  ;;  %v6169_v38 = vshrl.u32 %v15092_v61, 16  ;;  %813 = vst.msk [vmem:[#allocation11 + $0x304] sm:$0xf] %vm763_vm7, %v748_v1  ;;  %v10663_v60 = vcombine.low %v7914_v46, %v7914_v46  ;;  %v7467_v4 = vpop.permute.xlu0 %7466 }
 0x299   :  { %818 = vst.msk [vmem:[#allocation11 + $0x318] sm:$0xf] %vm763_vm7, %v753_v32  ;;  %v10664_v43 = vcombine.high %v7914_v46, %v7914_v46  ;;  %v10661_v22 = vcombine.low %v7912_v52, %v7912_v52  ;;  %6868 = vrot.lane.b32.xlu1 %v10544_v39, %s11911_s4  ;;  %3930 = vst.msk [vmem:[#allocation11 + $0x32c] sm:$0xf] %vm763_vm7, %v3865_v55  ;;  %v6179_v31 = vshll.u32 %v15090_v58, 16  ;;  %6866 = vrot.lane.b32.xlu0 %v10543_v63, %s11911_s4  ;;  %v11084_v46 = vpop.f32.mrb[52].mxu1 }
 0x29a   :  { %v10662_v34 = vcombine.high %v7912_v52, %v7912_v52  ;;  %v15124_v37 = vor.u32 %v6158_v10, %v6157_v11  ;;  %v3863_v53 = vpack.c.bf16 %v3754_v6, %v3754_v6  ;;  %v6178_v29 = vrot.slane %v6176_v0, 7 }
 0x29b   :  { %v8518_v12 = vshrl.u32 %v10663_v60, 16  ;;  %v8521_v33 = vshll.u32 %v10663_v60, 16  ;;  %v8527_v8 = vshll.u32 %v10664_v43, 16  ;;  %v8504_v9 = vshrl.u32 %v10661_v22, 16  ;;  %v6385_v11 = vpop.permute.xlu1 %6384 }
 0x29c   :  { %v8507_v39 = vshll.u32 %v10661_v22, 16  ;;  %v7918_v27 = vsel %vm7886_vm8, %v7789_v26, %v7469_v7  ;;  %v7916_v36 = vsel %vm7886_vm8, %v7787_v28, %v7467_v4  ;;  %3928 = vst.msk [vmem:[#allocation11 + $0x324] sm:$0xf] %vm763_vm7, %v3863_v53  ;;  %v6171_v57 = vrot.slane %v6169_v38, 7  ;;  %v6383_v54 = vpop.permute.xlu0 %6382  ;;  %v5464_v7 = vld [vmem:[#allocation2 + $0x148] sm:$0xf] }
 0x29d   :  { %v8520_v41 = vrot.slane %v8518_v12, 4  ;;  %v8523_v5 = vrot.slane %v8521_v33, 5  ;;  %v8506_v63 = vrot.slane %v8504_v9, 4  ;;  %7504 = vrot.lane.b32.xlu1 %v14960_v45, %s11912_s26  ;;  %v6172_v30 = vshll.u32 %v15092_v61, 16  ;;  %7502 = vrot.lane.b32.xlu0 %v14962_v20, %s11912_s26  ;;  %v3767_v33 = vpop.f32.mrb[53].mxu1 }
 0x29e   :  { %v8509_v42 = vrot.slane %v8507_v39, 5  ;;  %v8513_v10 = vshll.u32 %v10662_v34, 16  ;;  %v10667_v40 = vcombine.low %v7918_v27, %v7918_v27  ;;  %v10668_v48 = vcombine.high %v7918_v27, %v7918_v27  ;;  %v5465_v4 = vld [vmem:[#allocation2 + $0x14c] sm:$0x1] }
 0x29f   :  { %v8524_v25 = vor.u32 %v8523_v5, %v8520_v41  ;;  %v8529_v58 = vrot.slane %v8527_v8, 5  ;;  %v10665_v44 = vcombine.low %v7916_v36, %v7916_v36  ;;  %v10666_v16 = vcombine.high %v7916_v36, %v7916_v36  ;;  %v6389_v60 = vpop.permute.xlu1 %6388  ;;  %v5462_v36 = vld [vmem:[#allocation2 + $0x140] sm:$0xf] }
 0x2a0   :  { %v8510_v1 = vor.u32 %v8509_v42, %v8506_v63  ;;  %v8546_v3 = vshrl.u32 %v10667_v40, 16  ;;  %v8549_v32 = vshll.u32 %v10667_v40, 16  ;;  %v8555_v26 = vshll.u32 %v10668_v48, 16  ;;  %v6387_v43 = vpop.permute.xlu0 %6386  ;;  %v16938_v63 = vld [vmem:[#allocation56_spill] sm:$0xff] }
 0x2a1   :  { %v8525_v45 = vrot.slane %v8524_v25, 4  ;;  %v8532_v28 = vshrl.u32 %v10665_v44, 16  ;;  %v8535_v61 = vshll.u32 %v10665_v44, 16  ;;  %v8541_v47 = vshll.u32 %v10666_v16, 16  ;;  %7508 = vrot.lane.b32.xlu1 %v15038_v13, %s11912_s26  ;;  %7506 = vrot.lane.b32.xlu0 %v15048_v56, %s11912_s26  ;;  %v15171_v48 = vld [vmem:[#allocation2 + $0x158] sm:$0xf] }
 0x2a2   :  { %v8511_v50 = vrot.slane %v8510_v1, 4  ;;  %v8515_v55 = vrot.slane %v8513_v10, 5  ;;  %v8548_v20 = vrot.slane %v8546_v3, 4  ;;  %v8551_v0 = vrot.slane %v8549_v32, 5  ;;  %v16939_v44 = vld [vmem:[#allocation88_spill] sm:$0xff] }
 0x2a3   :  { %v8530_v52 = vsel %vm12524_vm5, %v8525_v45, %v8529_v58  ;;  %v8534_v6 = vrot.slane %v8532_v28, 4  ;;  %v8537_v38 = vrot.slane %v8535_v61, 5  ;;  %v6181_v22 = vor.u32 %v6179_v31, %v6178_v29  ;;  %v11085_v29 = vpop.f32.mrb[54].mxu1  ;;  %v16941_v28 = vld [vmem:[#allocation90_spill] sm:$0xff] }
 0x2a4   :  { %v8516_v34 = vsel %vm12524_vm5, %v8511_v50, %v8515_v55  ;;  %v8552_v13 = vor.u32 %v8551_v0, %v8548_v20  ;;  %v8557_v53 = vrot.slane %v8555_v26, 5  ;;  %v8543_v12 = vrot.slane %v8541_v47, 5  ;;  %v3770_v24 = vpop.f32.mrb[55].mxu1  ;;  %v6831_v41 = vpop.permute.xlu0 %6830  ;;  %v16942_v47 = vld [vmem:[#allocation92_spill] sm:$0xff] }
 0x2a5   :  { %v8538_v8 = vor.u32 %v8537_v38, %v8534_v6  ;;  %v7619_v56 = vsel %vm309_vm0, %v10398_v59, %v6385_v11  ;;  %v7616_v9 = vsel %vm309_vm0, %v10397_v21, %v6383_v54  ;;  %6424 = vrot.lane.b32.xlu1 %v15109_v23, %s11908_s21  ;;  %v10771_v31 = vcombine.low %v8516_v34, %v8530_v52  ;;  %v6833_v23 = vpop.permute.xlu1 %6832  ;;  %v16940_v54 = vld [vmem:[#allocation89_spill] sm:$0xff]  ;;  %v16943_v52 = vld [vmem:[#allocation55_spill] sm:$0xff]  ;;  %v16944_v38 = vld [vmem:[#allocation94_spill] sm:$0xff] }
 0x2a6   :  { %v8553_v39 = vrot.slane %v8552_v13, 4  ;;  %6422 = vrot.lane.b32.xlu0 %v15124_v37, %s11908_s21  ;;  %v6174_v27 = vor.u32 %v6172_v30, %v6171_v57  ;;  %v3868_v51 = vpack.c.bf16 %v11084_v46, %v11084_v46  ;;  %v751_v59 = vpack.c.bf16 %v16937_v18, %v16937_v18  ;;  %v16946_v34 = vld [vmem:[#allocation19_spill] sm:$0xff] }
 0x2a7   :  { %v8539_v21 = vrot.slane %v8538_v8, 4  ;;  %11174 = vmatprep.mubr.msk.bf16.mxu1 %vm9335_vm9, %v10771_v31  ;;  %v3866_v5 = vpack.c.bf16 %v3767_v33, %v3767_v33  ;;  %v754_v42 = vpack.c.bf16 %v16938_v63, %v16938_v63  ;;  %v3869_v10 = vpack.c.bf16 %v11085_v29, %v11085_v29 }
 0x2a8   :  { %v8558_v37 = vsel %vm12524_vm5, %v8553_v39, %v8557_v53  ;;  %v7625_v57 = vsel %vm309_vm0, %v10400_v15, %v6389_v60  ;;  %v7622_v30 = vsel %vm309_vm0, %v10399_v19, %v6387_v43  ;;  %3933 = vst.msk [vmem:[#allocation11 + $0x338] sm:$0xf] %vm763_vm7, %v3868_v51  ;;  %816 = vst.msk [vmem:[#allocation11 + $0x310] sm:$0xf] %vm763_vm7, %v751_v59  ;;  %v5467_v19 = vld [vmem:[#allocation2 + $0x154] sm:$0x1]  ;;  %v6835_v45 = vpop.permute.xlu0 %6834 }
 0x2a9   :  { %v10546_v40 = vcombine.low %v5464_v7, %v5465_v4  ;;  %v8544_v25 = vsel %vm12524_vm5, %v8539_v21, %v8543_v12  ;;  %6428 = vrot.lane.b32.xlu1 %v6181_v22, %s11908_s21  ;;  %3931 = vst.msk [vmem:[#allocation11 + $0x330] sm:$0xf] %vm763_vm7, %v3866_v5  ;;  %819 = vst.msk [vmem:[#allocation11 + $0x31c] sm:$0xf] %vm763_vm7, %v754_v42  ;;  %v15179_v49 = vcombine.low %v5464_v7, %v5464_v7  ;;  %v6837_v26 = vpop.permute.xlu1 %6836  ;;  %v16945_v43 = vld [vmem:[#allocation95_spill] sm:$0xff]  ;;  %v11088_v53 = vpop.f32.mrb[56].mxu1 }
 0x2aa   :  { %3934 = vst.msk [vmem:[#allocation11 + $0x33c] sm:$0xf] %vm763_vm7, %v3869_v10  ;;  %v10545_v2 = vcombine.low %v5462_v36, %v5463_v14  ;;  %v15181_v15 = vcombine.low %v5462_v36, %v5462_v36  ;;  %6426 = vrot.lane.b32.xlu0 %v6174_v27, %s11908_s21  ;;  %v10772_v58 = vcombine.low %v8544_v25, %v8558_v37  ;;  %v16947_v39 = vld [vmem:[#allocation21_spill] sm:$0xff]  ;;  %v3783_v59 = vpop.f32.mrb[57].mxu1  ;;  %v15236_v42 = vpop.f32.mrb[64].mxu0 }
 0x2ab   :  { %v752_v16 = vpack.c.bf16 %v16939_v44, %v16939_v44  ;;  %v3867_v11 = vpack.c.bf16 %v3770_v24, %v3770_v24  ;;  %v757_v1 = vpack.c.bf16 %v16940_v54, %v16940_v54  ;;  %v7793_v3 = vsel %vm3424_vm6, %v7619_v56, %v6833_v23  ;;  %v15231_v24 = vld [vmem:[#allocation2 + $0xc4] sm:$0x1]  ;;  %v11089_v63 = vpop.f32.mrb[58].mxu1  ;;  %v15238_v10 = vld [vmem:[#allocation2 + $0xbc] sm:$0x1]  ;;  %v15241_v25 = vpop.f32.mrb[65].mxu0 }
 0x2ac   :  { %v7791_v32 = vsel %vm3424_vm6, %v7616_v9, %v6831_v41  ;;  %v755_v61 = vpack.c.bf16 %v16941_v28, %v16941_v28  ;;  %v758_v50 = vpack.c.bf16 %v16942_v47, %v16942_v47  ;;  %11175 = vmatmul.mubr.msk.bf16.gmra.mrb[76].mxu1 %vm9335_vm9, %v10772_v58  ;;  %v7797_v55 = vsel %vm3424_vm6, %v7625_v57, %v6837_v26  ;;  %v7471_v29 = vpop.permute.xlu0 %7470  ;;  %v15251_v54 = vld [vmem:[#allocation2 + $0xb8] sm:$0xf] }
 0x2ad   :  { %817 = vst.msk [vmem:[#allocation11 + $0x314] sm:$0xf] %vm763_vm7, %v752_v16  ;;  %3932 = vst.msk [vmem:[#allocation11 + $0x334] sm:$0xf] %vm763_vm7, %v3867_v11  ;;  %v10548_v20 = vcombine.low %v15171_v48, %v5469_v17  ;;  %v15202_v0 = vcombine.low %v15171_v48, %v15171_v48  ;;  %v10547_v46 = vcombine.low %v5466_v62, %v5467_v19  ;;  %6872 = vrot.lane.b32.xlu1 %v10546_v40, %s11911_s4  ;;  %v7473_v31 = vpop.permute.xlu1 %7472  ;;  %v3786_v48 = vpop.f32.mrb[59].mxu1 }
 0x2ae   :  { %822 = vst.msk [vmem:[#allocation11 + $0x388] sm:$0xf] %vm763_vm7, %v757_v1  ;;  %820 = vst.msk [vmem:[#allocation11 + $0x380] sm:$0xf] %vm763_vm7, %v755_v61  ;;  %v756_v6 = vpack.c.bf16 %v16943_v52, %v16943_v52  ;;  %v761_v60 = vpack.c.bf16 %v16944_v38, %v16944_v38  ;;  %v759_v22 = vpack.c.bf16 %v16945_v43, %v16945_v43  ;;  %6870 = vrot.lane.b32.xlu0 %v10545_v2, %s11911_s4  ;;  %v15243_v19 = vld [vmem:[#allocation2 + $0xc0] sm:$0xf] }
 0x2af   :  { %823 = vst.msk [vmem:[#allocation11 + $0x38c] sm:$0xf] %vm763_vm7, %v758_v50  ;;  %v762_v13 = vpack.c.bf16 %v16946_v34, %v16946_v34  ;;  %v7250_v12 = vshrl.u32 %v15179_v49, 16  ;;  %v7253_v33 = vshll.u32 %v15179_v49, 16  ;;  %v7243_v8 = vshrl.u32 %v15181_v15, 16 }
 0x2b0   :  { %v7246_v56 = vshll.u32 %v15181_v15, 16  ;;  %v7795_v9 = vsel %vm3424_vm6, %v7622_v30, %v6835_v45  ;;  %v15221_v7 = vcombine.low %v5466_v62, %v5466_v62  ;;  %821 = vst.msk [vmem:[#allocation11 + $0x384] sm:$0xf] %vm763_vm7, %v756_v6  ;;  %826 = vst.msk [vmem:[#allocation11 + $0x398] sm:$0xf] %vm763_vm7, %v761_v60  ;;  %v3872_v4 = vpack.c.bf16 %v11088_v53, %v11088_v53  ;;  %v7475_v62 = vpop.permute.xlu0 %7474 }
 0x2b1   :  { %824 = vst.msk [vmem:[#allocation11 + $0x390] sm:$0xf] %vm763_vm7, %v759_v22  ;;  %827 = vst.msk [vmem:[#allocation11 + $0x39c] sm:$0xf] %vm763_vm7, %v762_v13  ;;  %v760_v27 = vpack.c.bf16 %v16947_v39, %v16947_v39  ;;  %v7922_v51 = vsel %vm7886_vm8, %v7793_v3, %v7473_v31  ;;  %v7920_v18 = vsel %vm7886_vm8, %v7791_v32, %v7471_v29  ;;  %v7252_v36 = vrot.slane %v7250_v12, 7  ;;  %v7477_v17 = vpop.permute.xlu1 %7476  ;;  %v15255_v3 = vpop.f32.mrb[66].mxu0 }
 0x2b2   :  { %v7245_v14 = vrot.slane %v7243_v8, 7  ;;  %v10671_v21 = vcombine.low %v7922_v51, %v7922_v51  ;;  %v10672_v23 = vcombine.high %v7922_v51, %v7922_v51  ;;  %v10669_v41 = vcombine.low %v7920_v18, %v7920_v18  ;;  %6876 = vrot.lane.b32.xlu1 %v10548_v20, %s11911_s4  ;;  %3937 = vst.msk [vmem:[#allocation11 + $0x3a8] sm:$0xf] %vm763_vm7, %v3872_v4  ;;  %v15258_v61 = vpop.f32.mrb[67].mxu0 }
 0x2b3   :  { %v10670_v5 = vcombine.high %v7920_v18, %v7920_v18  ;;  %825 = vst.msk [vmem:[#allocation11 + $0x394] sm:$0xf] %vm763_vm7, %v760_v27  ;;  %6874 = vrot.lane.b32.xlu0 %v10547_v46, %s11911_s4  ;;  %v3870_v37 = vpack.c.bf16 %v3783_v59, %v3783_v59  ;;  %v3873_v57 = vpack.c.bf16 %v11089_v63, %v11089_v63  ;;  %v15261_v46 = vpop.f32.mrb[60].mxu1  ;;  %v15270_v4 = vpop.f32.mrb[68].mxu0 }
 0x2b4   :  { %v7255_v30 = vor.u32 %v7253_v33, %v7252_v36  ;;  %v7248_v40 = vor.u32 %v7246_v56, %v7245_v14  ;;  %v8574_v49 = vshrl.u32 %v10671_v21, 16  ;;  %v8577_v2 = vshll.u32 %v10671_v21, 16  ;;  %v6391_v22 = vpop.permute.xlu0 %6390  ;;  %v15265_v33 = vpop.f32.mrb[61].mxu1 }
 0x2b5   :  { %v8560_v15 = vshrl.u32 %v10669_v41, 16  ;;  %v10402_v58 = vcombine.low %v15243_v19, %v15231_v24  ;;  %v8563_v44 = vshll.u32 %v10669_v41, 16  ;;  %v7926_v16 = vsel %vm7886_vm8, %v7797_v55, %v7477_v17  ;;  %3935 = vst.msk [vmem:[#allocation11 + $0x3a0] sm:$0xf] %vm763_vm7, %v3870_v37  ;;  %3938 = vst.msk [vmem:[#allocation11 + $0x3ac] sm:$0xf] %vm763_vm7, %v3873_v57  ;;  %v6393_v43 = vpop.permute.xlu1 %6392 }
 0x2b6   :  { %v7924_v11 = vsel %vm7886_vm8, %v7795_v9, %v7475_v62  ;;  %v10401_v1 = vcombine.low %v15251_v54, %v15238_v10  ;;  %v8576_v32 = vrot.slane %v8574_v49, 4  ;;  %v8579_v26 = vrot.slane %v8577_v2, 5  ;;  %7512 = vrot.lane.b32.xlu1 %v7255_v30, %s11912_s26  ;;  %v11093_v29 = vpop.f32.mrb[62].mxu1  ;;  %v15274_v36 = vpop.f32.mrb[69].mxu0  ;;  %v5309_v62 = vld [vmem:[#allocation2 + $0xd4] sm:$0x1] }
 0x2b7   :  { %v8583_v45 = vshll.u32 %v10672_v23, 16  ;;  %v8562_v28 = vrot.slane %v8560_v15, 4  ;;  %v8565_v47 = vrot.slane %v8563_v44, 5  ;;  %v8569_v50 = vshll.u32 %v10670_v5, 16  ;;  %7510 = vrot.lane.b32.xlu0 %v7248_v40, %s11912_s26  ;;  %v15272_v59 = vpop.f32.mrb[63].mxu1 }
 0x2b8   :  { %v10675_v55 = vcombine.low %v7926_v16, %v7926_v16  ;;  %v10676_v20 = vcombine.high %v7926_v16, %v7926_v16  ;;  %v8580_v52 = vor.u32 %v8579_v26, %v8576_v32  ;;  %v10673_v6 = vcombine.low %v7924_v11, %v7924_v11  ;;  %v15277_v63 = vpop.permute.xlu0 %6394  ;;  %v5307_v26 = vld [vmem:[#allocation2 + $0xcc] sm:$0x1] }
 0x2b9   :  { %v10674_v38 = vcombine.high %v7924_v11, %v7924_v11  ;;  %v3871_v60 = vpack.c.bf16 %v3786_v48, %v3786_v48  ;;  %v8566_v34 = vor.u32 %v8565_v47, %v8562_v28  ;;  %v8585_v39 = vrot.slane %v8583_v45, 5  ;;  %v6397_v5 = vpop.permute.xlu1 %6396  ;;  %v15286_v48 = vpop.f32.mrb[70].mxu0  ;;  %v5344_v47 = vld [vmem:[#allocation2 + $0x178] sm:$0xf] }
 0x2ba   :  { %v8602_v13 = vshrl.u32 %v10675_v55, 16  ;;  %v8605_v53 = vshll.u32 %v10675_v55, 16  ;;  %v15263_v12 = vshll.u32 %v10676_v20, 16  ;;  %v8581_v8 = vrot.slane %v8580_v52, 4  ;;  %v15296_v44 = vpop.f32.mrb[71].mxu0 }
 0x2bb   :  { %v8588_v56 = vshrl.u32 %v10673_v6, 16  ;;  %v8591_v9 = vshll.u32 %v10673_v6, 16  ;;  %v15267_v31 = vshll.u32 %v10674_v38, 16  ;;  %3936 = vst.msk [vmem:[#allocation11 + $0x3a4] sm:$0xf] %vm763_vm7, %v3871_v60  ;;  %v8567_v27 = vrot.slane %v8566_v34, 4 }
 0x2bc   :  { %v8604_v51 = vrot.slane %v8602_v13, 4  ;;  %v8607_v18 = vrot.slane %v8605_v53, 5  ;;  %v8571_v14 = vrot.slane %v8569_v50, 5  ;;  %v8613_v21 = vrot.slane %v15263_v12, 5  ;;  %v15309_v55 = vpop.permute.xlu0 %6838  ;;  %v11722_v6 = vld [vmem:[#allocation2 + $0xd0] sm:$0xf] }
 0x2bd   :  { %v8590_v23 = vrot.slane %v8588_v56, 4  ;;  %v8593_v41 = vrot.slane %v8591_v9, 5  ;;  %v15281_v37 = vsel %vm12524_vm5, %v8581_v8, %v8585_v39  ;;  %v8599_v30 = vrot.slane %v15267_v31, 5  ;;  %v6841_v50 = vpop.permute.xlu1 %6840  ;;  %v5346_v8 = vld [vmem:[#allocation2 + $0x180] sm:$0xf] }
 0x2be   :  { %v8608_v57 = vor.u32 %v8607_v18, %v8604_v51  ;;  %v5135_v40 = vpack.c.bf16 %v15236_v42, %v15236_v42  ;;  %v15290_v49 = vsel %vm12524_vm5, %v8567_v27, %v8571_v14  ;;  %v5133_v15 = vpack.c.bf16 %v15241_v25, %v15241_v25 }
 0x2bf   :  { %v8594_v2 = vor.u32 %v8593_v41, %v8590_v23  ;;  %v5136_v17 = vpack.c.bf16 %v15255_v3, %v15255_v3  ;;  %v7264_v42 = vshrl.u32 %v15202_v0, 16  ;;  %v7267_v11 = vshll.u32 %v15202_v0, 16 }
 0x2c0   :  { %v8609_v16 = vrot.slane %v8608_v57, 4  ;;  %5200 = vst.msk [vmem:[#allocation11 + $0x48] sm:$0xf] %vm763_vm7, %v5135_v40  ;;  %v7257_v32 = vshrl.u32 %v15221_v7, 16  ;;  %5198 = vst.msk [vmem:[#allocation11 + $0x40] sm:$0xf] %vm763_vm7, %v5133_v15  ;;  %v5134_v3 = vpack.c.bf16 %v15258_v61, %v15258_v61  ;;  %v3876_v28 = vpack.c.bf16 %v15261_v46, %v15261_v46  ;;  %v6843_v9 = vpop.permute.xlu0 %6842 }
 0x2c1   :  { %v8595_v45 = vrot.slane %v8594_v2, 4  ;;  %5201 = vst.msk [vmem:[#allocation11 + $0x4c] sm:$0xf] %vm763_vm7, %v5136_v17  ;;  %v7260_v25 = vshll.u32 %v15221_v7, 16  ;;  %v7631_v0 = vsel %vm309_vm0, %v10402_v58, %v6393_v43  ;;  %v7266_v20 = vrot.slane %v7264_v42, 7  ;;  %v15323_v58 = vpop.f32.mrb[72].mxu0  ;;  %v6845_v56 = vpop.permute.xlu1 %6844 }
 0x2c2   :  { %v7259_v52 = vrot.slane %v7257_v32, 7  ;;  %v10404_v38 = vcombine.low %v11722_v6, %v5309_v62  ;;  %v5342_v7 = vld [vmem:[#allocation2 + $0x170] sm:$0xf]  ;;  %v7628_v61 = vsel %vm309_vm0, %v10401_v1, %v6391_v22  ;;  %5199 = vst.msk [vmem:[#allocation11 + $0x44] sm:$0xf] %vm763_vm7, %v5134_v3  ;;  %v3874_v24 = vpack.c.bf16 %v15265_v33, %v15265_v33  ;;  %v15327_v54 = vpop.f32.mrb[73].mxu0 }
 0x2c3   :  { %3941 = vst.msk [vmem:[#allocation11 + $0x3b8] sm:$0xf] %vm763_vm7, %v3876_v28  ;;  %v11723_v46 = vld [vmem:[#allocation2 + $0xc8] sm:$0xf]  ;;  %v3877_v19 = vpack.c.bf16 %v11093_v29, %v11093_v29  ;;  %v8614_v43 = vsel %vm12524_vm5, %v8609_v16, %v8613_v21  ;;  %v7269_v34 = vor.u32 %v7267_v11, %v7266_v20  ;;  %v10486_v10 = vcombine.low %v5344_v47, %v5344_v47  ;;  %v15342_v51 = vpop.f32.mrb[74].mxu0 }
 0x2c4   :  { %v10403_v60 = vcombine.low %v11723_v46, %v5307_v26  ;;  %v7262_v13 = vor.u32 %v7260_v25, %v7259_v52  ;;  %v8600_v1 = vsel %vm12524_vm5, %v8595_v45, %v8599_v30  ;;  %3939 = vst.msk [vmem:[#allocation11 + $0x3b0] sm:$0xf] %vm763_vm7, %v3874_v24  ;;  %v10485_v22 = vcombine.low %v5342_v7, %v5342_v7  ;;  %v5348_v33 = vld [vmem:[#allocation2 + $0x188] sm:$0xf]  ;;  %v15350_v21 = vpop.f32.mrb[75].mxu0  ;;  %v7479_v15 = vpop.permute.xlu0 %7478 }
 0x2c5   :  { %3942 = vst.msk [vmem:[#allocation11 + $0x3bc] sm:$0xf] %vm763_vm7, %v3877_v19  ;;  %v3875_v53 = vpack.c.bf16 %v15272_v59, %v15272_v59  ;;  %v5139_v12 = vpack.c.bf16 %v15270_v4, %v15270_v4  ;;  %7516 = vrot.lane.b32.xlu1 %v7269_v34, %s11912_s26  ;;  %v7637_v31 = vsel %vm309_vm0, %v10404_v38, %v6397_v5  ;;  %v6190_v29 = vshrl.u32 %v10486_v10, 16  ;;  %v7481_v2 = vpop.permute.xlu1 %7480  ;;  %v15369_v26 = vpop.f32.mrb[76].mxu0  ;;  %v5476_v19 = vld [vmem:[#allocation2 + $0x180] sm:$0xf] }
 0x2c6   :  { %7514 = vrot.lane.b32.xlu0 %v7262_v13, %s11912_s26  ;;  %v6193_v39 = vshll.u32 %v10486_v10, 16  ;;  %v10773_v27 = vcombine.low %v15290_v49, %v15281_v37  ;;  %v7634_v4 = vsel %vm309_vm0, %v10403_v60, %v15277_v63  ;;  %v6183_v18 = vshrl.u32 %v10485_v22, 16  ;;  %v15361_v49 = vld [vmem:[#allocation2 + $0x174] sm:$0x1]  ;;  %v15375_v47 = vpop.f32.mrb[77].mxu0 }
 0x2c7   :  { %v6186_v59 = vshll.u32 %v10485_v22, 16  ;;  %3940 = vst.msk [vmem:[#allocation11 + $0x3b4] sm:$0xf] %vm763_vm7, %v3875_v53  ;;  %5204 = vst.msk [vmem:[#allocation11 + $0x58] sm:$0xf] %vm763_vm7, %v5139_v12  ;;  %v5137_v14 = vpack.c.bf16 %v15274_v36, %v15274_v36  ;;  %v6192_v23 = vrot.slane %v6190_v29, 7  ;;  %v5140_v41 = vpack.c.bf16 %v15286_v48, %v15286_v48 }
 0x2c8   :  { %11178 = vmatprep.mubr.msk.bf16.mxu1 %vm9335_vm9, %v10773_v27  ;;  %v10488_v5 = vcombine.low %v5348_v33, %v5348_v33  ;;  %v10487_v37 = vcombine.low %v5346_v8, %v5346_v8  ;;  %v6185_v63 = vrot.slane %v6183_v18, 7  ;;  %v7801_v57 = vsel %vm3424_vm6, %v7631_v0, %v6841_v50  ;;  %v15359_v36 = vld [vmem:[#allocation2 + $0x170] sm:$0xf]  ;;  %v5471_v0 = vld [vmem:[#allocation2 + $0x16c] sm:$0x1]  ;;  %v7483_v7 = vpop.permute.xlu0 %7482  ;;  %v15386_v34 = vpop.f32.mrb[78].mxu0 }
 0x2c9   :  { %5202 = vst.msk [vmem:[#allocation11 + $0x50] sm:$0xf] %vm763_vm7, %v5137_v14  ;;  %v5138_v30 = vpack.c.bf16 %v15296_v44, %v15296_v44  ;;  %v10774_v40 = vcombine.low %v8600_v1, %v8614_v43  ;;  %v6195_v17 = vor.u32 %v6193_v39, %v6192_v23  ;;  %5205 = vst.msk [vmem:[#allocation11 + $0x5c] sm:$0xf] %vm763_vm7, %v5140_v41  ;;  %v7485_v38 = vpop.permute.xlu1 %7484  ;;  %v5477_v43 = vld [vmem:[#allocation2 + $0x184] sm:$0x1] }
 0x2ca   :  { %v6204_v48 = vshrl.u32 %v10488_v5, 16  ;;  %v6207_v62 = vshll.u32 %v10488_v5, 16  ;;  %v6197_v16 = vshrl.u32 %v10487_v37, 16  ;;  %v6188_v42 = vor.u32 %v6186_v59, %v6185_v63  ;;  %v5474_v22 = vld [vmem:[#allocation2 + $0x178] sm:$0xf]  ;;  %v15393_v53 = vpop.f32.mrb[79].mxu0 }
 0x2cb   :  { %v7799_v11 = vsel %vm3424_vm6, %v7628_v61, %v15309_v55  ;;  %v6200_v32 = vshll.u32 %v10487_v37, 16  ;;  %5203 = vst.msk [vmem:[#allocation11 + $0x54] sm:$0xf] %vm763_vm7, %v5138_v30  ;;  %11179 = vmatmul.mubr.msk.bf16.gmra.mrb[80].mxu1 %vm9335_vm9, %v10774_v40  ;;  %v7805_v44 = vsel %vm3424_vm6, %v7637_v31, %v6845_v56  ;;  %6432 = vrot.lane.b32.xlu1 %v6195_v17, %s11908_s21  ;;  %v5470_v55 = vld [vmem:[#allocation2 + $0x168] sm:$0xf]  ;;  %v15407_v63 = vpop.f32.mrb[80].mxu0 }
 0x2cc   :  { %v6206_v45 = vrot.slane %v6204_v48, 7  ;;  %v6199_v25 = vrot.slane %v6197_v16, 7  ;;  %v7803_v3 = vsel %vm3424_vm6, %v7634_v4, %v6843_v9  ;;  %v10550_v28 = vcombine.low %v15359_v36, %v15361_v49  ;;  %6430 = vrot.lane.b32.xlu0 %v6188_v42, %s11908_s21  ;;  %v5475_v9 = vld [vmem:[#allocation2 + $0x17c] sm:$0x1]  ;;  %v15414_v49 = vpop.f32.mrb[81].mxu0 }
 0x2cd   :  { %v15380_v50 = vcombine.low %v15359_v36, %v15359_v36  ;;  %v5143_v20 = vpack.c.bf16 %v15323_v58, %v15323_v58  ;;  %v7930_v52 = vsel %vm7886_vm8, %v7801_v57, %v7481_v2  ;;  %v7928_v6 = vsel %vm7886_vm8, %v7799_v11, %v7479_v15  ;;  %v15401_v27 = vpop.permute.xlu1 %6400 }
 0x2ce   :  { %v6209_v61 = vor.u32 %v6207_v62, %v6206_v45  ;;  %v6202_v46 = vor.u32 %v6200_v32, %v6199_v25  ;;  %v10679_v60 = vcombine.low %v7930_v52, %v7930_v52  ;;  %v10680_v24 = vcombine.high %v7930_v52, %v7930_v52 }
 0x2cf   :  { %5208 = vst.msk [vmem:[#allocation11 + $0xc8] sm:$0xf] %vm763_vm7, %v5143_v20  ;;  %v10677_v13 = vcombine.low %v7928_v6, %v7928_v6  ;;  %v10678_v10 = vcombine.high %v7928_v6, %v7928_v6  ;;  %v5141_v58 = vpack.c.bf16 %v15327_v54, %v15327_v54  ;;  %v5144_v1 = vpack.c.bf16 %v15342_v51, %v15342_v51  ;;  %v15403_v51 = vpop.permute.xlu0 %6398 }
 0x2d0   :  { %6436 = vrot.lane.b32.xlu1 %v6209_v61, %s11908_s21  ;;  %v10549_v12 = vcombine.low %v5470_v55, %v5471_v0  ;;  %v8630_v33 = vshrl.u32 %v10679_v60, 16  ;;  %v8633_v8 = vshll.u32 %v10679_v60, 16  ;;  %v8639_v56 = vshll.u32 %v10680_v24, 16  ;;  %6434 = vrot.lane.b32.xlu0 %v6202_v46, %s11908_s21  ;;  %v5311_v24 = vld [vmem:[#allocation2 + $0xe4] sm:$0x1] }
 0x2d1   :  { %v15397_v31 = vcombine.low %v5470_v55, %v5470_v55  ;;  %v8616_v29 = vshrl.u32 %v10677_v13, 16  ;;  %v8619_v39 = vshll.u32 %v10677_v13, 16  ;;  %5206 = vst.msk [vmem:[#allocation11 + $0xc0] sm:$0xf] %vm763_vm7, %v5141_v58  ;;  %5209 = vst.msk [vmem:[#allocation11 + $0xcc] sm:$0xf] %vm763_vm7, %v5144_v1  ;;  %v10552_v54 = vcombine.low %v5476_v19, %v5477_v43  ;;  %v15417_v62 = vpop.permute.xlu1 %6404 }
 0x2d2   :  { %v8632_v4 = vrot.slane %v8630_v33, 4  ;;  %v8635_v18 = vrot.slane %v8633_v8, 5  ;;  %v8625_v59 = vshll.u32 %v10678_v10, 16  ;;  %v15405_v14 = vcombine.low %v5476_v19, %v5476_v19 }
 0x2d3   :  { %v8641_v23 = vrot.slane %v8639_v56, 5  ;;  %v8618_v41 = vrot.slane %v8616_v29, 4  ;;  %v8621_v5 = vrot.slane %v8619_v39, 5  ;;  %v10551_v37 = vcombine.low %v5474_v22, %v5475_v9  ;;  %v15419_v16 = vpop.permute.xlu0 %6402  ;;  %v11724_v29 = vld [vmem:[#allocation2 + $0xe8] sm:$0xf] }
 0x2d4   :  { %6880 = vrot.lane.b32.xlu1 %v10550_v28, %s11911_s4  ;;  %v8636_v57 = vor.u32 %v8635_v18, %v8632_v4  ;;  %v5142_v30 = vpack.c.bf16 %v15350_v21, %v15350_v21  ;;  %v7934_v40 = vsel %vm7886_vm8, %v7805_v44, %v7485_v38  ;;  %v7932_v36 = vsel %vm7886_vm8, %v7803_v3, %v7483_v7  ;;  %v15423_v44 = vpop.f32.mrb[82].mxu0  ;;  %v5313_v38 = vld [vmem:[#allocation2 + $0xec] sm:$0x1]  ;;  %v5317_v18 = vld [vmem:[#allocation2 + $0xfc] sm:$0x1] }
 0x2d5   :  { %6878 = vrot.lane.b32.xlu0 %v10549_v12, %s11911_s4  ;;  %v8622_v2 = vor.u32 %v8621_v5, %v8618_v41  ;;  %v10683_v15 = vcombine.low %v7934_v40, %v7934_v40  ;;  %v10684_v17 = vcombine.high %v7934_v40, %v7934_v40  ;;  %v10681_v48 = vcombine.low %v7932_v36, %v7932_v36  ;;  %v15427_v55 = vpop.f32.mrb[83].mxu0  ;;  %v15440_v19 = vpop.permute.xlu1 %6848 }
 0x2d6   :  { %v8637_v42 = vrot.slane %v8636_v57, 4  ;;  %v8627_v11 = vrot.slane %v8625_v59, 5  ;;  %5207 = vst.msk [vmem:[#allocation11 + $0xc4] sm:$0xf] %vm763_vm7, %v5142_v30  ;;  %v10682_v21 = vcombine.high %v7932_v36, %v7932_v36  ;;  %v7278_v32 = vshrl.u32 %v15380_v50, 16  ;;  %v15452_v8 = vpop.f32.mrb[84].mxu0 }
 0x2d7   :  { %v8623_v45 = vrot.slane %v8622_v2, 4  ;;  %v15425_v25 = vcombine.low %v5474_v22, %v5474_v22  ;;  %v8658_v3 = vshrl.u32 %v10683_v15, 16  ;;  %v8661_v28 = vshll.u32 %v10683_v15, 16  ;;  %v15442_v43 = vpop.permute.xlu0 %6846  ;;  %v5352_v59 = vld [vmem:[#allocation2 + $0x198] sm:$0xf] }
 0x2d8   :  { %6884 = vrot.lane.b32.xlu1 %v10552_v54, %s11911_s4  ;;  %v15430_v0 = vshll.u32 %v10684_v17, 16  ;;  %v8644_v20 = vshrl.u32 %v10681_v48, 16  ;;  %v8647_v52 = vshll.u32 %v10681_v48, 16  ;;  %v7281_v6 = vshll.u32 %v15380_v50, 16  ;;  %v11725_v54 = vld [vmem:[#allocation2 + $0xe0] sm:$0xf] }
 0x2d9   :  { %v15435_v7 = vsel %vm12524_vm5, %v8637_v42, %v8641_v23  ;;  %6882 = vrot.lane.b32.xlu0 %v10551_v37, %s11911_s4  ;;  %v8660_v61 = vrot.slane %v8658_v3, 4  ;;  %v8663_v46 = vrot.slane %v8661_v28, 5  ;;  %v15438_v60 = vshll.u32 %v10682_v21, 16  ;;  %v15454_v23 = vpop.f32.mrb[85].mxu0  ;;  %v5315_v37 = vld [vmem:[#allocation2 + $0xf4] sm:$0x1]  ;;  %v15462_v57 = vpop.permute.xlu1 %6852 }
 0x2da   :  { %v15446_v13 = vsel %vm12524_vm5, %v8623_v45, %v8627_v11  ;;  %v8646_v50 = vrot.slane %v8644_v20, 4  ;;  %v8649_v10 = vrot.slane %v8647_v52, 5  ;;  %v7280_v58 = vrot.slane %v7278_v32, 7  ;;  %v15464_v30 = vpop.f32.mrb[86].mxu0  ;;  %v5350_v21 = vld [vmem:[#allocation2 + $0x190] sm:$0xf] }
 0x2db   :  { %v8664_v1 = vor.u32 %v8663_v46, %v8660_v61  ;;  %v7271_v22 = vshrl.u32 %v15397_v31, 16  ;;  %v7274_v12 = vshll.u32 %v15397_v31, 16  ;;  %v5147_v33 = vpack.c.bf16 %v15369_v26, %v15369_v26  ;;  %v15469_v17 = vpop.permute.xlu0 %6850  ;;  %v15471_v48 = vpop.f32.mrb[87].mxu0  ;;  %v11727_v52 = vld [vmem:[#allocation2 + $0xf0] sm:$0xf] }
 0x2dc   :  { %v8650_v56 = vor.u32 %v8649_v10, %v8646_v50  ;;  %v7283_v9 = vor.u32 %v7281_v6, %v7280_v58  ;;  %v10406_v39 = vcombine.low %v11724_v29, %v5313_v38  ;;  %v10405_v4 = vcombine.low %v11725_v54, %v5311_v24  ;;  %v5356_v58 = vld [vmem:[#allocation2 + $0x1a8] sm:$0xf] }
 0x2dd   :  { %v8669_v41 = vrot.slane %v15430_v0, 5  ;;  %v7273_v5 = vrot.slane %v7271_v22, 7  ;;  %5212 = vst.msk [vmem:[#allocation11 + $0xd8] sm:$0xf] %vm763_vm7, %v5147_v33  ;;  %v5145_v26 = vpack.c.bf16 %v15375_v47, %v15375_v47  ;;  %v5148_v31 = vpack.c.bf16 %v15386_v34, %v15386_v34  ;;  %v11726_v0 = vld [vmem:[#allocation2 + $0xf8] sm:$0xf]  ;;  %v15485_v38 = vpop.permute.xlu1 %7488 }
 0x2de   :  { %v8665_v40 = vrot.slane %v8664_v1, 4  ;;  %v8651_v36 = vrot.slane %v8650_v56, 4  ;;  %v8655_v2 = vrot.slane %v15438_v60, 5  ;;  %7520 = vrot.lane.b32.xlu1 %v7283_v9, %s11912_s26  ;;  %v7292_v15 = vshrl.u32 %v15405_v14, 16  ;;  %v5354_v1 = vld [vmem:[#allocation2 + $0x1a0] sm:$0xf] }
 0x2df   :  { %v7276_v47 = vor.u32 %v7274_v12, %v7273_v5  ;;  %v7643_v34 = vsel %vm309_vm0, %v10406_v39, %v15401_v27  ;;  %5210 = vst.msk [vmem:[#allocation11 + $0xd0] sm:$0xf] %vm763_vm7, %v5145_v26  ;;  %5213 = vst.msk [vmem:[#allocation11 + $0xdc] sm:$0xf] %vm763_vm7, %v5148_v31  ;;  %v7295_v42 = vshll.u32 %v15405_v14, 16  ;;  %v7285_v11 = vshrl.u32 %v15425_v25, 16  ;;  %v7487_v46 = vpop.permute.xlu0 %7486 }
 0x2e0   :  { %v7640_v32 = vsel %vm309_vm0, %v10405_v4, %v15403_v51  ;;  %v7294_v45 = vrot.slane %v7292_v15, 7  ;;  %v7288_v3 = vshll.u32 %v15425_v25, 16  ;;  %v5146_v28 = vpack.c.bf16 %v15393_v53, %v15393_v53  ;;  %v15496_v22 = vpop.f32.mrb[88].mxu0  ;;  %v15518_v5 = vld [vmem:[#allocation2 + $0x190] sm:$0xf] }
 0x2e1   :  { %7518 = vrot.lane.b32.xlu0 %v7276_v47, %s11912_s26  ;;  %v7287_v27 = vrot.slane %v7285_v11, 7  ;;  %v10408_v20 = vcombine.low %v11726_v0, %v5317_v18  ;;  %v10407_v6 = vcombine.low %v11727_v52, %v5315_v37  ;;  %v10490_v14 = vcombine.low %v5352_v59, %v5352_v59  ;;  %v15503_v33 = vpop.f32.mrb[89].mxu0  ;;  %v15512_v39 = vpop.permute.xlu1 %7492  ;;  %v15561_v52 = vld [vmem:[#allocation2 + $0x1a0] sm:$0xf] }
 0x2e2   :  { %v7297_v61 = vor.u32 %v7295_v42, %v7294_v45  ;;  %5211 = vst.msk [vmem:[#allocation11 + $0xd4] sm:$0xf] %vm763_vm7, %v5146_v28  ;;  %v10489_v51 = vcombine.low %v5350_v21, %v5350_v21  ;;  %v5151_v25 = vpack.c.bf16 %v15407_v63, %v15407_v63  ;;  %v10775_v53 = vcombine.low %v15446_v13, %v15435_v7  ;;  %v15514_v54 = vpop.f32.mrb[90].mxu0  ;;  %v5478_v45 = vld [vmem:[#allocation2 + $0x188] sm:$0xf] }
 0x2e3   :  { %v8670_v60 = vsel %vm12524_vm5, %v8665_v40, %v8669_v41  ;;  %v8656_v24 = vsel %vm12524_vm5, %v8651_v36, %v8655_v2  ;;  %v7290_v50 = vor.u32 %v7288_v3, %v7287_v27  ;;  %v6218_v10 = vshrl.u32 %v10490_v14, 16  ;;  %v15522_v26 = vpop.permute.xlu0 %7490  ;;  %v5479_v3 = vld [vmem:[#allocation2 + $0x18c] sm:$0x1] }
 0x2e4   :  { %7524 = vrot.lane.b32.xlu1 %v7297_v61, %s11912_s26  ;;  %v7649_v63 = vsel %vm309_vm0, %v10408_v20, %v15417_v62  ;;  %v6221_v12 = vshll.u32 %v10490_v14, 16  ;;  %v6211_v7 = vshrl.u32 %v10489_v51, 16  ;;  %v6214_v13 = vshll.u32 %v10489_v51, 16  ;;  %5216 = vst.msk [vmem:[#allocation11 + $0x148] sm:$0xf] %vm763_vm7, %v5151_v25  ;;  %11182 = vmatprep.mubr.msk.bf16.mxu1 %vm9335_vm9, %v10775_v53 }
 0x2e5   :  { %7522 = vrot.lane.b32.xlu0 %v7290_v50, %s11912_s26  ;;  %v7646_v56 = vsel %vm309_vm0, %v10407_v6, %v15419_v16  ;;  %v6220_v9 = vrot.slane %v6218_v10, 7  ;;  %v5149_v29 = vpack.c.bf16 %v15414_v49, %v15414_v49  ;;  %v5152_v62 = vpack.c.bf16 %v15423_v44, %v15423_v44  ;;  %v15520_v16 = vld [vmem:[#allocation2 + $0x194] sm:$0x1]  ;;  %v15524_v49 = vpop.f32.mrb[91].mxu0  ;;  %v15543_v42 = vpop.permute.xlu1 %6408  ;;  %v15563_v6 = vld [vmem:[#allocation2 + $0x1a4] sm:$0x1] }
 0x2e6   :  { %v6213_v4 = vrot.slane %v6211_v7, 7  ;;  %v10492_v18 = vcombine.low %v5356_v58, %v5356_v58  ;;  %v10491_v59 = vcombine.low %v5354_v1, %v5354_v1  ;;  %v5150_v41 = vpack.c.bf16 %v15427_v55, %v15427_v55  ;;  %v15565_v14 = vpop.f32.mrb[92].mxu0  ;;  %v5482_v25 = vld [vmem:[#allocation2 + $0x198] sm:$0xf]  ;;  %v5483_v53 = vld [vmem:[#allocation2 + $0x19c] sm:$0x1] }
 0x2e7   :  { %v6223_v31 = vor.u32 %v6221_v12, %v6220_v9  ;;  %v7809_v44 = vsel %vm3424_vm6, %v7643_v34, %v15440_v19  ;;  %v7807_v37 = vsel %vm3424_vm6, %v7640_v32, %v15442_v43  ;;  %5214 = vst.msk [vmem:[#allocation11 + $0x140] sm:$0xf] %vm763_vm7, %v5149_v29  ;;  %5217 = vst.msk [vmem:[#allocation11 + $0x14c] sm:$0xf] %vm763_vm7, %v5152_v62 }
 0x2e8   :  { %v10776_v55 = vcombine.low %v8656_v24, %v8670_v60  ;;  %v6216_v40 = vor.u32 %v6214_v13, %v6213_v4  ;;  %v6232_v36 = vshrl.u32 %v10492_v18, 16  ;;  %v6235_v2 = vshll.u32 %v10492_v18, 16  ;;  %5215 = vst.msk [vmem:[#allocation11 + $0x144] sm:$0xf] %vm763_vm7, %v5150_v41 }
 0x2e9   :  { %v6225_v15 = vshrl.u32 %v10491_v59, 16  ;;  %6440 = vrot.lane.b32.xlu1 %v6223_v31, %s11908_s21  ;;  %v6228_v47 = vshll.u32 %v10491_v59, 16  ;;  %v7813_v19 = vsel %vm3424_vm6, %v7649_v63, %v15462_v57  ;;  %v15539_v43 = vsel %vm3424_vm6, %v7646_v56, %v15469_v17  ;;  %v15552_v17 = vpop.permute.xlu0 %6406  ;;  %v15574_v50 = vpop.permute.xlu1 %6412 }
 0x2ea   :  { %11183 = vmatmul.mubr.msk.bf16.gmra.mrb[84].mxu1 %vm9335_vm9, %v10776_v55  ;;  %v10554_v34 = vcombine.low %v15518_v5, %v15520_v16  ;;  %6438 = vrot.lane.b32.xlu0 %v6216_v40, %s11908_s21  ;;  %v6234_v11 = vrot.slane %v6232_v36, 7  ;;  %v15548_v32 = vcombine.low %v15518_v5, %v15518_v5  ;;  %v5155_v57 = vpack.c.bf16 %v15452_v8, %v15452_v8 }
 0x2eb   :  { %v6227_v21 = vrot.slane %v6225_v15, 7  ;;  %v7938_v28 = vsel %vm7886_vm8, %v7809_v44, %v15485_v38  ;;  %v7936_v27 = vsel %vm7886_vm8, %v7807_v37, %v7487_v46  ;;  %v5153_v0 = vpack.c.bf16 %v15454_v23, %v15454_v23  ;;  %v15568_v46 = vpop.f32.mrb[93].mxu0 }
 0x2ec   :  { %v5156_v20 = vpack.c.bf16 %v15464_v30, %v15464_v30  ;;  %v6237_v8 = vor.u32 %v6235_v2, %v6234_v11  ;;  %5220 = vst.msk [vmem:[#allocation11 + $0x158] sm:$0xf] %vm763_vm7, %v5155_v57  ;;  %v10687_v51 = vcombine.low %v7938_v28, %v7938_v28  ;;  %v10688_v38 = vcombine.high %v7938_v28, %v7938_v28  ;;  %v15576_v10 = vpop.f32.mrb[94].mxu0 }
 0x2ed   :  { %v6230_v61 = vor.u32 %v6228_v47, %v6227_v21  ;;  %v10553_v23 = vcombine.low %v5478_v45, %v5479_v3  ;;  %v15570_v60 = vcombine.low %v5478_v45, %v5478_v45  ;;  %v10685_v30 = vcombine.low %v7936_v27, %v7936_v27  ;;  %5218 = vst.msk [vmem:[#allocation11 + $0x150] sm:$0xf] %vm763_vm7, %v5153_v0  ;;  %v15586_v7 = vpop.permute.xlu0 %6410  ;;  %v15588_v13 = vpop.f32.mrb[95].mxu0 }
 0x2ee   :  { %v10686_v24 = vcombine.high %v7936_v27, %v7936_v27  ;;  %5221 = vst.msk [vmem:[#allocation11 + $0x15c] sm:$0xf] %vm763_vm7, %v5156_v20  ;;  %6444 = vrot.lane.b32.xlu1 %v6237_v8, %s11908_s21  ;;  %v8686_v58 = vshrl.u32 %v10687_v51, 16  ;;  %v8689_v1 = vshll.u32 %v10687_v51, 16  ;;  %v10556_v63 = vcombine.low %v15561_v52, %v15563_v6  ;;  %v15596_v37 = vpop.permute.xlu1 %6856 }
 0x2ef   :  { %6442 = vrot.lane.b32.xlu0 %v6230_v61, %s11908_s21  ;;  %v15584_v12 = vcombine.low %v15561_v52, %v15561_v52  ;;  %v8695_v56 = vshll.u32 %v10688_v38, 16  ;;  %v8672_v9 = vshrl.u32 %v10685_v30, 16  ;;  %v8675_v29 = vshll.u32 %v10685_v30, 16  ;;  %v5321_v30 = vld [vmem:[#allocation2 + $0x10c] sm:$0x1] }
 0x2f0   :  { %v10555_v62 = vcombine.low %v5482_v25, %v5483_v53  ;;  %v8688_v4 = vrot.slane %v8686_v58, 4  ;;  %v8691_v18 = vrot.slane %v8689_v1, 5  ;;  %v8681_v59 = vshll.u32 %v10686_v24, 16 }
 0x2f1   :  { %v5154_v41 = vpack.c.bf16 %v15471_v48, %v15471_v48  ;;  %v8674_v5 = vrot.slane %v8672_v9, 4  ;;  %v8677_v16 = vrot.slane %v8675_v29, 5  ;;  %v15592_v31 = vcombine.low %v5482_v25, %v5482_v25  ;;  %v15602_v2 = vpop.permute.xlu0 %6854 }
 0x2f2   :  { %v7942_v44 = vsel %vm7886_vm8, %v7813_v19, %v15512_v39  ;;  %6888 = vrot.lane.b32.xlu1 %v10554_v34, %s11911_s4  ;;  %v8692_v55 = vor.u32 %v8691_v18, %v8688_v4  ;;  %v7306_v48 = vshrl.u32 %v15548_v32, 16  ;;  %v8697_v15 = vrot.slane %v8695_v56, 5  ;;  %v15608_v34 = vpop.f32.mrb[96].mxu0  ;;  %v5319_v4 = vld [vmem:[#allocation2 + $0x104] sm:$0x1] }
 0x2f3   :  { %6886 = vrot.lane.b32.xlu0 %v10553_v23, %s11911_s4  ;;  %5219 = vst.msk [vmem:[#allocation11 + $0x154] sm:$0xf] %vm763_vm7, %v5154_v41  ;;  %v10691_v40 = vcombine.low %v7942_v44, %v7942_v44  ;;  %v10692_v36 = vcombine.high %v7942_v44, %v7942_v44  ;;  %v8678_v47 = vor.u32 %v8677_v16, %v8674_v5  ;;  %v7309_v19 = vshll.u32 %v15548_v32, 16  ;;  %v15611_v57 = vpop.f32.mrb[97].mxu0  ;;  %v15613_v52 = vpop.permute.xlu1 %6860  ;;  %v11728_v16 = vld [vmem:[#allocation2 + $0x108] sm:$0xf] }
 0x2f4   :  { %v7940_v39 = vsel %vm7886_vm8, %v15539_v43, %v15522_v26  ;;  %v8693_v11 = vrot.slane %v8692_v55, 4  ;;  %v7299_v3 = vshrl.u32 %v15570_v60, 16  ;;  %v7308_v20 = vrot.slane %v7306_v48, 7  ;;  %v15615_v6 = vpop.f32.mrb[98].mxu0 }
 0x2f5   :  { %v8714_v21 = vshrl.u32 %v10691_v40, 16  ;;  %v8717_v45 = vshll.u32 %v10691_v40, 16  ;;  %v8723_v28 = vshll.u32 %v10692_v36, 16  ;;  %v10689_v27 = vcombine.low %v7940_v39, %v7940_v39  ;;  %v15619_v61 = vpop.permute.xlu0 %6858  ;;  %v15621_v51 = vpop.f32.mrb[99].mxu0 }
 0x2f6   :  { %v10690_v0 = vcombine.high %v7940_v39, %v7940_v39  ;;  %v8679_v26 = vrot.slane %v8678_v47, 4  ;;  %v8683_v43 = vrot.slane %v8681_v59, 5  ;;  %6892 = vrot.lane.b32.xlu1 %v10556_v63, %s11911_s4  ;;  %v15625_v38 = vsel %vm12524_vm5, %v8693_v11, %v8697_v15  ;;  %v5325_v15 = vld [vmem:[#allocation2 + $0x11c] sm:$0x1]  ;;  %v5323_v47 = vld [vmem:[#allocation2 + $0x114] sm:$0x1] }
 0x2f7   :  { %6890 = vrot.lane.b32.xlu0 %v10555_v62, %s11911_s4  ;;  %v8716_v32 = vrot.slane %v8714_v21, 4  ;;  %v8719_v8 = vrot.slane %v8717_v45, 5  ;;  %v8700_v25 = vshrl.u32 %v10689_v27, 16  ;;  %v8703_v53 = vshll.u32 %v10689_v27, 16  ;;  %v15630_v18 = vpop.permute.xlu1 %7496  ;;  %v15645_v39 = vpop.f32.mrb[100].mxu0 }
 0x2f8   :  { %v8709_v23 = vshll.u32 %v10690_v0, 16  ;;  %v7311_v58 = vor.u32 %v7309_v19, %v7308_v20  ;;  %v7301_v1 = vrot.slane %v7299_v3, 7  ;;  %v7302_v63 = vshll.u32 %v15570_v60, 16  ;;  %v5360_v60 = vld [vmem:[#allocation2 + $0x1c0] sm:$0xf] }
 0x2f9   :  { %v8720_v24 = vor.u32 %v8719_v8, %v8716_v32  ;;  %v8725_v56 = vrot.slane %v8723_v28, 5  ;;  %v8702_v9 = vrot.slane %v8700_v25, 4  ;;  %v8705_v29 = vrot.slane %v8703_v53, 5  ;;  %v15637_v55 = vpop.permute.xlu0 %7494  ;;  %v11729_v21 = vld [vmem:[#allocation2 + $0x100] sm:$0xf]  ;;  %v15653_v28 = vpop.f32.mrb[101].mxu0 }
 0x2fa   :  { %v5159_v62 = vpack.c.bf16 %v15496_v22, %v15496_v22  ;;  %v15634_v59 = vsel %vm12524_vm5, %v8679_v26, %v8683_v43  ;;  %7528 = vrot.lane.b32.xlu1 %v7311_v58, %s11912_s26  ;;  %v7304_v5 = vor.u32 %v7302_v63, %v7301_v1  ;;  %v10410_v44 = vcombine.low %v11728_v16, %v5321_v30  ;;  %v5358_v3 = vld [vmem:[#allocation2 + $0x1b8] sm:$0xf]  ;;  %v15661_v43 = vpop.f32.mrb[102].mxu0  ;;  %v11731_v25 = vld [vmem:[#allocation2 + $0x110] sm:$0xf] }
 0x2fb   :  { %v8721_v41 = vrot.slane %v8720_v24, 4  ;;  %v8706_v40 = vor.u32 %v8705_v29, %v8702_v9  ;;  %v5157_v22 = vpack.c.bf16 %v15503_v33, %v15503_v33  ;;  %v5160_v36 = vpack.c.bf16 %v15514_v54, %v15514_v54  ;;  %v15659_v26 = vpop.permute.xlu1 %7500  ;;  %v11730_v32 = vld [vmem:[#allocation2 + $0x118] sm:$0xf]  ;;  %v15667_v24 = vpop.f32.mrb[103].mxu0  ;;  %v5362_v16 = vld [vmem:[#allocation2 + $0x1c8] sm:$0xf] }
 0x2fc   :  { %5224 = vst.msk [vmem:[#allocation11 + $0x1c8] sm:$0xf] %vm763_vm7, %v5159_v62  ;;  %v7320_v48 = vshrl.u32 %v15584_v12, 16  ;;  %v8711_v11 = vrot.slane %v8709_v23, 5  ;;  %7526 = vrot.lane.b32.xlu0 %v7304_v5, %s11912_s26  ;;  %v10409_v45 = vcombine.low %v11729_v21, %v5319_v4  ;;  %v7323_v33 = vshll.u32 %v15584_v12, 16 }
 0x2fd   :  { %v15649_v19 = vsel %vm12524_vm5, %v8721_v41, %v8725_v56  ;;  %v8707_v54 = vrot.slane %v8706_v40, 4  ;;  %5222 = vst.msk [vmem:[#allocation11 + $0x1c0] sm:$0xf] %vm763_vm7, %v5157_v22  ;;  %5225 = vst.msk [vmem:[#allocation11 + $0x1cc] sm:$0xf] %vm763_vm7, %v5160_v36  ;;  %v7313_v0 = vshrl.u32 %v15592_v31, 16  ;;  %v5158_v12 = vpack.c.bf16 %v15524_v49, %v15524_v49  ;;  %v15665_v30 = vpop.permute.xlu0 %7498 }
 0x2fe   :  { %v7322_v27 = vrot.slane %v7320_v48, 7  ;;  %v7316_v20 = vshll.u32 %v15592_v31, 16  ;;  %v10412_v8 = vcombine.low %v11730_v32, %v5325_v15  ;;  %v10411_v53 = vcombine.low %v11731_v25, %v5323_v47  ;;  %v5364_v62 = vld [vmem:[#allocation2 + $0x1d0] sm:$0xf]  ;;  %v15695_v47 = vpop.f32.mrb[104].mxu0 }
 0x2ff   :  { %v10494_v23 = vcombine.low %v5360_v60, %v5360_v60  ;;  %v7655_v58 = vsel %vm309_vm0, %v10410_v44, %v15543_v42  ;;  %v7315_v1 = vrot.slane %v7313_v0, 7  ;;  %v10493_v63 = vcombine.low %v5358_v3, %v5358_v3  ;;  %5223 = vst.msk [vmem:[#allocation11 + $0x1c4] sm:$0xf] %vm763_vm7, %v5158_v12  ;;  %v15679_v44 = vpop.permute.xlu1 %6416  ;;  %v15701_v21 = vld [vmem:[#allocation2 + $0x1b8] sm:$0xf] }
 0x300   :  { %v7325_v31 = vor.u32 %v7323_v33, %v7322_v27  ;;  %v8712_v56 = vsel %vm12524_vm5, %v8707_v54, %v8711_v11  ;;  %v7652_v49 = vsel %vm309_vm0, %v10409_v45, %v15552_v17  ;;  %v5163_v42 = vpack.c.bf16 %v15565_v14, %v15565_v14  ;;  %v15703_v45 = vld [vmem:[#allocation2 + $0x1bc] sm:$0x1] }
 0x301   :  { %v6246_v9 = vshrl.u32 %v10494_v23, 16  ;;  %v6249_v29 = vshll.u32 %v10494_v23, 16  ;;  %v7318_v4 = vor.u32 %v7316_v20, %v7315_v1  ;;  %v6239_v41 = vshrl.u32 %v10493_v63, 16  ;;  %v15687_v36 = vpop.permute.xlu0 %6414 }
 0x302   :  { %7532 = vrot.lane.b32.xlu1 %v7325_v31, %s11912_s26  ;;  %v6242_v5 = vshll.u32 %v10493_v63, 16  ;;  %v7661_v60 = vsel %vm309_vm0, %v10412_v8, %v15574_v50  ;;  %v7658_v17 = vsel %vm309_vm0, %v10411_v53, %v15586_v7  ;;  %v10777_v22 = vcombine.low %v15634_v59, %v15625_v38  ;;  %5228 = vst.msk [vmem:[#allocation11 + $0x1d8] sm:$0xf] %vm763_vm7, %v5163_v42  ;;  %v5486_v63 = vld [vmem:[#allocation2 + $0x1b0] sm:$0xf] }
 0x303   :  { %v6248_v40 = vrot.slane %v6246_v9, 7  ;;  %7530 = vrot.lane.b32.xlu0 %v7318_v4, %s11912_s26  ;;  %v6241_v48 = vrot.slane %v6239_v41, 7  ;;  %v5161_v14 = vpack.c.bf16 %v15568_v46, %v15568_v46  ;;  %v5164_v50 = vpack.c.bf16 %v15576_v10, %v15576_v10  ;;  %v15705_v46 = vpop.f32.mrb[105].mxu0  ;;  %v15711_v27 = vpop.permute.xlu1 %6420  ;;  %v5491_v42 = vld [vmem:[#allocation2 + $0x1c4] sm:$0x1] }
 0x304   :  { %v10496_v15 = vcombine.low %v5364_v62, %v5364_v62  ;;  %11186 = vmatprep.mubr.msk.bf16.mxu1 %vm9335_vm9, %v10777_v22  ;;  %v10495_v38 = vcombine.low %v5362_v16, %v5362_v16  ;;  %v5162_v59 = vpack.c.bf16 %v15588_v13, %v15588_v13  ;;  %v10778_v11 = vcombine.low %v8712_v56, %v15649_v19  ;;  %v15713_v13 = vpop.f32.mrb[106].mxu0 }
 0x305   :  { %v6251_v7 = vor.u32 %v6249_v29, %v6248_v40  ;;  %v6244_v33 = vor.u32 %v6242_v5, %v6241_v48  ;;  %v7817_v10 = vsel %vm3424_vm6, %v7655_v58, %v15596_v37  ;;  %5226 = vst.msk [vmem:[#allocation11 + $0x1d0] sm:$0xf] %vm763_vm7, %v5161_v14  ;;  %5229 = vst.msk [vmem:[#allocation11 + $0x1dc] sm:$0xf] %vm763_vm7, %v5164_v50  ;;  %v15722_v12 = vpop.permute.xlu0 %6418  ;;  %v15724_v32 = vpop.f32.mrb[107].mxu0 }
 0x306   :  { %v6260_v3 = vshrl.u32 %v10496_v15, 16  ;;  %v6263_v54 = vshll.u32 %v10496_v15, 16  ;;  %v7815_v19 = vsel %vm3424_vm6, %v7652_v49, %v15602_v2  ;;  %v6253_v0 = vshrl.u32 %v10495_v38, 16  ;;  %5227 = vst.msk [vmem:[#allocation11 + $0x1d4] sm:$0xf] %vm763_vm7, %v5162_v59  ;;  %11187 = vmatmul.mubr.msk.bf16.gmra.mrb[88].mxu1 %vm9335_vm9, %v10778_v11  ;;  %v15751_v48 = vpop.f32.mrb[108].mxu0 }
 0x307   :  { %6448 = vrot.lane.b32.xlu1 %v6251_v7, %s11908_s21  ;;  %v6256_v20 = vshll.u32 %v10495_v38, 16  ;;  %v7821_v37 = vsel %vm3424_vm6, %v7661_v60, %v15613_v52  ;;  %6446 = vrot.lane.b32.xlu0 %v6244_v33, %s11908_s21  ;;  %v7819_v25 = vsel %vm3424_vm6, %v7658_v17, %v15619_v61  ;;  %v10558_v2 = vcombine.low %v15701_v21, %v15703_v45  ;;  %v5487_v61 = vld [vmem:[#allocation2 + $0x1b4] sm:$0x1]  ;;  %v5492_v29 = vld [vmem:[#allocation2 + $0x1c8] sm:$0xf]  ;;  %v15741_v62 = vpop.permute.xlu1 %6864  ;;  %v15758_v15 = vpop.f32.mrb[109].mxu0 }
 0x308   :  { %v6262_v8 = vrot.slane %v6260_v3, 7  ;;  %v15733_v53 = vcombine.low %v15701_v21, %v15701_v21  ;;  %v6255_v23 = vrot.slane %v6253_v0, 7  ;;  %v5167_v52 = vpack.c.bf16 %v15608_v34, %v15608_v34  ;;  %v5490_v5 = vld [vmem:[#allocation2 + $0x1c0] sm:$0xf]  ;;  %v15762_v45 = vpop.f32.mrb[110].mxu0 }
 0x309   :  { %v7946_v58 = vsel %vm7886_vm8, %v7817_v10, %v15630_v18  ;;  %v7944_v31 = vsel %vm7886_vm8, %v7815_v19, %v15637_v55  ;;  %v5165_v34 = vpack.c.bf16 %v15611_v57, %v15611_v57  ;;  %v5168_v18 = vpack.c.bf16 %v15615_v6, %v15615_v6  ;;  %v5493_v55 = vld [vmem:[#allocation2 + $0x1cc] sm:$0x1]  ;;  %v15748_v16 = vpop.permute.xlu0 %6862  ;;  %v15768_v0 = vpop.f32.mrb[111].mxu0 }
 0x30a   :  { %v6265_v1 = vor.u32 %v6263_v54, %v6262_v8  ;;  %v10695_v56 = vcombine.low %v7946_v58, %v7946_v58  ;;  %v10696_v49 = vcombine.high %v7946_v58, %v7946_v58  ;;  %v10693_v9 = vcombine.low %v7944_v31, %v7944_v31  ;;  %5232 = vst.msk [vmem:[#allocation11 + $0x248] sm:$0xf] %vm763_vm7, %v5167_v52 }
 0x30b   :  { %v6258_v4 = vor.u32 %v6256_v20, %v6255_v23  ;;  %v10694_v41 = vcombine.high %v7944_v31, %v7944_v31  ;;  %v10557_v14 = vcombine.low %v5486_v63, %v5487_v61  ;;  %v15754_v57 = vcombine.low %v5486_v63, %v5486_v63  ;;  %5230 = vst.msk [vmem:[#allocation11 + $0x240] sm:$0xf] %vm763_vm7, %v5165_v34  ;;  %v15760_v21 = vpop.permute.xlu1 %6868 }
 0x30c   :  { %6452 = vrot.lane.b32.xlu1 %v6265_v1, %s11908_s21  ;;  %v8742_v60 = vshrl.u32 %v10695_v56, 16  ;;  %v8745_v17 = vshll.u32 %v10695_v56, 16  ;;  %v8751_v40 = vshll.u32 %v10696_v49, 16  ;;  %v8728_v22 = vshrl.u32 %v10693_v9, 16  ;;  %5233 = vst.msk [vmem:[#allocation11 + $0x24c] sm:$0xf] %vm763_vm7, %v5168_v18 }
 0x30d   :  { %6450 = vrot.lane.b32.xlu0 %v6258_v4, %s11908_s21  ;;  %v8731_v50 = vshll.u32 %v10693_v9, 16  ;;  %v8737_v6 = vshll.u32 %v10694_v41, 16  ;;  %v10560_v11 = vcombine.low %v5492_v29, %v5493_v55  ;;  %v15764_v3 = vcombine.low %v5492_v29, %v5492_v29  ;;  %v15766_v19 = vpop.permute.xlu0 %6866  ;;  %v5329_v18 = vld [vmem:[#allocation2 + $0x134] sm:$0x1] }
 0x30e   :  { %v8744_v7 = vrot.slane %v8742_v60, 4  ;;  %v8747_v38 = vrot.slane %v8745_v17, 5  ;;  %v8730_v59 = vrot.slane %v8728_v22, 4  ;;  %v8753_v33 = vrot.slane %v8751_v40, 5  ;;  %v5327_v17 = vld [vmem:[#allocation2 + $0x12c] sm:$0x1] }
 0x30f   :  { %v8733_v10 = vrot.slane %v8731_v50, 5  ;;  %v10559_v54 = vcombine.low %v5490_v5, %v5491_v42  ;;  %v5166_v8 = vpack.c.bf16 %v15621_v51, %v15621_v51  ;;  %v7950_v23 = vsel %vm7886_vm8, %v7821_v37, %v15659_v26  ;;  %v15780_v51 = vpop.permute.xlu1 %7504 }
 0x310   :  { %6896 = vrot.lane.b32.xlu1 %v10558_v2, %s11911_s4  ;;  %v8748_v20 = vor.u32 %v8747_v38, %v8744_v7  ;;  %v7948_v52 = vsel %vm7886_vm8, %v7819_v25, %v15665_v30  ;;  %v10699_v31 = vcombine.low %v7950_v23, %v7950_v23  ;;  %v10700_v1 = vcombine.high %v7950_v23, %v7950_v23 }
 0x311   :  { %6894 = vrot.lane.b32.xlu0 %v10557_v14, %s11911_s4  ;;  %v8734_v58 = vor.u32 %v8733_v10, %v8730_v59  ;;  %v10697_v63 = vcombine.low %v7948_v52, %v7948_v52  ;;  %v8739_v56 = vrot.slane %v8737_v6, 5  ;;  %5231 = vst.msk [vmem:[#allocation11 + $0x244] sm:$0xf] %vm763_vm7, %v5166_v8  ;;  %v10698_v2 = vcombine.high %v7948_v52, %v7948_v52  ;;  %v15784_v25 = vpop.permute.xlu0 %7502  ;;  %v11733_v8 = vld [vmem:[#allocation2 + $0x128] sm:$0xf] }
 0x312   :  { %v8749_v61 = vrot.slane %v8748_v20, 4  ;;  %v7334_v49 = vshrl.u32 %v15733_v53, 16  ;;  %v15782_v26 = vcombine.low %v5490_v5, %v5490_v5  ;;  %v8770_v37 = vshrl.u32 %v10699_v31, 16 }
 0x313   :  { %v8735_v9 = vrot.slane %v8734_v58, 4  ;;  %v8773_v30 = vshll.u32 %v10699_v31, 16  ;;  %v15787_v29 = vshll.u32 %v10700_v1, 16  ;;  %v8756_v4 = vshrl.u32 %v10697_v63, 16  ;;  %v15799_v6 = vpop.permute.xlu1 %7508  ;;  %v5368_v1 = vld [vmem:[#allocation2 + $0x1e0] sm:$0xf] }
 0x314   :  { %6900 = vrot.lane.b32.xlu1 %v10560_v11, %s11911_s4  ;;  %v8759_v41 = vshll.u32 %v10697_v63, 16  ;;  %v7337_v34 = vshll.u32 %v15733_v53, 16  ;;  %v15792_v55 = vsel %vm12524_vm5, %v8749_v61, %v8753_v33  ;;  %v8772_v5 = vrot.slane %v8770_v37, 4 }
 0x315   :  { %6898 = vrot.lane.b32.xlu0 %v10559_v54, %s11911_s4  ;;  %v8775_v42 = vrot.slane %v8773_v30, 5  ;;  %v8765_v60 = vshll.u32 %v10698_v2, 16  ;;  %v15797_v40 = vsel %vm12524_vm5, %v8735_v9, %v8739_v56  ;;  %v8758_v22 = vrot.slane %v8756_v4, 4  ;;  %v15805_v11 = vpop.permute.xlu0 %7506  ;;  %v11732_v54 = vld [vmem:[#allocation2 + $0x130] sm:$0xf] }
 0x316   :  { %v8761_v14 = vrot.slane %v8759_v41, 5  ;;  %v7336_v50 = vrot.slane %v7334_v49, 7  ;;  %v7327_v7 = vshrl.u32 %v15754_v57, 16  ;;  %v7330_v38 = vshll.u32 %v15754_v57, 16  ;;  %v5331_v49 = vld [vmem:[#allocation2 + $0x13c] sm:$0x1] }
 0x317   :  { %v8776_v53 = vor.u32 %v8775_v42, %v8772_v5  ;;  %v5171_v59 = vpack.c.bf16 %v15645_v39, %v15645_v39  ;;  %v10414_v20 = vcombine.low %v11732_v54, %v5329_v18  ;;  %v10413_v23 = vcombine.low %v11733_v8, %v5327_v17  ;;  %v5333_v39 = vld [vmem:[#allocation2 + $0x144] sm:$0x1]  ;;  %v5366_v30 = vld [vmem:[#allocation2 + $0x1d8] sm:$0xf] }
 0x318   :  { %v8762_v33 = vor.u32 %v8761_v14, %v8758_v22  ;;  %v7339_v10 = vor.u32 %v7337_v34, %v7336_v50  ;;  %v8781_v52 = vrot.slane %v15787_v29, 5  ;;  %v7329_v58 = vrot.slane %v7327_v7, 7  ;;  %v15821_v29 = vpop.permute.xlu1 %6424 }
 0x319   :  { %5236 = vst.msk [vmem:[#allocation11 + $0x258] sm:$0xf] %vm763_vm7, %v5171_v59  ;;  %v5169_v31 = vpack.c.bf16 %v15653_v28, %v15653_v28  ;;  %v5172_v57 = vpack.c.bf16 %v15661_v43, %v15661_v43  ;;  %v8777_v63 = vrot.slane %v8776_v53, 4  ;;  %v8767_v56 = vrot.slane %v8765_v60, 5  ;;  %v15828_v18 = vpop.permute.xlu0 %6422  ;;  %v11735_v60 = vld [vmem:[#allocation2 + $0x138] sm:$0xf] }
 0x31a   :  { %v8763_v61 = vrot.slane %v8762_v33, 4  ;;  %7536 = vrot.lane.b32.xlu1 %v7339_v10, %s11912_s26  ;;  %v7348_v2 = vshrl.u32 %v15764_v3, 16  ;;  %v7332_v9 = vor.u32 %v7330_v38, %v7329_v58  ;;  %v7667_v37 = vsel %vm309_vm0, %v10414_v20, %v15679_v44  ;;  %v5372_v59 = vld [vmem:[#allocation2 + $0x1f0] sm:$0xf]  ;;  %v5370_v33 = vld [vmem:[#allocation2 + $0x1e8] sm:$0xf] }
 0x31b   :  { %5234 = vst.msk [vmem:[#allocation11 + $0x250] sm:$0xf] %vm763_vm7, %v5169_v31  ;;  %5237 = vst.msk [vmem:[#allocation11 + $0x25c] sm:$0xf] %vm763_vm7, %v5172_v57  ;;  %v7351_v28 = vshll.u32 %v15764_v3, 16  ;;  %v7341_v43 = vshrl.u32 %v15782_v26, 16  ;;  %v7664_v4 = vsel %vm309_vm0, %v10413_v23, %v15687_v36  ;;  %v5170_v44 = vpack.c.bf16 %v15667_v24, %v15667_v24 }
 0x31c   :  { %v7350_v41 = vrot.slane %v7348_v2, 7  ;;  %v7344_v34 = vshll.u32 %v15782_v26, 16  ;;  %7534 = vrot.lane.b32.xlu0 %v7332_v9, %s11912_s26  ;;  %v11734_v3 = vld [vmem:[#allocation2 + $0x140] sm:$0xf]  ;;  %v10415_v17 = vcombine.low %v11735_v60, %v5331_v49  ;;  %v10498_v22 = vcombine.low %v5368_v1, %v5368_v1  ;;  %v15858_v1 = vld [vmem:[#allocation2 + $0x1dc] sm:$0x1] }
 0x31d   :  { %v7343_v5 = vrot.slane %v7341_v43, 7  ;;  %v10416_v42 = vcombine.low %v11734_v3, %v5333_v39  ;;  %5235 = vst.msk [vmem:[#allocation11 + $0x254] sm:$0xf] %vm763_vm7, %v5170_v44  ;;  %v10497_v36 = vcombine.low %v5366_v30, %v5366_v30  ;;  %v5175_v26 = vpack.c.bf16 %v15695_v47, %v15695_v47  ;;  %v15856_v39 = vld [vmem:[#allocation2 + $0x1d8] sm:$0xf] }
 0x31e   :  { %v7353_v14 = vor.u32 %v7351_v28, %v7350_v41  ;;  %v10779_v24 = vcombine.low %v15797_v40, %v15792_v55  ;;  %v8782_v50 = vsel %vm12524_vm5, %v8777_v63, %v8781_v52  ;;  %v8768_v53 = vsel %vm12524_vm5, %v8763_v61, %v8767_v56  ;;  %v5495_v41 = vld [vmem:[#allocation2 + $0x1d4] sm:$0x1]  ;;  %v5500_v3 = vld [vmem:[#allocation2 + $0x1e8] sm:$0xf] }
 0x31f   :  { %v7346_v7 = vor.u32 %v7344_v34, %v7343_v5  ;;  %v6274_v38 = vshrl.u32 %v10498_v22, 16  ;;  %v7673_v10 = vsel %vm309_vm0, %v10416_v42, %v15711_v27  ;;  %v6277_v54 = vshll.u32 %v10498_v22, 16  ;;  %5240 = vst.msk [vmem:[#allocation11 + $0x2c8] sm:$0xf] %vm763_vm7, %v5175_v26  ;;  %v15852_v27 = vpop.permute.xlu1 %6428  ;;  %v5501_v42 = vld [vmem:[#allocation2 + $0x1ec] sm:$0x1] }
 0x320   :  { %7540 = vrot.lane.b32.xlu1 %v7353_v14, %s11912_s26  ;;  %v6267_v47 = vshrl.u32 %v10497_v36, 16  ;;  %v6270_v20 = vshll.u32 %v10497_v36, 16  ;;  %11190 = vmatprep.mubr.msk.bf16.mxu1 %vm9335_vm9, %v10779_v24  ;;  %v7670_v55 = vsel %vm309_vm0, %v10415_v17, %v15722_v12  ;;  %v5173_v8 = vpack.c.bf16 %v15705_v46, %v15705_v46  ;;  %v15860_v12 = vpop.permute.xlu0 %6426  ;;  %v5499_v36 = vld [vmem:[#allocation2 + $0x1e4] sm:$0x1] }
 0x321   :  { %7538 = vrot.lane.b32.xlu0 %v7346_v7, %s11912_s26  ;;  %v6276_v40 = vrot.slane %v6274_v38, 7  ;;  %v5176_v23 = vpack.c.bf16 %v15713_v13, %v15713_v13  ;;  %v10500_v58 = vcombine.low %v5372_v59, %v5372_v59  ;;  %v10499_v31 = vcombine.low %v5370_v33, %v5370_v33 }
 0x322   :  { %v6269_v52 = vrot.slane %v6267_v47, 7  ;;  %v5174_v57 = vpack.c.bf16 %v15724_v32, %v15724_v32  ;;  %v7825_v46 = vsel %vm3424_vm6, %v7667_v37, %v15741_v62  ;;  %v7823_v13 = vsel %vm3424_vm6, %v7664_v4, %v15748_v16  ;;  %5238 = vst.msk [vmem:[#allocation11 + $0x2c0] sm:$0xf] %vm763_vm7, %v5173_v8  ;;  %v5494_v4 = vld [vmem:[#allocation2 + $0x1d0] sm:$0xf] }
 0x323   :  { %v6279_v63 = vor.u32 %v6277_v54, %v6276_v40  ;;  %5241 = vst.msk [vmem:[#allocation11 + $0x2cc] sm:$0xf] %vm763_vm7, %v5176_v23  ;;  %v10780_v61 = vcombine.low %v8768_v53, %v8782_v50  ;;  %v6288_v32 = vshrl.u32 %v10500_v58, 16  ;;  %v6291_v2 = vshll.u32 %v10500_v58, 16  ;;  %v15892_v60 = vpop.permute.xlu1 %6872 }
 0x324   :  { %v6272_v56 = vor.u32 %v6270_v20, %v6269_v52  ;;  %v6281_v49 = vshrl.u32 %v10499_v31, 16  ;;  %5239 = vst.msk [vmem:[#allocation11 + $0x2c4] sm:$0xf] %vm763_vm7, %v5174_v57  ;;  %v6284_v9 = vshll.u32 %v10499_v31, 16  ;;  %v7829_v62 = vsel %vm3424_vm6, %v7673_v10, %v15760_v21  ;;  %v15895_v26 = vpop.permute.xlu0 %6870 }
 0x325   :  { %6456 = vrot.lane.b32.xlu1 %v6279_v63, %s11908_s21  ;;  %11191 = vmatmul.mubr.msk.bf16.gmra.mrb[92].mxu1 %vm9335_vm9, %v10780_v61  ;;  %v7827_v16 = vsel %vm3424_vm6, %v7670_v55, %v15766_v19  ;;  %v10562_v37 = vcombine.low %v15856_v39, %v15858_v1  ;;  %v6290_v28 = vrot.slane %v6288_v32, 7  ;;  %v15880_v30 = vcombine.low %v15856_v39, %v15856_v39 }
 0x326   :  { %6454 = vrot.lane.b32.xlu0 %v6272_v56, %s11908_s21  ;;  %v6283_v43 = vrot.slane %v6281_v49, 7  ;;  %v5179_v34 = vpack.c.bf16 %v15751_v48, %v15751_v48  ;;  %v7954_v21 = vsel %vm7886_vm8, %v7825_v46, %v15780_v51  ;;  %v7952_v19 = vsel %vm7886_vm8, %v7823_v13, %v15784_v25  ;;  %v5498_v51 = vld [vmem:[#allocation2 + $0x1e0] sm:$0xf] }
 0x327   :  { %v5177_v44 = vpack.c.bf16 %v15758_v15, %v15758_v15  ;;  %v5180_v5 = vpack.c.bf16 %v15762_v45, %v15762_v45  ;;  %v6293_v17 = vor.u32 %v6291_v2, %v6290_v28  ;;  %v10703_v48 = vcombine.low %v7954_v21, %v7954_v21  ;;  %v15911_v31 = vpop.permute.xlu1 %6876 }
 0x328   :  { %v6286_v22 = vor.u32 %v6284_v9, %v6283_v43  ;;  %5244 = vst.msk [vmem:[#allocation11 + $0x2d8] sm:$0xf] %vm763_vm7, %v5179_v34  ;;  %v10704_v14 = vcombine.high %v7954_v21, %v7954_v21  ;;  %v10561_v25 = vcombine.low %v5494_v4, %v5495_v41  ;;  %v15897_v24 = vcombine.low %v5494_v4, %v5494_v4  ;;  %v15917_v63 = vpop.permute.xlu0 %6874 }
 0x329   :  { %v10701_v15 = vcombine.low %v7952_v19, %v7952_v19  ;;  %v10702_v50 = vcombine.high %v7952_v19, %v7952_v19  ;;  %5242 = vst.msk [vmem:[#allocation11 + $0x2d0] sm:$0xf] %vm763_vm7, %v5177_v44  ;;  %5245 = vst.msk [vmem:[#allocation11 + $0x2dc] sm:$0xf] %vm763_vm7, %v5180_v5  ;;  %6460 = vrot.lane.b32.xlu1 %v6293_v17, %s11908_s21  ;;  %v8798_v45 = vshrl.u32 %v10703_v48, 16  ;;  %v8801_v53 = vshll.u32 %v10703_v48, 16 }
 0x32a   :  { %6458 = vrot.lane.b32.xlu0 %v6286_v22, %s11908_s21  ;;  %v10564_v7 = vcombine.low %v5500_v3, %v5501_v42  ;;  %v15903_v38 = vcombine.low %v5500_v3, %v5500_v3  ;;  %v8807_v59 = vshll.u32 %v10704_v14, 16  ;;  %v10563_v54 = vcombine.low %v5498_v51, %v5499_v36  ;;  %v5335_v44 = vld [vmem:[#allocation2 + $0x14c] sm:$0x1] }
 0x32b   :  { %v8784_v33 = vshrl.u32 %v10701_v15, 16  ;;  %v8787_v10 = vshll.u32 %v10701_v15, 16  ;;  %v8800_v47 = vrot.slane %v8798_v45, 4  ;;  %v8803_v20 = vrot.slane %v8801_v53, 5  ;;  %v15927_v5 = vpop.permute.xlu1 %7512  ;;  %v11737_v53 = vld [vmem:[#allocation2 + $0x148] sm:$0xf] }
 0x32c   :  { %v8793_v55 = vshll.u32 %v10702_v50, 16  ;;  %v5178_v40 = vpack.c.bf16 %v15768_v0, %v15768_v0  ;;  %v15907_v52 = vcombine.low %v5498_v51, %v5498_v51  ;;  %v7958_v58 = vsel %vm7886_vm8, %v7829_v62, %v15799_v6  ;;  %v15930_v48 = vpop.permute.xlu0 %7510 }
 0x32d   :  { %v8786_v8 = vrot.slane %v8784_v33, 4  ;;  %v8789_v23 = vrot.slane %v8787_v10, 5  ;;  %6904 = vrot.lane.b32.xlu1 %v10562_v37, %s11911_s4  ;;  %v8804_v57 = vor.u32 %v8803_v20, %v8800_v47  ;;  %v10707_v39 = vcombine.low %v7958_v58, %v7958_v58  ;;  %v5341_v33 = vld [vmem:[#allocation2 + $0x164] sm:$0x1] }
 0x32e   :  { %6902 = vrot.lane.b32.xlu0 %v10561_v25, %s11911_s4  ;;  %5243 = vst.msk [vmem:[#allocation11 + $0x2d4] sm:$0xf] %vm763_vm7, %v5178_v40  ;;  %v10708_v1 = vcombine.high %v7958_v58, %v7958_v58  ;;  %v7362_v0 = vshrl.u32 %v15880_v30, 16  ;;  %v8809_v46 = vrot.slane %v8807_v59, 5  ;;  %v7956_v6 = vsel %vm7886_vm8, %v7827_v16, %v15805_v11  ;;  %v5337_v11 = vld [vmem:[#allocation2 + $0x154] sm:$0x1] }
 0x32f   :  { %v8790_v13 = vor.u32 %v8789_v23, %v8786_v8  ;;  %v7365_v61 = vshll.u32 %v15880_v30, 16  ;;  %v8805_v56 = vrot.slane %v8804_v57, 4  ;;  %v8826_v32 = vshrl.u32 %v10707_v39, 16  ;;  %v11736_v25 = vld [vmem:[#allocation2 + $0x150] sm:$0xf] }
 0x330   :  { %v8829_v2 = vshll.u32 %v10707_v39, 16  ;;  %v7355_v49 = vshrl.u32 %v15897_v24, 16  ;;  %v8835_v9 = vshll.u32 %v10708_v1, 16  ;;  %v10705_v62 = vcombine.low %v7956_v6, %v7956_v6  ;;  %v15940_v8 = vld [vmem:[#allocation2 + $0x15c] sm:$0x1] }
 0x331   :  { %v10706_v37 = vcombine.high %v7956_v6, %v7956_v6  ;;  %v7364_v28 = vrot.slane %v7362_v0, 7  ;;  %v8791_v43 = vrot.slane %v8790_v13, 4  ;;  %v8795_v4 = vrot.slane %v8793_v55, 5  ;;  %6908 = vrot.lane.b32.xlu1 %v10564_v7, %s11911_s4  ;;  %v11738_v39 = vld [vmem:[#allocation2 + $0x160] sm:$0xf] }
 0x332   :  { %6906 = vrot.lane.b32.xlu0 %v10563_v54, %s11911_s4  ;;  %v8828_v41 = vrot.slane %v8826_v32, 4  ;;  %v8831_v34 = vrot.slane %v8829_v2, 5  ;;  %v8810_v16 = vsel %vm12524_vm5, %v8805_v56, %v8809_v46  ;;  %v8812_v30 = vshrl.u32 %v10705_v62, 16  ;;  %v5376_v0 = vld [vmem:[#allocation2 + $0x208] sm:$0xf] }
 0x333   :  { %v8815_v21 = vshll.u32 %v10705_v62, 16  ;;  %v8821_v19 = vshll.u32 %v10706_v37, 16  ;;  %v7367_v42 = vor.u32 %v7365_v61, %v7364_v28  ;;  %v7357_v17 = vrot.slane %v7355_v49, 7  ;;  %v5374_v46 = vld [vmem:[#allocation2 + $0x200] sm:$0xf]  ;;  %v15952_v49 = vpop.f32.mrb[64].mxu1 }
 0x334   :  { %v8832_v3 = vor.u32 %v8831_v34, %v8828_v41  ;;  %v7358_v22 = vshll.u32 %v15897_v24, 16  ;;  %v8837_v14 = vrot.slane %v8835_v9, 5  ;;  %v8814_v51 = vrot.slane %v8812_v30, 4  ;;  %v5380_v56 = vld [vmem:[#allocation2 + $0x218] sm:$0xf] }
 0x335   :  { %v8817_v36 = vrot.slane %v8815_v21, 5  ;;  %v10418_v15 = vcombine.low %v11736_v25, %v5337_v11  ;;  %7544 = vrot.lane.b32.xlu1 %v7367_v42, %s11912_s26  ;;  %v10417_v7 = vcombine.low %v11737_v53, %v5335_v44  ;;  %v7376_v59 = vshrl.u32 %v15903_v38, 16  ;;  %v5378_v32 = vld [vmem:[#allocation2 + $0x210] sm:$0xf]  ;;  %v11739_v37 = vld [vmem:[#allocation2 + $0x158] sm:$0xf] }
 0x336   :  { %v8833_v50 = vrot.slane %v8832_v3, 4  ;;  %v7360_v45 = vor.u32 %v7358_v22, %v7357_v17  ;;  %v8796_v10 = vsel %vm12524_vm5, %v8791_v43, %v8795_v4  ;;  %v7379_v54 = vshll.u32 %v15903_v38, 16  ;;  %v15959_v43 = vpop.f32.mrb[65].mxu1  ;;  %v11621_v30 = vld [vmem:[#allocation2 + $0x1c0] ss:$0 sps:$4 sm:$0xff]  }
 0x337   :  { %v8818_v24 = vor.u32 %v8817_v36, %v8814_v51  ;;  %v7369_v47 = vshrl.u32 %v15907_v52, 16  ;;  %v8823_v20 = vrot.slane %v8821_v19, 5  ;;  %v7378_v55 = vrot.slane %v7376_v59, 7  ;;  %v15944_v38 = vpop.permute.xlu1 %7516  ;;  %v15963_v11 = vpop.f32.mrb[66].mxu1 }
 0x338   :  { %7542 = vrot.lane.b32.xlu0 %v7360_v45, %s11912_s26  ;;  %v7372_v40 = vshll.u32 %v15907_v52, 16  ;;  %v8838_v23 = vsel %vm12524_vm5, %v8833_v50, %v8837_v14  ;;  %v10420_v1 = vcombine.low %v11738_v39, %v5341_v33  ;;  %v7679_v13 = vsel %vm309_vm0, %v10418_v15, %v15821_v29  ;;  %v15950_v2 = vpop.permute.xlu0 %7514  ;;  %v15970_v44 = vpop.f32.mrb[67].mxu1 }
 0x339   :  { %v8819_v58 = vrot.slane %v8818_v24, 4  ;;  %v7371_v57 = vrot.slane %v7369_v47, 7  ;;  %v7676_v6 = vsel %vm309_vm0, %v10417_v7, %v15828_v18  ;;  %v7381_v52 = vor.u32 %v7379_v54, %v7378_v55  ;;  %v11620_v18 = vld [vmem:[#allocation2 + $0x1c8] ss:$0 sps:$4 sm:$0xff]  }
 0x33a   :  { %v10781_v61 = vcombine.low %v8796_v10, %v8810_v16  ;;  %v10419_v28 = vcombine.low %v11739_v37, %v15940_v8  ;;  %v7833_v29 = vsel %vm3424_vm6, %v7679_v13, %v15892_v60  ;;  %v10502_v4 = vcombine.low %v5376_v0, %v5376_v0  ;;  %v5504_v8 = vld [vmem:[#allocation2 + $0x200] sm:$0xf] }
 0x33b   :  { %v8824_v9 = vsel %vm12524_vm5, %v8819_v58, %v8823_v20  ;;  %v7374_v62 = vor.u32 %v7372_v40, %v7371_v57  ;;  %7548 = vrot.lane.b32.xlu1 %v7381_v52, %s11912_s26  ;;  %v10501_v41 = vcombine.low %v5374_v46, %v5374_v46  ;;  %v7685_v16 = vsel %vm309_vm0, %v10420_v1, %v15852_v27  ;;  %v5502_v52 = vld [vmem:[#allocation2 + $0x1f8] sm:$0xf] }
 0x33c   :  { %11194 = vmatprep.mubr.msk.bf16.mxu1 %vm9335_vm9, %v10781_v61  ;;  %v10782_v34 = vcombine.low %v8824_v9, %v8838_v23  ;;  %v7831_v60 = vsel %vm3424_vm6, %v7676_v6, %v15895_v26  ;;  %v10504_v21 = vcombine.low %v5380_v56, %v5380_v56  ;;  %v10503_v19 = vcombine.low %v5378_v32, %v5378_v32  ;;  %v5505_v23 = vld [vmem:[#allocation2 + $0x204] sm:$0x1] }
 0x33d   :  { %7546 = vrot.lane.b32.xlu0 %v7374_v62, %s11912_s26  ;;  %v6302_v3 = vshrl.u32 %v10502_v4, 16  ;;  %v6305_v42 = vshll.u32 %v10502_v4, 16  ;;  %v6295_v17 = vshrl.u32 %v10501_v41, 16  ;;  %v6298_v22 = vshll.u32 %v10501_v41, 16  ;;  %v15973_v15 = vpop.permute.xlu1 %6432  ;;  %v5503_v62 = vld [vmem:[#allocation2 + $0x1fc] sm:$0x1] }
 0x33e   :  { %11195 = vmatmul.mubr.msk.bf16.gmra.mrb[96].mxu1 %vm9335_vm9, %v10782_v34  ;;  %v6316_v14 = vshrl.u32 %v10504_v21, 16  ;;  %v6319_v51 = vshll.u32 %v10504_v21, 16  ;;  %v6309_v36 = vshrl.u32 %v10503_v19, 16  ;;  %v6312_v25 = vshll.u32 %v10503_v19, 16  ;;  %v15980_v53 = vpop.permute.xlu0 %6430 }
 0x33f   :  { %4366 = vrot.lane.b32.xlu1 %v11620_v18, %s11908_s21  ;;  %v6304_v27 = vrot.slane %v6302_v3, 7  ;;  %v6297_v26 = vrot.slane %v6295_v17, 7  ;;  %v7962_v50 = vsel %vm7886_vm8, %v7833_v29, %v15927_v5  ;;  %v7960_v45 = vsel %vm7886_vm8, %v7831_v60, %v15930_v48  ;;  %v5506_v17 = vld [vmem:[#allocation2 + $0x208] sm:$0xf] }
 0x340   :  { %v6318_v7 = vrot.slane %v6316_v14, 7  ;;  %v6311_v59 = vrot.slane %v6309_v36, 7  ;;  %v10711_v33 = vcombine.low %v7962_v50, %v7962_v50  ;;  %v10712_v10 = vcombine.high %v7962_v50, %v7962_v50 }
 0x341   :  { %4364 = vrot.lane.b32.xlu0 %v11621_v30, %s11908_s21  ;;  %v6307_v24 = vor.u32 %v6305_v42, %v6304_v27  ;;  %v6300_v54 = vor.u32 %v6298_v22, %v6297_v26  ;;  %v10709_v47 = vcombine.low %v7960_v45, %v7960_v45  ;;  %v10710_v20 = vcombine.high %v7960_v45, %v7960_v45  ;;  %v5508_v30 = vld [vmem:[#allocation2 + $0x210] sm:$0xf]  ;;  %v5345_v45 = vld [vmem:[#allocation2 + $0x17c] sm:$0x1] }
 0x342   :  { %v7682_v55 = vsel %vm309_vm0, %v10419_v28, %v15860_v12  ;;  %v7837_v5 = vsel %vm3424_vm6, %v7685_v16, %v15911_v31  ;;  %v8854_v40 = vshrl.u32 %v10711_v33, 16  ;;  %v8857_v48 = vshll.u32 %v10711_v33, 16  ;;  %v15987_v58 = vpop.permute.xlu1 %6436  ;;  %v15990_v46 = vpop.permute.xlu0 %6434 }
 0x343   :  { %6464 = vrot.lane.b32.xlu1 %v6307_v24, %s11908_s21  ;;  %v6321_v57 = vor.u32 %v6319_v51, %v6318_v7  ;;  %v8863_v39 = vshll.u32 %v10712_v10, 16  ;;  %v8840_v1 = vshrl.u32 %v10709_v47, 16  ;;  %v8843_v0 = vshll.u32 %v10709_v47, 16 }
 0x344   :  { %v7835_v12 = vsel %vm3424_vm6, %v7682_v55, %v15917_v63  ;;  %v6314_v31 = vor.u32 %v6312_v25, %v6311_v59  ;;  %v8856_v13 = vrot.slane %v8854_v40, 4  ;;  %v8859_v6 = vrot.slane %v8857_v48, 5  ;;  %v5507_v25 = vld [vmem:[#allocation2 + $0x20c] sm:$0x1] }
 0x345   :  { %6462 = vrot.lane.b32.xlu0 %v6300_v54, %s11908_s21  ;;  %v8842_v61 = vrot.slane %v8840_v1, 4  ;;  %v8845_v56 = vrot.slane %v8843_v0, 5  ;;  %v8849_v32 = vshll.u32 %v10710_v20, 16  ;;  %v10566_v9 = vcombine.low %v5504_v8, %v5505_v23 }
 0x346   :  { %v8860_v37 = vor.u32 %v8859_v6, %v8856_v13  ;;  %v8865_v28 = vrot.slane %v8863_v39, 5  ;;  %v15995_v29 = vcombine.low %v5504_v8, %v5504_v8  ;;  %v7966_v18 = vsel %vm7886_vm8, %v7837_v5, %v15944_v38  ;;  %v15999_v4 = vpop.permute.xlu1 %6880  ;;  %v5509_v38 = vld [vmem:[#allocation2 + $0x214] sm:$0x1]  ;;  %v11740_v8 = vld [vmem:[#allocation2 + $0x178] sm:$0xf] }
 0x347   :  { %6468 = vrot.lane.b32.xlu1 %v6321_v57, %s11908_s21  ;;  %v8846_v63 = vor.u32 %v8845_v56, %v8842_v61  ;;  %v10715_v41 = vcombine.low %v7966_v18, %v7966_v18  ;;  %v10716_v34 = vcombine.high %v7966_v18, %v7966_v18  ;;  %v7964_v16 = vsel %vm7886_vm8, %v7835_v12, %v15950_v2  ;;  %v16004_v60 = vpop.permute.xlu0 %6878  ;;  %v5343_v57 = vld [vmem:[#allocation2 + $0x174] sm:$0x1]  ;;  %v5349_v13 = vld [vmem:[#allocation2 + $0x18c] sm:$0x1] }
 0x348   :  { %v8861_v21 = vrot.slane %v8860_v37, 4  ;;  %v10565_v19 = vcombine.low %v5502_v52, %v5503_v62  ;;  %v10713_v3 = vcombine.low %v7964_v16, %v7964_v16  ;;  %v10714_v42 = vcombine.high %v7964_v16, %v7964_v16  ;;  %v11741_v37 = vld [vmem:[#allocation2 + $0x170] sm:$0xf] }
 0x349   :  { %6466 = vrot.lane.b32.xlu0 %v6314_v31, %s11908_s21  ;;  %v8847_v22 = vrot.slane %v8846_v63, 4  ;;  %v8851_v14 = vrot.slane %v8849_v32, 5  ;;  %v8882_v51 = vshrl.u32 %v10715_v41, 16  ;;  %v8885_v36 = vshll.u32 %v10715_v41, 16  ;;  %v5347_v32 = vld [vmem:[#allocation2 + $0x184] sm:$0x1] }
 0x34a   :  { %v10629_v27 = vcombine.low %v5502_v52, %v5502_v52  ;;  %v8891_v26 = vshll.u32 %v10716_v34, 16  ;;  %v8868_v50 = vshrl.u32 %v10713_v3, 16  ;;  %v8871_v2 = vshll.u32 %v10713_v3, 16  ;;  %v16007_v7 = vpop.permute.xlu1 %6884  ;;  %v11742_v34 = vld [vmem:[#allocation2 + $0x188] sm:$0xf] }
 0x34b   :  { %v16011_v59 = vsel %vm12524_vm5, %v8861_v21, %v8865_v28  ;;  %6912 = vrot.lane.b32.xlu1 %v10566_v9, %s11911_s4  ;;  %v8884_v33 = vrot.slane %v8882_v51, 4  ;;  %v8887_v10 = vrot.slane %v8885_v36, 5  ;;  %v10568_v24 = vcombine.low %v5508_v30, %v5509_v38  ;;  %v16017_v39 = vpop.permute.xlu0 %6882  ;;  %v16025_v21 = vpop.f32.mrb[68].mxu1 }
 0x34c   :  { %v8852_v54 = vsel %vm12524_vm5, %v8847_v22, %v8851_v14  ;;  %v8870_v47 = vrot.slane %v8868_v50, 4  ;;  %v8873_v20 = vrot.slane %v8871_v2, 5  ;;  %v8877_v55 = vshll.u32 %v10714_v42, 16  ;;  %v11743_v42 = vld [vmem:[#allocation2 + $0x180] sm:$0xf]  ;;  %v16029_v22 = vpop.f32.mrb[69].mxu1 }
 0x34d   :  { %6910 = vrot.lane.b32.xlu0 %v10565_v19, %s11911_s4  ;;  %v8888_v5 = vor.u32 %v8887_v10, %v8884_v33  ;;  %v10632_v40 = vcombine.low %v5508_v30, %v5508_v30  ;;  %v10567_v48 = vcombine.low %v5506_v17, %v5507_v25  ;;  %v10422_v23 = vcombine.low %v11740_v8, %v5345_v45 }
 0x34e   :  { %v8893_v1 = vrot.slane %v8891_v26, 5  ;;  %v8874_v0 = vor.u32 %v8873_v20, %v8870_v47  ;;  %v7390_v12 = vshrl.u32 %v15995_v29, 16  ;;  %v7393_v31 = vshll.u32 %v15995_v29, 16 }
 0x34f   :  { %v8889_v6 = vrot.slane %v8888_v5, 4  ;;  %6916 = vrot.lane.b32.xlu1 %v10568_v24, %s11911_s4  ;;  %v10631_v52 = vcombine.low %v5506_v17, %v5506_v17  ;;  %v7383_v61 = vshrl.u32 %v10629_v27, 16  ;;  %v7386_v56 = vshll.u32 %v10629_v27, 16  ;;  %v16033_v27 = vpop.f32.mrb[70].mxu1 }
 0x350   :  { %v8875_v9 = vrot.slane %v8874_v0, 4  ;;  %v8879_v62 = vrot.slane %v8877_v55, 5  ;;  %v10421_v28 = vcombine.low %v11741_v37, %v5343_v57  ;;  %v7392_v18 = vrot.slane %v7390_v12, 7  ;;  %v7521_v63 = vpop.permute.xlu1 %7520  ;;  %v16041_v33 = vpop.f32.mrb[71].mxu1  ;;  %v5382_v55 = vld [vmem:[#allocation2 + $0x220] sm:$0xf] }
 0x351   :  { %6914 = vrot.lane.b32.xlu0 %v10567_v48, %s11911_s4  ;;  %v7691_v41 = vsel %vm309_vm0, %v10422_v23, %v15973_v15  ;;  %v7385_v29 = vrot.slane %v7383_v61, 7  ;;  %v10424_v16 = vcombine.low %v11742_v34, %v5349_v13  ;;  %v7404_v30 = vshrl.u32 %v10632_v40, 16  ;;  %v11635_v57 = vld [vmem:[#allocation2 + $0x1d0] ss:$0 sps:$4 sm:$0xff]   ;;  %v11636_v37 = vld [vmem:[#allocation2 + $0x1e8] ss:$0 sps:$4 sm:$0xff]  }
 0x352   :  { %v8894_v19 = vsel %vm12524_vm5, %v8889_v6, %v8893_v1  ;;  %v7395_v3 = vor.u32 %v7393_v31, %v7392_v18  ;;  %v10423_v38 = vcombine.low %v11743_v42, %v5347_v32  ;;  %v7407_v17 = vshll.u32 %v10632_v40, 16 }
 0x353   :  { %v8880_v14 = vsel %vm12524_vm5, %v8875_v9, %v8879_v62  ;;  %v7388_v51 = vor.u32 %v7386_v56, %v7385_v29  ;;  %v7406_v15 = vrot.slane %v7404_v30, 7  ;;  %v7397_v36 = vshrl.u32 %v10631_v52, 16  ;;  %v7519_v25 = vpop.permute.xlu0 %7518  ;;  %v11637_v29 = vld [vmem:[#allocation2 + $0x1e0] ss:$0 sps:$4 sm:$0xff]  }
 0x354   :  { %7552 = vrot.lane.b32.xlu1 %v7395_v3, %s11912_s26  ;;  %v7400_v26 = vshll.u32 %v10631_v52, 16  ;;  %v9723_v50 = vpack.c.bf16 %v15952_v49, %v15952_v49  ;;  %v9721_v2 = vpack.c.bf16 %v15959_v43, %v15959_v43  ;;  %v10783_v45 = vcombine.low %v8852_v54, %v16011_v59  ;;  %v5384_v54 = vld [vmem:[#allocation2 + $0x228] sm:$0xf] }
 0x355   :  { %v7688_v10 = vsel %vm309_vm0, %v10421_v28, %v15980_v53  ;;  %7550 = vrot.lane.b32.xlu0 %v7388_v51, %s11912_s26  ;;  %v7409_v24 = vor.u32 %v7407_v17, %v7406_v15  ;;  %v7399_v47 = vrot.slane %v7397_v36, 7  ;;  %v7841_v20 = vsel %vm3424_vm6, %v7691_v41, %v15999_v4 }
 0x356   :  { %9788 = vst.msk [vmem:[#allocation11 + $0x68] sm:$0xf] %vm763_vm7, %v9723_v50  ;;  %9786 = vst.msk [vmem:[#allocation11 + $0x60] sm:$0xf] %vm763_vm7, %v9721_v2  ;;  %11198 = vmatprep.mubr.msk.bf16.mxu1 %vm9335_vm9, %v10783_v45  ;;  %v7839_v49 = vsel %vm3424_vm6, %v7688_v10, %v16004_v60  ;;  %v9724_v43 = vpack.c.bf16 %v15963_v11, %v15963_v11  ;;  %v9722_v53 = vpack.c.bf16 %v15970_v44, %v15970_v44  ;;  %v7525_v5 = vpop.permute.xlu1 %7524  ;;  %v11634_v11 = vld [vmem:[#allocation2 + $0x1d8] ss:$0 sps:$4 sm:$0xff]  }
 0x357   :  { %v10784_v59 = vcombine.low %v8880_v14, %v8894_v19  ;;  %v7697_v4 = vsel %vm309_vm0, %v10424_v16, %v15987_v58  ;;  %v7402_v40 = vor.u32 %v7400_v26, %v7399_v47  ;;  %v7970_v48 = vsel %vm7886_vm8, %v7841_v20, %v7521_v63  ;;  %v7523_v23 = vpop.permute.xlu0 %7522  ;;  %v5388_v50 = vld [vmem:[#allocation2 + $0x238] sm:$0xf] }
 0x358   :  { %v7968_v8 = vsel %vm7886_vm8, %v7839_v49, %v7519_v25  ;;  %v7694_v60 = vsel %vm309_vm0, %v10423_v38, %v15990_v46  ;;  %7556 = vrot.lane.b32.xlu1 %v7409_v24, %s11912_s26  ;;  %9789 = vst.msk [vmem:[#allocation11 + $0x6c] sm:$0xf] %vm763_vm7, %v9724_v43  ;;  %9787 = vst.msk [vmem:[#allocation11 + $0x64] sm:$0xf] %vm763_vm7, %v9722_v53  ;;  %v10719_v44 = vcombine.low %v7970_v48, %v7970_v48  ;;  %v5386_v49 = vld [vmem:[#allocation2 + $0x230] sm:$0xf] }
 0x359   :  { %11199 = vmatmul.mubr.msk.bf16.gmra.mrb[100].mxu1 %vm9335_vm9, %v10784_v59  ;;  %v10717_v58 = vcombine.low %v7968_v8, %v7968_v8  ;;  %7554 = vrot.lane.b32.xlu0 %v7402_v40, %s11912_s26  ;;  %v7845_v1 = vsel %vm3424_vm6, %v7697_v4, %v16007_v7  ;;  %v10720_v0 = vcombine.high %v7970_v48, %v7970_v48  ;;  %v5353_v43 = vld [vmem:[#allocation2 + $0x19c] sm:$0x1] }
 0x35a   :  { %v10506_v12 = vcombine.low %v5384_v54, %v5384_v54  ;;  %v10505_v46 = vcombine.low %v5382_v55, %v5382_v55  ;;  %v8910_v31 = vshrl.u32 %v10719_v44, 16  ;;  %v8913_v13 = vshll.u32 %v10719_v44, 16 }
 0x35b   :  { %v10718_v6 = vcombine.high %v7968_v8, %v7968_v8  ;;  %v8896_v52 = vshrl.u32 %v10717_v58, 16  ;;  %v7843_v61 = vsel %vm3424_vm6, %v7694_v60, %v16017_v39  ;;  %v8899_v56 = vshll.u32 %v10717_v58, 16  ;;  %v16073_v62 = vpop.permute.xlu1 %6440 }
 0x35c   :  { %v6330_v32 = vshrl.u32 %v10506_v12, 16  ;;  %v7974_v9 = vsel %vm7886_vm8, %v7845_v1, %v7525_v5  ;;  %4370 = vrot.lane.b32.xlu1 %v11634_v11, %s11908_s21  ;;  %v8912_v7 = vrot.slane %v8910_v31, 4  ;;  %v8915_v28 = vrot.slane %v8913_v13, 5  ;;  %v16076_v41 = vpop.permute.xlu0 %6438  ;;  %v5351_v5 = vld [vmem:[#allocation2 + $0x194] sm:$0x1] }
 0x35d   :  { %v8898_v18 = vrot.slane %v8896_v52, 4  ;;  %v6333_v63 = vshll.u32 %v10506_v12, 16  ;;  %4368 = vrot.lane.b32.xlu0 %v11635_v57, %s11908_s21  ;;  %v8919_v34 = vshll.u32 %v10720_v0, 16  ;;  %v8901_v39 = vrot.slane %v8899_v56, 5  ;;  %v11744_v12 = vld [vmem:[#allocation2 + $0x198] sm:$0xf] }
 0x35e   :  { %v6332_v16 = vrot.slane %v6330_v32, 7  ;;  %v6323_v30 = vshrl.u32 %v10505_v46, 16  ;;  %v8916_v19 = vor.u32 %v8915_v28, %v8912_v7  ;;  %v8905_v3 = vshll.u32 %v10718_v6, 16  ;;  %v11745_v31 = vld [vmem:[#allocation2 + $0x190] sm:$0xf] }
 0x35f   :  { %v6326_v42 = vshll.u32 %v10505_v46, 16  ;;  %v10723_v38 = vcombine.low %v7974_v9, %v7974_v9  ;;  %v8902_v17 = vor.u32 %v8901_v39, %v8898_v18  ;;  %v10724_v51 = vcombine.high %v7974_v9, %v7974_v9  ;;  %v5512_v32 = vld [vmem:[#allocation2 + $0x220] sm:$0xf]  ;;  %v5513_v9 = vld [vmem:[#allocation2 + $0x224] sm:$0x1] }
 0x360   :  { %v6325_v14 = vrot.slane %v6323_v30, 7  ;;  %v7972_v15 = vsel %vm7886_vm8, %v7843_v61, %v7523_v23  ;;  %4374 = vrot.lane.b32.xlu1 %v11636_v37, %s11908_s21  ;;  %v6335_v36 = vor.u32 %v6333_v63, %v6332_v16  ;;  %v16081_v2 = vpop.permute.xlu1 %6444  ;;  %v8921_v10 = vrot.slane %v8919_v34, 5  ;;  %v5510_v37 = vld [vmem:[#allocation2 + $0x218] sm:$0xf]  ;;  %v5357_v34 = vld [vmem:[#allocation2 + $0x1ac] sm:$0x1] }
 0x361   :  { %v8938_v25 = vshrl.u32 %v10723_v38, 16  ;;  %v8941_v26 = vshll.u32 %v10723_v38, 16  ;;  %v16083_v45 = vpop.permute.xlu0 %6442  ;;  %4372 = vrot.lane.b32.xlu0 %v11637_v29, %s11908_s21  ;;  %v10721_v47 = vcombine.low %v7972_v15, %v7972_v15  ;;  %v10722_v20 = vcombine.high %v7972_v15, %v7972_v15  ;;  %v5511_v29 = vld [vmem:[#allocation2 + $0x21c] sm:$0x1]  ;;  %v16100_v15 = vld [vmem:[#allocation2 + $0x230] sm:$0xf] }
 0x362   :  { %v6328_v24 = vor.u32 %v6326_v42, %v6325_v14  ;;  %v8917_v53 = vrot.slane %v8916_v19, 4  ;;  %v8907_v59 = vrot.slane %v8905_v3, 5  ;;  %v8903_v4 = vrot.slane %v8902_v17, 4  ;;  %v5355_v3 = vld [vmem:[#allocation2 + $0x1a4] sm:$0x1] }
 0x363   :  { %v8940_v54 = vrot.slane %v8938_v25, 4  ;;  %v8943_v55 = vrot.slane %v8941_v26, 5  ;;  %v8947_v40 = vshll.u32 %v10724_v51, 16  ;;  %v8924_v48 = vshrl.u32 %v10721_v47, 16 }
 0x364   :  { %v8927_v8 = vshll.u32 %v10721_v47, 16  ;;  %6472 = vrot.lane.b32.xlu1 %v6335_v36, %s11908_s21  ;;  %v8933_v60 = vshll.u32 %v10722_v20, 16  ;;  %v10508_v11 = vcombine.low %v5388_v50, %v5388_v50  ;;  %v10507_v44 = vcombine.low %v5386_v49, %v5386_v49  ;;  %v16087_v58 = vpop.permute.xlu1 %6888  ;;  %v16102_v36 = vld [vmem:[#allocation2 + $0x234] sm:$0x1]  ;;  %v11746_v47 = vld [vmem:[#allocation2 + $0x1a8] sm:$0xf] }
 0x365   :  { %v8944_v23 = vor.u32 %v8943_v55, %v8940_v54  ;;  %v16089_v57 = vpop.permute.xlu0 %6886  ;;  %6470 = vrot.lane.b32.xlu0 %v6328_v24, %s11908_s21  ;;  %v8926_v1 = vrot.slane %v8924_v48, 4  ;;  %v10426_v46 = vcombine.low %v11744_v12, %v5353_v43  ;;  %v10425_v13 = vcombine.low %v11745_v31, %v5351_v5  ;;  %v5514_v54 = vld [vmem:[#allocation2 + $0x228] sm:$0xf]  ;;  %v5515_v55 = vld [vmem:[#allocation2 + $0x22c] sm:$0x1] }
 0x366   :  { %v8929_v0 = vrot.slane %v8927_v8, 5  ;;  %v6344_v52 = vshrl.u32 %v10508_v11, 16  ;;  %v6347_v61 = vshll.u32 %v10508_v11, 16  ;;  %v6337_v56 = vshrl.u32 %v10507_v44, 16  ;;  %v16106_v26 = vpop.f32.mrb[72].mxu1 }
 0x367   :  { %v8945_v6 = vrot.slane %v8944_v23, 4  ;;  %v8922_v7 = vsel %vm12524_vm5, %v8917_v53, %v8921_v10  ;;  %v8949_v28 = vrot.slane %v8947_v40, 5  ;;  %v6340_v63 = vshll.u32 %v10507_v44, 16  ;;  %v11747_v53 = vld [vmem:[#allocation2 + $0x1a0] sm:$0xf] }
 0x368   :  { %v8930_v18 = vor.u32 %v8929_v0, %v8926_v1  ;;  %v8908_v39 = vsel %vm12524_vm5, %v8903_v4, %v8907_v59  ;;  %v8935_v16 = vrot.slane %v8933_v60, 5  ;;  %v6346_v30 = vrot.slane %v6344_v52, 7  ;;  %v6893_v42 = vpop.permute.xlu1 %6892 }
 0x369   :  { %v6339_v19 = vrot.slane %v6337_v56, 7  ;;  %v7703_v17 = vsel %vm309_vm0, %v10426_v46, %v16073_v62  ;;  %v7700_v14 = vsel %vm309_vm0, %v10425_v13, %v16076_v41  ;;  %v10634_v51 = vcombine.low %v5512_v32, %v5512_v32  ;;  %v16104_v25 = vpop.permute.xlu0 %6890  ;;  %v16110_v62 = vpop.f32.mrb[73].mxu1 }
 0x36a   :  { %v8931_v38 = vrot.slane %v8930_v18, 4  ;;  %v8950_v50 = vsel %vm12524_vm5, %v8945_v6, %v8949_v28  ;;  %v6349_v10 = vor.u32 %v6347_v61, %v6346_v30  ;;  %v10428_v20 = vcombine.low %v11746_v47, %v5357_v34  ;;  %v16112_v5 = vpop.f32.mrb[74].mxu1 }
 0x36b   :  { %v6342_v24 = vor.u32 %v6340_v63, %v6339_v19  ;;  %v10570_v49 = vcombine.low %v5512_v32, %v5513_v9  ;;  %v10569_v41 = vcombine.low %v5510_v37, %v5511_v29  ;;  %v10633_v43 = vcombine.low %v5510_v37, %v5510_v37  ;;  %v16122_v23 = vpop.f32.mrb[75].mxu1 }
 0x36c   :  { %v10427_v59 = vcombine.low %v11747_v53, %v5355_v3  ;;  %v8936_v4 = vsel %vm12524_vm5, %v8931_v38, %v8935_v16  ;;  %6476 = vrot.lane.b32.xlu1 %v6349_v10, %s11908_s21  ;;  %v10572_v40 = vcombine.low %v16100_v15, %v16102_v36  ;;  %v10636_v48 = vcombine.low %v16100_v15, %v16100_v15  ;;  %v7529_v0 = vpop.permute.xlu1 %7528 }
 0x36d   :  { %6474 = vrot.lane.b32.xlu0 %v6342_v24, %s11908_s21  ;;  %v7418_v8 = vshrl.u32 %v10634_v51, 16  ;;  %v10635_v60 = vcombine.low %v5514_v54, %v5514_v54  ;;  %v9727_v11 = vpack.c.bf16 %v16025_v21, %v16025_v21  ;;  %v9725_v44 = vpack.c.bf16 %v16029_v22, %v16029_v22 }
 0x36e   :  { %v10785_v1 = vcombine.low %v8908_v39, %v8922_v7  ;;  %v7709_v12 = vsel %vm309_vm0, %v10428_v20, %v16081_v2  ;;  %v10571_v46 = vcombine.low %v5514_v54, %v5515_v55  ;;  %v9728_v31 = vpack.c.bf16 %v16033_v27, %v16033_v27  ;;  %v7527_v61 = vpop.permute.xlu0 %7526 }
 0x36f   :  { %v9726_v13 = vpack.c.bf16 %v16041_v33, %v16041_v33  ;;  %9792 = vst.msk [vmem:[#allocation11 + $0x78] sm:$0xf] %vm763_vm7, %v9727_v11  ;;  %9790 = vst.msk [vmem:[#allocation11 + $0x70] sm:$0xf] %vm763_vm7, %v9725_v44  ;;  %v7420_v21 = vrot.slane %v7418_v8, 7  ;;  %v7421_v22 = vshll.u32 %v10634_v51, 16  ;;  %v10786_v52 = vcombine.low %v8936_v4, %v8950_v50 }
 0x370   :  { %11202 = vmatprep.mubr.msk.bf16.mxu1 %vm9335_vm9, %v10785_v1  ;;  %v7411_v6 = vshrl.u32 %v10633_v43, 16  ;;  %6920 = vrot.lane.b32.xlu1 %v10570_v49, %s11911_s4  ;;  %v7706_v27 = vsel %vm309_vm0, %v10427_v59, %v16083_v45  ;;  %v7849_v33 = vsel %vm3424_vm6, %v7703_v17, %v16087_v58  ;;  %9793 = vst.msk [vmem:[#allocation11 + $0x7c] sm:$0xf] %vm763_vm7, %v9728_v31  ;;  %v7414_v2 = vshll.u32 %v10633_v43, 16 }
 0x371   :  { %6918 = vrot.lane.b32.xlu0 %v10569_v41, %s11911_s4  ;;  %9791 = vst.msk [vmem:[#allocation11 + $0x74] sm:$0xf] %vm763_vm7, %v9726_v13  ;;  %v7432_v56 = vshrl.u32 %v10636_v48, 16  ;;  %v7847_v32 = vsel %vm3424_vm6, %v7700_v14, %v16089_v57  ;;  %11203 = vmatmul.mubr.msk.bf16.gmra.mrb[104].mxu1 %vm9335_vm9, %v10786_v52  ;;  %v7435_v37 = vshll.u32 %v10636_v48, 16  ;;  %v7425_v7 = vshrl.u32 %v10635_v60, 16 }
 0x372   :  { %v7413_v9 = vrot.slane %v7411_v6, 7  ;;  %v7853_v28 = vsel %vm3424_vm6, %v7709_v12, %v6893_v42  ;;  %v7978_v18 = vsel %vm7886_vm8, %v7849_v33, %v7529_v0  ;;  %v7976_v58 = vsel %vm7886_vm8, %v7847_v32, %v7527_v61  ;;  %v11650_v12 = vld [vmem:[#allocation2 + $0x200] ss:$0 sps:$4 sm:$0xff]  }
 0x373   :  { %v7434_v45 = vrot.slane %v7432_v56, 7  ;;  %v7423_v63 = vor.u32 %v7421_v22, %v7420_v21  ;;  %v7428_v29 = vshll.u32 %v10635_v60, 16  ;;  %v10727_v34 = vcombine.low %v7978_v18, %v7978_v18  ;;  %v11651_v21 = vld [vmem:[#allocation2 + $0x1f8] ss:$0 sps:$4 sm:$0xff]  }
 0x374   :  { %v10728_v39 = vcombine.high %v7978_v18, %v7978_v18  ;;  %v7533_v16 = vpop.permute.xlu1 %7532  ;;  %6924 = vrot.lane.b32.xlu1 %v10572_v40, %s11911_s4  ;;  %v7416_v57 = vor.u32 %v7414_v2, %v7413_v9  ;;  %v7427_v30 = vrot.slane %v7425_v7, 7  ;;  %v10725_v19 = vcombine.low %v7976_v58, %v7976_v58  ;;  %v11652_v18 = vld [vmem:[#allocation2 + $0x210] ss:$0 sps:$4 sm:$0xff]  }
 0x375   :  { %6922 = vrot.lane.b32.xlu0 %v10571_v46, %s11911_s4  ;;  %v10726_v3 = vcombine.high %v7976_v58, %v7976_v58  ;;  %v7851_v42 = vsel %vm3424_vm6, %v7706_v27, %v16104_v25  ;;  %v7437_v38 = vor.u32 %v7435_v37, %v7434_v45  ;;  %v8966_v17 = vshrl.u32 %v10727_v34, 16  ;;  %v7531_v51 = vpop.permute.xlu0 %7530  ;;  %v11653_v58 = vld [vmem:[#allocation2 + $0x208] ss:$0 sps:$4 sm:$0xff]  }
 0x376   :  { %v8969_v14 = vshll.u32 %v10727_v34, 16  ;;  %v8975_v15 = vshll.u32 %v10728_v39, 16  ;;  %v8952_v36 = vshrl.u32 %v10725_v19, 16  ;;  %v8955_v50 = vshll.u32 %v10725_v19, 16 }
 0x377   :  { %v7982_v10 = vsel %vm7886_vm8, %v7853_v28, %v7533_v16  ;;  %v8968_v24 = vrot.slane %v8966_v17, 4  ;;  %v8961_v20 = vshll.u32 %v10726_v3, 16  ;;  %v7430_v41 = vor.u32 %v7428_v29, %v7427_v30  ;;  %v5361_v17 = vld [vmem:[#allocation2 + $0x1c4] sm:$0x1] }
 0x378   :  { %v8971_v47 = vrot.slane %v8969_v14, 5  ;;  %v10731_v49 = vcombine.low %v7982_v10, %v7982_v10  ;;  %7560 = vrot.lane.b32.xlu1 %v7423_v63, %s11912_s26  ;;  %v8954_v43 = vrot.slane %v8952_v36, 4  ;;  %v8957_v25 = vrot.slane %v8955_v50, 5 }
 0x379   :  { %7558 = vrot.lane.b32.xlu0 %v7416_v57, %s11912_s26  ;;  %v10732_v53 = vcombine.high %v7982_v10, %v7982_v10  ;;  %v16158_v59 = vpop.permute.xlu1 %6448  ;;  %v7980_v40 = vsel %vm7886_vm8, %v7851_v42, %v7531_v51  ;;  %v16161_v48 = vpop.permute.xlu0 %6446  ;;  %v8977_v8 = vrot.slane %v8975_v15, 5  ;;  %v8963_v0 = vrot.slane %v8961_v20, 5  ;;  %v11654_v51 = vld [vmem:[#allocation2 + $0x220] ss:$0 sps:$4 sm:$0xff]   ;;  %v11655_v15 = vld [vmem:[#allocation2 + $0x218] ss:$0 sps:$4 sm:$0xff]  }
 0x37a   :  { %v8972_v54 = vor.u32 %v8971_v47, %v8968_v24  ;;  %v8994_v55 = vshrl.u32 %v10731_v49, 16  ;;  %v8997_v4 = vshll.u32 %v10731_v49, 16  ;;  %v8958_v60 = vor.u32 %v8957_v25, %v8954_v43  ;;  %v11748_v20 = vld [vmem:[#allocation2 + $0x1c0] sm:$0xf]  ;;  %v5365_v43 = vld [vmem:[#allocation2 + $0x1d4] sm:$0x1] }
 0x37b   :  { %v10729_v11 = vcombine.low %v7980_v40, %v7980_v40  ;;  %v10730_v44 = vcombine.high %v7980_v40, %v7980_v40  ;;  %v9003_v22 = vshll.u32 %v10732_v53, 16  ;;  %v9731_v63 = vpack.c.bf16 %v16106_v26, %v16106_v26  ;;  %v11656_v25 = vld [vmem:[#allocation2 + $0x230] ss:$0 sps:$4 sm:$0xff]   ;;  %v11657_v53 = vld [vmem:[#allocation2 + $0x228] ss:$0 sps:$4 sm:$0xff]  }
 0x37c   :  { %v8973_v1 = vrot.slane %v8972_v54, 4  ;;  %v8996_v46 = vrot.slane %v8994_v55, 4  ;;  %v8999_v31 = vrot.slane %v8997_v4, 5  ;;  %7564 = vrot.lane.b32.xlu1 %v7437_v38, %s11912_s26  ;;  %v8959_v13 = vrot.slane %v8958_v60, 4  ;;  %v11749_v55 = vld [vmem:[#allocation2 + $0x1b8] sm:$0xf] }
 0x37d   :  { %7562 = vrot.lane.b32.xlu0 %v7430_v41, %s11912_s26  ;;  %v8980_v6 = vshrl.u32 %v10729_v11, 16  ;;  %v8983_v52 = vshll.u32 %v10729_v11, 16  ;;  %v8989_v27 = vshll.u32 %v10730_v44, 16  ;;  %v9005_v28 = vrot.slane %v9003_v22, 5  ;;  %9796 = vst.msk [vmem:[#allocation11 + $0xe8] sm:$0xf] %vm763_vm7, %v9731_v63 }
 0x37e   :  { %v9000_v61 = vor.u32 %v8999_v31, %v8996_v46  ;;  %v16165_v33 = vpop.permute.xlu1 %6452  ;;  %v8978_v2 = vsel %vm12524_vm5, %v8973_v1, %v8977_v8  ;;  %v8964_v56 = vsel %vm12524_vm5, %v8959_v13, %v8963_v0  ;;  %v9729_v34 = vpack.c.bf16 %v16110_v62, %v16110_v62  ;;  %v5359_v41 = vld [vmem:[#allocation2 + $0x1bc] sm:$0x1]  ;;  %v5363_v40 = vld [vmem:[#allocation2 + $0x1cc] sm:$0x1]  ;;  %v11750_v60 = vld [vmem:[#allocation2 + $0x1d0] sm:$0xf] }
 0x37f   :  { %v8982_v32 = vrot.slane %v8980_v6, 4  ;;  %v8985_v9 = vrot.slane %v8983_v52, 5  ;;  %v16171_v37 = vpop.permute.xlu0 %6450  ;;  %v8991_v29 = vrot.slane %v8989_v27, 5  ;;  %v10787_v39 = vcombine.low %v8964_v56, %v8978_v2  ;;  %v11176_v57 = vpop.f32.mrb[76].mxu1  ;;  %v11751_v0 = vld [vmem:[#allocation2 + $0x1c8] sm:$0xf] }
 0x380   :  { %v9001_v7 = vrot.slane %v9000_v61, 4  ;;  %4378 = vrot.lane.b32.xlu1 %v11650_v12, %s11908_s21  ;;  %v9732_v42 = vpack.c.bf16 %v16112_v5, %v16112_v5  ;;  %v9730_v26 = vpack.c.bf16 %v16122_v23, %v16122_v23  ;;  %v9514_v38 = vpop.f32.mrb[77].mxu1  ;;  %9794 = vst.msk [vmem:[#allocation11 + $0xe0] sm:$0xf] %vm763_vm7, %v9729_v34  ;;  %v9735_v5 = vpack.c.bf16 %v11176_v57, %v11176_v57 }
 0x381   :  { %4376 = vrot.lane.b32.xlu0 %v11651_v21, %s11908_s21  ;;  %v8986_v45 = vor.u32 %v8985_v9, %v8982_v32  ;;  %11206 = vmatprep.mubr.msk.bf16.mxu1 %vm9335_vm9, %v10787_v39  ;;  %v11177_v62 = vpop.f32.mrb[78].mxu1  ;;  %v9733_v10 = vpack.c.bf16 %v9514_v38, %v9514_v38  ;;  %v10430_v49 = vcombine.low %v11748_v20, %v5361_v17 }
 0x382   :  { %v6897_v16 = vpop.permute.xlu1 %6896  ;;  %v9006_v30 = vsel %vm12524_vm5, %v9001_v7, %v9005_v28  ;;  %9797 = vst.msk [vmem:[#allocation11 + $0xec] sm:$0xf] %vm763_vm7, %v9732_v42  ;;  %9795 = vst.msk [vmem:[#allocation11 + $0xe4] sm:$0xf] %vm763_vm7, %v9730_v26  ;;  %v9517_v23 = vpop.f32.mrb[79].mxu1  ;;  %v9736_v24 = vpack.c.bf16 %v11177_v62, %v11177_v62  ;;  %v10429_v4 = vcombine.low %v11749_v55, %v5359_v41 }
 0x383   :  { %v8987_v19 = vrot.slane %v8986_v45, 4  ;;  %v6895_v3 = vpop.permute.xlu0 %6894  ;;  %v9734_v47 = vpack.c.bf16 %v9517_v23, %v9517_v23  ;;  %9800 = vst.msk [vmem:[#allocation11 + $0xf8] sm:$0xf] %vm763_vm7, %v9735_v5  ;;  %9798 = vst.msk [vmem:[#allocation11 + $0xf0] sm:$0xf] %vm763_vm7, %v9733_v10  ;;  %v7715_v8 = vsel %vm309_vm0, %v10430_v49, %v16158_v59  ;;  %v10432_v11 = vcombine.low %v11750_v60, %v5365_v43 }
 0x384   :  { %4382 = vrot.lane.b32.xlu1 %v11652_v18, %s11908_s21  ;;  %9801 = vst.msk [vmem:[#allocation11 + $0xfc] sm:$0xf] %vm763_vm7, %v9736_v24  ;;  %v7857_v44 = vsel %vm3424_vm6, %v7715_v8, %v6897_v16  ;;  %v10431_v12 = vcombine.low %v11751_v0, %v5363_v40  ;;  %v7712_v31 = vsel %vm309_vm0, %v10429_v4, %v16161_v48 }
 0x385   :  { %v8992_v14 = vsel %vm12524_vm5, %v8987_v19, %v8991_v29  ;;  %4380 = vrot.lane.b32.xlu0 %v11653_v58, %s11908_s21  ;;  %9799 = vst.msk [vmem:[#allocation11 + $0xf4] sm:$0xf] %vm763_vm7, %v9734_v47  ;;  %v7855_v59 = vsel %vm3424_vm6, %v7712_v31, %v6895_v3  ;;  %v7721_v6 = vsel %vm309_vm0, %v10432_v11, %v16165_v33 }
 0x386   :  { %v10788_v36 = vcombine.low %v8992_v14, %v9006_v30  ;;  %v6901_v50 = vpop.permute.xlu1 %6900  ;;  %v7718_v2 = vsel %vm309_vm0, %v10431_v12, %v16171_v37 }
 0x387   :  { %v6899_v54 = vpop.permute.xlu0 %6898  ;;  %v7861_v48 = vsel %vm3424_vm6, %v7721_v6, %v6901_v50  ;;  %v5367_v6 = vld [vmem:[#allocation2 + $0x1dc] sm:$0x1] }
 0x388   :  { %11207 = vmatmul.mubr.msk.bf16.gmra.mrb[108].mxu1 %vm9335_vm9, %v10788_v36  ;;  %4386 = vrot.lane.b32.xlu1 %v11654_v51, %s11908_s21  ;;  %v7859_v7 = vsel %vm3424_vm6, %v7718_v2, %v6899_v54 }
 0x389   :  { %4384 = vrot.lane.b32.xlu0 %v11655_v15, %s11908_s21 }
 0x38c   :  { %v7537_v1 = vpop.permute.xlu1 %7536  ;;  %4390 = vrot.lane.b32.xlu1 %v11656_v25, %s11908_s21 }
 0x38d   :  { %4388 = vrot.lane.b32.xlu0 %v11657_v53, %s11908_s21  ;;  %v7986_v46 = vsel %vm7886_vm8, %v7857_v44, %v7537_v1 }
 0x38e   :  { %v10735_v13 = vcombine.low %v7986_v46, %v7986_v46  ;;  %v10736_v21 = vcombine.high %v7986_v46, %v7986_v46  ;;  %v7535_v22 = vpop.permute.xlu0 %7534  ;;  %v5369_v46 = vld [vmem:[#allocation2 + $0x1e4] sm:$0x1] }
 0x38f   :  { %v7984_v27 = vsel %vm7886_vm8, %v7855_v59, %v7535_v22 }
 0x390   :  { %v9022_v52 = vshrl.u32 %v10735_v13, 16  ;;  %v9025_v61 = vshll.u32 %v10735_v13, 16  ;;  %v9031_v56 = vshll.u32 %v10736_v21, 16  ;;  %v10733_v32 = vcombine.low %v7984_v27, %v7984_v27 }
 0x391   :  { %v10734_v9 = vcombine.high %v7984_v27, %v7984_v27  ;;  %v11752_v27 = vld [vmem:[#allocation2 + $0x1e0] sm:$0xf] }
 0x392   :  { %v9024_v28 = vrot.slane %v9022_v52, 4  ;;  %v9027_v45 = vrot.slane %v9025_v61, 5  ;;  %v7541_v18 = vpop.permute.xlu1 %7540  ;;  %v9008_v58 = vshrl.u32 %v10733_v32, 16  ;;  %v9011_v63 = vshll.u32 %v10733_v32, 16 }
 0x393   :  { %v9017_v33 = vshll.u32 %v10734_v9, 16  ;;  %v7990_v29 = vsel %vm7886_vm8, %v7861_v48, %v7541_v18  ;;  %v7539_v34 = vpop.permute.xlu0 %7538  ;;  %v9033_v30 = vrot.slane %v9031_v56, 5  ;;  %v10434_v2 = vcombine.low %v11752_v27, %v5369_v46  ;;  %v5373_v18 = vld [vmem:[#allocation2 + $0x1f4] sm:$0x1] }
 0x394   :  { %v9028_v39 = vor.u32 %v9027_v45, %v9024_v28  ;;  %v10739_v16 = vcombine.low %v7990_v29, %v7990_v29  ;;  %v10740_v57 = vcombine.high %v7990_v29, %v7990_v29  ;;  %v7988_v37 = vsel %vm7886_vm8, %v7859_v7, %v7539_v34  ;;  %v11753_v28 = vld [vmem:[#allocation2 + $0x1d8] sm:$0xf] }
 0x395   :  { %v9010_v19 = vrot.slane %v9008_v58, 4  ;;  %v9013_v3 = vrot.slane %v9011_v63, 5  ;;  %v10737_v42 = vcombine.low %v7988_v37, %v7988_v37  ;;  %v9019_v38 = vrot.slane %v9017_v33, 5  ;;  %v5371_v58 = vld [vmem:[#allocation2 + $0x1ec] sm:$0x1] }
 0x396   :  { %v9029_v26 = vrot.slane %v9028_v39, 4  ;;  %v9050_v17 = vshrl.u32 %v10739_v16, 16  ;;  %v9053_v62 = vshll.u32 %v10739_v16, 16  ;;  %v10738_v51 = vcombine.high %v7988_v37, %v7988_v37  ;;  %v11754_v33 = vld [vmem:[#allocation2 + $0x1f0] sm:$0xf] }
 0x397   :  { %v9014_v14 = vor.u32 %v9013_v3, %v9010_v19  ;;  %v9036_v15 = vshrl.u32 %v10737_v42, 16  ;;  %v9039_v5 = vshll.u32 %v10737_v42, 16  ;;  %v6457_v23 = vpop.permute.xlu1 %6456  ;;  %v9059_v24 = vshll.u32 %v10740_v57, 16  ;;  %v11755_v57 = vld [vmem:[#allocation2 + $0x1e8] sm:$0xf] }
 0x398   :  { %v9034_v36 = vsel %vm12524_vm5, %v9029_v26, %v9033_v30  ;;  %v9052_v50 = vrot.slane %v9050_v17, 4  ;;  %v9055_v10 = vrot.slane %v9053_v62, 5  ;;  %v6455_v47 = vpop.permute.xlu0 %6454  ;;  %v9045_v43 = vshll.u32 %v10738_v51, 16 }
 0x399   :  { %v9015_v20 = vrot.slane %v9014_v14, 4  ;;  %v9038_v49 = vrot.slane %v9036_v15, 4  ;;  %v9041_v41 = vrot.slane %v9039_v5, 5  ;;  %v9061_v4 = vrot.slane %v9059_v24, 5 }
 0x39a   :  { %v9056_v25 = vor.u32 %v9055_v10, %v9052_v50  ;;  %v9047_v44 = vrot.slane %v9045_v43, 5  ;;  %v10433_v45 = vcombine.low %v11753_v28, %v5367_v6  ;;  %v7727_v63 = vsel %vm309_vm0, %v10434_v2, %v6457_v23 }
 0x39b   :  { %v9020_v53 = vsel %vm12524_vm5, %v9015_v20, %v9019_v38  ;;  %v9042_v54 = vor.u32 %v9041_v41, %v9038_v49  ;;  %v6461_v40 = vpop.permute.xlu1 %6460  ;;  %v10436_v29 = vcombine.low %v11754_v33, %v5373_v18  ;;  %v10435_v37 = vcombine.low %v11755_v57, %v5371_v58 }
 0x39c   :  { %v9057_v55 = vrot.slane %v9056_v25, 4  ;;  %v6459_v8 = vpop.permute.xlu0 %6458  ;;  %v10789_v60 = vcombine.low %v9020_v53, %v9034_v36  ;;  %v7724_v16 = vsel %vm309_vm0, %v10433_v45, %v6455_v47 }
 0x39d   :  { %v9043_v11 = vrot.slane %v9042_v54, 4  ;;  %v7733_v17 = vsel %vm309_vm0, %v10436_v29, %v6461_v40  ;;  %v7730_v15 = vsel %vm309_vm0, %v10435_v37, %v6459_v8 }
 0x39e   :  { %v9062_v1 = vsel %vm12524_vm5, %v9057_v55, %v9061_v4  ;;  %11210 = vmatprep.mubr.msk.bf16.mxu1 %vm9335_vm9, %v10789_v60  ;;  %v11180_v12 = vpop.f32.mrb[80].mxu1 }
 0x39f   :  { %v9048_v0 = vsel %vm12524_vm5, %v9043_v11, %v9047_v44  ;;  %v6905_v31 = vpop.permute.xlu1 %6904  ;;  %v9739_v59 = vpack.c.bf16 %v11180_v12, %v11180_v12  ;;  %v9530_v22 = vpop.f32.mrb[81].mxu1 }
 0x3a0   :  { %v6903_v13 = vpop.permute.xlu0 %6902  ;;  %v10790_v21 = vcombine.low %v9048_v0, %v9062_v1  ;;  %v9737_v52 = vpack.c.bf16 %v9530_v22, %v9530_v22  ;;  %v11181_v61 = vpop.f32.mrb[82].mxu1  ;;  %v7865_v34 = vsel %vm3424_vm6, %v7727_v63, %v6905_v31  ;;  %v3995_v1 = vld [vmem:[#allocation2 + $0x1d0] sm:$0xf] }
 0x3a1   :  { %9804 = vst.msk [vmem:[#allocation11 + $0x168] sm:$0xf] %vm763_vm7, %v9739_v59  ;;  %v9740_v56 = vpack.c.bf16 %v11181_v61, %v11181_v61  ;;  %v9533_v32 = vpop.f32.mrb[83].mxu1  ;;  %v7863_v19 = vsel %vm3424_vm6, %v7724_v16, %v6903_v13 }
 0x3a2   :  { %11211 = vmatmul.mubr.msk.bf16.gmra.mrb[112].mxu1 %vm9335_vm9, %v10790_v21  ;;  %9802 = vst.msk [vmem:[#allocation11 + $0x160] sm:$0xf] %vm763_vm7, %v9737_v52  ;;  %v9738_v7 = vpack.c.bf16 %v9533_v32, %v9533_v32  ;;  %v3994_v21 = vld [vmem:[#allocation2 + $0x1c8] sm:$0xf] }
 0x3a3   :  { %v6909_v9 = vpop.permute.xlu1 %6908  ;;  %9805 = vst.msk [vmem:[#allocation11 + $0x16c] sm:$0xf] %vm763_vm7, %v9740_v56 }
 0x3a4   :  { %v6907_v48 = vpop.permute.xlu0 %6906  ;;  %9803 = vst.msk [vmem:[#allocation11 + $0x164] sm:$0xf] %vm763_vm7, %v9738_v7  ;;  %v7869_v5 = vsel %vm3424_vm6, %v7733_v17, %v6909_v9 }
 0x3a5   :  { %v7867_v36 = vsel %vm3424_vm6, %v7730_v15, %v6907_v48  ;;  %v5377_v15 = vld [vmem:[#allocation2 + $0x20c] sm:$0x1] }
 0x3a7   :  { %v7545_v39 = vpop.permute.xlu1 %7544 }
 0x3a8   :  { %v7994_v30 = vsel %vm7886_vm8, %v7865_v34, %v7545_v39 }
 0x3a9   :  { %v10743_v3 = vcombine.low %v7994_v30, %v7994_v30  ;;  %v10744_v26 = vcombine.high %v7994_v30, %v7994_v30 }
 0x3aa   :  { %v7543_v42 = vpop.permute.xlu0 %7542 }
 0x3ab   :  { %v7992_v38 = vsel %vm7886_vm8, %v7863_v19, %v7543_v42  ;;  %v9078_v62 = vshrl.u32 %v10743_v3, 16  ;;  %v9081_v14 = vshll.u32 %v10743_v3, 16  ;;  %v9087_v20 = vshll.u32 %v10744_v26, 16 }
 0x3ac   :  { %v10741_v51 = vcombine.low %v7992_v38, %v7992_v38  ;;  %v10742_v23 = vcombine.high %v7992_v38, %v7992_v38 }
 0x3ad   :  { %v9080_v50 = vrot.slane %v9078_v62, 4  ;;  %v9083_v10 = vrot.slane %v9081_v14, 5  ;;  %v7549_v47 = vpop.permute.xlu1 %7548  ;;  %v9089_v12 = vrot.slane %v9087_v20, 5  ;;  %v11756_v20 = vld [vmem:[#allocation2 + $0x208] sm:$0xf] }
 0x3ae   :  { %v9064_v24 = vshrl.u32 %v10741_v51, 16  ;;  %v9067_v49 = vshll.u32 %v10741_v51, 16  ;;  %v9073_v41 = vshll.u32 %v10742_v23, 16  ;;  %v7998_v43 = vsel %vm7886_vm8, %v7869_v5, %v7549_v47 }
 0x3af   :  { %v7547_v25 = vpop.permute.xlu0 %7546  ;;  %v9084_v53 = vor.u32 %v9083_v10, %v9080_v50  ;;  %v10747_v55 = vcombine.low %v7998_v43, %v7998_v43  ;;  %v10748_v4 = vcombine.high %v7998_v43, %v7998_v43  ;;  %v5375_v50 = vld [vmem:[#allocation2 + $0x204] sm:$0x1]  ;;  %v11757_v43 = vld [vmem:[#allocation2 + $0x200] sm:$0xf] }
 0x3b0   :  { %v9066_v54 = vrot.slane %v9064_v24, 4  ;;  %v9069_v40 = vrot.slane %v9067_v49, 5  ;;  %v7996_v8 = vsel %vm7886_vm8, %v7867_v36, %v7547_v25  ;;  %v9075_v22 = vrot.slane %v9073_v41, 5 }
 0x3b1   :  { %v9085_v60 = vrot.slane %v9084_v53, 4  ;;  %v9106_v11 = vshrl.u32 %v10747_v55, 16  ;;  %v9109_v44 = vshll.u32 %v10747_v55, 16  ;;  %v4367_v0 = vpop.permute.xlu1 %4366  ;;  %v10745_v31 = vcombine.low %v7996_v8, %v7996_v8  ;;  %v5381_v53 = vld [vmem:[#allocation2 + $0x21c] sm:$0x1] }
 0x3b2   :  { %v9070_v46 = vor.u32 %v9069_v40, %v9066_v54  ;;  %v10746_v13 = vcombine.high %v7996_v8, %v7996_v8  ;;  %v9115_v61 = vshll.u32 %v10748_v4, 16  ;;  %v4547_v32 = vsel %vm309_vm0, %v3995_v1, %v4367_v0  ;;  %v5379_v54 = vld [vmem:[#allocation2 + $0x214] sm:$0x1]  ;;  %v11758_v40 = vld [vmem:[#allocation2 + $0x218] sm:$0xf] }
 0x3b3   :  { %v4365_v59 = vpop.permute.xlu0 %4364  ;;  %v9108_v6 = vrot.slane %v9106_v11, 4  ;;  %v9111_v52 = vrot.slane %v9109_v44, 5  ;;  %v9092_v2 = vshrl.u32 %v10745_v31, 16  ;;  %v9095_v56 = vshll.u32 %v10745_v31, 16 }
 0x3b4   :  { %v9071_v27 = vrot.slane %v9070_v46, 4  ;;  %v9090_v9 = vsel %vm12524_vm5, %v9085_v60, %v9089_v12  ;;  %v4544_v7 = vsel %vm309_vm0, %v3994_v21, %v4365_v59  ;;  %v9101_v63 = vshll.u32 %v10746_v13, 16  ;;  %v11759_v60 = vld [vmem:[#allocation2 + $0x210] sm:$0xf] }
 0x3b5   :  { %v9112_v48 = vor.u32 %v9111_v52, %v9108_v6  ;;  %v6465_v28 = vpop.permute.xlu1 %6464  ;;  %v9094_v18 = vrot.slane %v9092_v2, 4  ;;  %v9097_v58 = vrot.slane %v9095_v56, 5  ;;  %v10342_v34 = vcombine.low %v4544_v7, %v4547_v32 }
 0x3b6   :  { %v9076_v45 = vsel %vm12524_vm5, %v9071_v27, %v9075_v22  ;;  %v9117_v39 = vrot.slane %v9115_v61, 5  ;;  %v9103_v3 = vrot.slane %v9101_v63, 5  ;;  %v10438_v49 = vcombine.low %v11756_v20, %v5377_v15 }
 0x3b7   :  { %v6463_v33 = vpop.permute.xlu0 %6462  ;;  %v9113_v29 = vrot.slane %v9112_v48, 4  ;;  %v9098_v16 = vor.u32 %v9097_v58, %v9094_v18  ;;  %v10791_v57 = vcombine.low %v9076_v45, %v9090_v9  ;;  %11145 = vmatmul.mubr.msk.bf16.gmra.mrb[112].mxu0 %vm3424_vm6, %v10342_v34  ;;  %v10437_v25 = vcombine.low %v11757_v43, %v5375_v50 }
 0x3b8   :  { %v7739_v4 = vsel %vm309_vm0, %v10438_v49, %v6465_v28  ;;  %v10440_v8 = vcombine.low %v11758_v40, %v5381_v53  ;;  %v10439_v11 = vcombine.low %v11759_v60, %v5379_v54 }
 0x3b9   :  { %v6469_v37 = vpop.permute.xlu1 %6468  ;;  %v9118_v30 = vsel %vm12524_vm5, %v9113_v29, %v9117_v39  ;;  %v9099_v19 = vrot.slane %v9098_v16, 4  ;;  %11214 = vmatprep.mubr.msk.bf16.mxu1 %vm9335_vm9, %v10791_v57  ;;  %v7736_v44 = vsel %vm309_vm0, %v10437_v25, %v6463_v33 }
 0x3ba   :  { %v7745_v22 = vsel %vm309_vm0, %v10440_v8, %v6469_v37  ;;  %v3997_v37 = vld [vmem:[#allocation2 + $0x1e0] sm:$0xf] }
 0x3bb   :  { %v6467_v42 = vpop.permute.xlu0 %6466  ;;  %v9104_v26 = vsel %vm12524_vm5, %v9099_v19, %v9103_v3 }
 0x3bc   :  { %v10792_v17 = vcombine.low %v9104_v26, %v9118_v30  ;;  %v7742_v6 = vsel %vm309_vm0, %v10439_v11, %v6467_v42 }
 0x3bd   :  { %v11184_v38 = vpop.f32.mrb[84].mxu1  ;;  %v6913_v62 = vpop.permute.xlu1 %6912 }
 0x3be   :  { %v9743_v14 = vpack.c.bf16 %v11184_v38, %v11184_v38  ;;  %v9546_v51 = vpop.f32.mrb[85].mxu1  ;;  %11215 = vmatmul.mubr.msk.bf16.gmra.mrb[116].mxu1 %vm9335_vm9, %v10792_v17  ;;  %v7873_v1 = vsel %vm3424_vm6, %v7739_v4, %v6913_v62 }
 0x3bf   :  { %v6911_v5 = vpop.permute.xlu0 %6910  ;;  %v9741_v23 = vpack.c.bf16 %v9546_v51, %v9546_v51  ;;  %v11185_v36 = vpop.f32.mrb[86].mxu1  ;;  %v3996_v51 = vld [vmem:[#allocation2 + $0x1d8] sm:$0xf] }
 0x3c0   :  { %9808 = vst.msk [vmem:[#allocation11 + $0x178] sm:$0xf] %vm763_vm7, %v9743_v14  ;;  %v9744_v10 = vpack.c.bf16 %v11185_v36, %v11185_v36  ;;  %v9549_v24 = vpop.f32.mrb[87].mxu1  ;;  %v7871_v12 = vsel %vm3424_vm6, %v7736_v44, %v6911_v5 }
 0x3c1   :  { %9806 = vst.msk [vmem:[#allocation11 + $0x170] sm:$0xf] %vm763_vm7, %v9741_v23  ;;  %v9742_v47 = vpack.c.bf16 %v9549_v24, %v9549_v24  ;;  %v6917_v41 = vpop.permute.xlu1 %6916 }
 0x3c2   :  { %9809 = vst.msk [vmem:[#allocation11 + $0x17c] sm:$0xf] %vm763_vm7, %v9744_v10  ;;  %v7877_v27 = vsel %vm3424_vm6, %v7745_v22, %v6917_v41  ;;  %v3999_v10 = vld [vmem:[#allocation2 + $0x1f0] sm:$0xf]  ;;  %v3998_v41 = vld [vmem:[#allocation2 + $0x1e8] sm:$0xf] }
 0x3c3   :  { %v6915_v55 = vpop.permute.xlu0 %6914  ;;  %9807 = vst.msk [vmem:[#allocation11 + $0x174] sm:$0xf] %vm763_vm7, %v9742_v47 }
 0x3c4   :  { %v7875_v58 = vsel %vm3424_vm6, %v7742_v6, %v6915_v55 }
 0x3c6   :  { %v7553_v0 = vpop.permute.xlu1 %7552 }
 0x3c7   :  { %v8002_v46 = vsel %vm7886_vm8, %v7873_v1, %v7553_v0  ;;  %v7551_v31 = vpop.permute.xlu0 %7550 }
 0x3c8   :  { %v10751_v13 = vcombine.low %v8002_v46, %v8002_v46  ;;  %v10752_v21 = vcombine.high %v8002_v46, %v8002_v46  ;;  %v8000_v59 = vsel %vm7886_vm8, %v7871_v12, %v7551_v31 }
 0x3c9   :  { %v10749_v52 = vcombine.low %v8000_v59, %v8000_v59  ;;  %v10750_v61 = vcombine.high %v8000_v59, %v8000_v59 }
 0x3ca   :  { %v9134_v2 = vshrl.u32 %v10751_v13, 16  ;;  %v9137_v56 = vshll.u32 %v10751_v13, 16  ;;  %v9143_v32 = vshll.u32 %v10752_v21, 16  ;;  %v7557_v9 = vpop.permute.xlu1 %7556 }
 0x3cb   :  { %v9120_v48 = vshrl.u32 %v10749_v52, 16  ;;  %v9123_v7 = vshll.u32 %v10749_v52, 16  ;;  %v9129_v28 = vshll.u32 %v10750_v61, 16  ;;  %v8006_v45 = vsel %vm7886_vm8, %v7877_v27, %v7557_v9  ;;  %v7555_v18 = vpop.permute.xlu0 %7554 }
 0x3cc   :  { %v9136_v63 = vrot.slane %v9134_v2, 4  ;;  %v9139_v33 = vrot.slane %v9137_v56, 5  ;;  %v10755_v29 = vcombine.low %v8006_v45, %v8006_v45  ;;  %v9145_v34 = vrot.slane %v9143_v32, 5 }
 0x3cd   :  { %v9122_v39 = vrot.slane %v9120_v48, 4  ;;  %v9125_v16 = vrot.slane %v9123_v7, 5  ;;  %v10756_v57 = vcombine.high %v8006_v45, %v8006_v45  ;;  %v8004_v42 = vsel %vm7886_vm8, %v7875_v58, %v7555_v18 }
 0x3ce   :  { %v9140_v30 = vor.u32 %v9139_v33, %v9136_v63  ;;  %v9162_v19 = vshrl.u32 %v10755_v29, 16  ;;  %v9165_v3 = vshll.u32 %v10755_v29, 16  ;;  %v4371_v26 = vpop.permute.xlu1 %4370  ;;  %v9131_v17 = vrot.slane %v9129_v28, 5  ;;  %v5385_v63 = vld [vmem:[#allocation2 + $0x22c] sm:$0x1] }
 0x3cf   :  { %v9126_v38 = vor.u32 %v9125_v16, %v9122_v39  ;;  %v10753_v62 = vcombine.low %v8004_v42, %v8004_v42  ;;  %v10754_v14 = vcombine.high %v8004_v42, %v8004_v42  ;;  %v4369_v15 = vpop.permute.xlu0 %4368  ;;  %v4553_v50 = vsel %vm309_vm0, %v3997_v37, %v4371_v26  ;;  %v5383_v33 = vld [vmem:[#allocation2 + $0x224] sm:$0x1]  ;;  %v5389_v39 = vld [vmem:[#allocation2 + $0x23c] sm:$0x1]  ;;  %v5387_v16 = vld [vmem:[#allocation2 + $0x234] sm:$0x1] }
 0x3d0   :  { %v9141_v5 = vrot.slane %v9140_v30, 4  ;;  %v9164_v23 = vrot.slane %v9162_v19, 4  ;;  %v9167_v36 = vrot.slane %v9165_v3, 5  ;;  %v9171_v47 = vshll.u32 %v10756_v57, 16  ;;  %v11760_v57 = vld [vmem:[#allocation2 + $0x228] sm:$0xf] }
 0x3d1   :  { %v9127_v24 = vrot.slane %v9126_v38, 4  ;;  %v9148_v20 = vshrl.u32 %v10753_v62, 16  ;;  %v9151_v49 = vshll.u32 %v10753_v62, 16  ;;  %v9157_v53 = vshll.u32 %v10754_v14, 16  ;;  %v11761_v30 = vld [vmem:[#allocation2 + $0x220] sm:$0xf] }
 0x3d2   :  { %v9146_v43 = vsel %vm12524_vm5, %v9141_v5, %v9145_v34  ;;  %v9168_v25 = vor.u32 %v9167_v36, %v9164_v23  ;;  %v4550_v54 = vsel %vm309_vm0, %v3996_v51, %v4369_v15  ;;  %v4375_v55 = vpop.permute.xlu1 %4374  ;;  %v9173_v12 = vrot.slane %v9171_v47, 5  ;;  %v11762_v26 = vld [vmem:[#allocation2 + $0x238] sm:$0xf] }
 0x3d3   :  { %v9132_v4 = vsel %vm12524_vm5, %v9127_v24, %v9131_v17  ;;  %v9150_v40 = vrot.slane %v9148_v20, 4  ;;  %v9153_v8 = vrot.slane %v9151_v49, 5  ;;  %v10343_v60 = vcombine.low %v4550_v54, %v4553_v50  ;;  %v4373_v11 = vpop.permute.xlu0 %4372  ;;  %v11763_v17 = vld [vmem:[#allocation2 + $0x230] sm:$0xf] }
 0x3d4   :  { %v9169_v44 = vrot.slane %v9168_v25, 4  ;;  %v4559_v1 = vsel %vm309_vm0, %v3999_v10, %v4375_v55  ;;  %v4556_v0 = vsel %vm309_vm0, %v3998_v41, %v4373_v11  ;;  %v10793_v13 = vcombine.low %v9132_v4, %v9146_v43 }
 0x3d5   :  { %v9154_v46 = vor.u32 %v9153_v8, %v9150_v40  ;;  %v10344_v31 = vcombine.low %v4556_v0, %v4559_v1  ;;  %11148 = vmatprep.mubr.msk.bf16.mxu0 %vm3424_vm6, %v10343_v60  ;;  %v9159_v22 = vrot.slane %v9157_v53, 5  ;;  %v10442_v37 = vcombine.low %v11760_v57, %v5385_v63  ;;  %v4002_v57 = vld [vmem:[#allocation2 + $0x210] sm:$0xf] }
 0x3d6   :  { %v9174_v21 = vsel %vm12524_vm5, %v9169_v44, %v9173_v12  ;;  %11218 = vmatprep.mubr.msk.bf16.mxu1 %vm9335_vm9, %v10793_v13  ;;  %v6473_v6 = vpop.permute.xlu1 %6472  ;;  %v10441_v19 = vcombine.low %v11761_v30, %v5383_v33  ;;  %v10444_v38 = vcombine.low %v11762_v26, %v5389_v39  ;;  %v10443_v62 = vcombine.low %v11763_v17, %v5387_v16  ;;  %v4003_v33 = vld [vmem:[#allocation2 + $0x218] sm:$0xf] }
 0x3d7   :  { %v9155_v59 = vrot.slane %v9154_v46, 4  ;;  %11149 = vmatmul.mubr.msk.bf16.gmra.mrb[116].mxu0 %vm3424_vm6, %v10344_v31  ;;  %v6471_v52 = vpop.permute.xlu0 %6470  ;;  %v7751_v14 = vsel %vm309_vm0, %v10442_v37, %v6473_v6 }
 0x3d8   :  { %v7748_v51 = vsel %vm309_vm0, %v10441_v19, %v6471_v52 }
 0x3d9   :  { %v9160_v61 = vsel %vm12524_vm5, %v9155_v59, %v9159_v22  ;;  %v11188_v27 = vpop.f32.mrb[88].mxu1 }
 0x3da   :  { %v10794_v2 = vcombine.low %v9160_v61, %v9174_v21  ;;  %v9747_v56 = vpack.c.bf16 %v11188_v27, %v11188_v27  ;;  %v9562_v32 = vpop.f32.mrb[89].mxu1  ;;  %v4001_v27 = vld [vmem:[#allocation2 + $0x208] sm:$0xf] }
 0x3db   :  { %v9745_v9 = vpack.c.bf16 %v9562_v32, %v9562_v32  ;;  %v11189_v48 = vpop.f32.mrb[90].mxu1 }
 0x3dc   :  { %11219 = vmatmul.mubr.msk.bf16.gmra.mrb[120].mxu1 %vm9335_vm9, %v10794_v2  ;;  %9812 = vst.msk [vmem:[#allocation11 + $0x1e8] sm:$0xf] %vm763_vm7, %v9747_v56  ;;  %v9748_v7 = vpack.c.bf16 %v11189_v48, %v11189_v48  ;;  %v9565_v28 = vpop.f32.mrb[91].mxu1 }
 0x3dd   :  { %9810 = vst.msk [vmem:[#allocation11 + $0x1e0] sm:$0xf] %vm763_vm7, %v9745_v9  ;;  %v9746_v45 = vpack.c.bf16 %v9565_v28, %v9565_v28  ;;  %v4000_v28 = vld [vmem:[#allocation2 + $0x200] sm:$0xf] }
 0x3de   :  { %v6477_v18 = vpop.permute.xlu1 %6476  ;;  %9813 = vst.msk [vmem:[#allocation11 + $0x1ec] sm:$0xf] %vm763_vm7, %v9748_v7 }
 0x3df   :  { %v6475_v58 = vpop.permute.xlu0 %6474  ;;  %9811 = vst.msk [vmem:[#allocation11 + $0x1e4] sm:$0xf] %vm763_vm7, %v9746_v45  ;;  %v7757_v50 = vsel %vm309_vm0, %v10444_v38, %v6477_v18 }
 0x3e0   :  { %v7754_v10 = vsel %vm309_vm0, %v10443_v62, %v6475_v58 }
 0x3e2   :  { %v6921_v29 = vpop.permute.xlu1 %6920 }
 0x3e3   :  { %v6919_v34 = vpop.permute.xlu0 %6918  ;;  %v7881_v15 = vsel %vm3424_vm6, %v7751_v14, %v6921_v29 }
 0x3e4   :  { %v7879_v5 = vsel %vm3424_vm6, %v7748_v51, %v6919_v34 }
 0x3e6   :  { %v6925_v3 = vpop.permute.xlu1 %6924 }
 0x3e7   :  { %v6923_v42 = vpop.permute.xlu0 %6922  ;;  %v7885_v25 = vsel %vm3424_vm6, %v7757_v50, %v6925_v3  ;;  %v4005_v50 = vld [vmem:[#allocation2 + $0x228] sm:$0xf] }
 0x3e8   :  { %v7883_v53 = vsel %vm3424_vm6, %v7754_v10, %v6923_v42  ;;  %v4004_v10 = vld [vmem:[#allocation2 + $0x220] sm:$0xf] }
 0x3ea   :  { %v7561_v23 = vpop.permute.xlu1 %7560 }
 0x3eb   :  { %v7559_v36 = vpop.permute.xlu0 %7558  ;;  %v8010_v24 = vsel %vm7886_vm8, %v7881_v15, %v7561_v23 }
 0x3ec   :  { %v8008_v47 = vsel %vm7886_vm8, %v7879_v5, %v7559_v36  ;;  %v10759_v20 = vcombine.low %v8010_v24, %v8010_v24  ;;  %v10760_v49 = vcombine.high %v8010_v24, %v8010_v24 }
 0x3ed   :  { %v10757_v41 = vcombine.low %v8008_v47, %v8008_v47  ;;  %v10758_v43 = vcombine.high %v8008_v47, %v8008_v47 }
 0x3ee   :  { %v9190_v54 = vshrl.u32 %v10759_v20, 16  ;;  %v9193_v55 = vshll.u32 %v10759_v20, 16  ;;  %v9199_v4 = vshll.u32 %v10760_v49, 16  ;;  %v7565_v8 = vpop.permute.xlu1 %7564 }
 0x3ef   :  { %v9176_v40 = vshrl.u32 %v10757_v41, 16  ;;  %v7563_v60 = vpop.permute.xlu0 %7562  ;;  %v9179_v11 = vshll.u32 %v10757_v41, 16  ;;  %v8014_v44 = vsel %vm7886_vm8, %v7885_v25, %v7565_v8  ;;  %v9185_v31 = vshll.u32 %v10758_v43, 16 }
 0x3f0   :  { %v8012_v1 = vsel %vm7886_vm8, %v7883_v53, %v7563_v60  ;;  %v9192_v0 = vrot.slane %v9190_v54, 4  ;;  %v9195_v12 = vrot.slane %v9193_v55, 5  ;;  %v10763_v21 = vcombine.low %v8014_v44, %v8014_v44 }
 0x3f1   :  { %v9178_v46 = vrot.slane %v9176_v40, 4  ;;  %v9181_v13 = vrot.slane %v9179_v11, 5  ;;  %v10764_v59 = vcombine.high %v8014_v44, %v8014_v44  ;;  %v9201_v6 = vrot.slane %v9199_v4, 5 }
 0x3f2   :  { %v9196_v22 = vor.u32 %v9195_v12, %v9192_v0  ;;  %v10761_v52 = vcombine.low %v8012_v1, %v8012_v1  ;;  %v10762_v61 = vcombine.high %v8012_v1, %v8012_v1  ;;  %v4379_v2 = vpop.permute.xlu1 %4378  ;;  %v9218_v9 = vshrl.u32 %v10763_v21, 16  ;;  %v4007_v12 = vld [vmem:[#allocation2 + $0x238] sm:$0xf] }
 0x3f3   :  { %v4377_v56 = vpop.permute.xlu0 %4376  ;;  %v9182_v32 = vor.u32 %v9181_v13, %v9178_v46  ;;  %v9221_v48 = vshll.u32 %v10763_v21, 16  ;;  %v9227_v7 = vshll.u32 %v10764_v59, 16  ;;  %v9187_v18 = vrot.slane %v9185_v31, 5  ;;  %v4006_v46 = vld [vmem:[#allocation2 + $0x230] sm:$0xf] }
 0x3f4   :  { %v9197_v45 = vrot.slane %v9196_v22, 4  ;;  %v9204_v58 = vshrl.u32 %v10761_v52, 16  ;;  %v9207_v63 = vshll.u32 %v10761_v52, 16  ;;  %v9220_v34 = vrot.slane %v9218_v9, 4 }
 0x3f5   :  { %v9183_v29 = vrot.slane %v9182_v32, 4  ;;  %v9223_v39 = vrot.slane %v9221_v48, 5  ;;  %v9213_v16 = vshll.u32 %v10762_v61, 16  ;;  %v9229_v30 = vrot.slane %v9227_v7, 5 }
 0x3f6   :  { %v9202_v37 = vsel %vm12524_vm5, %v9197_v45, %v9201_v6  ;;  %v9206_v19 = vrot.slane %v9204_v58, 4  ;;  %v9209_v3 = vrot.slane %v9207_v63, 5  ;;  %v4383_v42 = vpop.permute.xlu1 %4382  ;;  %v4565_v62 = vsel %vm309_vm0, %v4001_v27, %v4379_v2 }
 0x3f7   :  { %v4381_v26 = vpop.permute.xlu0 %4380  ;;  %v9188_v38 = vsel %vm12524_vm5, %v9183_v29, %v9187_v18  ;;  %v9224_v17 = vor.u32 %v9223_v39, %v9220_v34  ;;  %v4562_v14 = vsel %vm309_vm0, %v4000_v28, %v4377_v56  ;;  %v4571_v23 = vsel %vm309_vm0, %v4003_v33, %v4383_v42 }
 0x3f8   :  { %v11192_v51 = vpop.f32.mrb[92].mxu1  ;;  %v9210_v15 = vor.u32 %v9209_v3, %v9206_v19  ;;  %v10345_v5 = vcombine.low %v4562_v14, %v4565_v62  ;;  %v4568_v36 = vsel %vm309_vm0, %v4002_v57, %v4381_v26  ;;  %v10795_v49 = vcombine.low %v9188_v38, %v9202_v37 }
 0x3f9   :  { %v9578_v24 = vpop.f32.mrb[93].mxu1  ;;  %v9225_v47 = vrot.slane %v9224_v17, 4  ;;  %v10346_v20 = vcombine.low %v4568_v36, %v4571_v23  ;;  %v9751_v41 = vpack.c.bf16 %v11192_v51, %v11192_v51  ;;  %v9215_v53 = vrot.slane %v9213_v16, 5 }
 0x3fa   :  { %v11193_v43 = vpop.f32.mrb[94].mxu1  ;;  %v9211_v25 = vrot.slane %v9210_v15, 4  ;;  %11152 = vmatprep.mubr.msk.bf16.mxu0 %vm3424_vm6, %v10345_v5  ;;  %v4387_v54 = vpop.permute.xlu1 %4386  ;;  %v9749_v4 = vpack.c.bf16 %v9578_v24, %v9578_v24  ;;  %11222 = vmatprep.mubr.msk.bf16.mxu1 %vm9335_vm9, %v10795_v49 }
 0x3fb   :  { %v4385_v55 = vpop.permute.xlu0 %4384  ;;  %v9752_v40 = vpack.c.bf16 %v11193_v43, %v11193_v43  ;;  %v9230_v8 = vsel %vm12524_vm5, %v9225_v47, %v9229_v30  ;;  %v4577_v60 = vsel %vm309_vm0, %v4005_v50, %v4387_v54  ;;  %11153 = vmatmul.mubr.msk.bf16.gmra.mrb[120].mxu0 %vm3424_vm6, %v10346_v20  ;;  %9816 = vst.msk [vmem:[#allocation11 + $0x1f8] sm:$0xf] %vm763_vm7, %v9751_v41  ;;  %v9581_v44 = vpop.f32.mrb[95].mxu1 }
 0x3fc   :  { %v4574_v11 = vsel %vm309_vm0, %v4004_v10, %v4385_v55  ;;  %v9216_v1 = vsel %vm12524_vm5, %v9211_v25, %v9215_v53  ;;  %9814 = vst.msk [vmem:[#allocation11 + $0x1f0] sm:$0xf] %vm763_vm7, %v9749_v4  ;;  %v9750_v31 = vpack.c.bf16 %v9581_v44, %v9581_v44 }
 0x3fd   :  { %v10347_v0 = vcombine.low %v4574_v11, %v4577_v60  ;;  %9817 = vst.msk [vmem:[#allocation11 + $0x1fc] sm:$0xf] %vm763_vm7, %v9752_v40  ;;  %v10796_v13 = vcombine.low %v9216_v1, %v9230_v8 }
 0x3fe   :  { %v4391_v21 = vpop.permute.xlu1 %4390  ;;  %9815 = vst.msk [vmem:[#allocation11 + $0x1f4] sm:$0xf] %vm763_vm7, %v9750_v31 }
 0x3ff   :  { %v4389_v59 = vpop.permute.xlu0 %4388  ;;  %11156 = vmatprep.mubr.msk.bf16.mxu0 %vm3424_vm6, %v10347_v0  ;;  %11223 = vmatmul.mubr.msk.bf16.gmra.mrb[124].mxu1 %vm9335_vm9, %v10796_v13  ;;  %v4583_v35 = vsel %vm309_vm0, %v4007_v12, %v4391_v21 }
 0x400   :  { %v4580_v22 = vsel %vm309_vm0, %v4006_v46, %v4389_v59 }
 0x401   :  { %v10348_v6 = vcombine.low %v4580_v22, %v4583_v35 }
 0x403   :  { %11157 = vmatmul.mubr.msk.bf16.gmra.mrb[124].mxu0 %vm3424_vm6, %v10348_v6 }
 0x411   :  { %v11196_v52 = vpop.f32.mrb[96].mxu1 }
 0x412   :  { %v9755_v61 = vpack.c.bf16 %v11196_v52, %v11196_v52  ;;  %v9594_v27 = vpop.f32.mrb[97].mxu1 }
 0x413   :  { %v9753_v2 = vpack.c.bf16 %v9594_v27, %v9594_v27  ;;  %v11197_v56 = vpop.f32.mrb[98].mxu1 }
 0x414   :  { %9820 = vst.msk [vmem:[#allocation11 + $0x268] sm:$0xf] %vm763_vm7, %v9755_v61  ;;  %v9756_v32 = vpack.c.bf16 %v11197_v56, %v11197_v56  ;;  %v9597_v9 = vpop.f32.mrb[99].mxu1 }
 0x415   :  { %9818 = vst.msk [vmem:[#allocation11 + $0x260] sm:$0xf] %vm763_vm7, %v9753_v2  ;;  %v9754_v48 = vpack.c.bf16 %v9597_v9, %v9597_v9 }
 0x416   :  { %9821 = vst.msk [vmem:[#allocation11 + $0x26c] sm:$0xf] %vm763_vm7, %v9756_v32 }
 0x417   :  { %9819 = vst.msk [vmem:[#allocation11 + $0x264] sm:$0xf] %vm763_vm7, %v9754_v48 }
 0x42c   :  { %v11200_v7 = vpop.f32.mrb[100].mxu1 }
 0x42d   :  { %v9759_v28 = vpack.c.bf16 %v11200_v7, %v11200_v7  ;;  %v9610_v45 = vpop.f32.mrb[101].mxu1 }
 0x42e   :  { %v9757_v18 = vpack.c.bf16 %v9610_v45, %v9610_v45  ;;  %v11201_v58 = vpop.f32.mrb[102].mxu1 }
 0x42f   :  { %9824 = vst.msk [vmem:[#allocation11 + $0x278] sm:$0xf] %vm763_vm7, %v9759_v28  ;;  %v9760_v63 = vpack.c.bf16 %v11201_v58, %v11201_v58  ;;  %v9613_v33 = vpop.f32.mrb[103].mxu1 }
 0x430   :  { %9822 = vst.msk [vmem:[#allocation11 + $0x270] sm:$0xf] %vm763_vm7, %v9757_v18  ;;  %v9758_v29 = vpack.c.bf16 %v9613_v33, %v9613_v33 }
 0x431   :  { %9825 = vst.msk [vmem:[#allocation11 + $0x27c] sm:$0xf] %vm763_vm7, %v9760_v63 }
 0x432   :  { %9823 = vst.msk [vmem:[#allocation11 + $0x274] sm:$0xf] %vm763_vm7, %v9758_v29 }
 0x444   :  { %v11204_v34 = vpop.f32.mrb[104].mxu1 }
 0x445   :  { %v9763_v39 = vpack.c.bf16 %v11204_v34, %v11204_v34  ;;  %v9626_v16 = vpop.f32.mrb[105].mxu1 }
 0x446   :  { %v9761_v57 = vpack.c.bf16 %v9626_v16, %v9626_v16  ;;  %v11205_v37 = vpop.f32.mrb[106].mxu1 }
 0x447   :  { %9828 = vst.msk [vmem:[#allocation11 + $0x2e8] sm:$0xf] %vm763_vm7, %v9763_v39  ;;  %v9764_v30 = vpack.c.bf16 %v11205_v37, %v11205_v37  ;;  %v9629_v19 = vpop.f32.mrb[107].mxu1 }
 0x448   :  { %9826 = vst.msk [vmem:[#allocation11 + $0x2e0] sm:$0xf] %vm763_vm7, %v9761_v57  ;;  %v9762_v3 = vpack.c.bf16 %v9629_v19, %v9629_v19 }
 0x449   :  { %9829 = vst.msk [vmem:[#allocation11 + $0x2ec] sm:$0xf] %vm763_vm7, %v9764_v30 }
 0x44a   :  { %9827 = vst.msk [vmem:[#allocation11 + $0x2e4] sm:$0xf] %vm763_vm7, %v9762_v3 }
 0x45b   :  { %v11208_v42 = vpop.f32.mrb[108].mxu1 }
 0x45c   :  { %v9767_v26 = vpack.c.bf16 %v11208_v42, %v11208_v42  ;;  %v9642_v38 = vpop.f32.mrb[109].mxu1 }
 0x45d   :  { %v9765_v17 = vpack.c.bf16 %v9642_v38, %v9642_v38  ;;  %v11209_v62 = vpop.f32.mrb[110].mxu1 }
 0x45e   :  { %9832 = vst.msk [vmem:[#allocation11 + $0x2f8] sm:$0xf] %vm763_vm7, %v9767_v26  ;;  %v9768_v14 = vpack.c.bf16 %v11209_v62, %v11209_v62  ;;  %v9645_v51 = vpop.f32.mrb[111].mxu1 }
 0x45f   :  { %9830 = vst.msk [vmem:[#allocation11 + $0x2f0] sm:$0xf] %vm763_vm7, %v9765_v17  ;;  %v9766_v15 = vpack.c.bf16 %v9645_v51, %v9645_v51 }
 0x460   :  { %9833 = vst.msk [vmem:[#allocation11 + $0x2fc] sm:$0xf] %vm763_vm7, %v9768_v14 }
 0x461   :  { %9831 = vst.msk [vmem:[#allocation11 + $0x2f4] sm:$0xf] %vm763_vm7, %v9766_v15 }
 0x475   :  { %v11212_v5 = vpop.f32.mrb[112].mxu1 }
 0x476   :  { %v9771_v23 = vpack.c.bf16 %v11212_v5, %v11212_v5  ;;  %v9658_v36 = vpop.f32.mrb[113].mxu1 }
 0x477   :  { %v9769_v50 = vpack.c.bf16 %v9658_v36, %v9658_v36  ;;  %v11213_v10 = vpop.f32.mrb[114].mxu1 }
 0x478   :  { %9836 = vst.msk [vmem:[#allocation11 + $0x368] sm:$0xf] %vm763_vm7, %v9771_v23  ;;  %v9772_v24 = vpack.c.bf16 %v11213_v10, %v11213_v10  ;;  %v9661_v47 = vpop.f32.mrb[115].mxu1 }
 0x479   :  { %9834 = vst.msk [vmem:[#allocation11 + $0x360] sm:$0xf] %vm763_vm7, %v9769_v50  ;;  %v9770_v20 = vpack.c.bf16 %v9661_v47, %v9661_v47 }
 0x47a   :  { %9837 = vst.msk [vmem:[#allocation11 + $0x36c] sm:$0xf] %vm763_vm7, %v9772_v24 }
 0x47b   :  { %9835 = vst.msk [vmem:[#allocation11 + $0x364] sm:$0xf] %vm763_vm7, %v9770_v20 }
 0x48a   :  { %v11146_v49 = vpop.f32.mrb[112].mxu0 }
 0x48b   :  { %v5183_v41 = vpack.c.bf16 %v11146_v49, %v11146_v49  ;;  %v5070_v43 = vpop.f32.mrb[113].mxu0 }
 0x48c   :  { %v5181_v25 = vpack.c.bf16 %v5070_v43, %v5070_v43  ;;  %v11147_v53 = vpop.f32.mrb[114].mxu0 }
 0x48d   :  { %5248 = vst.msk [vmem:[#allocation11 + $0x348] sm:$0xf] %vm763_vm7, %v5183_v41  ;;  %v5184_v54 = vpack.c.bf16 %v11147_v53, %v11147_v53  ;;  %v5073_v55 = vpop.f32.mrb[115].mxu0 }
 0x48e   :  { %5246 = vst.msk [vmem:[#allocation11 + $0x340] sm:$0xf] %vm763_vm7, %v5181_v25  ;;  %v5182_v4 = vpack.c.bf16 %v5073_v55, %v5073_v55 }
 0x48f   :  { %5249 = vst.msk [vmem:[#allocation11 + $0x34c] sm:$0xf] %vm763_vm7, %v5184_v54 }
 0x490   :  { %5247 = vst.msk [vmem:[#allocation11 + $0x344] sm:$0xf] %vm763_vm7, %v5182_v4 }
 0x491   :  { %v11216_v40 = vpop.f32.mrb[116].mxu1 }
 0x492   :  { %v9775_v8 = vpack.c.bf16 %v11216_v40, %v11216_v40  ;;  %v9674_v60 = vpop.f32.mrb[117].mxu1 }
 0x493   :  { %v9773_v11 = vpack.c.bf16 %v9674_v60, %v9674_v60  ;;  %v11217_v44 = vpop.f32.mrb[118].mxu1 }
 0x494   :  { %9840 = vst.msk [vmem:[#allocation11 + $0x378] sm:$0xf] %vm763_vm7, %v9775_v8  ;;  %v9776_v1 = vpack.c.bf16 %v11217_v44, %v11217_v44  ;;  %v9677_v0 = vpop.f32.mrb[119].mxu1 }
 0x495   :  { %9838 = vst.msk [vmem:[#allocation11 + $0x370] sm:$0xf] %vm763_vm7, %v9773_v11  ;;  %v9774_v12 = vpack.c.bf16 %v9677_v0, %v9677_v0 }
 0x496   :  { %9841 = vst.msk [vmem:[#allocation11 + $0x37c] sm:$0xf] %vm763_vm7, %v9776_v1 }
 0x497   :  { %9839 = vst.msk [vmem:[#allocation11 + $0x374] sm:$0xf] %vm763_vm7, %v9774_v12 }
 0x4aa   :  { %v11150_v46 = vpop.f32.mrb[116].mxu0 }
 0x4ab   :  { %v5187_v31 = vpack.c.bf16 %v11150_v46, %v11150_v46  ;;  %v5086_v13 = vpop.f32.mrb[117].mxu0 }
 0x4ac   :  { %v5185_v21 = vpack.c.bf16 %v5086_v13, %v5086_v13  ;;  %v11151_v59 = vpop.f32.mrb[118].mxu0 }
 0x4ad   :  { %5252 = vst.msk [vmem:[#allocation11 + $0x358] sm:$0xf] %vm763_vm7, %v5187_v31  ;;  %v5188_v35 = vpack.c.bf16 %v11151_v59, %v11151_v59  ;;  %v5089_v22 = vpop.f32.mrb[119].mxu0 }
 0x4ae   :  { %5250 = vst.msk [vmem:[#allocation11 + $0x350] sm:$0xf] %vm763_vm7, %v5185_v21  ;;  %v5186_v6 = vpack.c.bf16 %v5089_v22, %v5089_v22 }
 0x4af   :  { %5253 = vst.msk [vmem:[#allocation11 + $0x35c] sm:$0xf] %vm763_vm7, %v5188_v35  ;;  %v11220_v52 = vpop.f32.mrb[120].mxu1 }
 0x4b0   :  { %5251 = vst.msk [vmem:[#allocation11 + $0x354] sm:$0xf] %vm763_vm7, %v5186_v6  ;;  %v9779_v61 = vpack.c.bf16 %v11220_v52, %v11220_v52  ;;  %v9690_v27 = vpop.f32.mrb[121].mxu1 }
 0x4b1   :  { %v9777_v2 = vpack.c.bf16 %v9690_v27, %v9690_v27  ;;  %v11221_v56 = vpop.f32.mrb[122].mxu1 }
 0x4b2   :  { %9844 = vst.msk [vmem:[#allocation11 + $0x3e8] sm:$0xf] %vm763_vm7, %v9779_v61  ;;  %v9780_v32 = vpack.c.bf16 %v11221_v56, %v11221_v56  ;;  %v9693_v9 = vpop.f32.mrb[123].mxu1 }
 0x4b3   :  { %9842 = vst.msk [vmem:[#allocation11 + $0x3e0] sm:$0xf] %vm763_vm7, %v9777_v2  ;;  %v9778_v48 = vpack.c.bf16 %v9693_v9, %v9693_v9 }
 0x4b4   :  { %9845 = vst.msk [vmem:[#allocation11 + $0x3ec] sm:$0xf] %vm763_vm7, %v9780_v32 }
 0x4b5   :  { %9843 = vst.msk [vmem:[#allocation11 + $0x3e4] sm:$0xf] %vm763_vm7, %v9778_v48 }
 0x4ce   :  { %v11154_v7 = vpop.f32.mrb[120].mxu0 }
 0x4cf   :  { %v5191_v28 = vpack.c.bf16 %v11154_v7, %v11154_v7  ;;  %v5102_v45 = vpop.f32.mrb[121].mxu0 }
 0x4d0   :  { %v5189_v18 = vpack.c.bf16 %v5102_v45, %v5102_v45  ;;  %v11155_v58 = vpop.f32.mrb[122].mxu0 }
 0x4d1   :  { %5256 = vst.msk [vmem:[#allocation11 + $0x3c8] sm:$0xf] %vm763_vm7, %v5191_v28  ;;  %v5192_v63 = vpack.c.bf16 %v11155_v58, %v11155_v58  ;;  %v5105_v33 = vpop.f32.mrb[123].mxu0 }
 0x4d2   :  { %5254 = vst.msk [vmem:[#allocation11 + $0x3c0] sm:$0xf] %vm763_vm7, %v5189_v18  ;;  %v5190_v29 = vpack.c.bf16 %v5105_v33, %v5105_v33  ;;  %v11224_v34 = vpop.f32.mrb[124].mxu1 }
 0x4d3   :  { %5257 = vst.msk [vmem:[#allocation11 + $0x3cc] sm:$0xf] %vm763_vm7, %v5192_v63  ;;  %v9783_v39 = vpack.c.bf16 %v11224_v34, %v11224_v34  ;;  %v9706_v16 = vpop.f32.mrb[125].mxu1 }
 0x4d4   :  { %5255 = vst.msk [vmem:[#allocation11 + $0x3c4] sm:$0xf] %vm763_vm7, %v5190_v29  ;;  %v9781_v57 = vpack.c.bf16 %v9706_v16, %v9706_v16  ;;  %v11225_v37 = vpop.f32.mrb[126].mxu1 }
 0x4d5   :  { %9848 = vst.msk [vmem:[#allocation11 + $0x3f8] sm:$0xf] %vm763_vm7, %v9783_v39  ;;  %v9784_v30 = vpack.c.bf16 %v11225_v37, %v11225_v37  ;;  %v9709_v19 = vpop.f32.mrb[127].mxu1 }
 0x4d6   :  { %9846 = vst.msk [vmem:[#allocation11 + $0x3f0] sm:$0xf] %vm763_vm7, %v9781_v57  ;;  %v9782_v3 = vpack.c.bf16 %v9709_v19, %v9709_v19  ;;  %v11158_v42 = vpop.f32.mrb[124].mxu0 }
 0x4d7   :  { %9849 = vst.msk [vmem:[#allocation11 + $0x3fc] sm:$0xf] %vm763_vm7, %v9784_v30  ;;  %v5195_v26 = vpack.c.bf16 %v11158_v42, %v11158_v42  ;;  %v5118_v38 = vpop.f32.mrb[125].mxu0 }
 0x4d8   :  { %9847 = vst.msk [vmem:[#allocation11 + $0x3f4] sm:$0xf] %vm763_vm7, %v9782_v3  ;;  %v5193_v17 = vpack.c.bf16 %v5118_v38, %v5118_v38  ;;  %v11159_v62 = vpop.f32.mrb[126].mxu0 }
 0x4d9   :  { %5260 = vst.msk [vmem:[#allocation11 + $0x3d8] sm:$0xf] %vm763_vm7, %v5195_v26  ;;  %v5196_v14 = vpack.c.bf16 %v11159_v62, %v11159_v62  ;;  %v5121_v51 = vpop.f32.mrb[127].mxu0 }
 0x4da   :  { %5258 = vst.msk [vmem:[#allocation11 + $0x3d0] sm:$0xf] %vm763_vm7, %v5193_v17  ;;  %v5194_v15 = vpack.c.bf16 %v5121_v51, %v5121_v51 }
 0x4db   :  { %5261 = vst.msk [vmem:[#allocation11 + $0x3dc] sm:$0xf] %vm763_vm7, %v5196_v14 }
 0x4dc   :  { %5259 = vst.msk [vmem:[#allocation11 + $0x3d4] sm:$0xf] %vm763_vm7, %v5194_v15 }
 0x4dd   :  { %11885 = shalt.err (!%p11882_p2)
}
 0x4de   :  { %s11886_s7 = scalar_lea.hbm %s16400_s5, 16384 }
 0x4df   :  { %p11887_p3 = scmp.ne.s32.totalorder %s16400_s5, %s11886_s7  ;;  %p11890_p4 = scmp.lt.u32.totalorder %s11886_s7, %s16400_s5 }
 0x4e1   :  { %p11892_p5 = pnand %p11890_p4, %p11887_p3 }
 0x4e3   :  { %11895 = shalt.err (!%p11892_p5)
}
 0x4e4   :  { %9861 = dma.vmem_to_hbm [thread:$0]  %s9856_s28, 16384, %s16400_s5, [#allocation4], %s11907_s3, %s11907_s3, %s11908_s21  }
 0x4e5   :  { %11902 = dma.done.wait [#allocation4], 16384  }
 0x4e6   :  { %11903 = vsyncadd [#allocation4], 4294950912 }
 0x4e7   :  { %9865 = vsyncpa [#allocation3], 1 }
 0x4e8   :  { %9866 = vsyncpa [#allocation6], 1 }
 0x4e9   :  { %9867 = vsyncpa [#allocation9], 1 }
 0x4ea   :  { %9868 = vsyncpa [#allocation4], 1 }

</bundles_post_ra>
